<compile_context>
chip_gen: v5e
topology: v5e:2x2
jax: 0.10.0
libtpu: 0.0.40
codegen_flags: <defaults>
</compile_context>

<pallas_src>
import jax
import jax.numpy as jnp
from jax.experimental import pallas as pl
from jax.experimental.pallas import tpu as pltpu


# ----------------------------------------------------------------------------
# Padded flat activation layout helpers.
# Each image is stored as L rows of C channels: P zero rows, H*W interior rows
# (row-major pixels), then (L - P - H*W) >= W+1 zero rows.  P and L are rounded
# up to multiples of 8 so image bases and interior stores are sublane-aligned.
# ----------------------------------------------------------------------------
def _row_layout(H, W):
    P = -(-(W + 1) // 8) * 8
    L = -(-(P + H * W + W + 1) // 8) * 8
    return P, L


def pad_flat(x_nhwc):
    """(N,H,W,C) -> (N*L, C) padded flat layout (used only for the network input)."""
    N, H, W, C = x_nhwc.shape
    P, L = _row_layout(H, W)
    xf = jnp.pad(x_nhwc.reshape(N, H * W, C), ((0, 0), (P, L - P - H * W), (0, 0)))
    return xf.reshape(N * L, C)


def unpad_nhwc(xflat, N, H, W):
    """(N*L, C) padded flat -> (N,H,W,C)."""
    C = xflat.shape[-1]
    P, L = _row_layout(H, W)
    return xflat.reshape(N, L, C)[:, P:P + H * W, :].reshape(N, H, W, C)


# ----------------------------------------------------------------------------
# Weight folding:  (3,3,Cin,Cout) [kh,kw,ci,co] f32  ->  bf16
#   Cin == 3  : (1, 27,    Cout)   single dot, taps folded dx-outer / dy-inner
#   Cin <= 64 : (9, Cin,   Cout)   one weight slab per (dy,dx) tap (9-dot path)
#   Cin >= 128: (3, 3*Cin, Cout)   grouped by dx, dy folded along K (lane aligned)
# ----------------------------------------------------------------------------
def _fold_weights(w):
    _, _, cin, cout = w.shape
    if cin == 3:
        return jnp.transpose(w, (1, 0, 2, 3)).reshape(1, 9 * cin, cout).astype(jnp.bfloat16)
    if cin <= 64:
        return w.reshape(9, cin, cout).astype(jnp.bfloat16)
    return jnp.transpose(w, (1, 0, 2, 3)).reshape(3, 3 * cin, cout).astype(jnp.bfloat16)


# ----------------------------------------------------------------------------
# Fused conv3x3(stride 1, pad 1) + bias + ReLU (+ optional 2x2/2 maxpool) kernel.
# Reads and writes the padded-flat layout; the output zero halo is written here
# so the next layer consumes the result directly (no host glue).
# ----------------------------------------------------------------------------
def _make_conv_kernel(N, H, W, Cin, tn, pool):
    M = H * W
    P_in, L_in = _row_layout(H, W)
    Ho, Wo = (H // 2, W // 2) if pool else (H, W)
    Mo = Ho * Wo
    P_out, L_out = _row_layout(Ho, Wo)
    bot = L_out - P_out - Mo

    def kernel(x_ref, w_ref, b_ref, o_ref):
        # x_ref: (N*L_in, Cin)  bf16  padded flat activation, whole batch (VMEM resident)
        # w_ref: (T, K, tn)     bf16  folded weight stripe for this Cout tile
        # b_ref: (1, tn)        f32
        # o_ref: (N*L_out, tn)  bf16  padded flat output stripe (halo rows written too)
        col = jax.lax.broadcasted_iota(jnp.int32, (M, 1), 0) % W
        mask_l = col != 0          # hoisted: reused by every dx = -1 tap, every image
        mask_r = col != W - 1      # hoisted: reused by every dx = +1 tap, every image
        zero = jnp.zeros((), x_ref.dtype)
        bias = b_ref[...]

        def masked(a, dx):
            if dx == -1:
                return jnp.where(mask_l, a, zero)
            if dx == 1:
                return jnp.where(mask_r, a, zero)
            return a

        for n in range(N):                       # batch folded into the kernel
            base = n * L_in + P_in               # first interior row of image n

            def tap(dy, dx, base=base):
                # Shifted window: input pixel (y+dy, x+dx) for every output (y, x).
                return masked(x_ref[pl.ds(base + dy * W + dx, M), :], dx)

            if Cin == 3:
                # First layer: one dot, K = 27 (folded dx-outer / dy-inner).
                a = jnp.concatenate(
                    [tap(dy, dx) for dx in (-1, 0, 1) for dy in (-1, 0, 1)], axis=-1)
                acc = jnp.dot(a, w_ref[0], preferred_element_type=jnp.float32)
            elif Cin <= 64:
                # 9 accumulating dots on direct shifted windows (no concat copies).
                acc, t = None, 0
                for dy in (-1, 0, 1):
                    for dx in (-1, 0, 1):
                        d = jnp.dot(tap(dy, dx), w_ref[t],
                                    preferred_element_type=jnp.float32)
                        acc = d if acc is None else acc + d
                        t += 1
            else:
                # 3 dots, K = 3*Cin (lane-aligned concat over dy per dx group).
                acc = None
                for g, dx in enumerate((-1, 0, 1)):
                    a = jnp.concatenate(
                        [x_ref[pl.ds(base + dy * W + dx, M), :] for dy in (-1, 0, 1)],
                        axis=-1)
                    d = jnp.dot(masked(a, dx), w_ref[g],
                                preferred_element_type=jnp.float32)
                    acc = d if acc is None else acc + d

            y = jnp.maximum(acc + bias, 0.0)                 # (M, tn) f32

            if pool:
                # Fused 2x2 / stride-2 max pool on the VMEM-resident tile.
                y = y.reshape(H // 2, 2, W, tn)
                y = jnp.maximum(y[:, 0], y[:, 1])             # row pairs
                y = y.reshape(H // 2, W // 2, 2 * tn)
                y = jnp.maximum(y[..., :tn], y[..., tn:])     # column pairs
                y = y.reshape(Mo, tn)

            # Write the padded flat layout the next layer consumes directly.
            ob = n * L_out
            o_ref[pl.ds(ob, P_out), :] = jnp.zeros((P_out, tn), o_ref.dtype)
            o_ref[pl.ds(ob + P_out, Mo), :] = y.astype(o_ref.dtype)
            o_ref[pl.ds(ob + P_out + Mo, bot), :] = jnp.zeros((bot, tn), o_ref.dtype)

    return kernel


def conv3x3_relu(xflat, w_fold, b2, *, N, H, W, pool):
    """xflat: (N*L_in, Cin) bf16 padded flat -> (N*L_out, Cout) bf16 padded flat."""
    Cin = xflat.shape[-1]
    T, K, Cout = w_fold.shape
    P_in, L_in = _row_layout(H, W)
    assert xflat.shape == (N * L_in, Cin), (xflat.shape, N, L_in, Cin)
    Ho, Wo = (H // 2, W // 2) if pool else (H, W)
    P_out, L_out = _row_layout(Ho, Wo)

    # Cout stripe: parallel grid axis for the wide layers (v7x megacore) and a
    # smaller resident weight block (<= 2.25 MiB bf16) for v5e's scoped VMEM.
    tn = min(Cout, 256)
    assert Cout % tn == 0
    cout_tiles = Cout // tn

    return pl.pallas_call(
        _make_conv_kernel(N, H, W, Cin, tn, pool),
        out_shape=jax.ShapeDtypeStruct((N * L_out, Cout), xflat.dtype),
        grid=(cout_tiles,),
        in_specs=[
            pl.BlockSpec((N * L_in, Cin), lambda j: (0, 0)),   # whole batch, VMEM resident
            pl.BlockSpec((T, K, tn), lambda j: (0, 0, j)),     # folded weight stripe
            pl.BlockSpec((1, tn), lambda j: (0, j)),
        ],
        out_specs=pl.BlockSpec((N * L_out, tn), lambda j: (0, j)),
        compiler_params=pltpu.CompilerParams(dimension_semantics=("parallel",)),
    )(xflat, w_fold, b2)


# ----------------------------------------------------------------------------
# VGG19 slice structure (torchvision vgg19.features indices 0..29).
# Per conv layer: (Cin, Cout, pool_after) -- the 2x2 maxpool that follows a conv
# in the torch graph is fused into that conv's kernel epilogue.
# ----------------------------------------------------------------------------
VGG19_SLICES = [
    [(3, 64, False)],                                                     # features[0:2]
    [(64, 64, True), (64, 128, False)],                                   # features[2:7]
    [(128, 128, True), (128, 256, False)],                                # features[7:12]
    [(256, 256, False), (256, 256, False), (256, 256, True),
     (256, 512, False)],                                                  # features[12:21]
    [(512, 512, False), (512, 512, False), (512, 512, True),
     (512, 512, False)],                                                  # features[21:30]
]


def init_vgg19_params(key):
    """Deterministic synthetic conv weights/biases (shapes match real VGG19),
    pre-folded into the kernel's bf16 layout."""
    # TODO(synk): real torchvision pretrained weights would be loaded & folded here.
    params = []
    li = 0
    for ops in VGG19_SLICES:
        for cin, cout, _ in ops:
            kw = jax.random.fold_in(key, 2 * li)
            kb = jax.random.fold_in(key, 2 * li + 1)
            std = (2.0 / (9.0 * cin)) ** 0.5
            w = jax.random.normal(kw, (3, 3, cin, cout), jnp.float32) * std
            b = jax.random.normal(kb, (cout,), jnp.float32) * 0.01
            params.append((_fold_weights(w), b.reshape(1, cout)))
            li += 1
    return params


def vgg19_forward(x_nchw, params):
    """Returns [h_relu1, ..., h_relu5] in NCHW f32, matching the torch module."""
    N, _, H, W = x_nchw.shape
    x = jnp.transpose(x_nchw, (0, 2, 3, 1)).astype(jnp.bfloat16)   # NCHW -> NHWC
    buf = pad_flat(x)                                              # only host pad in the net
    outs = []
    it = iter(params)
    for ops in VGG19_SLICES:
        for cin, cout, pool in ops:
            w_fold, b2 = next(it)
            buf = conv3x3_relu(buf, w_fold, b2, N=N, H=H, W=W, pool=pool)
            if pool:
                H, W = H // 2, W // 2
        outs.append(
            jnp.transpose(unpad_nhwc(buf, N, H, W).astype(jnp.float32), (0, 3, 1, 2)))
    return outs


# ----------------------------------------------------------------------------
# Self-test against pure-JAX references (same bf16 operands).  Covers the
# Cin=3 / Cin=64 / Cin>=128 matmul paths, the fused pool, Cout tiling, and the
# zero-halo output rows the next layer depends on.
# ----------------------------------------------------------------------------
def _self_test(key):
    configs = [
        (16, 16, 3, 64, False),    # concat9 path (first layer)
        (8, 8, 64, 128, True),     # dots9 path + fused pool
        (8, 8, 128, 512, False),   # group3 path, 2 Cout tiles
        (4, 4, 256, 256, True),    # group3 path + fused pool, tiny spatial
    ]
    for t, (H, W, Cin, Cout, pool) in enumerate(configs):
        kx = jax.random.fold_in(key, 100 + 3 * t)
        kw = jax.random.fold_in(key, 101 + 3 * t)
        kb = jax.random.fold_in(key, 102 + 3 * t)
        N = 2
        x = jax.random.normal(kx, (N, H, W, Cin), jnp.float32)
        w = jax.random.normal(kw, (3, 3, Cin, Cout), jnp.float32) * (2.0 / (9 * Cin)) ** 0.5
        b = jax.random.normal(kb, (Cout,), jnp.float32) * 0.05
        xb = x.astype(jnp.bfloat16)

        got_flat = conv3x3_relu(pad_flat(xb), _fold_weights(w), b.reshape(1, Cout),
                                N=N, H=H, W=W, pool=pool)
        Ho, Wo = (H // 2, W // 2) if pool else (H, W)
        got = unpad_nhwc(got_flat, N, Ho, Wo).astype(jnp.float32)

        wb = w.astype(jnp.bfloat16).astype(jnp.float32)
        ref = jax.nn.relu(
            jax.lax.conv_general_dilated(
                xb.astype(jnp.float32), wb, (1, 1), "SAME",
                dimension_numbers=("NHWC", "HWIO", "NHWC")) + b)
        if pool:
            ref = ref.reshape(N, H // 2, 2, W // 2, 2, Cout).max(axis=(2, 4))
        assert bool(jnp.allclose(got, ref, rtol=2e-2, atol=2e-2)), (
            "conv mismatch", H, W, Cin, Cout, pool, float(jnp.max(jnp.abs(got - ref))))

        # The next layer reads the zero halo rows this kernel wrote -- check them.
        P_out, L_out = _row_layout(Ho, Wo)
        r = got_flat.reshape(N, L_out, Cout)
        assert bool(jnp.all(r[:, :P_out, :] == 0)), "top halo not zero"
        assert bool(jnp.all(r[:, P_out + Ho * Wo:, :] == 0)), "bottom halo not zero"


if __name__ == "__main__":
    key = jax.random.PRNGKey(0)
    _self_test(key)

    # Small input consistent with the module: batch=2, 3 RGB channels, 32x32.
    x = jax.random.normal(jax.random.fold_in(key, 1234), (2, 3, 32, 32), jnp.float32)
    params = init_vgg19_params(key)

    fwd = jax.jit(vgg19_forward)
    outs = jax.block_until_ready(fwd(x, params))

    expected_shapes = [
        (2, 64, 32, 32),
        (2, 128, 16, 16),
        (2, 256, 8, 8),
        (2, 512, 4, 4),
        (2, 512, 2, 2),
    ]
    for o, s in zip(outs, expected_shapes):
        assert o.shape == s, (o.shape, s)
        assert o.dtype == jnp.float32
        assert bool(jnp.all(jnp.isfinite(o)))

    print("KERNEL_OK")
</pallas_src>

<mosaic_0001>
module attributes {stable_mosaic.version = 11 : i64} {
  func.func @kernel(%arg0: i32, %arg1: memref<608x3xbf16, #tpu.memory_space<vmem>>, %arg2: memref<1x27x64xbf16, #tpu.memory_space<vmem>>, %arg3: memref<1x64xf32, #tpu.memory_space<vmem>>, %arg4: memref<608x64xbf16, #tpu.memory_space<vmem>>) attributes {dimension_semantics = [#tpu.dimension_semantics<parallel>], iteration_bounds = array<i64: 1>, scalar_prefetch = 0 : i64, scratch_operands = 0 : i64, tpu.core_type = #tpu.core_type<tc>, window_params = [{pipeline_mode = #tpu.pipeline_mode<synchronous>, transform_indices = @transform_0, window_bounds = array<i64: 608, 3>}, {transform_indices = @transform_1, window_bounds = array<i64: 1, 27, 64>}, {transform_indices = @transform_2, window_bounds = array<i64: 1, 64>}, {transform_indices = @transform_3, window_bounds = array<i64: 608, 64>}]} {
    %0 = tpu.iota {dimensions = array<i32: 0>} : vector<256x1xi32>
    %c16_i32 = arith.constant 16 : i32
    %c0_i32 = arith.constant 0 : i32
    %1 = arith.cmpi eq, %c16_i32, %c0_i32 : i32
    %c1_i32 = arith.constant 1 : i32
    %2 = arith.select %1, %c1_i32, %c16_i32 : i32
    %3 = vector.broadcast %2 : i32 to vector<256x1xi32>
    %4 = arith.remsi %0, %3 : vector<256x1xi32>
    %c0_i32_0 = arith.constant 0 : i32
    %5 = vector.broadcast %c0_i32_0 : i32 to vector<256x1xi32>
    %6 = arith.cmpi ne, %4, %5 : vector<256x1xi32>
    %c0_i32_1 = arith.constant 0 : i32
    %7 = vector.broadcast %c0_i32_1 : i32 to vector<256x1xi32>
    %8 = arith.cmpi slt, %4, %7 : vector<256x1xi32>
    %c0_i32_2 = arith.constant 0 : i32
    %9 = arith.cmpi slt, %2, %c0_i32_2 : i32
    %10 = vector.broadcast %9 : i1 to vector<256x1xi1>
    %11 = vector.broadcast %10 : vector<256x1xi1> to vector<256x1xi1>
    %12 = arith.xori %8, %11 : vector<256x1xi1>
    %13 = arith.andi %12, %6 : vector<256x1xi1>
    %14 = vector.broadcast %2 : i32 to vector<256x1xi32>
    %15 = arith.addi %4, %14 : vector<256x1xi32>
    %16 = arith.select %13, %15, %4 : vector<256x1xi1>, vector<256x1xi32>
    %c0_i32_3 = arith.constant 0 : i32
    %17 = vector.broadcast %c0_i32_3 : i32 to vector<256x1xi32>
    %18 = arith.cmpi ne, %16, %17 : vector<256x1xi32>
    %c15_i32 = arith.constant 15 : i32
    %19 = vector.broadcast %c15_i32 : i32 to vector<256x1xi32>
    %20 = arith.cmpi ne, %16, %19 : vector<256x1xi32>
    %c0 = arith.constant 0 : index
    %c0_4 = arith.constant 0 : index
    %21 = vector.load %arg3[%c0, %c0_4] : memref<1x64xf32, #tpu.memory_space<vmem>>, vector<1x64xf32>
    %c7 = arith.constant 7 : index
    %c0_5 = arith.constant 0 : index
    %22 = vector.load %arg1[%c7, %c0_5] : memref<608x3xbf16, #tpu.memory_space<vmem>>, vector<256x3xbf16>
    %cst = arith.constant 0.000000e+00 : bf16
    %23 = vector.shape_cast %18 : vector<256x1xi1> to vector<256x1xi1>
    %24 = vector.broadcast %23 : vector<256x1xi1> to vector<256x3xi1>
    %25 = vector.broadcast %cst : bf16 to vector<256x3xbf16>
    %26 = arith.select %24, %22, %25 : vector<256x3xi1>, vector<256x3xbf16>
    %c23 = arith.constant 23 : index
    %c0_6 = arith.constant 0 : index
    %27 = vector.load %arg1[%c23, %c0_6] : memref<608x3xbf16, #tpu.memory_space<vmem>>, vector<256x3xbf16>
    %cst_7 = arith.constant 0.000000e+00 : bf16
    %28 = vector.shape_cast %18 : vector<256x1xi1> to vector<256x1xi1>
    %29 = vector.broadcast %28 : vector<256x1xi1> to vector<256x3xi1>
    %30 = vector.broadcast %cst_7 : bf16 to vector<256x3xbf16>
    %31 = arith.select %29, %27, %30 : vector<256x3xi1>, vector<256x3xbf16>
    %c39 = arith.constant 39 : index
    %c0_8 = arith.constant 0 : index
    %32 = vector.load %arg1[%c39, %c0_8] : memref<608x3xbf16, #tpu.memory_space<vmem>>, vector<256x3xbf16>
    %cst_9 = arith.constant 0.000000e+00 : bf16
    %33 = vector.shape_cast %18 : vector<256x1xi1> to vector<256x1xi1>
    %34 = vector.broadcast %33 : vector<256x1xi1> to vector<256x3xi1>
    %35 = vector.broadcast %cst_9 : bf16 to vector<256x3xbf16>
    %36 = arith.select %34, %32, %35 : vector<256x3xi1>, vector<256x3xbf16>
    %c8 = arith.constant 8 : index
    %c0_10 = arith.constant 0 : index
    %37 = vector.load %arg1[%c8, %c0_10] : memref<608x3xbf16, #tpu.memory_space<vmem>>, vector<256x3xbf16>
    %c24 = arith.constant 24 : index
    %c0_11 = arith.constant 0 : index
    %38 = vector.load %arg1[%c24, %c0_11] : memref<608x3xbf16, #tpu.memory_space<vmem>>, vector<256x3xbf16>
    %c40 = arith.constant 40 : index
    %c0_12 = arith.constant 0 : index
    %39 = vector.load %arg1[%c40, %c0_12] : memref<608x3xbf16, #tpu.memory_space<vmem>>, vector<256x3xbf16>
    %c9 = arith.constant 9 : index
    %c0_13 = arith.constant 0 : index
    %40 = vector.load %arg1[%c9, %c0_13] : memref<608x3xbf16, #tpu.memory_space<vmem>>, vector<256x3xbf16>
    %cst_14 = arith.constant 0.000000e+00 : bf16
    %41 = vector.shape_cast %20 : vector<256x1xi1> to vector<256x1xi1>
    %42 = vector.broadcast %41 : vector<256x1xi1> to vector<256x3xi1>
    %43 = vector.broadcast %cst_14 : bf16 to vector<256x3xbf16>
    %44 = arith.select %42, %40, %43 : vector<256x3xi1>, vector<256x3xbf16>
    %c25 = arith.constant 25 : index
    %c0_15 = arith.constant 0 : index
    %45 = vector.load %arg1[%c25, %c0_15] : memref<608x3xbf16, #tpu.memory_space<vmem>>, vector<256x3xbf16>
    %cst_16 = arith.constant 0.000000e+00 : bf16
    %46 = vector.shape_cast %20 : vector<256x1xi1> to vector<256x1xi1>
    %47 = vector.broadcast %46 : vector<256x1xi1> to vector<256x3xi1>
    %48 = vector.broadcast %cst_16 : bf16 to vector<256x3xbf16>
    %49 = arith.select %47, %45, %48 : vector<256x3xi1>, vector<256x3xbf16>
    %c41 = arith.constant 41 : index
    %c0_17 = arith.constant 0 : index
    %50 = vector.load %arg1[%c41, %c0_17] : memref<608x3xbf16, #tpu.memory_space<vmem>>, vector<256x3xbf16>
    %cst_18 = arith.constant 0.000000e+00 : bf16
    %51 = vector.shape_cast %20 : vector<256x1xi1> to vector<256x1xi1>
    %52 = vector.broadcast %51 : vector<256x1xi1> to vector<256x3xi1>
    %53 = vector.broadcast %cst_18 : bf16 to vector<256x3xbf16>
    %54 = arith.select %52, %50, %53 : vector<256x3xi1>, vector<256x3xbf16>
    %55 = tpu.concatenate %26, %31, %36, %37, %38, %39, %44, %49, %54 in 1 : vector<256x3xbf16>, vector<256x3xbf16>, vector<256x3xbf16>, vector<256x3xbf16>, vector<256x3xbf16>, vector<256x3xbf16>, vector<256x3xbf16>, vector<256x3xbf16>, vector<256x3xbf16> -> vector<256x27xbf16>
    %c0_19 = arith.constant 0 : index
    %c0_20 = arith.constant 0 : index
    %c0_21 = arith.constant 0 : index
    %56 = vector.load %arg2[%c0_19, %c0_20, %c0_21] : memref<1x27x64xbf16, #tpu.memory_space<vmem>>, vector<1x27x64xbf16>
    %57 = vector.shape_cast %56 : vector<1x27x64xbf16> to vector<27x64xbf16>
    %cst_22 = arith.constant dense<0.000000e+00> : vector<256x64xf32>
    %58 = tpu.matmul %55, %57, %cst_22 {dimension_numbers = #tpu.dot_dimension_numbers<[1], [0], [0], [1], [0, 0, 1, 1], [], []>} : vector<256x27xbf16>, vector<27x64xbf16>, vector<256x64xf32> -> vector<256x64xf32>
    %59 = vector.broadcast %21 : vector<1x64xf32> to vector<256x64xf32>
    %60 = arith.addf %58, %59 : vector<256x64xf32>
    %cst_23 = arith.constant 0.000000e+00 : f32
    %61 = vector.broadcast %cst_23 : f32 to vector<256x64xf32>
    %62 = arith.maximumf %60, %61 : vector<256x64xf32>
    %cst_24 = arith.constant 0.000000e+00 : bf16
    %63 = vector.broadcast %cst_24 : bf16 to vector<24x64xbf16>
    %c0_25 = arith.constant 0 : index
    %c0_26 = arith.constant 0 : index
    %64 = vector.load %arg4[%c0_25, %c0_26] : memref<608x64xbf16, #tpu.memory_space<vmem>>, vector<24x64xbf16>
    tpu.vector_store %arg4[%c0_25, %c0_26], %63 {strides = array<i32>} : memref<608x64xbf16, #tpu.memory_space<vmem>>, vector<24x64xbf16>,
    %65 = arith.truncf %62 : vector<256x64xf32> to vector<256x64xbf16>
    %c24_27 = arith.constant 24 : index
    %c0_28 = arith.constant 0 : index
    %66 = vector.load %arg4[%c24_27, %c0_28] : memref<608x64xbf16, #tpu.memory_space<vmem>>, vector<256x64xbf16>
    tpu.vector_store %arg4[%c24_27, %c0_28], %65 {strides = array<i32>} : memref<608x64xbf16, #tpu.memory_space<vmem>>, vector<256x64xbf16>,
    %cst_29 = arith.constant 0.000000e+00 : bf16
    %67 = vector.broadcast %cst_29 : bf16 to vector<24x64xbf16>
    %c280 = arith.constant 280 : index
    %c0_30 = arith.constant 0 : index
    %68 = vector.load %arg4[%c280, %c0_30] : memref<608x64xbf16, #tpu.memory_space<vmem>>, vector<24x64xbf16>
    tpu.vector_store %arg4[%c280, %c0_30], %67 {strides = array<i32>} : memref<608x64xbf16, #tpu.memory_space<vmem>>, vector<24x64xbf16>,
    %c311 = arith.constant 311 : index
    %c0_31 = arith.constant 0 : index
    %69 = vector.load %arg1[%c311, %c0_31] : memref<608x3xbf16, #tpu.memory_space<vmem>>, vector<256x3xbf16>
    %cst_32 = arith.constant 0.000000e+00 : bf16
    %70 = vector.shape_cast %18 : vector<256x1xi1> to vector<256x1xi1>
    %71 = vector.broadcast %70 : vector<256x1xi1> to vector<256x3xi1>
    %72 = vector.broadcast %cst_32 : bf16 to vector<256x3xbf16>
    %73 = arith.select %71, %69, %72 : vector<256x3xi1>, vector<256x3xbf16>
    %c327 = arith.constant 327 : index
    %c0_33 = arith.constant 0 : index
    %74 = vector.load %arg1[%c327, %c0_33] : memref<608x3xbf16, #tpu.memory_space<vmem>>, vector<256x3xbf16>
    %cst_34 = arith.constant 0.000000e+00 : bf16
    %75 = vector.shape_cast %18 : vector<256x1xi1> to vector<256x1xi1>
    %76 = vector.broadcast %75 : vector<256x1xi1> to vector<256x3xi1>
    %77 = vector.broadcast %cst_34 : bf16 to vector<256x3xbf16>
    %78 = arith.select %76, %74, %77 : vector<256x3xi1>, vector<256x3xbf16>
    %c343 = arith.constant 343 : index
    %c0_35 = arith.constant 0 : index
    %79 = vector.load %arg1[%c343, %c0_35] : memref<608x3xbf16, #tpu.memory_space<vmem>>, vector<256x3xbf16>
    %cst_36 = arith.constant 0.000000e+00 : bf16
    %80 = vector.shape_cast %18 : vector<256x1xi1> to vector<256x1xi1>
    %81 = vector.broadcast %80 : vector<256x1xi1> to vector<256x3xi1>
    %82 = vector.broadcast %cst_36 : bf16 to vector<256x3xbf16>
    %83 = arith.select %81, %79, %82 : vector<256x3xi1>, vector<256x3xbf16>
    %c312 = arith.constant 312 : index
    %c0_37 = arith.constant 0 : index
    %84 = vector.load %arg1[%c312, %c0_37] : memref<608x3xbf16, #tpu.memory_space<vmem>>, vector<256x3xbf16>
    %c328 = arith.constant 328 : index
    %c0_38 = arith.constant 0 : index
    %85 = vector.load %arg1[%c328, %c0_38] : memref<608x3xbf16, #tpu.memory_space<vmem>>, vector<256x3xbf16>
    %c344 = arith.constant 344 : index
    %c0_39 = arith.constant 0 : index
    %86 = vector.load %arg1[%c344, %c0_39] : memref<608x3xbf16, #tpu.memory_space<vmem>>, vector<256x3xbf16>
    %c313 = arith.constant 313 : index
    %c0_40 = arith.constant 0 : index
    %87 = vector.load %arg1[%c313, %c0_40] : memref<608x3xbf16, #tpu.memory_space<vmem>>, vector<256x3xbf16>
    %cst_41 = arith.constant 0.000000e+00 : bf16
    %88 = vector.shape_cast %20 : vector<256x1xi1> to vector<256x1xi1>
    %89 = vector.broadcast %88 : vector<256x1xi1> to vector<256x3xi1>
    %90 = vector.broadcast %cst_41 : bf16 to vector<256x3xbf16>
    %91 = arith.select %89, %87, %90 : vector<256x3xi1>, vector<256x3xbf16>
    %c329 = arith.constant 329 : index
    %c0_42 = arith.constant 0 : index
    %92 = vector.load %arg1[%c329, %c0_42] : memref<608x3xbf16, #tpu.memory_space<vmem>>, vector<256x3xbf16>
    %cst_43 = arith.constant 0.000000e+00 : bf16
    %93 = vector.shape_cast %20 : vector<256x1xi1> to vector<256x1xi1>
    %94 = vector.broadcast %93 : vector<256x1xi1> to vector<256x3xi1>
    %95 = vector.broadcast %cst_43 : bf16 to vector<256x3xbf16>
    %96 = arith.select %94, %92, %95 : vector<256x3xi1>, vector<256x3xbf16>
    %c345 = arith.constant 345 : index
    %c0_44 = arith.constant 0 : index
    %97 = vector.load %arg1[%c345, %c0_44] : memref<608x3xbf16, #tpu.memory_space<vmem>>, vector<256x3xbf16>
    %cst_45 = arith.constant 0.000000e+00 : bf16
    %98 = vector.shape_cast %20 : vector<256x1xi1> to vector<256x1xi1>
    %99 = vector.broadcast %98 : vector<256x1xi1> to vector<256x3xi1>
    %100 = vector.broadcast %cst_45 : bf16 to vector<256x3xbf16>
    %101 = arith.select %99, %97, %100 : vector<256x3xi1>, vector<256x3xbf16>
    %102 = tpu.concatenate %73, %78, %83, %84, %85, %86, %91, %96, %101 in 1 : vector<256x3xbf16>, vector<256x3xbf16>, vector<256x3xbf16>, vector<256x3xbf16>, vector<256x3xbf16>, vector<256x3xbf16>, vector<256x3xbf16>, vector<256x3xbf16>, vector<256x3xbf16> -> vector<256x27xbf16>
    %c0_46 = arith.constant 0 : index
    %c0_47 = arith.constant 0 : index
    %c0_48 = arith.constant 0 : index
    %103 = vector.load %arg2[%c0_46, %c0_47, %c0_48] : memref<1x27x64xbf16, #tpu.memory_space<vmem>>, vector<1x27x64xbf16>
    %104 = vector.shape_cast %103 : vector<1x27x64xbf16> to vector<27x64xbf16>
    %cst_49 = arith.constant dense<0.000000e+00> : vector<256x64xf32>
    %105 = tpu.matmul %102, %104, %cst_49 {dimension_numbers = #tpu.dot_dimension_numbers<[1], [0], [0], [1], [0, 0, 1, 1], [], []>} : vector<256x27xbf16>, vector<27x64xbf16>, vector<256x64xf32> -> vector<256x64xf32>
    %106 = vector.broadcast %21 : vector<1x64xf32> to vector<256x64xf32>
    %107 = arith.addf %105, %106 : vector<256x64xf32>
    %cst_50 = arith.constant 0.000000e+00 : f32
    %108 = vector.broadcast %cst_50 : f32 to vector<256x64xf32>
    %109 = arith.maximumf %107, %108 : vector<256x64xf32>
    %cst_51 = arith.constant 0.000000e+00 : bf16
    %110 = vector.broadcast %cst_51 : bf16 to vector<24x64xbf16>
    %c304 = arith.constant 304 : index
    %c0_52 = arith.constant 0 : index
    %111 = vector.load %arg4[%c304, %c0_52] : memref<608x64xbf16, #tpu.memory_space<vmem>>, vector<24x64xbf16>
    tpu.vector_store %arg4[%c304, %c0_52], %110 {strides = array<i32>} : memref<608x64xbf16, #tpu.memory_space<vmem>>, vector<24x64xbf16>,
    %112 = arith.truncf %109 : vector<256x64xf32> to vector<256x64xbf16>
    %c328_53 = arith.constant 328 : index
    %c0_54 = arith.constant 0 : index
    %113 = vector.load %arg4[%c328_53, %c0_54] : memref<608x64xbf16, #tpu.memory_space<vmem>>, vector<256x64xbf16>
    tpu.vector_store %arg4[%c328_53, %c0_54], %112 {strides = array<i32>} : memref<608x64xbf16, #tpu.memory_space<vmem>>, vector<256x64xbf16>,
    %cst_55 = arith.constant 0.000000e+00 : bf16
    %114 = vector.broadcast %cst_55 : bf16 to vector<24x64xbf16>
    %c584 = arith.constant 584 : index
    %c0_56 = arith.constant 0 : index
    %115 = vector.load %arg4[%c584, %c0_56] : memref<608x64xbf16, #tpu.memory_space<vmem>>, vector<24x64xbf16>
    tpu.vector_store %arg4[%c584, %c0_56], %114 {strides = array<i32>} : memref<608x64xbf16, #tpu.memory_space<vmem>>, vector<24x64xbf16>,
    return
  }
  func.func @transform_0(%arg0: i32) -> (i32, i32) {
    %c0_i32 = arith.constant 0 : i32
    %c0_i32_0 = arith.constant 0 : i32
    %c0_i32_1 = arith.constant 0 : i32
    return %c0_i32, %c0_i32_0 : i32, i32
  }
  func.func @transform_1(%arg0: i32) -> (i32, i32, i32) {
    %c0_i32 = arith.constant 0 : i32
    %c0_i32_0 = arith.constant 0 : i32
    %c0_i32_1 = arith.constant 0 : i32
    return %c0_i32, %c0_i32_0, %arg0 : i32, i32, i32
  }
  func.func @transform_2(%arg0: i32) -> (i32, i32) {
    %c0_i32 = arith.constant 0 : i32
    %c0_i32_0 = arith.constant 0 : i32
    return %c0_i32, %arg0 : i32, i32
  }
  func.func @transform_3(%arg0: i32) -> (i32, i32) {
    %c0_i32 = arith.constant 0 : i32
    %c0_i32_0 = arith.constant 0 : i32
    return %c0_i32, %arg0 : i32, i32
  }
}

</mosaic_0001>

<bundles_post_ra>
// kernel: tpu_custom_call.1
= control target key start
LH: loop header
LB: loop body
LE: loop exit
PB: predicated region body
PF: predicated region fallthrough
CT: control target
= control target key end

     0   :  { %v17_v0 = vlaneseq  ;;  %vm6276_vm0 = vmmov 1   ;;  %v11810_v2 = vmov 0   ;;  %vm11787_vm7 = vsmask.f32 3328  ;;  %s6278_s24 = smov 3   ;;  %s6279_s29 = smov 6   ;;  %s11783_s0 = inlined_call_operand.vmem [shape: bf16[608,3], index: 0, kind: input, shape index: {}]   ;;  %s11784_s1 = inlined_call_operand.vmem [shape: bf16[1,27,64], index: 1, kind: input, shape index: {}]   ;;  %s11785_s2 = inlined_call_operand.vmem [shape: f32[1,64], index: 2, kind: input, shape index: {}]   ;;  %s11786_s3 = inlined_call_operand.vmem [shape: bf16[608,64], index: 3, kind: output, shape index: {}]  }
   0x1   :  { %vm597_vm1 = vmpackc.low %vm6276_vm0, %vm6276_vm0  ;;  %vm661_vm8 = vsmask.f32 7440  ;;  %v6337_v25 = vunpack.c.l.b16 %v11810_v2  ;;  %v6340_v26 = vunpack.c.h.b16 %v11810_v2  ;;  %v1246_v44 = vld [vmem:[%s11783_s0 + $0x8] sm:$0x8]  ;;  %v12209_v51 = vmov 0  ;;  %s6280_s23 = smov 9  }
   0x2   :  { %v6307_v1 = vshrl.u32 %v17_v0, 7  ;;  %v6310_v3 = vsel %vm597_vm1, 65537, %v11810_v2  ;;  %vm6371_vm14 = vmor %vm11787_vm7, %vm661_vm8  ;;  %v6398_v63 = vld [vmem:[%s11783_s0 + $0x28] sm:$0xf]  ;;  %v6526_v22 = vld [vmem:[%s11783_s0 + $0x14] sm:$0xf] }
   0x3   :  { %12198 = vst [vmem:[#allocation3_spill] sm:$0xff] %v6310_v3  ;;  %v11808_v4 = vshll.u32 %v6310_v3, 16  ;;  %v11809_v5 = vshrl.u32 %v6310_v3, 16  ;;  %v7029_v43 = vld [vmem:[%s11783_s0 + $0x84] sm:$0xf]  ;;  %s6281_s15 = smov 12  }
   0x4   :  { %12197 = vst [vmem:[#allocation2_spill] sm:$0xff] %v6307_v1  ;;  %v54_v6 = vand.u32 15, %v6307_v1  ;;  %v26_v7 = vadd.s32 64, %v6307_v1  ;;  %v22_v8 = vadd.s32 32, %v6307_v1  ;;  %v20_v9 = vadd.s32 16, %v6307_v1  ;;  %s6282_s18 = smov 15  }
   0x5   :  { %v6320_v10 = vrot.slane %v11808_v4, 5  ;;  %v679_v11 = vrot.slane %v11809_v5, 4  ;;  %v28_v12 = vadd.s32 80, %v6307_v1  ;;  %v24_v13 = vadd.s32 48, %v6307_v1  ;;  %s6283_s21 = smov 18   ;;  %s6284_s26 = smov 21  }
   0x6   :  { %vm434_vm2 = vcmp.ne.s32.totalorder %v54_v6, 0  ;;  %v110_v14 = vand.u32 15, %v26_v7  ;;  %v82_v15 = vand.u32 15, %v22_v8  ;;  %v68_v16 = vand.u32 15, %v20_v9  ;;  %v502_v6 = vld [vmem:[%s11783_s0 + $0xc] sm:$0xf] }
   0x7   :  { %vm596_vm3 = vmpackc.low %vm434_vm2, %vm434_vm2  ;;  %v680_v17 = vor.u32 %v679_v11, %v6320_v10  ;;  %v124_v18 = vand.u32 15, %v28_v12  ;;  %v96_v19 = vand.u32 15, %v24_v13  ;;  %v6364_v37 = vadd.s32 96, %v6307_v1  ;;  %s6285_s27 = smov 24  }
   0x8   :  { %v628_v20 = vsel %vm596_vm3, 65537, %v11810_v2  ;;  %vm442_vm4 = vcmp.ne.s32.totalorder %v110_v14, 0  ;;  %vm6328_vm5 = vcmp.ne.s32.totalorder %v82_v15, 0  ;;  %vm6332_vm6 = vcmp.ne.s32.totalorder %v68_v16, 0 }
   0x9   :  { %v664_v23 = vshll.u32 %v628_v20, 16  ;;  %v667_v24 = vshrl.u32 %v628_v20, 16  ;;  %vm604_vm9 = vmpackc.low %vm442_vm4, %vm442_vm4  ;;  %v6343_v28 = vrot.slane %v680_v17, 4  ;;  %vm6351_vm12 = vcmp.ne.s32.totalorder %v124_v18, 0 }
   0xa   :  { %v636_v27 = vsel %vm604_vm9, 65537, %v11810_v2  ;;  %vm600_vm10 = vmpackc.low %vm6328_vm5, %vm6328_vm5  ;;  %vm6359_vm13 = vcmp.ne.s32.totalorder %v96_v19, 0  ;;  %v6367_v38 = vadd.s32 128, %v6307_v1  ;;  %v12212_v11 = vmov 0  ;;  %v6429_v19 = vld [vmem:[%s11783_s0 + $0x2c] sm:$0xf] }
   0xb   :  { %v666_v29 = vrot.slane %v664_v23, 5  ;;  %v669_v30 = vrot.slane %v667_v24, 4  ;;  %v743_v31 = vshll.u32 %v636_v27, 16  ;;  %v747_v32 = vshrl.u32 %v636_v27, 16  ;;  %vm598_vm11 = vmpackc.low %vm6332_vm6, %vm6332_vm6  ;;  %v6444_v24 = vld [vmem:[%s11783_s0 + $0x18] sm:$0xf] }
   0xc   :  { %v632_v34 = vsel %vm600_vm10, 65537, %v11810_v2  ;;  %v6357_v35 = vsel %vm598_vm11, 65537, %v11810_v2  ;;  %v12215_v13 = vmov 0  ;;  %vm606_vm10 = vmpackc.low %vm6351_vm12, %vm6351_vm12  ;;  %v44_v4 = vadd.s32 208, %v6307_v1 }
   0xd   :  { %v670_v39 = vor.u32 %v669_v30, %v666_v29  ;;  %v982_v40 = vunpack.c.l.b16 %v666_v29  ;;  %v983_v41 = vunpack.c.h.b16 %v666_v29  ;;  %v745_v42 = vrot.slane %v743_v31, 5 }
   0xe   :  { %v749_v45 = vrot.slane %v747_v32, 4  ;;  %v703_v46 = vshll.u32 %v632_v34, 16  ;;  %v707_v47 = vshrl.u32 %v632_v34, 16  ;;  %v683_v48 = vshll.u32 %v6357_v35, 16 }
   0xf   :  { %v671_v49 = vrot.slane %v670_v39, 4  ;;  %vm986_vm15 = vcmp.ne.s32.totalorder %v982_v40, %v6337_v25  ;;  %vm987_vm0 = vcmp.ne.s32.totalorder %v983_v41, %v6340_v26  ;;  %v746_v50 = vsel %vm6371_vm14, %v6343_v28, %v745_v42  ;;  %v6467_v40 = vld [vmem:[%s11783_s0 + $0x1c] sm:$0xf] }
  0x10   :  { %vm6384_vm1 = vmpackc.low %vm987_vm0, %vm986_vm15  ;;  %v750_v52 = vor.u32 %v749_v45, %v745_v42  ;;  %v1038_v53 = vunpack.c.l.b16 %v746_v50  ;;  %v1039_v54 = vunpack.c.h.b16 %v746_v50  ;;  %v705_v55 = vrot.slane %v703_v46, 5 }
  0x11   :  { %v12210_v51 = vsel %vm6384_vm1, 4294967295, %v12209_v51  ;;  %v676_v56 = vsel %vm6371_vm14, %v671_v49, %v6320_v10  ;;  %v1249_v57 = vsel %vm6384_vm1, %v1246_v44, 0  ;;  %v709_v58 = vrot.slane %v707_v47, 4  ;;  %vm602_vm0 = vmpackc.low %vm6359_vm13, %vm6359_vm13 }
  0x12   :  { %12211 = vst [vmem:[#allocation4_spill] sm:$0xff] %v12210_v51  ;;  %v6393_v59 = vrot.slane %v683_v48, 5  ;;  %v989_v60 = vunpack.c.l.b16 %v676_v56  ;;  %v990_v61 = vunpack.c.h.b16 %v676_v56  ;;  %v2185_v62 = vunpack.c.l.b16 %v1249_v57 }
  0x13   :  { %v751_v0 = vrot.slane %v750_v52, 4  ;;  %vm1042_vm2 = vcmp.ne.s32.totalorder %v1038_v53, %v6337_v25  ;;  %vm1043_vm3 = vcmp.ne.s32.totalorder %v1039_v54, %v6340_v26  ;;  %v706_v7 = vsel %vm6371_vm14, %v6343_v28, %v705_v55  ;;  %v503_v53 = vld [vmem:[%s11783_s0 + $0x10] sm:$0xf] }
  0x14   :  { %v710_v8 = vor.u32 %v709_v58, %v705_v55  ;;  %vm993_vm4 = vcmp.ne.s32.totalorder %v989_v60, %v6337_v25  ;;  %vm994_vm5 = vcmp.ne.s32.totalorder %v990_v61, %v6340_v26  ;;  %vm6413_vm6 = vmpackc.low %vm1043_vm3, %vm1042_vm2  ;;  %v1010_v12 = vunpack.c.l.b16 %v706_v7 }
  0x15   :  { %v756_v9 = vsel %vm6371_vm14, %v751_v0, %v6320_v10  ;;  %v12213_v11 = vsel %vm6413_vm6, 4294967295, %v12212_v11  ;;  %vm6417_vm8 = vmpackc.low %vm994_vm5, %vm993_vm4  ;;  %v1257_v16 = vsel %vm6413_vm6, %v6398_v63, 0  ;;  %v1011_v21 = vunpack.c.h.b16 %v706_v7 }
  0x16   :  { %12214 = vst [vmem:[#allocation5_spill] sm:$0xff] %v12213_v11  ;;  %v12216_v13 = vsel %vm6417_vm8, 4294967295, %v12215_v13  ;;  %v1045_v14 = vunpack.c.l.b16 %v756_v9  ;;  %v1046_v15 = vunpack.c.h.b16 %v756_v9  ;;  %v711_v17 = vrot.slane %v710_v8, 4 }
  0x17   :  { %12217 = vst [vmem:[#allocation6_spill] sm:$0xff] %v12216_v13  ;;  %v1250_v18 = vsel %vm6417_vm8, %v502_v6, 0  ;;  %v2193_v20 = vunpack.c.l.b16 %v1257_v16  ;;  %vm6432_vm9 = vcmp.ne.s32.totalorder %v1010_v12, %v6337_v25  ;;  %v12220_v29 = vmov 0 }
  0x18   :  { %v2186_v23 = vunpack.c.l.b16 %v1250_v18  ;;  %vm1049_vm11 = vcmp.ne.s32.totalorder %v1045_v14, %v6337_v25  ;;  %vm1050_vm15 = vcmp.ne.s32.totalorder %v1046_v15, %v6340_v26  ;;  %v716_v27 = vsel %vm6371_vm14, %v711_v17, %v6320_v10 }
  0x19   :  { %vm6452_vm2 = vmpackc.low %vm1050_vm15, %vm1049_vm11  ;;  %vm1015_vm3 = vcmp.ne.s32.totalorder %v1011_v21, %v6340_v26  ;;  %v1017_v30 = vunpack.c.l.b16 %v716_v27  ;;  %v1018_v31 = vunpack.c.h.b16 %v716_v27  ;;  %v686_v32 = vsel %vm6371_vm14, %v6343_v28, %v6393_v59 }
  0x1a   :  { %v12221_v29 = vsel %vm6452_vm2, 4294967295, %v12220_v29  ;;  %v2218_v34 = vpack.c.b16 %v2186_v23, %v2185_v62  ;;  %v1258_v39 = vsel %vm6452_vm2, %v6429_v19, 0  ;;  %vm6471_vm4 = vmpackc.low %vm1015_vm3, %vm6432_vm9  ;;  %v12223_v41 = vmov 0 }
  0x1b   :  { %12222 = vst [vmem:[#allocation7_spill] sm:$0xff] %v12221_v29  ;;  %v12224_v41 = vsel %vm6471_vm4, 4294967295, %v12223_v41  ;;  %v687_v42 = vshrl.u32 %v6357_v35, 16  ;;  %v996_v44 = vunpack.c.l.b16 %v686_v32  ;;  %v2194_v45 = vunpack.c.l.b16 %v1258_v39 }
  0x1c   :  { %12225 = vst [vmem:[#allocation8_spill] sm:$0xff] %v12224_v41  ;;  %vm1021_vm5 = vcmp.ne.s32.totalorder %v1017_v30, %v6337_v25  ;;  %vm1022_vm11 = vcmp.ne.s32.totalorder %v1018_v31, %v6340_v26  ;;  %v1253_v46 = vsel %vm6471_vm4, %v6444_v24, 0  ;;  %2235 = vrot.lane.b32.xlu0 %v2218_v34, %s6278_s24  ;;  %v12226_v47 = vmov 0 }
  0x1d   :  { %vm6482_vm15 = vmpackc.low %vm1022_vm11, %vm1021_vm5  ;;  %v2189_v48 = vunpack.c.l.b16 %v1253_v46  ;;  %v689_v49 = vrot.slane %v687_v42, 4  ;;  %v997_v35 = vunpack.c.h.b16 %v686_v32  ;;  %vm1000_vm9 = vcmp.ne.s32.totalorder %v996_v44, %v6337_v25 }
  0x1e   :  { %v12227_v47 = vsel %vm6482_vm15, 4294967295, %v12226_v47  ;;  %v2222_v50 = vpack.c.b16 %v2194_v45, %v2193_v20  ;;  %v1254_v52 = vsel %vm6482_vm15, %v6467_v40, 0  ;;  %v638_v54 = vsel %vm606_vm10, 65537, %v11810_v2 }
  0x1f   :  { %12228 = vst [vmem:[#allocation9_spill] sm:$0xff] %v12227_v47  ;;  %v634_v55 = vsel %vm602_vm0, 65537, %v11810_v2  ;;  %v2190_v56 = vunpack.c.l.b16 %v1254_v52  ;;  %v690_v57 = vor.u32 %v689_v49, %v6393_v59  ;;  %vm1001_vm3 = vcmp.ne.s32.totalorder %v997_v35, %v6340_v26 }
  0x20   :  { %v763_v58 = vshll.u32 %v638_v54, 16  ;;  %2243 = vrot.lane.b32.xlu2 %v2222_v50, %s6278_s24  ;;  %vm6508_vm5 = vmpackc.low %vm1001_vm3, %vm1000_vm9  ;;  %v12229_v60 = vmov 0  ;;  %v767_v33 = vshrl.u32 %v638_v54, 16  ;;  %v723_v61 = vshll.u32 %v634_v55, 16 }
  0x21   :  { %v12230_v60 = vsel %vm6508_vm5, 4294967295, %v12229_v60  ;;  %v727_v62 = vshrl.u32 %v634_v55, 16  ;;  %v138_v0 = vand.u32 15, %v6364_v37  ;;  %v2220_v36 = vpack.c.b16 %v2190_v56, %v2189_v48  ;;  %v6561_v55 = vld [vmem:[%s11783_s0 + $0x20] sm:$0xf] }
  0x22   :  { %12231 = vst [vmem:[#allocation10_spill] sm:$0xff] %v12230_v60  ;;  %v691_v6 = vrot.slane %v690_v57, 4  ;;  %v1251_v7 = vsel %vm6508_vm5, %v503_v53, 0  ;;  %v765_v59 = vrot.slane %v763_v58, 5  ;;  %v769_v9 = vrot.slane %v767_v33, 4 }
  0x23   :  { %v2187_v8 = vunpack.c.l.b16 %v1251_v7  ;;  %v725_v12 = vrot.slane %v723_v61, 5  ;;  %v729_v14 = vrot.slane %v727_v62, 4  ;;  %2239 = vrot.lane.b32.xlu1 %v2220_v36, %s6278_s24  ;;  %vm446_vm12 = vcmp.ne.s32.totalorder %v138_v0, 0  ;;  %v6566_v56 = vld [vmem:[%s11783_s0 + $0x34] sm:$0xf] }
  0x24   :  { %v696_v15 = vsel %vm6371_vm14, %v691_v6, %v6320_v10  ;;  %v766_v37 = vsel %vm6371_vm14, %v6343_v28, %v765_v59  ;;  %v166_v16 = vand.u32 15, %v6367_v38  ;;  %v770_v20 = vor.u32 %v769_v9, %v765_v59  ;;  %vm608_vm13 = vmpackc.low %vm446_vm12, %vm446_vm12  ;;  %v6537_v38 = vld [vmem:[%s11783_s0 + $0x30] sm:$0xf]  ;;  %v6593_v9 = vld [vmem:[%s11783_s0 + $0x24] sm:$0xf] }
  0x25   :  { %v1003_v17 = vunpack.c.l.b16 %v696_v15  ;;  %v1004_v18 = vunpack.c.h.b16 %v696_v15  ;;  %v1052_v21 = vunpack.c.l.b16 %v766_v37  ;;  %v1053_v23 = vunpack.c.h.b16 %v766_v37 }
  0x26   :  { %v726_v27 = vsel %vm6371_vm14, %v6343_v28, %v725_v12  ;;  %v730_v30 = vor.u32 %v729_v14, %v725_v12  ;;  %v640_v31 = vsel %vm608_vm13, 65537, %v11810_v2  ;;  %v771_v32 = vrot.slane %v770_v20, 4 }
  0x27   :  { %vm1007_vm10 = vcmp.ne.s32.totalorder %v1003_v17, %v6337_v25  ;;  %vm1008_vm0 = vcmp.ne.s32.totalorder %v1004_v18, %v6340_v26  ;;  %vm1056_vm11 = vcmp.ne.s32.totalorder %v1052_v21, %v6337_v25  ;;  %v12232_v34 = vmov 0 }
  0x28   :  { %vm6540_vm9 = vmpackc.low %vm1008_vm0, %vm1007_vm10  ;;  %vm1057_vm3 = vcmp.ne.s32.totalorder %v1053_v23, %v6340_v26  ;;  %v731_v39 = vrot.slane %v730_v30, 4  ;;  %v1024_v42 = vunpack.c.l.b16 %v726_v27  ;;  %v1025_v44 = vunpack.c.h.b16 %v726_v27  ;;  %v6612_v30 = vld [vmem:[%s11783_s0 + $0x38] sm:$0xf] }
  0x29   :  { %v12233_v34 = vsel %vm6540_vm9, 4294967295, %v12232_v34  ;;  %v1252_v45 = vsel %vm6540_vm9, %v6526_v22, 0  ;;  %v776_v46 = vsel %vm6371_vm14, %v771_v32, %v6320_v10  ;;  %vm6551_vm12 = vmpackc.low %vm1057_vm3, %vm1056_vm11  ;;  %v12235_v48 = vmov 0 }
  0x2a   :  { %12234 = vst [vmem:[#allocation11_spill] sm:$0xff] %v12233_v34  ;;  %v12236_v48 = vsel %vm6551_vm12, 4294967295, %v12235_v48  ;;  %v783_v49 = vshll.u32 %v640_v31, 16  ;;  %v787_v35 = vshrl.u32 %v640_v31, 16  ;;  %v2188_v50 = vunpack.c.l.b16 %v1252_v45 }
  0x2b   :  { %12237 = vst [vmem:[#allocation12_spill] sm:$0xff] %v12236_v48  ;;  %v1059_v52 = vunpack.c.l.b16 %v776_v46  ;;  %v1060_v53 = vunpack.c.h.b16 %v776_v46  ;;  %v1259_v54 = vsel %vm6551_vm12, %v6537_v38, 0  ;;  %v736_v58 = vsel %vm6371_vm14, %v731_v39, %v6320_v10 }
  0x2c   :  { %v2195_v57 = vunpack.c.l.b16 %v1259_v54  ;;  %vm1028_vm13 = vcmp.ne.s32.totalorder %v1024_v42, %v6337_v25  ;;  %vm1029_vm10 = vcmp.ne.s32.totalorder %v1025_v44, %v6340_v26  ;;  %v2219_v33 = vpack.c.b16 %v2188_v50, %v2187_v8 }
  0x2d   :  { %vm1063_vm0 = vcmp.ne.s32.totalorder %v1059_v52, %v6337_v25  ;;  %vm1064_vm11 = vcmp.ne.s32.totalorder %v1060_v53, %v6340_v26  ;;  %vm6575_vm3 = vmpackc.low %vm1029_vm10, %vm1028_vm13  ;;  %v12238_v61 = vmov 0  ;;  %v1031_v62 = vunpack.c.l.b16 %v736_v58 }
  0x2e   :  { %v12239_v61 = vsel %vm6575_vm3, 4294967295, %v12238_v61  ;;  %vm6579_vm7 = vmpackc.low %vm1064_vm11, %vm1063_vm0  ;;  %v12241_v0 = vmov 0  ;;  %v1032_v36 = vunpack.c.h.b16 %v736_v58  ;;  %v1255_v6 = vsel %vm6575_vm3, %v6561_v55, 0  ;;  %2237 = vrot.lane.b32.xlu0 %v2219_v33, %s6278_s24 }
  0x2f   :  { %12240 = vst [vmem:[#allocation13_spill] sm:$0xff] %v12239_v61  ;;  %v12242_v0 = vsel %vm6579_vm7, 4294967295, %v12241_v0  ;;  %v785_v7 = vrot.slane %v783_v49, 5  ;;  %v789_v59 = vrot.slane %v787_v35, 4  ;;  %v1260_v8 = vsel %vm6579_vm7, %v6566_v56, 0 }
  0x30   :  { %12243 = vst [vmem:[#allocation14_spill] sm:$0xff] %v12242_v0  ;;  %vm1035_vm13 = vcmp.ne.s32.totalorder %v1031_v62, %v6337_v25  ;;  %v2191_v12 = vunpack.c.l.b16 %v1255_v6  ;;  %vm450_vm10 = vcmp.ne.s32.totalorder %v166_v16, 0  ;;  %v2196_v14 = vunpack.c.l.b16 %v1260_v8 }
  0x31   :  { %vm1036_vm0 = vcmp.ne.s32.totalorder %v1032_v36, %v6340_v26  ;;  %v786_v15 = vsel %vm6371_vm14, %v6343_v28, %v785_v7  ;;  %v790_v37 = vor.u32 %v789_v59, %v785_v7  ;;  %vm612_vm11 = vmpackc.low %vm450_vm10, %vm450_vm10  ;;  %v12244_v17 = vmov 0  ;;  %v6646_v59 = vld [vmem:[%s11783_s0 + $0x48] sm:$0xf] }
  0x32   :  { %vm6600_vm12 = vmpackc.low %vm1036_vm0, %vm1035_vm13  ;;  %v1066_v18 = vunpack.c.l.b16 %v786_v15  ;;  %v1067_v20 = vunpack.c.h.b16 %v786_v15  ;;  %v644_v21 = vsel %vm612_vm11, 65537, %v11810_v2  ;;  %v32_v23 = vadd.s32 112, %v6307_v1 }
  0x33   :  { %v12245_v17 = vsel %vm6600_vm12, 4294967295, %v12244_v17  ;;  %v2223_v16 = vpack.c.b16 %v2196_v14, %v2195_v57  ;;  %v1256_v27 = vsel %vm6600_vm12, %v6593_v9, 0  ;;  %v791_v31 = vrot.slane %v790_v37, 4  ;;  %v6631_v57 = vld [vmem:[%s11783_s0 + $0x3c] sm:$0xf] }
  0x34   :  { %12246 = vst [vmem:[#allocation15_spill] sm:$0xff] %v12245_v17  ;;  %v823_v32 = vshll.u32 %v644_v21, 16  ;;  %v2192_v39 = vunpack.c.l.b16 %v1256_v27  ;;  %vm1070_vm13 = vcmp.ne.s32.totalorder %v1066_v18, %v6337_v25  ;;  %vm1071_vm10 = vcmp.ne.s32.totalorder %v1067_v20, %v6340_v26 }
  0x35   :  { %v827_v42 = vshrl.u32 %v644_v21, 16  ;;  %2245 = vrot.lane.b32.xlu2 %v2223_v16, %s6278_s24  ;;  %v796_v44 = vsel %vm6371_vm14, %v791_v31, %v6320_v10  ;;  %vm6620_vm0 = vmpackc.low %vm1071_vm10, %vm1070_vm13  ;;  %v12247_v45 = vmov 0  ;;  %v152_v49 = vand.u32 15, %v32_v23 }
  0x36   :  { %v12248_v45 = vsel %vm6620_vm0, 4294967295, %v12247_v45  ;;  %v825_v46 = vrot.slane %v823_v32, 5  ;;  %v36_v35 = vadd.s32 144, %v6307_v1  ;;  %v2221_v50 = vpack.c.b16 %v2192_v39, %v2191_v12 }
  0x37   :  { %12249 = vst [vmem:[#allocation16_spill] sm:$0xff] %v12248_v45  ;;  %v1073_v52 = vunpack.c.l.b16 %v796_v44  ;;  %v1074_v53 = vunpack.c.h.b16 %v796_v44  ;;  %v1261_v54 = vsel %vm6620_vm0, %v6612_v30, 0  ;;  %v829_v62 = vrot.slane %v827_v42, 4 }
  0x38   :  { %v2197_v58 = vunpack.c.l.b16 %v1261_v54  ;;  %v826_v33 = vsel %vm6371_vm14, %v6343_v28, %v825_v46  ;;  %vm448_vm11 = vcmp.ne.s32.totalorder %v152_v49, 0  ;;  %2241 = vrot.lane.b32.xlu1 %v2221_v50, %s6278_s24  ;;  %v12250_v7 = vmov 0  ;;  %v6674_v54 = vld [vmem:[%s11783_s0 + $0x4c] sm:$0xf] }
  0x39   :  { %vm1077_vm13 = vcmp.ne.s32.totalorder %v1073_v52, %v6337_v25  ;;  %vm1078_vm10 = vcmp.ne.s32.totalorder %v1074_v53, %v6340_v26  ;;  %v1094_v36 = vunpack.c.l.b16 %v826_v33  ;;  %v1095_v6 = vunpack.c.h.b16 %v826_v33  ;;  %vm610_vm7 = vmpackc.low %vm448_vm11, %vm448_vm11 }
  0x3a   :  { %vm6639_vm2 = vmpackc.low %vm1078_vm10, %vm1077_vm13  ;;  %v830_v8 = vor.u32 %v829_v62, %v825_v46  ;;  %v642_v12 = vsel %vm610_vm7, 65537, %v11810_v2  ;;  %v180_v14 = vand.u32 15, %v36_v35  ;;  %v40_v15 = vadd.s32 176, %v6307_v1 }
  0x3b   :  { %v12251_v7 = vsel %vm6639_vm2, 4294967295, %v12250_v7  ;;  %v1262_v37 = vsel %vm6639_vm2, %v6631_v57, 0  ;;  %vm1098_vm11 = vcmp.ne.s32.totalorder %v1094_v36, %v6337_v25  ;;  %vm1099_vm13 = vcmp.ne.s32.totalorder %v1095_v6, %v6340_v26  ;;  %v6681_v6 = vld [vmem:[%s11783_s0 + $0x40] sm:$0xf] }
  0x3c   :  { %12252 = vst [vmem:[#allocation17_spill] sm:$0xff] %v12251_v7  ;;  %v803_v18 = vshll.u32 %v642_v12, 16  ;;  %v2198_v20 = vunpack.c.l.b16 %v1262_v37  ;;  %v831_v21 = vrot.slane %v830_v8, 4  ;;  %vm6655_vm10 = vmpackc.low %vm1099_vm13, %vm1098_vm11  ;;  %v12253_v23 = vmov 0 }
  0x3d   :  { %v12254_v23 = vsel %vm6655_vm10, 4294967295, %v12253_v23  ;;  %v807_v16 = vshrl.u32 %v642_v12, 16  ;;  %vm452_vm7 = vcmp.ne.s32.totalorder %v180_v14, 0  ;;  %v1265_v27 = vsel %vm6655_vm10, %v6646_v59, 0 }
  0x3e   :  { %12255 = vst [vmem:[#allocation18_spill] sm:$0xff] %v12254_v23  ;;  %v805_v31 = vrot.slane %v803_v18, 5  ;;  %vm614_vm6 = vmpackc.low %vm452_vm7, %vm452_vm7  ;;  %v208_v32 = vand.u32 15, %v40_v15  ;;  %v38_v39 = vadd.s32 160, %v6307_v1  ;;  %v2224_v42 = vpack.c.b16 %v2198_v20, %v2197_v58 }
  0x3f   :  { %v836_v44 = vsel %vm6371_vm14, %v831_v21, %v6320_v10  ;;  %v2201_v46 = vunpack.c.l.b16 %v1265_v27  ;;  %v809_v49 = vrot.slane %v807_v16, 4  ;;  %v646_v53 = vsel %vm614_vm6, 65537, %v11810_v2 }
  0x40   :  { %v1101_v35 = vunpack.c.l.b16 %v836_v44  ;;  %v1102_v50 = vunpack.c.h.b16 %v836_v44  ;;  %v806_v52 = vsel %vm6371_vm14, %v6343_v28, %v805_v31  ;;  %2247 = vrot.lane.b32.xlu0 %v2224_v42, %s6278_s24  ;;  %v843_v36 = vshll.u32 %v646_v53, 16 }
  0x41   :  { %v810_v58 = vor.u32 %v809_v49, %v805_v31  ;;  %v1080_v33 = vunpack.c.l.b16 %v806_v52  ;;  %v1081_v62 = vunpack.c.h.b16 %v806_v52  ;;  %v847_v8 = vshrl.u32 %v646_v53, 16  ;;  %v6716_v53 = vld [vmem:[%s11783_s0 + $0x44] sm:$0xf] }
  0x42   :  { %vm1105_vm11 = vcmp.ne.s32.totalorder %v1101_v35, %v6337_v25  ;;  %vm1106_vm13 = vcmp.ne.s32.totalorder %v1102_v50, %v6340_v26  ;;  %vm6683_vm6 = vcmp.ne.s32.totalorder %v208_v32, 0  ;;  %v12258_v14 = vmov 0 }
  0x43   :  { %vm6687_vm7 = vmpackc.low %vm1106_vm13, %vm1105_vm11  ;;  %v811_v15 = vrot.slane %v810_v58, 4  ;;  %vm1084_vm10 = vcmp.ne.s32.totalorder %v1080_v33, %v6337_v25  ;;  %vm1085_vm2 = vcmp.ne.s32.totalorder %v1081_v62, %v6340_v26  ;;  %v845_v37 = vrot.slane %v843_v36, 5  ;;  %v6724_v36 = vld [vmem:[%s11783_s0 + $0x50] sm:$0xf] }
  0x44   :  { %v12259_v14 = vsel %vm6687_vm7, 4294967295, %v12258_v14  ;;  %v1266_v18 = vsel %vm6687_vm7, %v6674_v54, 0  ;;  %vm6696_vm0 = vmpackc.low %vm1085_vm2, %vm1084_vm10  ;;  %v12261_v20 = vmov 0  ;;  %v849_v21 = vrot.slane %v847_v8, 4 }
  0x45   :  { %12260 = vst [vmem:[#allocation19_spill] sm:$0xff] %v12259_v14  ;;  %v12262_v20 = vsel %vm6696_vm0, 4294967295, %v12261_v20  ;;  %v194_v16 = vand.u32 15, %v38_v39  ;;  %v42_v27 = vadd.s32 192, %v6307_v1  ;;  %v2202_v31 = vunpack.c.l.b16 %v1266_v18  ;;  %vm618_vm2 = vmpackc.low %vm6683_vm6, %vm6683_vm6 }
  0x46   :  { %12263 = vst [vmem:[#allocation20_spill] sm:$0xff] %v12262_v20  ;;  %v816_v32 = vsel %vm6371_vm14, %v811_v15, %v6320_v10  ;;  %v1263_v42 = vsel %vm6696_vm0, %v6681_v6, 0  ;;  %v846_v44 = vsel %vm6371_vm14, %v6343_v28, %v845_v37  ;;  %v850_v50 = vor.u32 %v849_v21, %v845_v37 }
  0x47   :  { %v1087_v39 = vunpack.c.l.b16 %v816_v32  ;;  %v1088_v49 = vunpack.c.h.b16 %v816_v32  ;;  %v2199_v35 = vunpack.c.l.b16 %v1263_v42  ;;  %v2226_v52 = vpack.c.b16 %v2202_v31, %v2201_v46 }
  0x48   :  { %v1108_v58 = vunpack.c.l.b16 %v846_v44  ;;  %v1109_v33 = vunpack.c.h.b16 %v846_v44  ;;  %v650_v62 = vsel %vm618_vm2, 65537, %v11810_v2  ;;  %v851_v8 = vrot.slane %v850_v50, 4  ;;  %v6756_v50 = vld [vmem:[%s11783_s0 + $0x54] sm:$0xf] }
  0x49   :  { %vm1091_vm10 = vcmp.ne.s32.totalorder %v1087_v39, %v6337_v25  ;;  %vm1092_vm11 = vcmp.ne.s32.totalorder %v1088_v49, %v6340_v26  ;;  %v883_v46 = vshll.u32 %v650_v62, 16  ;;  %2251 = vrot.lane.b32.xlu2 %v2226_v52, %s6278_s24  ;;  %v12264_v12 = vmov 0 }
  0x4a   :  { %vm6727_vm13 = vmpackc.low %vm1092_vm11, %vm1091_vm10  ;;  %vm1112_vm6 = vcmp.ne.s32.totalorder %v1108_v58, %v6337_v25  ;;  %vm1113_vm2 = vcmp.ne.s32.totalorder %v1109_v33, %v6340_v26  ;;  %v887_v15 = vshrl.u32 %v650_v62, 16  ;;  %vm6733_vm7 = vcmp.ne.s32.totalorder %v194_v16, 0 }
  0x4b   :  { %v12265_v12 = vsel %vm6727_vm13, 4294967295, %v12264_v12  ;;  %v1264_v18 = vsel %vm6727_vm13, %v6716_v53, 0  ;;  %v856_v21 = vsel %vm6371_vm14, %v851_v8, %v6320_v10  ;;  %vm6743_vm10 = vmpackc.low %vm1113_vm2, %vm1112_vm6  ;;  %v12269_v31 = vmov 0 }
  0x4c   :  { %12266 = vst [vmem:[#allocation21_spill] sm:$0xff] %v12265_v12  ;;  %v12270_v31 = vsel %vm6743_vm10, 4294967295, %v12269_v31  ;;  %v885_v32 = vrot.slane %v883_v46, 5  ;;  %v222_v42 = vand.u32 15, %v42_v27  ;;  %v2200_v44 = vunpack.c.l.b16 %v1264_v18  ;;  %vm616_vm11 = vmpackc.low %vm6733_vm7, %vm6733_vm7 }
  0x4d   :  { %12271 = vst [vmem:[#allocation22_spill] sm:$0xff] %v12270_v31  ;;  %v1115_v39 = vunpack.c.l.b16 %v856_v21  ;;  %v1116_v16 = vunpack.c.h.b16 %v856_v21  ;;  %v1267_v49 = vsel %vm6743_vm10, %v6724_v36, 0  ;;  %v889_v58 = vrot.slane %v887_v15, 4 }
  0x4e   :  { %v2203_v52 = vunpack.c.l.b16 %v1267_v49  ;;  %v886_v27 = vsel %vm6371_vm14, %v6343_v28, %v885_v32  ;;  %v648_v33 = vsel %vm616_vm11, 65537, %v11810_v2  ;;  %v2225_v62 = vpack.c.b16 %v2200_v44, %v2199_v35  ;;  %v6775_v35 = vld [vmem:[%s11783_s0 + $0x60] sm:$0xf] }
  0x4f   :  { %vm1119_vm6 = vcmp.ne.s32.totalorder %v1115_v39, %v6337_v25  ;;  %vm1120_vm2 = vcmp.ne.s32.totalorder %v1116_v16, %v6340_v26  ;;  %v1136_v8 = vunpack.c.l.b16 %v886_v27  ;;  %v12272_v46 = vmov 0  ;;  %12275 = vst [vmem:[#allocation24_spill] sm:$0xff] %v6775_v35 }
  0x50   :  { %vm6764_vm7 = vmpackc.low %vm1120_vm2, %vm1119_vm6  ;;  %v890_v37 = vor.u32 %v889_v58, %v885_v32  ;;  %v1137_v18 = vunpack.c.h.b16 %v886_v27  ;;  %v863_v21 = vshll.u32 %v648_v33, 16  ;;  %v867_v49 = vshrl.u32 %v648_v33, 16  ;;  %2249 = vrot.lane.b32.xlu1 %v2225_v62, %s6278_s24 }
  0x51   :  { %v12273_v46 = vsel %vm6764_vm7, 4294967295, %v12272_v46  ;;  %v1268_v15 = vsel %vm6764_vm7, %v6756_v50, 0  ;;  %vm1140_vm11 = vcmp.ne.s32.totalorder %v1136_v8, %v6337_v25  ;;  %vm458_vm6 = vcmp.ne.s32.totalorder %v222_v42, 0 }
  0x52   :  { %12274 = vst [vmem:[#allocation23_spill] sm:$0xff] %v12273_v46  ;;  %v46_v44 = vadd.s32 224, %v6307_v1  ;;  %v2204_v32 = vunpack.c.l.b16 %v1268_v15  ;;  %v891_v39 = vrot.slane %v890_v37, 4  ;;  %vm1141_vm2 = vcmp.ne.s32.totalorder %v1137_v18, %v6340_v26  ;;  %vm620_vm13 = vmpackc.low %vm458_vm6, %vm458_vm6 }
  0x53   :  { %v865_v16 = vrot.slane %v863_v21, 5  ;;  %vm6780_vm0 = vmpackc.low %vm1141_vm2, %vm1140_vm11  ;;  %v12276_v27 = vmov 0  ;;  %v869_v58 = vrot.slane %v867_v49, 4  ;;  %v652_v33 = vsel %vm620_vm13, 65537, %v11810_v2 }
  0x54   :  { %v12277_v27 = vsel %vm6780_vm0, 4294967295, %v12276_v27  ;;  %v250_v62 = vand.u32 15, %v46_v44  ;;  %v2227_v8 = vpack.c.b16 %v2204_v32, %v2203_v52  ;;  %v896_v42 = vsel %vm6371_vm14, %v891_v39, %v6320_v10  ;;  %v6799_v52 = vld [vmem:[%s11783_s0 + $0x64] sm:$0xf] }
  0x55   :  { %12278 = vst [vmem:[#allocation25_spill] sm:$0xff] %v12277_v27  ;;  %v1271_v37 = vsel %vm6780_vm0, %v6775_v35, 0  ;;  %v866_v18 = vsel %vm6371_vm14, %v6343_v28, %v865_v16  ;;  %v1143_v21 = vunpack.c.l.b16 %v896_v42  ;;  %v1144_v49 = vunpack.c.h.b16 %v896_v42  ;;  %v6806_v42 = vld [vmem:[%s11783_s0 + $0x58] sm:$0xf] }
  0x56   :  { %v2207_v15 = vunpack.c.l.b16 %v1271_v37  ;;  %v870_v5 = vor.u32 %v869_v58, %v865_v16  ;;  %2253 = vrot.lane.b32.xlu0 %v2227_v8, %s6278_s24  ;;  %12279 = vst [vmem:[#allocation26_spill] sm:$0xff] %v6799_v52  ;;  %v1122_v44 = vunpack.c.l.b16 %v866_v18  ;;  %v1123_v32 = vunpack.c.h.b16 %v866_v18 }
  0x57   :  { %v903_v39 = vshll.u32 %v652_v33, 16  ;;  %v907_v2 = vshrl.u32 %v652_v33, 16  ;;  %vm1147_vm13 = vcmp.ne.s32.totalorder %v1143_v21, %v6337_v25  ;;  %vm1148_vm11 = vcmp.ne.s32.totalorder %v1144_v49, %v6340_v26 }
  0x58   :  { %v871_v16 = vrot.slane %v870_v5, 4  ;;  %vm6808_vm6 = vcmp.ne.s32.totalorder %v250_v62, 0  ;;  %vm6812_vm2 = vmpackc.low %vm1148_vm11, %vm1147_vm13  ;;  %v12282_v8 = vmov 0  ;;  %vm1126_vm0 = vcmp.ne.s32.totalorder %v1122_v44, %v6337_v25 }
  0x59   :  { %v12283_v8 = vsel %vm6812_vm2, 4294967295, %v12282_v8  ;;  %vm1127_vm7 = vcmp.ne.s32.totalorder %v1123_v32, %v6340_v26  ;;  %v905_v33 = vrot.slane %v903_v39, 5  ;;  %v909_v37 = vrot.slane %v907_v2, 4  ;;  %vm624_vm13 = vmpackc.low %vm6808_vm6, %vm6808_vm6  ;;  %v6838_v39 = vld [vmem:[%s11783_s0 + $0x5c] sm:$0xf] }
  0x5a   :  { %12284 = vst [vmem:[#allocation27_spill] sm:$0xff] %v12283_v8  ;;  %v1272_v18 = vsel %vm6812_vm2, %v6799_v52, 0  ;;  %v876_v5 = vsel %vm6371_vm14, %v871_v16, %v6320_v10  ;;  %vm6824_vm10 = vmpackc.low %vm1127_vm7, %vm1126_vm0  ;;  %v12285_v62 = vmov 0  ;;  %v236_v21 = vand.u32 15, %v44_v4 }
  0x5b   :  { %v12286_v62 = vsel %vm6824_vm10, 4294967295, %v12285_v62  ;;  %v48_v49 = vadd.s32 240, %v6307_v1  ;;  %v2208_v44 = vunpack.c.l.b16 %v1272_v18  ;;  %v1129_v3 = vunpack.c.l.b16 %v876_v5 }
  0x5c   :  { %12287 = vst [vmem:[#allocation28_spill] sm:$0xff] %v12286_v62  ;;  %v1130_v32 = vunpack.c.h.b16 %v876_v5  ;;  %v1269_v2 = vsel %vm6824_vm10, %v6806_v42, 0  ;;  %v906_v4 = vsel %vm6371_vm14, %v6343_v28, %v905_v33  ;;  %v910_v18 = vor.u32 %v909_v37, %v905_v33 }
  0x5d   :  { %v2205_v16 = vunpack.c.l.b16 %v1269_v2  ;;  %v12288_v5 = vmov 0   ;;  %v2229_v8 = vpack.c.b16 %v2208_v44, %v2207_v15  ;;  %vm1133_vm0 = vcmp.ne.s32.totalorder %v1129_v3, %v6337_v25  ;;  %v6857_v3 = vld [vmem:[%s11783_s0 + $0x68] sm:$0xf] }
  0x5e   :  { %v656_v1 = vsel %vm624_vm13, 65537, %v12288_v5  ;;  %vm1134_vm7 = vcmp.ne.s32.totalorder %v1130_v32, %v6340_v26  ;;  %v1150_v58 = vunpack.c.l.b16 %v906_v4  ;;  %v12289_v27 = vmov 0  ;;  %12292 = vst [vmem:[#allocation30_spill] sm:$0xff] %v6857_v3 }
  0x5f   :  { %vm6846_vm11 = vmpackc.low %vm1134_vm7, %vm1133_vm0  ;;  %v911_v52 = vrot.slane %v910_v18, 4  ;;  %v1151_v62 = vunpack.c.h.b16 %v906_v4  ;;  %v943_v2 = vshll.u32 %v656_v1, 16  ;;  %v947_v35 = vshrl.u32 %v656_v1, 16  ;;  %2257 = vrot.lane.b32.xlu2 %v2229_v8, %s6278_s24 }
  0x60   :  { %v12290_v27 = vsel %vm6846_vm11, 4294967295, %v12289_v27  ;;  %v1270_v33 = vsel %vm6846_vm11, %v6838_v39, 0  ;;  %vm1154_vm6 = vcmp.ne.s32.totalorder %v1150_v58, %v6337_v25  ;;  %vm460_vm13 = vcmp.ne.s32.totalorder %v236_v21, 0 }
  0x61   :  { %12291 = vst [vmem:[#allocation29_spill] sm:$0xff] %v12290_v27  ;;  %v264_v15 = vand.u32 15, %v48_v49  ;;  %v2206_v37 = vunpack.c.l.b16 %v1270_v33  ;;  %v916_v1 = vsel %vm6371_vm14, %v911_v52, %v6320_v10  ;;  %vm1155_vm0 = vcmp.ne.s32.totalorder %v1151_v62, %v6340_v26  ;;  %vm622_vm7 = vmpackc.low %vm460_vm13, %vm460_vm13  ;;  %v6872_v49 = vld [vmem:[%s11783_s0 + $0x6c] sm:$0xf] }
  0x62   :  { %v945_v8 = vrot.slane %v943_v2, 5  ;;  %vm6864_vm2 = vmpackc.low %vm1155_vm0, %vm1154_vm6  ;;  %v12293_v44 = vmov 0  ;;  %v1157_v32 = vunpack.c.l.b16 %v916_v1  ;;  %v1158_v4 = vunpack.c.h.b16 %v916_v1  ;;  %12296 = vst [vmem:[#allocation32_spill] sm:$0xff] %v6872_v49 }
  0x63   :  { %v12294_v44 = vsel %vm6864_vm2, 4294967295, %v12293_v44  ;;  %v949_v18 = vrot.slane %v947_v35, 4  ;;  %v654_v58 = vsel %vm622_vm7, 65537, %v12288_v5  ;;  %v2228_v21 = vpack.c.b16 %v2206_v37, %v2205_v16 }
  0x64   :  { %12295 = vst [vmem:[#allocation31_spill] sm:$0xff] %v12294_v44  ;;  %v1273_v52 = vsel %vm6864_vm2, %v6857_v3, 0  ;;  %v946_v62 = vsel %vm6371_vm14, %v6343_v28, %v945_v8  ;;  %v923_v2 = vshll.u32 %v654_v58, 16  ;;  %vm1161_vm6 = vcmp.ne.s32.totalorder %v1157_v32, %v6337_v25  ;;  %v6893_v32 = vld [vmem:[%s11783_s0 + $0x78] sm:$0xf] }
  0x65   :  { %vm1162_vm13 = vcmp.ne.s32.totalorder %v1158_v4, %v6340_v26  ;;  %v2209_v35 = vunpack.c.l.b16 %v1273_v52  ;;  %v950_v16 = vor.u32 %v949_v18, %v945_v8  ;;  %2255 = vrot.lane.b32.xlu1 %v2228_v21, %s6278_s24  ;;  %v12297_v33 = vmov 0 }
  0x66   :  { %vm6883_vm0 = vmpackc.low %vm1162_vm13, %vm1161_vm6  ;;  %v1178_v37 = vunpack.c.l.b16 %v946_v62  ;;  %v1179_v1 = vunpack.c.h.b16 %v946_v62  ;;  %v925_v3 = vrot.slane %v923_v2, 5  ;;  %v927_v27 = vshrl.u32 %v654_v58, 16 }
  0x67   :  { %v12298_v33 = vsel %vm6883_vm0, 4294967295, %v12297_v33  ;;  %v1274_v44 = vsel %vm6883_vm0, %v6872_v49, 0  ;;  %v951_v8 = vrot.slane %v950_v16, 4  ;;  %vm6895_vm7 = vcmp.ne.s32.totalorder %v264_v15, 0 }
  0x68   :  { %12299 = vst [vmem:[#allocation33_spill] sm:$0xff] %v12298_v33  ;;  %v1206_v18 = vunpack.c.l.b16 %v6343_v28  ;;  %v2210_v21 = vunpack.c.l.b16 %v1274_v44  ;;  %vm1182_vm6 = vcmp.ne.s32.totalorder %v1178_v37, %v6337_v25  ;;  %vm1183_vm13 = vcmp.ne.s32.totalorder %v1179_v1, %v6340_v26  ;;  %v6921_v33 = vld [vmem:[%s11783_s0 + $0x7c] sm:$0xf]  ;;  %vm12309_vm2 = vmpackc.low %vm6895_vm7, %vm6895_vm7 }
  0x69   :  { %v926_v58 = vsel %vm6371_vm14, %v6343_v28, %v925_v3  ;;  %v956_v15 = vsel %vm6371_vm14, %v951_v8, %v6320_v10  ;;  %vm6911_vm10 = vmpackc.low %vm1183_vm13, %vm1182_vm6  ;;  %v12302_v52 = vmov 0  ;;  %v929_v44 = vrot.slane %v927_v27, 4  ;;  %12305 = vst [vmem:[#allocation35_spill] sm:$0xff] %v6921_v33  ;;  %v6931_v27 = vld [vmem:[%s11783_s0 + $0x70] sm:$0xf] }
  0x6a   :  { %v12303_v52 = vsel %vm6911_vm10, 4294967295, %v12302_v52  ;;  %v1164_v62 = vunpack.c.l.b16 %v926_v58  ;;  %v1165_v2 = vunpack.c.h.b16 %v926_v58  ;;  %v2230_v16 = vpack.c.b16 %v2210_v21, %v2209_v35 }
  0x6b   :  { %12304 = vst [vmem:[#allocation34_spill] sm:$0xff] %v12303_v52  ;;  %v1185_v37 = vunpack.c.l.b16 %v956_v15  ;;  %v1186_v1 = vunpack.c.h.b16 %v956_v15  ;;  %v1277_v49 = vsel %vm6911_vm10, %v6893_v32, 0  ;;  %v930_v8 = vor.u32 %v929_v44, %v925_v3 }
  0x6c   :  { %vm1168_vm6 = vcmp.ne.s32.totalorder %v1164_v62, %v6337_v25  ;;  %vm1169_vm13 = vcmp.ne.s32.totalorder %v1165_v2, %v6340_v26  ;;  %2259 = vrot.lane.b32.xlu0 %v2230_v16, %s6278_s24  ;;  %v12306_v35 = vmov 0  ;;  %v658_v3 = vsel %vm12309_vm2, 65537, %v12288_v5  ;;  %v1282_v16 = vld [vmem:[%s11783_s0 + $0x10] sm:$0x8] }
  0x6d   :  { %vm1189_vm11 = vcmp.ne.s32.totalorder %v1185_v37, %v6337_v25  ;;  %vm1190_vm0 = vcmp.ne.s32.totalorder %v1186_v1, %v6340_v26  ;;  %vm6933_vm10 = vmpackc.low %vm1169_vm13, %vm1168_vm6  ;;  %v1207_v21 = vunpack.c.h.b16 %v6343_v28  ;;  %v12310_v58 = vmov 0 }
  0x6e   :  { %v12307_v35 = vsel %vm6933_vm10, 4294967295, %v12306_v35  ;;  %vm6944_vm15 = vmpackc.low %vm1190_vm0, %vm1189_vm11  ;;  %v2213_v15 = vunpack.c.l.b16 %v1277_v49  ;;  %v931_v44 = vrot.slane %v930_v8, 4  ;;  %v963_v62 = vshll.u32 %v658_v3, 16 }
  0x6f   :  { %12308 = vst [vmem:[#allocation36_spill] sm:$0xff] %v12307_v35  ;;  %v12311_v58 = vsel %vm6944_vm15, 4294967295, %v12310_v58  ;;  %v967_v2 = vshrl.u32 %v658_v3, 16  ;;  %v1278_v4 = vsel %vm6944_vm15, %v6921_v33, 0  ;;  %vm6955_vm2 = vcmp.ne.s32.totalorder %v1206_v18, %v6337_v25 }
  0x70   :  { %12312 = vst [vmem:[#allocation37_spill] sm:$0xff] %v12311_v58  ;;  %vm6960_vm11 = vcmp.ne.s32.totalorder %v1207_v21, %v6340_v26  ;;  %v2214_v49 = vunpack.c.l.b16 %v1278_v4  ;;  %v936_v8 = vsel %vm6371_vm14, %v931_v44, %v6320_v10  ;;  %v965_v3 = vrot.slane %v963_v62, 5  ;;  %v6975_v4 = vld [vmem:[%s11783_s0 + $0x74] sm:$0xf] }
  0x71   :  { %v969_v5 = vrot.slane %v967_v2, 4  ;;  %v1171_v52 = vunpack.c.l.b16 %v936_v8  ;;  %v1172_v58 = vunpack.c.h.b16 %v936_v8  ;;  %v1275_v18 = vsel %vm6933_vm10, %v6931_v27, 0  ;;  %vm6986_vm6 = vmpackc.low %vm6960_vm11, %vm6955_vm2 }
  0x72   :  { %v1285_v33 = vsel %vm6384_vm1, %v1282_v16, 0  ;;  %v2232_v21 = vpack.c.b16 %v2214_v49, %v2213_v15  ;;  %v966_v44 = vsel %vm6371_vm14, %v6343_v28, %v965_v3  ;;  %v12317_v15 = vmov 0 }
  0x73   :  { %v970_v62 = vor.u32 %v969_v5, %v965_v3  ;;  %vm1175_vm0 = vcmp.ne.s32.totalorder %v1171_v52, %v6337_v25  ;;  %vm1176_vm7 = vcmp.ne.s32.totalorder %v1172_v58, %v6340_v26  ;;  %v1192_v2 = vunpack.c.l.b16 %v966_v44  ;;  %v6998_v5 = vld [vmem:[%s11783_s0 + $0x80] sm:$0xf]  ;;  %v7003_v58 = vld [vmem:[%s11783_s0 + $0x88] sm:$0xf] }
  0x74   :  { %v1193_v8 = vunpack.c.h.b16 %v966_v44  ;;  %v12318_v15 = vsel %vm6986_vm6, 4294967295, %v12317_v15  ;;  %2263 = vrot.lane.b32.xlu2 %v2232_v21, %s6278_s24  ;;  %vm6991_vm13 = vmpackc.low %vm1176_vm7, %vm1175_vm0  ;;  %v12320_v16 = vmov 0  ;;  %v2211_v28 = vunpack.c.l.b16 %v1275_v18 }
  0x75   :  { %12319 = vst [vmem:[#allocation38_spill] sm:$0xff] %v12318_v15  ;;  %v12321_v16 = vsel %vm6991_vm13, 4294967295, %v12320_v16  ;;  %v971_v52 = vrot.slane %v970_v62, 4  ;;  %v1286_v37 = vsel %vm6417_vm8, %v6526_v22, 0  ;;  %v2302_v1 = vunpack.c.l.b16 %v1285_v33 }
  0x76   :  { %12322 = vst [vmem:[#allocation39_spill] sm:$0xff] %v12321_v16  ;;  %v1276_v49 = vsel %vm6991_vm13, %v6975_v4, 0  ;;  %vm1196_vm2 = vcmp.ne.s32.totalorder %v1192_v2, %v6337_v25  ;;  %vm1197_vm11 = vcmp.ne.s32.totalorder %v1193_v8, %v6340_v26  ;;  %v2303_v3 = vunpack.c.l.b16 %v1286_v37 }
  0x77   :  { %v2212_v18 = vunpack.c.l.b16 %v1276_v49  ;;  %v976_v21 = vsel %vm6371_vm14, %v971_v52, %v6320_v10  ;;  %vm7016_vm0 = vmpackc.low %vm1197_vm11, %vm1196_vm2  ;;  %v12323_v44 = vmov 0  ;;  %v1281_v2 = vsel %vm6986_vm6, %v7003_v58, 0 }
  0x78   :  { %v12324_v44 = vsel %vm7016_vm0, 4294967295, %v12323_v44  ;;  %v1199_v22 = vunpack.c.l.b16 %v976_v21  ;;  %v1200_v33 = vunpack.c.h.b16 %v976_v21  ;;  %v1279_v62 = vsel %vm7016_vm0, %v6998_v5, 0 }
  0x79   :  { %12325 = vst [vmem:[#allocation40_spill] sm:$0xff] %v12324_v44  ;;  %v2231_v8 = vpack.c.b16 %v2212_v18, %v2211_v28  ;;  %v2335_v10 = vpack.c.b16 %v2303_v3, %v2302_v1  ;;  %v12326_v52 = vmov 0  ;;  %v2215_v37 = vunpack.c.l.b16 %v1279_v62 }
  0x7a   :  { %vm1203_vm14 = vcmp.ne.s32.totalorder %v1199_v22, %v6337_v25  ;;  %vm1204_vm7 = vcmp.ne.s32.totalorder %v1200_v33, %v6340_v26  ;;  %v2217_v49 = vunpack.c.l.b16 %v1281_v2  ;;  %v1291_v28 = vsel %vm6575_vm3, %v6398_v63, 0 }
  0x7b   :  { %2261 = vrot.lane.b32.xlu1 %v2231_v8, %s6278_s24  ;;  %vm7034_vm2 = vmpackc.low %vm1204_vm7, %vm1203_vm14  ;;  %v1287_v3 = vsel %vm6508_vm5, %v6444_v24, 0  ;;  %v1292_v18 = vsel %vm6600_vm12, %v6429_v19, 0  ;;  %v1288_v63 = vsel %vm6540_vm9, %v6467_v40, 0  ;;  %v2308_v22 = vunpack.c.l.b16 %v1291_v28 }
  0x7c   :  { %v12327_v52 = vsel %vm7034_vm2, 4294967295, %v12326_v52  ;;  %v1280_v1 = vsel %vm7034_vm2, %v7029_v43, 0  ;;  %2352 = vrot.lane.b32.xlu2 %v2335_v10, %s6279_s29  ;;  %v2309_v33 = vunpack.c.l.b16 %v1292_v18  ;;  %v2234_v2 = vpack.c.b16 %v2217_v49, %v2217_v49 }
  0x7d   :  { %12328 = vst [vmem:[#allocation41_spill] sm:$0xff] %v12327_v52  ;;  %v2216_v21 = vunpack.c.l.b16 %v1280_v1  ;;  %v2304_v8 = vunpack.c.l.b16 %v1287_v3  ;;  %v2305_v61 = vunpack.c.l.b16 %v1288_v63  ;;  %v1289_v24 = vsel %vm6471_vm4, %v6561_v55, 0 }
  0x7e   :  { %vm12329_vm11 = vnez %v12227_v47  ;;  %v2338_v10 = vpack.c.b16 %v2309_v33, %v2308_v22  ;;  %vm12330_vm14 = vnez %v12248_v45  ;;  %vm12331_vm7 = vnez %v12251_v7 }
  0x7f   :  { %v2233_v62 = vpack.c.b16 %v2216_v21, %v2215_v37  ;;  %v1290_v19 = vsel %vm12329_vm11, %v6593_v9, 0  ;;  %v1297_v40 = vsel %vm12330_vm14, %v6681_v6, 0  ;;  %v1298_v37 = vsel %vm12331_vm7, %v6716_v53, 0 }
  0x80   :  { %v2306_v49 = vunpack.c.l.b16 %v1289_v24  ;;  %v2307_v28 = vunpack.c.l.b16 %v1290_v19  ;;  %v2336_v55 = vpack.c.b16 %v2305_v61, %v2304_v8  ;;  %vm12332_vm3 = vnez %v12213_v11 }
  0x81   :  { %2265 = vrot.lane.b32.xlu0 %v2233_v62, %s6278_s24  ;;  %v1293_v9 = vsel %vm12332_vm3, %v6537_v38, 0  ;;  %vm12333_vm12 = vnez %v12221_v29  ;;  %v2314_v6 = vunpack.c.l.b16 %v1297_v40  ;;  %v2315_v3 = vunpack.c.l.b16 %v1298_v37  ;;  %v12342_v37 = vld [vmem:[#allocation31_spill] sm:$0xff] }
  0x82   :  { %v1294_v1 = vsel %vm12333_vm12, %v6566_v56, 0  ;;  %v2337_v18 = vpack.c.b16 %v2307_v28, %v2306_v49  ;;  %v2310_v21 = vunpack.c.l.b16 %v1293_v9  ;;  %vm12334_vm7 = vnez %v12236_v48  ;;  %v12344_v49 = vld [vmem:[#allocation33_spill] sm:$0xff] }
  0x83   :  { %2267 = vrot.lane.b32.xlu1 %v2234_v2, %s6278_s24  ;;  %v2311_v53 = vunpack.c.l.b16 %v1294_v1  ;;  %v1295_v63 = vsel %vm12334_vm7, %v6612_v30, 0  ;;  %vm12335_vm14 = vnez %v12242_v0  ;;  %v2341_v38 = vpack.c.b16 %v2315_v3, %v2314_v6  ;;  %v12346_v1 = vld [vmem:[#allocation24_spill] sm:$0xff]  ;;  %v12349_v3 = vld [vmem:[#allocation26_spill] sm:$0xff] }
  0x84   :  { %2358 = vrot.lane.b32.xlu2 %v2338_v10, %s6279_s29  ;;  %v1296_v61 = vsel %vm12335_vm14, %v6631_v57, 0  ;;  %vm12336_vm9 = vnez %v12270_v31  ;;  %vm12337_vm5 = vnez %v12273_v46  ;;  %v2312_v33 = vunpack.c.l.b16 %v1295_v63 }
  0x85   :  { %v1303_v56 = vsel %vm12336_vm9, %v6806_v42, 0  ;;  %v1304_v22 = vsel %vm12337_vm5, %v6838_v39, 0  ;;  %v2313_v62 = vunpack.c.l.b16 %v1296_v61  ;;  %v2339_v30 = vpack.c.b16 %v2311_v53, %v2310_v21 }
  0x86   :  { %vm12338_vm11 = vnez %v12262_v20  ;;  %vm12339_vm4 = vnez %v12265_v12  ;;  %v2320_v42 = vunpack.c.l.b16 %v1303_v56  ;;  %v2321_v8 = vunpack.c.l.b16 %v1304_v22  ;;  %v12352_v56 = vld [vmem:[#allocation30_spill] sm:$0xff]  ;;  %v12353_v22 = vld [vmem:[#allocation25_spill] sm:$0xff] }
  0x87   :  { %v1299_v57 = vsel %vm12338_vm11, %v6646_v59, 0  ;;  %v1300_v2 = vsel %vm12339_vm4, %v6674_v54, 0  ;;  %v2340_v24 = vpack.c.b16 %v2313_v62, %v2312_v33  ;;  %vm12340_vm5 = vnez %v12254_v23  ;;  %v12355_v62 = vld [vmem:[#allocation32_spill] sm:$0xff] }
  0x88   :  { %v2316_v19 = vunpack.c.l.b16 %v1299_v57  ;;  %v2317_v39 = vunpack.c.l.b16 %v1300_v2  ;;  %v1301_v10 = vsel %vm12340_vm5, %v6724_v36, 0  ;;  %vm12341_vm9 = vnez %v12259_v14 }
  0x89   :  { %2354 = vrot.lane.b32.xlu0 %v2336_v55, %s6279_s29  ;;  %v1302_v40 = vsel %vm12341_vm9, %v6756_v50, 0  ;;  %v2344_v59 = vpack.c.b16 %v2321_v8, %v2320_v42  ;;  %vm12343_vm11 = vnez %v12342_v37  ;;  %vm12345_vm4 = vnez %v12344_v49  ;;  %v12347_v50 = vld [vmem:[#allocation28_spill] sm:$0xff] }
  0x8a   :  { %v1309_v54 = vsel %vm12343_vm11, %v6931_v27, 0  ;;  %v1310_v28 = vsel %vm12345_vm4, %v6975_v4, 0  ;;  %v2318_v55 = vunpack.c.l.b16 %v1301_v10  ;;  %v2319_v9 = vunpack.c.l.b16 %v1302_v40  ;;  %v1283_v4 = vld [vmem:[%s11783_s0 + $0x8c] sm:$0xf] }
  0x8b   :  { %2356 = vrot.lane.b32.xlu1 %v2337_v18, %s6279_s29  ;;  %v2342_v36 = vpack.c.b16 %v2317_v39, %v2316_v19  ;;  %vm12348_vm8 = vnez %v12347_v50  ;;  %v12350_v18 = vld [vmem:[#allocation29_spill] sm:$0xff]  ;;  %v2326_v27 = vunpack.c.l.b16 %v1309_v54  ;;  %v2327_v53 = vunpack.c.l.b16 %v1310_v28  ;;  %v6127_v19 = vld [vmem:[%s11783_s0 + $0xc] sm:$0xff] }
  0x8c   :  { %2364 = vrot.lane.b32.xlu2 %v2341_v38, %s6279_s29  ;;  %v1305_v6 = vsel %vm12348_vm8, %v12346_v1, 0  ;;  %vm12351_vm1 = vnez %v12350_v18  ;;  %v2343_v63 = vpack.c.b16 %v2319_v9, %v2318_v55  ;;  %vm12354_vm4 = vnez %v12353_v22 }
  0x8d   :  { %v1306_v21 = vsel %vm12351_vm1, %v12349_v3, 0  ;;  %v2322_v61 = vunpack.c.l.b16 %v1305_v6  ;;  %v1307_v33 = vsel %vm12354_vm4, %v12352_v56, 0  ;;  %v2347_v2 = vpack.c.b16 %v2327_v53, %v2326_v27  ;;  %v12359_v53 = vld [vmem:[#allocation34_spill] sm:$0xff] }
  0x8e   :  { %v2323_v38 = vunpack.c.l.b16 %v1306_v21  ;;  %v1315_v42 = vsel %vm7016_vm0, %v7003_v58, 0  ;;  %v1316_v8 = vsel %vm7034_vm2, %v1283_v4, 0  ;;  %v2324_v39 = vunpack.c.l.b16 %v1307_v33  ;;  %v6129_v56 = vld [vmem:[%s11783_s0 + $0x1c] sm:$0xff]  ;;  %v6130_v33 = vld [vmem:[%s11783_s0 + $0x24] sm:$0xff]  ;;  %v7244_v44 = vpop.permute.xlu0 %2235 }
  0x8f   :  { %v1311_v58 = vsel %vm6933_vm10, %v6893_v32, 0  ;;  %v2332_v28 = vunpack.c.l.b16 %v1315_v42  ;;  %v2333_v55 = vunpack.c.l.b16 %v1316_v8  ;;  %v2475_v1 = vshrl.u32 %v6127_v19, 16  ;;  %12369 = vst [vmem:[#allocation32_spill] sm:$0xff] %v7244_v44 }
  0x90   :  { %v2345_v40 = vpack.c.b16 %v2323_v38, %v2322_v61  ;;  %v2478_v6 = vshll.u32 %v6127_v19, 16  ;;  %v2328_v21 = vunpack.c.l.b16 %v1311_v58  ;;  %vm12360_vm2 = vnez %v12359_v53  ;;  %v1284_v38 = vld [vmem:[%s11783_s0 + $0x90] sm:$0xf]  ;;  %v6128_v19 = vld [vmem:[%s11783_s0 + $0x14] sm:$0xff] }
  0x91   :  { %2360 = vrot.lane.b32.xlu0 %v2339_v30, %s6279_s29  ;;  %v12356_v30 = vld [vmem:[#allocation27_spill] sm:$0xff]  ;;  %v1314_v32 = vsel %vm6944_vm15, %v7029_v43, 0  ;;  %v2350_v61 = vpack.c.b16 %v2333_v55, %v2332_v28  ;;  %v2505_v58 = vshll.u32 %v6130_v33, 16  ;;  %v7171_v55 = vpop.permute.xlu2 %2243  ;;  %vm1447_vm8 = vsmask.f32 256 }
  0x92   :  { %vm12357_vm11 = vnez %v12356_v30  ;;  %v2331_v42 = vunpack.c.l.b16 %v1314_v32  ;;  %12362 = vst [vmem:[#allocation24_spill] sm:$0xff] %v7171_v55  ;;  %v6132_v32 = vld [vmem:[%s11783_s0 + $0x34] sm:$0xff]  ;;  %vm1448_vm15 = vsmask.f32 4368  ;;  %v12474_v30 = vmov 0 }
  0x93   :  { %2362 = vrot.lane.b32.xlu1 %v2340_v24, %s6279_s29  ;;  %v1308_v57 = vsel %vm12357_vm11, %v12355_v62, 0  ;;  %v6126_v24 = vld [vmem:[%s11783_s0 + $0x4] sm:$0xff]  ;;  %v12480_v22 = vmov 0  ;;  %vm12483_vm12 = vcmask 1042432   ;;  %v12592_v46 = vmov 0 }
  0x94   :  { %2370 = vrot.lane.b32.xlu2 %v2344_v59, %s6279_s29  ;;  %v2325_v10 = vunpack.c.l.b16 %v1308_v57  ;;  %v12358_v59 = vld [vmem:[#allocation35_spill] sm:$0xff]  ;;  %v2467_v9 = vshrl.u32 %v6126_v24, 16  ;;  %v2477_v57 = vrot.slane %v2475_v1, 4  ;;  %v2487_v1 = vshll.u32 %v6128_v19, 16 }
  0x95   :  { %v1312_v54 = vsel %vm6991_vm13, %v12358_v59, 0 }
  0x96   :  { %v2346_v3 = vpack.c.b16 %v2325_v10, %v2324_v39  ;;  %v2329_v27 = vunpack.c.l.b16 %v1312_v54  ;;  %v2493_v39 = vshrl.u32 %v6129_v56, 16  ;;  %v2496_v10 = vshll.u32 %v6129_v56, 16  ;;  %v6131_v56 = vld [vmem:[%s11783_s0 + $0x2c] sm:$0xff] }
  0x98   :  { %v2348_v8 = vpack.c.b16 %v2329_v27, %v2328_v21  ;;  %v2507_v27 = vrot.slane %v2505_v58, 5  ;;  %v6135_v58 = vld [vmem:[%s11783_s0 + $0x4c] sm:$0xff] }
  0x99   :  { %2366 = vrot.lane.b32.xlu0 %v2342_v36, %s6279_s29  ;;  %v2470_v36 = vshll.u32 %v6126_v24, 16  ;;  %v1317_v24 = vsel %vm6986_vm6, %v1284_v38, 0  ;;  %vm12363_vm6 = vsmask.f32 3328 }
  0x9a   :  { %vm12365_vm0 = vmmov %vm12363_vm6 }
  0x9b   :  { %2368 = vrot.lane.b32.xlu1 %v2343_v63, %s6279_s29  ;;  %v1313_v63 = vsel %vm12360_vm2, %v6998_v5, 0  ;;  %v2469_v5 = vrot.slane %v2467_v9, 4  ;;  %v2472_v62 = vrot.slane %v2470_v36, 5  ;;  %v2334_v9 = vunpack.c.l.b16 %v1317_v24  ;;  %vm12366_vm13 = vmmov %vm12365_vm0 }
  0x9c   :  { %2376 = vrot.lane.b32.xlu2 %v2347_v2, %s6279_s29  ;;  %v2480_v2 = vrot.slane %v2478_v6, 5  ;;  %v2330_v43 = vunpack.c.l.b16 %v1313_v63  ;;  %v2484_v36 = vshrl.u32 %v6128_v19, 16  ;;  %v2495_v6 = vrot.slane %v2493_v39, 4 }
  0x9d   :  { %v2473_v59 = vor.u32 %v2472_v62, %v2469_v5  ;;  %v2351_v38 = vpack.c.b16 %v2334_v9, %v2334_v9  ;;  %v2489_v5 = vrot.slane %v2487_v1, 5  ;;  %v2511_v24 = vshrl.u32 %v6131_v56, 16 }
  0x9e   :  { %v7169_v54 = vor.u32 %v2480_v2, %v2477_v57  ;;  %v2349_v28 = vpack.c.b16 %v2331_v42, %v2330_v43  ;;  %v2520_v2 = vshrl.u32 %v6132_v32, 16  ;;  %v2523_v43 = vshll.u32 %v6132_v32, 16 }
  0x9f   :  { %v2514_v19 = vshll.u32 %v6131_v56, 16  ;;  %v2550_v32 = vshll.u32 %v6135_v58, 16 }
  0xa0   :  { %v2482_v63 = vsel %vm12363_vm6, %v2473_v59, %v7169_v54  ;;  %v2522_v9 = vrot.slane %v2520_v2, 4 }
  0xa1   :  { %2372 = vrot.lane.b32.xlu0 %v2345_v40, %s6279_s29  ;;  %v2502_v40 = vshrl.u32 %v6130_v33, 16  ;;  %v2486_v33 = vrot.slane %v2484_v36, 4  ;;  %v2525_v36 = vrot.slane %v2523_v43, 5 }
  0xa3   :  { %2374 = vrot.lane.b32.xlu1 %v2346_v3, %s6279_s29  ;;  %v2498_v3 = vrot.slane %v2496_v10, 5  ;;  %v2504_v21 = vrot.slane %v2502_v40, 4  ;;  %v7188_v39 = vor.u32 %v2489_v5, %v2486_v33  ;;  %v7193_v40 = vpop.permute.xlu2 %2245  ;;  %v2526_v33 = vor.u32 %v2525_v36, %v2522_v9  ;;  %v6138_v9 = vld [vmem:[%s11783_s0 + $0x64] sm:$0xff] }
  0xa4   :  { %2382 = vrot.lane.b32.xlu2 %v2350_v61, %s6279_s29  ;;  %v6133_v61 = vld [vmem:[%s11783_s0 + $0x3c] sm:$0xff]  ;;  %12364 = vst [vmem:[#allocation26_spill] sm:$0xff] %v7193_v40 }
  0xa5   :  { %v2499_v62 = vor.u32 %v2498_v3, %v2495_v6  ;;  %v2508_v57 = vor.u32 %v2507_v27, %v2504_v21  ;;  %v2529_v42 = vshrl.u32 %v6133_v61, 16  ;;  %v2513_v3 = vrot.slane %v2511_v24, 4  ;;  %v6134_v27 = vld [vmem:[%s11783_s0 + $0x44] sm:$0xff] }
  0xa6   :  { %v2516_v21 = vrot.slane %v2514_v19, 5  ;;  %v7210_v56 = vsel %vm12363_vm6, %v7169_v54, %v7188_v39  ;;  %v2538_v43 = vshrl.u32 %v6134_v27, 16  ;;  %v2552_v24 = vrot.slane %v2550_v32, 5 }
  0xa7   :  { %v7191_v10 = vsel %vm12363_vm6, %v2499_v62, %v2508_v57  ;;  %v2531_v1 = vrot.slane %v2529_v42, 4  ;;  %v7214_v5 = vsel %vm12365_vm0, %v7188_v39, %v2499_v62  ;;  %v2541_v42 = vshll.u32 %v6134_v27, 16  ;;  %v6139_v62 = vld [vmem:[%s11783_s0 + $0x6c] sm:$0xff]  ;;  %vm12370_vm6 = vmmov %vm12365_vm0 }
  0xa8   :  { %v2517_v2 = vor.u32 %v2516_v21, %v2513_v3  ;;  %v2574_v32 = vshrl.u32 %v6138_v9, 16  ;;  %v2586_v15 = vshll.u32 %v6139_v62, 16 }
  0xa9   :  { %2378 = vrot.lane.b32.xlu0 %v2348_v8, %s6279_s29  ;;  %v2532_v8 = vshll.u32 %v6133_v61, 16  ;;  %v2543_v3 = vrot.slane %v2541_v42, 5 }
  0xab   :  { %2380 = vrot.lane.b32.xlu1 %v2349_v28, %s6279_s29  ;;  %v6136_v28 = vld [vmem:[%s11783_s0 + $0x54] sm:$0xff]  ;;  %v2534_v6 = vrot.slane %v2532_v8, 5  ;;  %v7229_v36 = vpop.permute.xlu2 %2251 }
  0xac   :  { %2611 = vrot.lane.b32.xlu2 %v2482_v63, %s6280_s23  ;;  %v2547_v63 = vshrl.u32 %v6135_v58, 16  ;;  %v2556_v61 = vshrl.u32 %v6136_v28, 16  ;;  %12367 = vst [vmem:[#allocation30_spill] sm:$0xff] %v7229_v36 }
  0xae   :  { %v2549_v8 = vrot.slane %v2547_v63, 4  ;;  %v2558_v19 = vrot.slane %v2556_v61, 4  ;;  %v6137_v63 = vld [vmem:[%s11783_s0 + $0x5c] sm:$0xff]  ;;  %v2577_v61 = vshll.u32 %v6138_v9, 16  ;;  %v2588_v9 = vrot.slane %v2586_v15, 5 }
  0xaf   :  { %v2565_v42 = vshrl.u32 %v6137_v63, 16 }
  0xb0   :  { %v2553_v21 = vor.u32 %v2552_v24, %v2549_v8  ;;  %v2568_v8 = vshll.u32 %v6137_v63, 16  ;;  %v2576_v24 = vrot.slane %v2574_v32, 4 }
  0xb1   :  { %2384 = vrot.lane.b32.xlu0 %v2351_v38, %s6279_s29  ;;  %v2559_v38 = vshll.u32 %v6136_v28, 16 }
  0xb2   :  { %v2570_v63 = vrot.slane %v2568_v8, 5 }
  0xb3   :  { %2609 = vrot.lane.b32.xlu1 %v2473_v59, %s6280_s23  ;;  %v2535_v59 = vor.u32 %v2534_v6, %v2531_v1  ;;  %v2561_v58 = vrot.slane %v2559_v38, 5  ;;  %v7232_v1 = vsel %vm12365_vm0, %v2508_v57, %v2517_v2  ;;  %v2540_v6 = vrot.slane %v2538_v43, 4 }
  0xb4   :  { %2617 = vrot.lane.b32.xlu2 %v7191_v10, %s6280_s23  ;;  %v2583_v38 = vshrl.u32 %v6139_v62, 16  ;;  %v7258_v62 = vpop.permute.xlu1 %2239 }
  0xb5   :  { %v7219_v28 = vsel %vm12366_vm13, %v2526_v33, %v2535_v59  ;;  %v2562_v27 = vor.u32 %v2561_v58, %v2558_v19  ;;  %vm12368_vm13 = vmmov %vm12365_vm0  ;;  %v2544_v57 = vor.u32 %v2543_v3, %v2540_v6  ;;  %v2579_v19 = vrot.slane %v2577_v61, 5  ;;  %12372 = vst [vmem:[#allocation42_spill] sm:$0xff] %v7258_v62  ;;  %v6141_v6 = vld [vmem:[%s11783_s0 + $0x7c] sm:$0xff] }
  0xb6   :  { %v7240_v52 = vsel %vm12368_vm13, %v2517_v2, %v2526_v33  ;;  %v2585_v58 = vrot.slane %v2583_v38, 4  ;;  %v2567_v3 = vrot.slane %v2565_v42, 4  ;;  %vm12373_vm13 = vmmov %vm12365_vm0  ;;  %v2601_v38 = vshrl.u32 %v6141_v6, 16 }
  0xb7   :  { %v7247_v43 = vsel %vm12370_vm6, %v2553_v21, %v2562_v27  ;;  %v7252_v33 = vsel %vm12365_vm0, %v2535_v59, %v2544_v57  ;;  %v2580_v15 = vor.u32 %v2579_v19, %v2576_v24  ;;  %v6140_v59 = vld [vmem:[%s11783_s0 + $0x74] sm:$0xff]  ;;  %v7267_v61 = vsel %vm12373_vm13, %v2544_v57, %v2553_v21  ;;  %vm12374_vm6 = vmmov %vm12365_vm0  ;;  %v7276_v24 = vpop.permute.xlu0 %2237 }
  0xb8   :  { %v2589_v32 = vor.u32 %v2588_v9, %v2585_v58  ;;  %v2604_v16 = vshll.u32 %v6141_v6, 16  ;;  %v2571_v35 = vor.u32 %v2570_v63, %v2567_v3  ;;  %v2592_v42 = vshrl.u32 %v6140_v59, 16  ;;  %12375 = vst [vmem:[#allocation43_spill] sm:$0xff] %v7276_v24  ;;  %vm12378_vm13 = vmmov %vm12365_vm0 }
  0xb9   :  { %2613 = vrot.lane.b32.xlu0 %v7210_v56, %s6280_s23  ;;  %v7256_v2 = vpop.permute.xlu2 %2257  ;;  %v2595_v8 = vshll.u32 %v6140_v59, 16  ;;  %v2603_v21 = vrot.slane %v2601_v38, 4  ;;  %v12426_v62 = vmov 0 }
  0xba   :  { %12371 = vst [vmem:[#allocation35_spill] sm:$0xff] %v7256_v2  ;;  %v7272_v49 = vsel %vm12374_vm6, %v2580_v15, %v2589_v32  ;;  %v2606_v57 = vrot.slane %v2604_v16, 5  ;;  %v7281_v19 = vsel %vm12365_vm0, %v2562_v27, %v2571_v35  ;;  %v2594_v58 = vrot.slane %v2592_v42, 4  ;;  %vm12380_vm6 = vmmov %vm12365_vm0 }
  0xbb   :  { %2615 = vrot.lane.b32.xlu1 %v7214_v5, %s6280_s23  ;;  %v2597_v9 = vrot.slane %v2595_v8, 5  ;;  %v7288_v63 = vsel %vm12378_vm13, %v2571_v35, %v2580_v15 }
  0xbc   :  { %2623 = vrot.lane.b32.xlu2 %v7219_v28, %s6280_s23  ;;  %v7285_v3 = vpop.permute.xlu1 %2241  ;;  %v2607_v59 = vor.u32 %v2606_v57, %v2603_v21 }
  0xbd   :  { %12377 = vst [vmem:[#allocation45_spill] sm:$0xff] %v7285_v3  ;;  %v2598_v37 = vor.u32 %v2597_v9, %v2594_v58  ;;  %v6142_v9 = vld [vmem:[%s11783_s0 + $0x84] sm:$0xff] }
  0xbf   :  { %v7294_v16 = vpop.permute.xlu0 %2247  ;;  %v7298_v27 = vsel %vm12380_vm6, %v2589_v32, %v2598_v37  ;;  %v7303_v35 = vsel %vm12365_vm0, %v2598_v37, %v2607_v59 }
  0xc0   :  { %12379 = vst [vmem:[#allocation46_spill] sm:$0xff] %v7294_v16 }
  0xc1   :  { %2619 = vrot.lane.b32.xlu0 %v7232_v1, %s6280_s23 }
  0xc3   :  { %2621 = vrot.lane.b32.xlu1 %v7240_v52, %s6280_s23 }
  0xc4   :  { %2629 = vrot.lane.b32.xlu2 %v7247_v43, %s6280_s23  ;;  %v7307_v15 = vpop.permute.xlu1 %2249 }
  0xc5   :  { %12382 = vst [vmem:[#allocation48_spill] sm:$0xff] %v7307_v15 }
  0xc8   :  { %v7313_v42 = vpop.permute.xlu0 %2253 }
  0xc9   :  { %2625 = vrot.lane.b32.xlu0 %v7252_v33, %s6280_s23  ;;  %12383 = vst [vmem:[#allocation49_spill] sm:$0xff] %v7313_v42 }
  0xcb   :  { %2627 = vrot.lane.b32.xlu1 %v7267_v61, %s6280_s23 }
  0xcc   :  { %2635 = vrot.lane.b32.xlu2 %v7272_v49, %s6280_s23 }
  0xce   :  { %v7283_v6 = vpop.permute.xlu2 %2263 }
  0xcf   :  { %12376 = vst [vmem:[#allocation44_spill] sm:$0xff] %v7283_v6 }
  0xd1   :  { %2631 = vrot.lane.b32.xlu0 %v7281_v19, %s6280_s23 }
  0xd3   :  { %2633 = vrot.lane.b32.xlu1 %v7288_v63, %s6280_s23 }
  0xd4   :  { %2641 = vrot.lane.b32.xlu2 %v2607_v59, %s6280_s23 }
  0xd6   :  { %v7300_v38 = vpop.permute.xlu2 %2352 }
  0xd7   :  { %12381 = vst [vmem:[#allocation47_spill] sm:$0xff] %v7300_v38  ;;  %v7321_v37 = vpop.permute.xlu1 %2255 }
  0xd8   :  { %12385 = vst [vmem:[#allocation51_spill] sm:$0xff] %v7321_v37 }
  0xd9   :  { %2637 = vrot.lane.b32.xlu0 %v7298_v27, %s6280_s23 }
  0xdb   :  { %2639 = vrot.lane.b32.xlu1 %v7303_v35, %s6280_s23 }
  0xdc   :  { %2661 = vrot.lane.b32.xlu2 %v7214_v5, %s6281_s15 }
  0xde   :  { %v7315_v32 = vpop.permute.xlu2 %2358  ;;  %v7329_v21 = vpop.permute.xlu0 %2259 }
  0xdf   :  { %12384 = vst [vmem:[#allocation50_spill] sm:$0xff] %v7315_v32 }
  0xe0   :  { %12387 = vst [vmem:[#allocation53_spill] sm:$0xff] %v7329_v21 }
  0xe1   :  { %2657 = vrot.lane.b32.xlu0 %v7169_v54, %s6281_s15 }
  0xe3   :  { %2659 = vrot.lane.b32.xlu1 %v7210_v56, %s6281_s15 }
  0xe4   :  { %2667 = vrot.lane.b32.xlu2 %v7240_v52, %s6281_s15 }
  0xe6   :  { %v7325_v8 = vpop.permute.xlu2 %2364 }
  0xe7   :  { %12386 = vst [vmem:[#allocation52_spill] sm:$0xff] %v7325_v8  ;;  %v2652_v8 = vshll.u32 %v6142_v9, 16 }
  0xe9   :  { %2663 = vrot.lane.b32.xlu0 %v7191_v10, %s6281_s15  ;;  %v2654_v32 = vrot.slane %v2652_v8, 5 }
  0xeb   :  { %2665 = vrot.lane.b32.xlu1 %v7232_v1, %s6281_s15 }
  0xec   :  { %2673 = vrot.lane.b32.xlu2 %v7267_v61, %s6281_s15 }
  0xed   :  { %v7333_v57 = vpop.permute.xlu1 %2261 }
  0xee   :  { %12388 = vst [vmem:[#allocation54_spill] sm:$0xff] %v7333_v57  ;;  %v7337_v54 = vpop.permute.xlu2 %2370 }
  0xef   :  { %12389 = vst [vmem:[#allocation55_spill] sm:$0xff] %v7337_v54  ;;  %v2649_v54 = vshrl.u32 %v6142_v9, 16 }
  0xf1   :  { %2669 = vrot.lane.b32.xlu0 %v7219_v28, %s6281_s15  ;;  %v2651_v21 = vrot.slane %v2649_v54, 4 }
  0xf3   :  { %v7341_v56 = vpop.permute.xlu0 %2265  ;;  %2671 = vrot.lane.b32.xlu1 %v7252_v33, %s6281_s15 }
  0xf4   :  { %12390 = vst [vmem:[#allocation56_spill] sm:$0xff] %v7341_v56  ;;  %2679 = vrot.lane.b32.xlu2 %v7288_v63, %s6281_s15 }
  0xf5   :  { %v7345_v58 = vpop.permute.xlu1 %2267 }
  0xf6   :  { %12391 = vst [vmem:[#allocation57_spill] sm:$0xff] %v7345_v58  ;;  %v7352_v57 = vpop.permute.xlu2 %2376 }
  0xf7   :  { %12392 = vst [vmem:[#allocation58_spill] sm:$0xff] %v7352_v57  ;;  %v12396_v57 = vld [vmem:[#allocation2_spill] sm:$0xff] }
  0xf8   :  { %v19_v38 = vadd.s32 8, %v12396_v57  ;;  %v21_v9 = vadd.s32 24, %v12396_v57  ;;  %v47_v6 = vadd.s32 232, %v12396_v57  ;;  %v41_v11 = vadd.s32 184, %v12396_v57 }
  0xf9   :  { %2675 = vrot.lane.b32.xlu0 %v7247_v43, %s6281_s15 }
  0xfa   :  { %v61_v54 = vand.u32 15, %v19_v38  ;;  %v75_v8 = vand.u32 15, %v21_v9  ;;  %v12402_v38 = vmov 0  }
  0xfb   :  { %v7356_v56 = vpop.permute.xlu0 %2354  ;;  %2677 = vrot.lane.b32.xlu1 %v7281_v19, %s6281_s15 }
  0xfc   :  { %12393 = vst [vmem:[#allocation59_spill] sm:$0xff] %v7356_v56  ;;  %2685 = vrot.lane.b32.xlu2 %v7303_v35, %s6281_s15  ;;  %v7370_v56 = vor.u32 %v2654_v32, %v2651_v21  ;;  %vm467_vm13 = vcmp.ne.s32.totalorder %v61_v54, 15  ;;  %vm469_vm6 = vcmp.ne.s32.totalorder %v75_v8, 15  ;;  %v49_v8 = vadd.s32 248, %v12396_v57 }
  0xfd   :  { %v7360_v58 = vpop.permute.xlu1 %2356  ;;  %vm1384_vm10 = vmpackc.low %vm467_vm13, %vm467_vm13 }
  0xfe   :  { %12394 = vst [vmem:[#allocation60_spill] sm:$0xff] %v7360_v58  ;;  %v7364_v37 = vpop.permute.xlu2 %2382  ;;  %v7385_v15 = vsel %vm12365_vm0, %v2607_v59, %v7370_v56  ;;  %v1416_v9 = vsel %vm1384_vm10, 65537, %v12402_v38  ;;  %vm1386_vm1 = vmpackc.low %vm469_vm6, %vm469_vm6 }
  0xff   :  { %12395 = vst [vmem:[#allocation61_spill] sm:$0xff] %v7364_v37  ;;  %v12399_v37 = vld [vmem:[#allocation3_spill] sm:$0xff]  ;;  %v1418_v54 = vsel %vm1386_vm1, 65537, %v12402_v38  ;;  %v1462_v18 = vshll.u32 %v1416_v9, 16  ;;  %vm7401_vm13 = vmor %vm1447_vm8, %vm1448_vm15 }
 0x100   :  { %v12400_v32 = vshrl.u32 %v12399_v37, 16  ;;  %v1477_v59 = vshrl.u32 %v1418_v54, 16  ;;  %v1480_v2 = vshll.u32 %v1418_v54, 16  ;;  %v12407_v31 = vshll.u32 %v12399_v37, 16 }
 0x101   :  { %2681 = vrot.lane.b32.xlu0 %v7272_v49, %s6281_s15  ;;  %v271_v54 = vand.u32 15, %v49_v8 }
 0x102   :  { %v1453_v21 = vrot.slane %v12400_v32, 7 }
 0x103   :  { %v7373_v42 = vpop.permute.xlu0 %2360  ;;  %2683 = vrot.lane.b32.xlu1 %v7298_v27, %s6281_s15  ;;  %vm7445_vm6 = vcmp.ne.s32.totalorder %v271_v54, 15 }
 0x104   :  { %12397 = vst [vmem:[#allocation2_spill] sm:$0xff] %v7373_v42  ;;  %2705 = vrot.lane.b32.xlu2 %v7188_v39, %s6282_s18  ;;  %v257_v42 = vand.u32 15, %v47_v6  ;;  %v1459_v39 = vshrl.u32 %v1416_v9, 16  ;;  %v7395_v6 = vrot.slane %v1453_v21, 4  ;;  %v7407_v3 = vor.u32 %v1453_v21, %v12407_v31  ;;  %vm12436_vm9 = vmpackc.low %vm7445_vm6, %vm7445_vm6 }
 0x105   :  { %v7377_v58 = vpop.permute.xlu1 %2362 }
 0x106   :  { %12398 = vst [vmem:[#allocation62_spill] sm:$0xff] %v7377_v58  ;;  %v7387_v16 = vpop.permute.xlu2 %2611  ;;  %v23_v58 = vadd.s32 40, %v12396_v57  ;;  %vm7397_vm10 = vcmp.ne.s32.totalorder %v257_v42, 15  ;;  %v1737_v8 = vunpack.c.l.b16 %v7407_v3 }
 0x107   :  { %12401 = vst [vmem:[#allocation3_spill] sm:$0xff] %v7387_v16  ;;  %v1461_v16 = vrot.slane %v1459_v39, 7  ;;  %v25_v39 = vadd.s32 56, %v12396_v57  ;;  %vm1412_vm15 = vmpackc.low %vm7397_vm10, %vm7397_vm10 }
 0x108   :  { %v89_v32 = vand.u32 15, %v23_v58  ;;  %v1479_v58 = vrot.slane %v1477_v59, 7  ;;  %vm1741_vm0 = vcmp.ne.s32.totalorder %v1737_v8, %v6337_v25 }
 0x109   :  { %2687 = vrot.lane.b32.xlu0 %v7385_v15, %s6281_s15  ;;  %v1464_v42 = vor.u32 %v1462_v18, %v1461_v16  ;;  %v1466_v31 = vrot.slane %v1461_v16, 4  ;;  %v103_v9 = vand.u32 15, %v25_v39  ;;  %v12415_v39 = vmov 0 }
 0x10a   :  { %vm7413_vm1 = vcmp.ne.s32.totalorder %v89_v32, 15  ;;  %v1482_v37 = vor.u32 %v1480_v2, %v1479_v58 }
 0x10b   :  { %v7409_v24 = vpop.permute.xlu0 %2366  ;;  %2689 = vrot.lane.b32.xlu1 %v7370_v56, %s6281_s15  ;;  %vm1388_vm8 = vmpackc.low %vm7413_vm1, %vm7413_vm1  ;;  %v1465_v18 = vsel %vm7401_vm13, %v7395_v6, %v1464_v42  ;;  %v1474_v59 = vsel %vm7401_vm13, %v1466_v31, %v7407_v3  ;;  %v7443_v42 = vsel %vm1412_vm15, 65537, %v12402_v38  ;;  %v6143_v31 = vld [vmem:[%s11783_s0 + $0x8c] sm:$0xff] }
 0x10c   :  { %12408 = vst [vmem:[#allocation63_spill] sm:$0xff] %v7409_v24  ;;  %2711 = vrot.lane.b32.xlu2 %v7232_v1, %s6282_s18  ;;  %v1738_v1 = vunpack.c.h.b16 %v7407_v3  ;;  %v1744_v16 = vunpack.c.l.b16 %v1465_v18  ;;  %v1745_v2 = vunpack.c.h.b16 %v1465_v18  ;;  %v1483_v50 = vsel %vm7401_vm13, %v7395_v6, %v1482_v37 }
 0x10d   :  { %v7418_v12 = vpop.permute.xlu1 %2368  ;;  %v1420_v32 = vsel %vm1388_vm8, 65537, %v12402_v38  ;;  %v1751_v37 = vunpack.c.l.b16 %v1474_v59  ;;  %v1752_v18 = vunpack.c.h.b16 %v1474_v59  ;;  %v1758_v8 = vunpack.c.l.b16 %v1483_v50 }
 0x10e   :  { %12411 = vst [vmem:[#allocation64_spill] sm:$0xff] %v7418_v12  ;;  %v7431_v21 = vpop.permute.xlu2 %2617  ;;  %vm1742_vm10 = vcmp.ne.s32.totalorder %v1738_v1, %v6340_v26  ;;  %vm7461_vm8 = vcmp.ne.s32.totalorder %v1744_v16, %v6337_v25  ;;  %vm7466_vm15 = vcmp.ne.s32.totalorder %v1745_v2, %v6340_v26  ;;  %v1759_v1 = vunpack.c.h.b16 %v1483_v50  ;;  %v500_v2 = vld [vmem:[%s11783_s0 + $0x4] sm:$0xf] }
 0x10f   :  { %12412 = vst [vmem:[#allocation65_spill] sm:$0xff] %v7431_v21  ;;  %vm7456_vm1 = vmpackc.low %vm1742_vm10, %vm1741_vm0  ;;  %v1484_v24 = vrot.slane %v1479_v58, 4  ;;  %v1495_v20 = vshrl.u32 %v1420_v32, 16  ;;  %v1711_v16 = vshrl.u32 %v7443_v42, 16  ;;  %vm7481_vm10 = vcmp.ne.s32.totalorder %v103_v9, 15 }
 0x110   :  { %v12416_v39 = vsel %vm7456_vm1, 4294967295, %v12415_v39  ;;  %v2697_v58 = vshrl.u32 %v6143_v31, 16  ;;  %v2700_v50 = vshll.u32 %v6143_v31, 16  ;;  %vm7494_vm0 = vmpackc.low %vm7466_vm15, %vm7461_vm8  ;;  %v1968_v9 = vsel %vm7456_vm1, %v500_v2, 0  ;;  %v501_v2 = vld [vmem:[%s11783_s0 + $0x8] sm:$0xf] }
 0x111   :  { %2707 = vrot.lane.b32.xlu0 %v7214_v5, %s6282_s18  ;;  %12417 = vst [vmem:[#allocation66_spill] sm:$0xff] %v12416_v39  ;;  %v12427_v62 = vsel %vm7494_vm0, 4294967295, %v12426_v62  ;;  %vm7501_vm2 = vcmp.ne.s32.totalorder %v1751_v37, %v6337_v25  ;;  %vm7506_vm11 = vcmp.ne.s32.totalorder %v1752_v18, %v6340_v26  ;;  %v1492_v31 = vsel %vm7401_vm13, %v1484_v24, %v7407_v3  ;;  %vm1390_vm4 = vmpackc.low %vm7481_vm10, %vm7481_vm10 }
 0x112   :  { %12428 = vst [vmem:[#allocation69_spill] sm:$0xff] %v12427_v62  ;;  %v1497_v54 = vrot.slane %v1495_v20, 7  ;;  %v1498_v5 = vshll.u32 %v1420_v32, 16  ;;  %vm7519_vm8 = vcmp.ne.s32.totalorder %v1758_v8, %v6337_v25  ;;  %vm1763_vm15 = vcmp.ne.s32.totalorder %v1759_v1, %v6340_v26  ;;  %vm7543_vm10 = vmpackc.low %vm7506_vm11, %vm7501_vm2 }
 0x113   :  { %v7470_v12 = vpop.permute.xlu0 %2372  ;;  %2709 = vrot.lane.b32.xlu1 %v7191_v10, %s6282_s18  ;;  %v27_v10 = vadd.s32 72, %v12396_v57  ;;  %v1765_v18 = vunpack.c.l.b16 %v1492_v31  ;;  %v1766_v45 = vunpack.c.h.b16 %v1492_v31  ;;  %v7533_v20 = vsel %vm12436_vm9, 65537, %v12402_v38  ;;  %vm7554_vm6 = vmpackc.low %vm1763_vm15, %vm7519_vm8 }
 0x114   :  { %12422 = vst [vmem:[#allocation67_spill] sm:$0xff] %v7470_v12  ;;  %2717 = vrot.lane.b32.xlu2 %v7252_v33, %s6282_s18  ;;  %v1969_v24 = vsel %vm7494_vm0, %v501_v2, 0  ;;  %v1500_v32 = vor.u32 %v1498_v5, %v1497_v54  ;;  %v2699_v1 = vrot.slane %v2697_v58, 4  ;;  %v2702_v59 = vrot.slane %v2700_v50, 5 }
 0x115   :  { %v7486_v12 = vpop.permute.xlu1 %2374  ;;  %v117_v8 = vand.u32 15, %v27_v10  ;;  %v2772_v31 = vunpack.c.l.b16 %v1968_v9  ;;  %v12437_v21 = vmov 0  ;;  %vm7548_vm9 = vcmp.ne.s32.totalorder %v1765_v18, %v6337_v25 }
 0x116   :  { %12425 = vst [vmem:[#allocation68_spill] sm:$0xff] %v7486_v12  ;;  %v7516_v12 = vpop.permute.xlu2 %2623  ;;  %v12438_v21 = vsel %vm7543_vm10, 4294967295, %v12437_v21  ;;  %v1501_v7 = vsel %vm7401_vm13, %v7395_v6, %v1500_v32  ;;  %vm7562_vm2 = vcmp.ne.s32.totalorder %v1766_v45, %v6340_v26  ;;  %v1422_v58 = vsel %vm1390_vm4, 65537, %v12402_v38 }
 0x117   :  { %12433 = vst [vmem:[#allocation70_spill] sm:$0xff] %v7516_v12  ;;  %v1502_v50 = vrot.slane %v1497_v54, 4  ;;  %v2773_v33 = vunpack.c.l.b16 %v1969_v24  ;;  %v1772_v5 = vunpack.c.l.b16 %v1501_v7  ;;  %v1773_v2 = vunpack.c.h.b16 %v1501_v7  ;;  %v7592_v54 = vld [vmem:[%s11783_s0 + $0x10] sm:$0xf]  ;;  %vm7601_vm4 = vmpackc.low %vm7562_vm2, %vm7548_vm9 }
 0x118   :  { %12439 = vst [vmem:[#allocation71_spill] sm:$0xff] %v12438_v21  ;;  %v1513_v37 = vshrl.u32 %v1422_v58, 16  ;;  %v7571_v18 = vrot.slane %v1711_v16, 7  ;;  %v1516_v4 = vshll.u32 %v1422_v58, 16  ;;  %v1971_v24 = vsel %vm7554_vm6, %v7592_v54, 0 }
 0x119   :  { %2713 = vrot.lane.b32.xlu0 %v7240_v52, %s6282_s18  ;;  %v12442_v52 = vmov 0  ;;  %v1510_v45 = vsel %vm7401_vm13, %v1502_v50, %v7407_v3  ;;  %vm1776_vm11 = vcmp.ne.s32.totalorder %v1772_v5, %v6337_v25  ;;  %vm1777_vm8 = vcmp.ne.s32.totalorder %v1773_v2, %v6340_v26  ;;  %v7620_v2 = vld [vmem:[%s11783_s0 + $0x14] sm:$0xf] }
 0x11a   :  { %v12443_v52 = vsel %vm7554_vm6, 4294967295, %v12442_v52  ;;  %v1515_v50 = vrot.slane %v1513_v37, 7  ;;  %v1779_v32 = vunpack.c.l.b16 %v1510_v45  ;;  %v2805_v12 = vpack.c.b16 %v2773_v33, %v2772_v31  ;;  %vm7613_vm15 = vmpackc.low %vm1777_vm8, %vm1776_vm11 }
 0x11b   :  { %12444 = vst [vmem:[#allocation72_spill] sm:$0xff] %v12443_v52  ;;  %v7567_v9 = vpop.permute.xlu0 %2378  ;;  %2715 = vrot.lane.b32.xlu1 %v7219_v28, %s6282_s18  ;;  %v7584_v28 = vld [vmem:[%s11783_s0 + $0xc] sm:$0xf]  ;;  %v12453_v10 = vmov 0  ;;  %v1780_v44 = vunpack.c.h.b16 %v1510_v45  ;;  %vm475_vm9 = vcmp.ne.s32.totalorder %v117_v8, 15  ;;  %v2775_v17 = vunpack.c.l.b16 %v1971_v24 }
 0x11c   :  { %12447 = vst [vmem:[#allocation73_spill] sm:$0xff] %v7567_v9  ;;  %2723 = vrot.lane.b32.xlu2 %v7281_v19, %s6282_s18  ;;  %v1970_v16 = vsel %vm7543_vm10, %v7584_v28, 0  ;;  %v12449_v19 = vmov 0  ;;  %v7611_v9 = vor.u32 %v2702_v59, %v2699_v1  ;;  %v12454_v10 = vsel %vm7613_vm15, 4294967295, %v12453_v10  ;;  %vm1392_vm2 = vmpackc.low %vm475_vm9, %vm475_vm9 }
 0x11d   :  { %v7577_v53 = vpop.permute.xlu1 %2380  ;;  %v12450_v19 = vsel %vm7601_vm4, 4294967295, %v12449_v19  ;;  %12455 = vst [vmem:[#allocation77_spill] sm:$0xff] %v12454_v10  ;;  %v2774_v5 = vunpack.c.l.b16 %v1970_v16  ;;  %v1972_v37 = vsel %vm7601_vm4, %v7620_v2, 0  ;;  %v1518_v1 = vor.u32 %v1516_v4, %v1515_v50 }
 0x11e   :  { %12448 = vst [vmem:[#allocation74_spill] sm:$0xff] %v7577_v53  ;;  %v7609_v53 = vpop.permute.xlu2 %2629  ;;  %vm7628_vm11 = vcmp.ne.s32.totalorder %v1779_v32, %v6337_v25  ;;  %vm7633_vm8 = vcmp.ne.s32.totalorder %v1780_v44, %v6340_v26  ;;  %v1424_v31 = vsel %vm1392_vm2, 65537, %v12402_v38  ;;  %v1520_v33 = vrot.slane %v1515_v50, 4  ;;  %v7649_v44 = vld [vmem:[%s11783_s0 + $0x18] sm:$0xf] }
 0x11f   :  { %12451 = vst [vmem:[#allocation75_spill] sm:$0xff] %v12450_v19  ;;  %v1519_v4 = vsel %vm7401_vm13, %v7395_v6, %v1518_v1  ;;  %v1531_v45 = vshrl.u32 %v1424_v31, 16  ;;  %v1534_v16 = vshll.u32 %v1424_v31, 16  ;;  %v1973_v24 = vsel %vm7613_vm15, %v7649_v44, 0  ;;  %vm7670_vm2 = vmpackc.low %vm7633_vm8, %vm7628_vm11 }
 0x120   :  { %12452 = vst [vmem:[#allocation76_spill] sm:$0xff] %v7609_v53  ;;  %v1786_v50 = vunpack.c.l.b16 %v1519_v4  ;;  %v1787_v1 = vunpack.c.h.b16 %v1519_v4  ;;  %v1528_v31 = vsel %vm7401_vm13, %v1520_v33, %v7407_v3  ;;  %vm12461_vm9 = vsmask.f32 3328 }
 0x121   :  { %2719 = vrot.lane.b32.xlu0 %v7267_v61, %s6282_s18  ;;  %v29_v61 = vadd.s32 88, %v12396_v57  ;;  %v2704_v58 = vsel %vm12461_vm9, %v7370_v56, %v7611_v9  ;;  %v2806_v7 = vpack.c.b16 %v2775_v17, %v2774_v5  ;;  %v1533_v53 = vrot.slane %v1531_v45, 7 }
 0x122   :  { %v12463_v4 = vmov 0  ;;  %vm1790_vm5 = vcmp.ne.s32.totalorder %v1786_v50, %v6337_v25  ;;  %vm1791_vm9 = vcmp.ne.s32.totalorder %v1787_v1, %v6340_v26  ;;  %v1793_v56 = vunpack.c.l.b16 %v1528_v31 }
 0x123   :  { %v7642_v32 = vpop.permute.xlu0 %2384  ;;  %2721 = vrot.lane.b32.xlu1 %v7247_v43, %s6282_s18  ;;  %v7660_v43 = vrot.slane %v2805_v12, 5  ;;  %v12464_v4 = vsel %vm7670_vm2, 4294967295, %v12463_v4  ;;  %v1794_v17 = vunpack.c.h.b16 %v1528_v31  ;;  %v2776_v12 = vunpack.c.l.b16 %v1972_v37  ;;  %vm7676_vm7 = vmpackc.low %vm1791_vm9, %vm1790_vm5  ;;  %v7689_v37 = vld [vmem:[%s11783_s0 + $0x1c] sm:$0xf] }
 0x124   :  { %12460 = vst [vmem:[#allocation78_spill] sm:$0xff] %v7642_v32  ;;  %2729 = vrot.lane.b32.xlu2 %v7298_v27, %s6282_s18  ;;  %v2777_v5 = vunpack.c.l.b16 %v1973_v24  ;;  %v12466_v33 = vmov 0  ;;  %v1536_v27 = vor.u32 %v1534_v16, %v1533_v53  ;;  %v131_v59 = vand.u32 15, %v29_v61 }
 0x125   :  { %v7662_v32 = vpop.permute.xlu1 %2609  ;;  %12465 = vst [vmem:[#allocation80_spill] sm:$0xff] %v12464_v4  ;;  %v12467_v33 = vsel %vm7676_vm7, 4294967295, %v12466_v33  ;;  %vm1797_vm8 = vcmp.ne.s32.totalorder %v1793_v56, %v6337_v25  ;;  %vm1798_vm14 = vcmp.ne.s32.totalorder %v1794_v17, %v6340_v26  ;;  %v1538_v8 = vrot.slane %v1533_v53, 4  ;;  %v7706_v53 = vld [vmem:[%s11783_s0 + $0x20] sm:$0xf] }
 0x126   :  { %12462 = vst [vmem:[#allocation79_spill] sm:$0xff] %v7662_v32  ;;  %v7680_v45 = vpop.permute.xlu2 %2635  ;;  %v7684_v50 = vrot.slane %v2806_v7, 5  ;;  %v1974_v16 = vsel %vm7670_vm2, %v7689_v37, 0  ;;  %v1537_v61 = vsel %vm7401_vm13, %v7395_v6, %v1536_v27  ;;  %vm7697_vm5 = vmpackc.low %vm1798_vm14, %vm1797_vm8  ;;  %v12470_v24 = vmov 0 }
 0x127   :  { %12468 = vst [vmem:[#allocation81_spill] sm:$0xff] %v12467_v33  ;;  %v12471_v24 = vsel %vm7697_vm5, 4294967295, %v12470_v24  ;;  %vm477_vm9 = vcmp.ne.s32.totalorder %v131_v59, 15  ;;  %v1975_v7 = vsel %vm7676_vm7, %v7706_v53, 0  ;;  %v1800_v1 = vunpack.c.l.b16 %v1537_v61 }
 0x128   :  { %12469 = vst [vmem:[#allocation82_spill] sm:$0xff] %v7680_v45  ;;  %v1801_v31 = vunpack.c.h.b16 %v1537_v61  ;;  %vm1394_vm11 = vmpackc.low %vm477_vm9, %vm477_vm9  ;;  %v1546_v56 = vsel %vm7401_vm13, %v1538_v8, %v7407_v3  ;;  %v2807_v17 = vpack.c.b16 %v2777_v5, %v2776_v12  ;;  %v2778_v8 = vunpack.c.l.b16 %v1974_v16 }
 0x129   :  { %12472 = vst [vmem:[#allocation83_spill] sm:$0xff] %v12471_v24  ;;  %2725 = vrot.lane.b32.xlu0 %v7288_v63, %s6282_s18  ;;  %v7717_v63 = vld [vmem:[%s11783_s0 + $0x24] sm:$0xf]  ;;  %v1426_v59 = vsel %vm1394_vm11, 65537, %v12402_v38  ;;  %v1807_v45 = vunpack.c.l.b16 %v1546_v56  ;;  %vm1804_vm14 = vcmp.ne.s32.totalorder %v1800_v1, %v6337_v25  ;;  %v2779_v61 = vunpack.c.l.b16 %v1975_v7 }
 0x12a   :  { %v1976_v27 = vsel %vm7697_vm5, %v7717_v63, 0  ;;  %vm1805_vm8 = vcmp.ne.s32.totalorder %v1801_v31, %v6340_v26  ;;  %v1549_v12 = vshrl.u32 %v1426_v59, 16  ;;  %v1552_v5 = vshll.u32 %v1426_v59, 16 }
 0x12b   :  { %v7723_v32 = vpop.permute.xlu0 %2613  ;;  %2727 = vrot.lane.b32.xlu1 %v7272_v49, %s6282_s18  ;;  %vm7729_vm9 = vmpackc.low %vm1805_vm8, %vm1804_vm14  ;;  %v1808_v34 = vunpack.c.h.b16 %v1546_v56  ;;  %vm1811_vm11 = vcmp.ne.s32.totalorder %v1807_v45, %v6337_v25  ;;  %v7740_v49 = vld [vmem:[%s11783_s0 + $0x28] sm:$0xf]  ;;  %v31_v1 = vadd.s32 104, %v12396_v57  ;;  %v33_v31 = vadd.s32 120, %v12396_v57 }
 0x12c   :  { %12473 = vst [vmem:[#allocation84_spill] sm:$0xff] %v7723_v32  ;;  %v12475_v30 = vsel %vm7729_vm9, 4294967295, %v12474_v30  ;;  %2735 = vrot.lane.b32.xlu2 %v2704_v58, %s6282_s18  ;;  %v1977_v16 = vsel %vm7729_vm9, %v7740_v49, 0  ;;  %v1551_v7 = vrot.slane %v1549_v12, 7  ;;  %v12478_v45 = vshrl.u32 %v7533_v20, 16 }
 0x12d   :  { %12476 = vst [vmem:[#allocation85_spill] sm:$0xff] %v12475_v30  ;;  %v7734_v60 = vpop.permute.xlu1 %2615  ;;  %v2780_v59 = vunpack.c.l.b16 %v1976_v27  ;;  %v2781_v58 = vunpack.c.l.b16 %v1977_v16  ;;  %vm1812_vm14 = vcmp.ne.s32.totalorder %v1808_v34, %v6340_v26  ;;  %v145_v12 = vand.u32 15, %v31_v1 }
 0x12e   :  { %12477 = vst [vmem:[#allocation86_spill] sm:$0xff] %v7734_v60  ;;  %v7749_v56 = vrot.slane %v12478_v45, 7  ;;  %v7752_v60 = vpop.permute.xlu2 %2641  ;;  %v1554_v32 = vor.u32 %v1552_v5, %v1551_v7  ;;  %vm7754_vm8 = vmpackc.low %vm1812_vm14, %vm1811_vm11  ;;  %v1556_v36 = vrot.slane %v1551_v7, 4  ;;  %v159_v40 = vand.u32 15, %v33_v31  ;;  %v7770_v5 = vld [vmem:[%s11783_s0 + $0x2c] sm:$0xf] }
 0x12f   :  { %12479 = vst [vmem:[#allocation87_spill] sm:$0xff] %v7752_v60  ;;  %v12481_v22 = vsel %vm7754_vm8, 4294967295, %v12480_v22  ;;  %v2825_v55 = vsel %vm12483_vm12, %v7660_v43, %v7684_v50  ;;  %v2826_v45 = vrot.slane %v2807_v17, 5  ;;  %v2808_v47 = vpack.c.b16 %v2779_v61, %v2778_v8  ;;  %v7806_v60 = vld [vmem:[%s11783_s0 + $0x30] sm:$0xf] }
 0x130   :  { %12482 = vst [vmem:[#allocation88_spill] sm:$0xff] %v12481_v22  ;;  %v35_v27 = vadd.s32 136, %v12396_v57  ;;  %v1555_v34 = vsel %vm7401_vm13, %v7395_v6, %v1554_v32  ;;  %v1978_v16 = vsel %vm7754_vm8, %v7770_v5, 0  ;;  %vm479_vm12 = vcmp.ne.s32.totalorder %v145_v12, 15 }
 0x131   :  { %2731 = vrot.lane.b32.xlu0 %v7303_v35, %s6282_s18  ;;  %v1564_v17 = vsel %vm7401_vm13, %v1556_v36, %v7407_v3  ;;  %v2809_v8 = vpack.c.b16 %v2781_v58, %v2780_v59  ;;  %v1814_v35 = vunpack.c.l.b16 %v1555_v34  ;;  %v1815_v61 = vunpack.c.h.b16 %v1555_v34  ;;  %vm1396_vm11 = vmpackc.low %vm479_vm12, %vm479_vm12 }
 0x132   :  { %v1821_v7 = vunpack.c.l.b16 %v1564_v17  ;;  %v1428_v1 = vsel %vm1396_vm11, 65537, %v12402_v38  ;;  %v1822_v31 = vunpack.c.h.b16 %v1564_v17  ;;  %vm7783_vm14 = vcmp.ne.s32.totalorder %v159_v40, 15 }
 0x133   :  { %v7778_v32 = vpop.permute.xlu0 %2619  ;;  %2733 = vrot.lane.b32.xlu1 %v7385_v15, %s6282_s18  ;;  %v173_v12 = vand.u32 15, %v35_v27  ;;  %v2828_v41 = vrot.slane %v2808_v47, 5  ;;  %vm1818_vm3 = vcmp.ne.s32.totalorder %v1814_v35, %v6337_v25  ;;  %vm1819_vm8 = vcmp.ne.s32.totalorder %v1815_v61, %v6340_v26  ;;  %vm1398_vm12 = vmpackc.low %vm7783_vm14, %vm7783_vm14  ;;  %v7823_v35 = vld [vmem:[%s11783_s0 + $0x34] sm:$0xf] }
 0x134   :  { %12484 = vst [vmem:[#allocation89_spill] sm:$0xff] %v7778_v32  ;;  %v2782_v36 = vunpack.c.l.b16 %v1978_v16  ;;  %2858 = vrot.lane.b32.xlu2 %v2825_v55, %s6283_s21  ;;  %vm7795_vm11 = vmpackc.low %vm1819_vm8, %vm1818_vm3  ;;  %v12488_v40 = vmov 0  ;;  %v1567_v15 = vshrl.u32 %v1428_v1, 16  ;;  %v1570_v47 = vshll.u32 %v1428_v1, 16 }
 0x135   :  { %v7792_v59 = vpop.permute.xlu1 %2621  ;;  %v12489_v40 = vsel %vm7795_vm11, 4294967295, %v12488_v40  ;;  %vm1825_vm9 = vcmp.ne.s32.totalorder %v1821_v7, %v6337_v25  ;;  %vm1826_vm5 = vcmp.ne.s32.totalorder %v1822_v31, %v6340_v26  ;;  %v7801_v58 = vrot.slane %v2809_v8, 5 }
 0x136   :  { %12487 = vst [vmem:[#allocation90_spill] sm:$0xff] %v7792_v59  ;;  %v1979_v55 = vsel %vm7795_vm11, %v7806_v60, 0  ;;  %vm7811_vm3 = vmpackc.low %vm1826_vm5, %vm1825_vm9  ;;  %v12491_v27 = vmov 0  ;;  %v1430_v34 = vsel %vm1398_vm12, 65537, %v12402_v38  ;;  %vm7816_vm8 = vcmp.ne.s32.totalorder %v173_v12, 15 }
 0x137   :  { %12490 = vst [vmem:[#allocation91_spill] sm:$0xff] %v12489_v40  ;;  %v12492_v27 = vsel %vm7811_vm3, 4294967295, %v12491_v27  ;;  %v2783_v17 = vunpack.c.l.b16 %v1979_v55  ;;  %v1569_v8 = vrot.slane %v1567_v15, 7  ;;  %v1980_v61 = vsel %vm7811_vm3, %v7823_v35, 0  ;;  %vm1400_vm5 = vmpackc.low %vm7816_vm8, %vm7816_vm8  ;;  %v7843_v55 = vpop.permute.xlu2 %2661 }
 0x138   :  { %12493 = vst [vmem:[#allocation92_spill] sm:$0xff] %v12492_v27  ;;  %v1585_v7 = vshrl.u32 %v1430_v34, 16  ;;  %v12496_v1 = vrot.slane %v7571_v18, 4  ;;  %v12497_v12 = vshll.u32 %v7533_v20, 16  ;;  %v1588_v59 = vshll.u32 %v1430_v34, 16 }
 0x139   :  { %12498 = vst [vmem:[#allocation93_spill] sm:$0xff] %v7843_v55  ;;  %2737 = vrot.lane.b32.xlu0 %v7611_v9, %s6282_s18  ;;  %v1572_v16 = vor.u32 %v1570_v47, %v1569_v8  ;;  %v1574_v32 = vrot.slane %v1569_v8, 4  ;;  %v1432_v51 = vsel %vm1400_vm5, 65537, %v12402_v38  ;;  %vm12499_vm9 = vcmask 1042432  }
 0x13a   :  { %v7836_v31 = vsel %vm7401_vm13, %v12496_v1, %v7407_v3  ;;  %v7841_v15 = vor.u32 %v12497_v12, %v7749_v56  ;;  %v1587_v13 = vrot.slane %v1585_v7, 7  ;;  %v2827_v1 = vsel %vm12499_vm9, %v7684_v50, %v2826_v45  ;;  %vm12500_vm14 = vmmov %vm12499_vm9 }
 0x13b   :  { %v2829_v14 = vsel %vm12500_vm14, %v2826_v45, %v2828_v41  ;;  %vm12501_vm12 = vmmov %vm12499_vm9  ;;  %v2784_v12 = vunpack.c.l.b16 %v1980_v61  ;;  %v7853_v23 = vpop.permute.xlu0 %2625  ;;  %2856 = vrot.lane.b32.xlu1 %v7660_v43, %s6283_s21  ;;  %v2810_v9 = vpack.c.b16 %v2783_v17, %v2782_v36  ;;  %v1573_v47 = vsel %vm7401_vm13, %v7395_v6, %v1572_v16 }
 0x13c   :  { %v2831_v20 = vsel %vm12501_vm12, %v2828_v41, %v7801_v58  ;;  %12502 = vst [vmem:[#allocation94_spill] sm:$0xff] %v7853_v23  ;;  %v1582_v50 = vsel %vm7401_vm13, %v1574_v32, %v7407_v3  ;;  %v1590_v34 = vor.u32 %v1588_v59, %v1587_v13  ;;  %v1828_v45 = vunpack.c.l.b16 %v1573_v47  ;;  %v7917_v23 = vld [vmem:[%s11783_s0 + $0x40] sm:$0xf] }
 0x13d   :  { %v1829_v8 = vunpack.c.h.b16 %v1573_v47  ;;  %v1835_v7 = vunpack.c.l.b16 %v1582_v50  ;;  %v1603_v41 = vshrl.u32 %v1432_v51, 16  ;;  %v7863_v61 = vpop.permute.xlu1 %2627  ;;  %2864 = vrot.lane.b32.xlu2 %v2831_v20, %s6283_s21  ;;  %v1836_v36 = vunpack.c.h.b16 %v1582_v50  ;;  %v7884_v50 = vld [vmem:[%s11783_s0 + $0x38] sm:$0xf] }
 0x13e   :  { %12503 = vst [vmem:[#allocation95_spill] sm:$0xff] %v7863_v61  ;;  %v1591_v43 = vsel %vm7401_vm13, %v7395_v6, %v1590_v34  ;;  %v1592_v17 = vrot.slane %v1587_v13, 4  ;;  %v1606_v16 = vshll.u32 %v1432_v51, 16  ;;  %vm1832_vm8 = vcmp.ne.s32.totalorder %v1828_v45, %v6337_v25 }
 0x13f   :  { %vm1833_vm5 = vcmp.ne.s32.totalorder %v1829_v8, %v6340_v26  ;;  %vm1839_vm9 = vcmp.ne.s32.totalorder %v1835_v7, %v6337_v25  ;;  %v37_v32 = vadd.s32 152, %v12396_v57  ;;  %v12504_v59 = vmov 0 }
 0x140   :  { %vm7873_vm14 = vmpackc.low %vm1833_vm5, %vm1832_vm8  ;;  %vm1840_vm12 = vcmp.ne.s32.totalorder %v1836_v36, %v6340_v26  ;;  %v1842_v20 = vunpack.c.l.b16 %v1591_v43  ;;  %v1843_v47 = vunpack.c.h.b16 %v1591_v43  ;;  %v1600_v51 = vsel %vm7401_vm13, %v1592_v17, %v7407_v3  ;;  %v7904_v17 = vpop.permute.xlu2 %2667 }
 0x141   :  { %v12505_v59 = vsel %vm7873_vm14, 4294967295, %v12504_v59  ;;  %v2832_v13 = vrot.slane %v2810_v9, 5  ;;  %v1981_v34 = vsel %vm7873_vm14, %v7884_v50, 0  ;;  %vm7889_vm8 = vmpackc.low %vm1840_vm12, %vm1839_vm9  ;;  %v12507_v45 = vmov 0  ;;  %2860 = vrot.lane.b32.xlu0 %v2827_v1, %s6283_s21  ;;  %v7899_v9 = vld [vmem:[%s11783_s0 + $0x3c] sm:$0xf] }
 0x142   :  { %12506 = vst [vmem:[#allocation96_spill] sm:$0xff] %v12505_v59  ;;  %v12508_v45 = vsel %vm7889_vm8, 4294967295, %v12507_v45  ;;  %v1605_v8 = vrot.slane %v1603_v41, 7  ;;  %v1849_v7 = vunpack.c.l.b16 %v1600_v51  ;;  %v2785_v43 = vunpack.c.l.b16 %v1981_v34 }
 0x143   :  { %12509 = vst [vmem:[#allocation97_spill] sm:$0xff] %v12508_v45  ;;  %vm1846_vm5 = vcmp.ne.s32.totalorder %v1842_v20, %v6337_v25  ;;  %vm1847_vm3 = vcmp.ne.s32.totalorder %v1843_v47, %v6340_v26  ;;  %v1982_v36 = vsel %vm7889_vm8, %v7899_v9, 0  ;;  %v12511_v41 = vmov 0  ;;  %v7911_v47 = vpop.permute.xlu0 %2631  ;;  %2862 = vrot.lane.b32.xlu1 %v2829_v14, %s6283_s21 }
 0x144   :  { %12510 = vst [vmem:[#allocation98_spill] sm:$0xff] %v7904_v17  ;;  %vm7906_vm9 = vmpackc.low %vm1847_vm3, %vm1846_vm5  ;;  %v2786_v1 = vunpack.c.l.b16 %v1982_v36  ;;  %v1608_v34 = vor.u32 %v1606_v16, %v1605_v8  ;;  %v1850_v20 = vunpack.c.h.b16 %v1600_v51  ;;  %vm1853_vm12 = vcmp.ne.s32.totalorder %v1849_v7, %v6337_v25 }
 0x145   :  { %v12512_v41 = vsel %vm7906_vm9, 4294967295, %v12511_v41  ;;  %12514 = vst [vmem:[#allocation100_spill] sm:$0xff] %v7911_v47  ;;  %v2811_v61 = vpack.c.b16 %v2785_v43, %v2784_v12  ;;  %v1983_v17 = vsel %vm7906_vm9, %v7917_v23, 0  ;;  %v187_v55 = vand.u32 15, %v37_v32  ;;  %v7927_v12 = vpop.permute.xlu1 %2633 }
 0x146   :  { %12513 = vst [vmem:[#allocation99_spill] sm:$0xff] %v12512_v41  ;;  %v1610_v36 = vrot.slane %v1605_v8, 4  ;;  %v2787_v16 = vunpack.c.l.b16 %v1983_v17  ;;  %v1609_v51 = vsel %vm7401_vm13, %v7395_v6, %v1608_v34  ;;  %vm1854_vm3 = vcmp.ne.s32.totalorder %v1850_v20, %v6340_v26  ;;  %v7938_v17 = vld [vmem:[%s11783_s0 + $0x44] sm:$0xf] }
 0x147   :  { %v39_v14 = vadd.s32 168, %v12396_v57  ;;  %12515 = vst [vmem:[#allocation101_spill] sm:$0xff] %v7927_v12  ;;  %v2834_v7 = vrot.slane %v2811_v61, 5  ;;  %vm7929_vm5 = vmpackc.low %vm1854_vm3, %vm1853_vm12  ;;  %v12516_v43 = vmov 0  ;;  %v1856_v47 = vunpack.c.l.b16 %v1609_v51 }
 0x148   :  { %v12517_v43 = vsel %vm7929_vm5, 4294967295, %v12516_v43  ;;  %v1857_v48 = vunpack.c.h.b16 %v1609_v51  ;;  %vm485_vm9 = vcmp.ne.s32.totalorder %v187_v55, 15  ;;  %vm12519_vm8 = vcmask 1042432  }
 0x149   :  { %12518 = vst [vmem:[#allocation102_spill] sm:$0xff] %v12517_v43  ;;  %v2833_v32 = vsel %vm12519_vm8, %v7801_v58, %v2832_v13  ;;  %v2812_v8 = vpack.c.b16 %v2787_v16, %v2786_v1  ;;  %v1984_v61 = vsel %vm7929_vm5, %v7938_v17, 0  ;;  %vm1402_vm12 = vmpackc.low %vm485_vm9, %vm485_vm9  ;;  %v1618_v34 = vsel %vm7401_vm13, %v1610_v36, %v7407_v3 }
 0x14a   :  { %v7950_v58 = vsel %vm7401_vm13, %v7395_v6, %v7841_v15  ;;  %v2835_v55 = vsel %vm12519_vm8, %v2832_v13, %v2834_v7  ;;  %vm1860_vm3 = vcmp.ne.s32.totalorder %v1856_v47, %v6337_v25  ;;  %vm1861_vm14 = vcmp.ne.s32.totalorder %v1857_v48, %v6340_v26  ;;  %2866 = vrot.lane.b32.xlu0 %v2833_v32, %s6283_s21  ;;  %v7964_v15 = vld [vmem:[%s11783_s0 + $0x48] sm:$0xf] }
 0x14b   :  { %v2836_v1 = vrot.slane %v2812_v8, 5  ;;  %vm7955_vm11 = vmpackc.low %vm1861_vm14, %vm1860_vm3  ;;  %v12520_v20 = vmov 0  ;;  %v2788_v16 = vunpack.c.l.b16 %v1984_v61  ;;  %v1434_v36 = vsel %vm1402_vm12, 65537, %v12402_v38  ;;  %12523 = vst [vmem:[#allocation104_spill] sm:$0xff] %v7964_v15  ;;  %v7971_v29 = vpop.permute.xlu0 %2637  ;;  %2868 = vrot.lane.b32.xlu1 %v2835_v55, %s6283_s21 }
 0x14c   :  { %v12521_v20 = vsel %vm7955_vm11, 4294967295, %v12520_v20  ;;  %v1863_v51 = vunpack.c.l.b16 %v1618_v34  ;;  %v1985_v48 = vsel %vm7955_vm11, %v7964_v15, 0  ;;  %v1621_v13 = vshrl.u32 %v1434_v36, 16  ;;  %vm12524_vm14 = vmmov %vm12519_vm8  ;;  %12525 = vst [vmem:[#allocation105_spill] sm:$0xff] %v7971_v29 }
 0x14d   :  { %12522 = vst [vmem:[#allocation103_spill] sm:$0xff] %v12521_v20  ;;  %v1624_v47 = vshll.u32 %v1434_v36, 16  ;;  %v1864_v8 = vunpack.c.h.b16 %v1618_v34  ;;  %v2837_v12 = vsel %vm12524_vm14, %v2834_v7, %v2836_v1  ;;  %v2789_v61 = vunpack.c.l.b16 %v1985_v48  ;;  %v7979_v7 = vpop.permute.xlu2 %2673 }
 0x14e   :  { %vm1867_vm9 = vcmp.ne.s32.totalorder %v1863_v51, %v6337_v25  ;;  %v201_v0 = vand.u32 15, %v39_v14  ;;  %2870 = vrot.lane.b32.xlu2 %v2837_v12, %s6283_s21  ;;  %v1623_v32 = vrot.slane %v1621_v13, 7  ;;  %v1947_v36 = vunpack.c.l.b16 %v7836_v31  ;;  %12526 = vst [vmem:[#allocation106_spill] sm:$0xff] %v7979_v7  ;;  %v7986_v12 = vpop.permute.xlu1 %2639 }
 0x14f   :  { %vm1868_vm12 = vcmp.ne.s32.totalorder %v1864_v8, %v6340_v26  ;;  %v1948_v34 = vunpack.c.h.b16 %v7836_v31  ;;  %v2813_v48 = vpack.c.b16 %v2789_v61, %v2788_v16  ;;  %v12527_v14 = vmov 0  ;;  %12530 = vst [vmem:[#allocation108_spill] sm:$0xff] %v7986_v12  ;;  %v7993_v31 = vld [vmem:[%s11783_s0 + $0x4c] sm:$0xf] }
 0x150   :  { %vm7981_vm8 = vmpackc.low %vm1868_vm12, %vm1867_vm9  ;;  %vm487_vm3 = vcmp.ne.s32.totalorder %v201_v0, 15  ;;  %v1626_v51 = vor.u32 %v1624_v47, %v1623_v32  ;;  %v1628_v13 = vrot.slane %v1623_v32, 4  ;;  %v215_v8 = vand.u32 15, %v41_v11  ;;  %12531 = vst [vmem:[#allocation109_spill] sm:$0xff] %v7993_v31 }
 0x151   :  { %v12528_v14 = vsel %vm7981_vm8, 4294967295, %v12527_v14  ;;  %vm1404_vm14 = vmpackc.low %vm487_vm3, %vm487_vm3  ;;  %v7988_v29 = vrot.slane %v2813_v48, 5  ;;  %v1986_v16 = vsel %vm7981_vm8, %v7993_v31, 0  ;;  %v43_v61 = vadd.s32 200, %v12396_v57 }
 0x152   :  { %12529 = vst [vmem:[#allocation107_spill] sm:$0xff] %v12528_v14  ;;  %v1436_v0 = vsel %vm1404_vm14, 65537, %v12402_v38  ;;  %v1627_v47 = vsel %vm7401_vm13, %v7395_v6, %v1626_v51  ;;  %v1636_v11 = vsel %vm7401_vm13, %v1628_v13, %v7407_v3  ;;  %vm12532_vm9 = vcmask 1042432  }
 0x153   :  { %v1639_v32 = vshrl.u32 %v1436_v0, 16  ;;  %v1642_v48 = vshll.u32 %v1436_v0, 16  ;;  %v2839_v55 = vsel %vm12532_vm9, %v2836_v1, %v7988_v29  ;;  %v1870_v7 = vunpack.c.l.b16 %v1627_v47  ;;  %v8023_v13 = vpop.permute.xlu0 %2657 }
 0x154   :  { %v1871_v12 = vunpack.c.h.b16 %v1627_v47  ;;  %v1877_v14 = vunpack.c.l.b16 %v1636_v11  ;;  %2872 = vrot.lane.b32.xlu0 %v2839_v55, %s6283_s21  ;;  %v1878_v43 = vunpack.c.h.b16 %v1636_v11  ;;  %vm489_vm12 = vcmp.ne.s32.totalorder %v215_v8, 15  ;;  %12537 = vst [vmem:[#allocation110_spill] sm:$0xff] %v8023_v13  ;;  %v8049_v11 = vld [vmem:[%s11783_s0 + $0x54] sm:$0xf] }
 0x155   :  { %v1641_v20 = vrot.slane %v1639_v32, 7  ;;  %v45_v31 = vadd.s32 216, %v12396_v57  ;;  %vm1874_vm3 = vcmp.ne.s32.totalorder %v1870_v7, %v6337_v25  ;;  %v2790_v51 = vunpack.c.l.b16 %v1986_v16  ;;  %vm1406_vm11 = vmpackc.low %vm489_vm12, %vm489_vm12  ;;  %12545 = vst [vmem:[#allocation114_spill] sm:$0xff] %v8049_v11 }
 0x156   :  { %vm1875_vm14 = vcmp.ne.s32.totalorder %v1871_v12, %v6340_v26  ;;  %vm1881_vm8 = vcmp.ne.s32.totalorder %v1877_v14, %v6337_v25  ;;  %vm8014_vm9 = vcmp.ne.s32.totalorder %v1947_v36, %v6337_v25  ;;  %vm8019_vm5 = vcmp.ne.s32.totalorder %v1948_v34, %v6340_v26  ;;  %v8034_v12 = vld [vmem:[%s11783_s0 + $0x50] sm:$0xf] }
 0x157   :  { %vm8025_vm7 = vmpackc.low %vm1875_vm14, %vm1874_vm3  ;;  %v12538_v57 = vmov 0  ;;  %v1644_v7 = vor.u32 %v1642_v48, %v1641_v20  ;;  %vm1882_vm2 = vcmp.ne.s32.totalorder %v1878_v43, %v6340_v26  ;;  %v1438_v14 = vsel %vm1406_vm11, 65537, %v12402_v38  ;;  %12541 = vst [vmem:[#allocation112_spill] sm:$0xff] %v8034_v12  ;;  %v8054_v48 = vpop.permute.xlu1 %2659 }
 0x158   :  { %v12539_v57 = vsel %vm8025_vm7, 4294967295, %v12538_v57  ;;  %v1646_v36 = vrot.slane %v1641_v20, 4  ;;  %v1987_v34 = vsel %vm8025_vm7, %v8034_v12, 0  ;;  %vm8039_vm12 = vmpackc.low %vm1882_vm2, %vm1881_vm8  ;;  %v12542_v8 = vmov 0  ;;  %12546 = vst [vmem:[#allocation115_spill] sm:$0xff] %v8054_v48 }
 0x159   :  { %12540 = vst [vmem:[#allocation111_spill] sm:$0xff] %v12539_v57  ;;  %v12543_v8 = vsel %vm8039_vm12, 4294967295, %v12542_v8  ;;  %v1657_v16 = vshrl.u32 %v1438_v14, 16  ;;  %v1660_v0 = vshll.u32 %v1438_v14, 16  ;;  %v229_v47 = vand.u32 15, %v43_v61  ;;  %v8060_v57 = vpop.permute.xlu2 %2679 }
 0x15a   :  { %12544 = vst [vmem:[#allocation113_spill] sm:$0xff] %v12543_v8  ;;  %v2791_v43 = vunpack.c.l.b16 %v1987_v34  ;;  %v1645_v20 = vsel %vm7401_vm13, %v7395_v6, %v1644_v7  ;;  %v1988_v32 = vsel %vm8039_vm12, %v8049_v11, 0  ;;  %v1654_v61 = vsel %vm7401_vm13, %v1646_v36, %v7407_v3 }
 0x15b   :  { %v1955_v14 = vunpack.c.h.b16 %v7950_v58  ;;  %v1884_v34 = vunpack.c.l.b16 %v1645_v20  ;;  %v1885_v13 = vunpack.c.h.b16 %v1645_v20  ;;  %v2792_v7 = vunpack.c.l.b16 %v1988_v32  ;;  %12547 = vst [vmem:[#allocation116_spill] sm:$0xff] %v8060_v57  ;;  %v8110_v32 = vpop.permute.xlu0 %2663 }
 0x15c   :  { %v2814_v12 = vpack.c.b16 %v2791_v43, %v2790_v51  ;;  %v1659_v41 = vrot.slane %v1657_v16, 7  ;;  %v1891_v15 = vunpack.c.l.b16 %v1654_v61  ;;  %v1892_v45 = vunpack.c.h.b16 %v1654_v61  ;;  %v8105_v43 = vld [vmem:[%s11783_s0 + $0x5c] sm:$0xf]  ;;  %12562 = vst [vmem:[#allocation119_spill] sm:$0xff] %v8110_v32 }
 0x15d   :  { %vm1888_vm2 = vcmp.ne.s32.totalorder %v1884_v34, %v6337_v25  ;;  %vm1889_vm11 = vcmp.ne.s32.totalorder %v1885_v13, %v6340_v26  ;;  %vm8064_vm8 = vcmp.ne.s32.totalorder %v229_v47, 15  ;;  %v243_v36 = vand.u32 15, %v45_v31  ;;  %v8084_v31 = vld [vmem:[%s11783_s0 + $0x58] sm:$0xf] }
 0x15e   :  { %v2840_v8 = vrot.slane %v2814_v12, 5  ;;  %vm8068_vm3 = vmpackc.low %vm1889_vm11, %vm1888_vm2  ;;  %v12550_v11 = vmov 0  ;;  %v1662_v20 = vor.u32 %v1660_v0, %v1659_v41  ;;  %vm1895_vm14 = vcmp.ne.s32.totalorder %v1891_v15, %v6337_v25 }
 0x15f   :  { %v12551_v11 = vsel %vm8068_vm3, 4294967295, %v12550_v11  ;;  %vm1896_vm12 = vcmp.ne.s32.totalorder %v1892_v45, %v6340_v26  ;;  %v12553_v51 = vunpack.c.l.b16 %v7950_v58  ;;  %v1989_v12 = vsel %vm8068_vm3, %v8084_v31, 0 }
 0x160   :  { %12552 = vst [vmem:[#allocation117_spill] sm:$0xff] %v12551_v11  ;;  %vm8089_vm2 = vmpackc.low %vm1896_vm12, %vm1895_vm14  ;;  %v12556_v15 = vmov 0  ;;  %v1664_v45 = vrot.slane %v1659_v41, 4  ;;  %vm8093_vm11 = vcmp.ne.s32.totalorder %v243_v36, 15  ;;  %vm12561_vm15 = vcmask 1042432  }
 0x161   :  { %vm8077_vm7 = vcmp.ne.s32.totalorder %v12553_v51, %v6337_v25  ;;  %v12557_v15 = vsel %vm8089_vm2, 4294967295, %v12556_v15  ;;  %v2841_v16 = vsel %vm12561_vm15, %v7988_v29, %v2840_v8  ;;  %v2793_v0 = vunpack.c.l.b16 %v1989_v12  ;;  %vm1408_vm15 = vmpackc.low %vm8064_vm8, %vm8064_vm8  ;;  %v8129_v12 = vpop.permute.xlu1 %2665 }
 0x162   :  { %12558 = vst [vmem:[#allocation118_spill] sm:$0xff] %v12557_v15  ;;  %v1663_v47 = vsel %vm7401_vm13, %v7395_v6, %v1662_v20  ;;  %v1990_v41 = vsel %vm8089_vm2, %v8105_v43, 0  ;;  %vm8116_vm12 = vcmp.ne.s32.totalorder %v1955_v14, %v6340_v26  ;;  %2874 = vrot.lane.b32.xlu1 %v2841_v16, %s6283_s21  ;;  %vm1410_vm14 = vmpackc.low %vm8093_vm11, %vm8093_vm11  ;;  %v1440_v51 = vsel %vm1408_vm15, 65537, %v12402_v38 }
 0x163   :  { %v1898_v61 = vunpack.c.l.b16 %v1663_v47  ;;  %v1899_v34 = vunpack.c.h.b16 %v1663_v47  ;;  %v2794_v36 = vunpack.c.l.b16 %v1990_v41  ;;  %v2815_v20 = vpack.c.b16 %v2793_v0, %v2792_v7  ;;  %12565 = vst [vmem:[#allocation120_spill] sm:$0xff] %v8129_v12  ;;  %vm8135_vm8 = vmpackc.low %vm8019_vm5, %vm8014_vm9 }
 0x164   :  { %v1672_v48 = vsel %vm7401_vm13, %v1664_v45, %v7407_v3  ;;  %v1442_v14 = vsel %vm1410_vm14, 65537, %v12402_v38  ;;  %v12566_v16 = vmov 0  ;;  %v1675_v7 = vshrl.u32 %v1440_v51, 16  ;;  %vm8149_vm5 = vmpackc.low %vm8116_vm12, %vm8077_vm7 }
 0x165   :  { %v12567_v16 = vsel %vm8135_vm8, 4294967295, %v12566_v16  ;;  %vm1902_vm11 = vcmp.ne.s32.totalorder %v1898_v61, %v6337_v25  ;;  %vm1903_vm15 = vcmp.ne.s32.totalorder %v1899_v34, %v6340_v26  ;;  %v1678_v58 = vshll.u32 %v1440_v51, 16  ;;  %v8156_v61 = vld [vmem:[%s11783_s0 + $0x60] sm:$0xf] }
 0x166   :  { %12568 = vst [vmem:[#allocation121_spill] sm:$0xff] %v12567_v16  ;;  %v2842_v0 = vrot.slane %v2815_v20, 5  ;;  %vm8141_vm2 = vmpackc.low %vm1903_vm15, %vm1902_vm11  ;;  %v12569_v45 = vmov 0  ;;  %v1905_v47 = vunpack.c.l.b16 %v1672_v48  ;;  %v1906_v41 = vunpack.c.h.b16 %v1672_v48  ;;  %v8161_v48 = vpop.permute.xlu2 %2685 }
 0x167   :  { %v12570_v45 = vsel %vm8141_vm2, 4294967295, %v12569_v45  ;;  %v1693_v1 = vshrl.u32 %v1442_v14, 16  ;;  %v12572_v55 = vmov 0  ;;  %v1991_v34 = vsel %vm8141_vm2, %v8156_v61, 0  ;;  %12575 = vst [vmem:[#allocation124_spill] sm:$0xff] %v8161_v48 }
 0x168   :  { %12571 = vst [vmem:[#allocation122_spill] sm:$0xff] %v12570_v45  ;;  %v12573_v55 = vsel %vm8149_vm5, 4294967295, %v12572_v55  ;;  %v1677_v20 = vrot.slane %v1675_v7, 7  ;;  %v1696_v51 = vshll.u32 %v1442_v14, 16  ;;  %vm12576_vm9 = vcmask 1042432  }
 0x169   :  { %12574 = vst [vmem:[#allocation123_spill] sm:$0xff] %v12573_v55  ;;  %v2843_v13 = vsel %vm12576_vm9, %v2840_v8, %v2842_v0  ;;  %v2795_v29 = vunpack.c.l.b16 %v1991_v34  ;;  %vm1909_vm7 = vcmp.ne.s32.totalorder %v1905_v47, %v6337_v25  ;;  %vm1910_vm12 = vcmp.ne.s32.totalorder %v1906_v41, %v6340_v26  ;;  %v8175_v8 = vld [vmem:[%s11783_s0 + $0x64] sm:$0xf]  ;;  %v8180_v41 = vpop.permute.xlu0 %2669  ;;  %vm12584_vm11 = vmmov %vm12576_vm9 }
 0x16a   :  { %2876 = vrot.lane.b32.xlu2 %v2843_v13, %s6283_s21  ;;  %v1680_v38 = vor.u32 %v1678_v58, %v1677_v20  ;;  %vm8167_vm14 = vmpackc.low %vm1910_vm12, %vm1909_vm7  ;;  %v12577_v12 = vmov 0  ;;  %v1682_v32 = vrot.slane %v1677_v20, 4  ;;  %v1695_v57 = vrot.slane %v1693_v1, 7  ;;  %12580 = vst [vmem:[#allocation126_spill] sm:$0xff] %v8180_v41  ;;  %v8185_v58 = vld [vmem:[%s11783_s0 + $0x7c] sm:$0xf] }
 0x16b   :  { %v12578_v12 = vsel %vm8167_vm14, 4294967295, %v12577_v12  ;;  %v1714_v14 = vshll.u32 %v7443_v42, 16  ;;  %v2816_v7 = vpack.c.b16 %v2795_v29, %v2794_v36  ;;  %v1992_v47 = vsel %vm8167_vm14, %v8175_v8, 0  ;;  %12581 = vst [vmem:[#allocation127_spill] sm:$0xff] %v8185_v58  ;;  %v8193_v36 = vld [vmem:[%s11783_s0 + $0x80] sm:$0xf] }
 0x16c   :  { %12579 = vst [vmem:[#allocation125_spill] sm:$0xff] %v12578_v12  ;;  %v1998_v42 = vsel %vm8135_vm8, %v8185_v58, 0  ;;  %v1999_v1 = vsel %vm8149_vm5, %v8193_v36, 0  ;;  %v1681_v34 = vsel %vm7401_vm13, %v7395_v6, %v1680_v38  ;;  %v2796_v20 = vunpack.c.l.b16 %v1992_v47  ;;  %v8204_v12 = vpop.permute.xlu1 %2671 }
 0x16d   :  { %12582 = vst [vmem:[#allocation128_spill] sm:$0xff] %v8193_v36  ;;  %v1690_v13 = vsel %vm7401_vm13, %v1682_v32, %v7407_v3  ;;  %v1698_v29 = vor.u32 %v1696_v51, %v1695_v57  ;;  %v2844_v41 = vrot.slane %v2816_v7, 5  ;;  %v1912_v48 = vunpack.c.l.b16 %v1681_v34 }
 0x16e   :  { %v1913_v16 = vunpack.c.h.b16 %v1681_v34  ;;  %v1919_v58 = vunpack.c.l.b16 %v1690_v13  ;;  %12583 = vst [vmem:[#allocation129_spill] sm:$0xff] %v8204_v12  ;;  %v1920_v36 = vunpack.c.h.b16 %v1690_v13  ;;  %v1700_v45 = vrot.slane %v1695_v57, 4 }
 0x16f   :  { %v1699_v55 = vsel %vm7401_vm13, %v7395_v6, %v1698_v29  ;;  %v1716_v38 = vor.u32 %v1714_v14, %v7571_v18  ;;  %v2845_v47 = vsel %vm12584_vm11, %v2842_v0, %v2844_v41  ;;  %vm1916_vm15 = vcmp.ne.s32.totalorder %v1912_v48, %v6337_v25 }
 0x170   :  { %vm1917_vm9 = vcmp.ne.s32.totalorder %v1913_v16, %v6340_v26  ;;  %vm1923_vm7 = vcmp.ne.s32.totalorder %v1919_v58, %v6337_v25  ;;  %2878 = vrot.lane.b32.xlu0 %v2845_v47, %s6283_s21  ;;  %v12585_v32 = vmov 0  ;;  %vm1924_vm5 = vcmp.ne.s32.totalorder %v1920_v36, %v6340_v26  ;;  %v8226_v16 = vld [vmem:[%s11783_s0 + $0x68] sm:$0xf]  ;;  %v8248_v36 = vpop.permute.xlu2 %2705 }
 0x171   :  { %vm8215_vm12 = vmpackc.low %vm1917_vm9, %vm1916_vm15  ;;  %v1926_v51 = vunpack.c.l.b16 %v1699_v55  ;;  %v1927_v57 = vunpack.c.h.b16 %v1699_v55  ;;  %v1708_v18 = vsel %vm7401_vm13, %v1700_v45, %v7407_v3  ;;  %v12588_v48 = vmov 0  ;;  %v8243_v45 = vld [vmem:[%s11783_s0 + $0x6c] sm:$0xf]  ;;  %12591 = vst [vmem:[#allocation132_spill] sm:$0xff] %v8248_v36  ;;  %v8256_v13 = vpop.permute.xlu0 %2675 }
 0x172   :  { %v12586_v32 = vsel %vm8215_vm12, 4294967295, %v12585_v32  ;;  %v1993_v0 = vsel %vm8215_vm12, %v8226_v16, 0  ;;  %vm8231_vm11 = vmpackc.low %vm1924_vm5, %vm1923_vm7  ;;  %v1717_v55 = vsel %vm7401_vm13, %v7395_v6, %v1716_v38  ;;  %v1933_v14 = vunpack.c.l.b16 %v1708_v18  ;;  %12595 = vst [vmem:[#allocation134_spill] sm:$0xff] %v8256_v13  ;;  %v8261_v38 = vld [vmem:[%s11783_s0 + $0x70] sm:$0xf] }
 0x173   :  { %12587 = vst [vmem:[#allocation130_spill] sm:$0xff] %v12586_v32  ;;  %v12589_v48 = vsel %vm8231_vm11, 4294967295, %v12588_v48  ;;  %v1934_v7 = vunpack.c.h.b16 %v1708_v18  ;;  %v2797_v3 = vunpack.c.l.b16 %v1993_v0  ;;  %vm1930_vm15 = vcmp.ne.s32.totalorder %v1926_v51, %v6337_v25  ;;  %v12659_v32 = vld [vmem:[#allocation127_spill] sm:$0xff] }
 0x174   :  { %12590 = vst [vmem:[#allocation131_spill] sm:$0xff] %v12589_v48  ;;  %vm1931_vm9 = vcmp.ne.s32.totalorder %v1927_v57, %v6340_v26  ;;  %v1994_v58 = vsel %vm8231_vm11, %v8243_v45, 0  ;;  %vm1937_vm13 = vcmp.ne.s32.totalorder %v1933_v14, %v6337_v25  ;;  %v1940_v34 = vunpack.c.l.b16 %v1717_v55 }
 0x175   :  { %vm8250_vm5 = vmpackc.low %vm1931_vm9, %vm1930_vm15  ;;  %v2798_v6 = vunpack.c.l.b16 %v1994_v58  ;;  %vm1938_vm7 = vcmp.ne.s32.totalorder %v1934_v7, %v6340_v26  ;;  %v2817_v29 = vpack.c.b16 %v2797_v3, %v2796_v20  ;;  %v12596_v51 = vmov 0  ;;  %v8274_v20 = vld [vmem:[%s11783_s0 + $0x74] sm:$0xf]  ;;  %v8279_v7 = vpop.permute.xlu1 %2677 }
 0x176   :  { %v12593_v46 = vsel %vm8250_vm5, 4294967295, %v12592_v46  ;;  %v1995_v47 = vsel %vm8250_vm5, %v8261_v38, 0  ;;  %vm8266_vm15 = vmpackc.low %vm1938_vm7, %vm1937_vm13  ;;  %v1941_v57 = vunpack.c.h.b16 %v1717_v55  ;;  %vm1944_vm9 = vcmp.ne.s32.totalorder %v1940_v34, %v6337_v25  ;;  %12599 = vst [vmem:[#allocation136_spill] sm:$0xff] %v8279_v7 }
 0x177   :  { %12594 = vst [vmem:[#allocation133_spill] sm:$0xff] %v12593_v46  ;;  %v12597_v51 = vsel %vm8266_vm15, 4294967295, %v12596_v51  ;;  %v2799_v18 = vunpack.c.l.b16 %v1995_v47  ;;  %v1996_v0 = vsel %vm8266_vm15, %v8274_v20, 0  ;;  %v2802_v14 = vunpack.c.l.b16 %v1998_v42  ;;  %v8291_v42 = vld [vmem:[%s11783_s0 + $0x78] sm:$0xf] }
 0x178   :  { %12598 = vst [vmem:[#allocation135_spill] sm:$0xff] %v12597_v51  ;;  %v2846_v3 = vrot.slane %v2817_v29, 5  ;;  %vm1945_vm13 = vcmp.ne.s32.totalorder %v1941_v57, %v6340_v26  ;;  %v2803_v58 = vunpack.c.l.b16 %v1999_v1  ;;  %v12600_v47 = vmov 0 }
 0x179   :  { %v2818_v55 = vpack.c.b16 %v2799_v18, %v2798_v6  ;;  %vm8282_vm7 = vmpackc.low %vm1945_vm13, %vm1944_vm9  ;;  %v2800_v34 = vunpack.c.l.b16 %v1996_v0  ;;  %v1736_v13 = vrot.slane %v7749_v56, 4  ;;  %vm12603_vm8 = vcmask 1042432   ;;  %12604 = vst [vmem:[#allocation138_spill] sm:$0xff] %v8291_v42  ;;  %v1318_v56 = vld [vmem:[%s11783_s0 + $0x84] sm:$0x1] }
 0x17a   :  { %v12601_v47 = vsel %vm8282_vm7, 4294967295, %v12600_v47  ;;  %v2847_v36 = vsel %vm12603_vm8, %v2844_v41, %v2846_v3  ;;  %v1997_v29 = vsel %vm8282_vm7, %v8291_v42, 0  ;;  %v2820_v1 = vpack.c.b16 %v2803_v58, %v2802_v14 }
 0x17b   :  { %12602 = vst [vmem:[#allocation137_spill] sm:$0xff] %v12601_v47  ;;  %2880 = vrot.lane.b32.xlu1 %v2847_v36, %s6283_s21  ;;  %v2848_v6 = vrot.slane %v2818_v55, 5  ;;  %v2801_v57 = vunpack.c.l.b16 %v1997_v29  ;;  %v1961_v18 = vunpack.c.l.b16 %v1736_v13  ;;  %v1962_v0 = vunpack.c.h.b16 %v1736_v13  ;;  %v8309_v13 = vpop.permute.xlu0 %2681 }
 0x17c   :  { %v2852_v7 = vrot.slane %v2820_v1, 5  ;;  %v2002_v41 = vsel %vm7456_vm1, %v7584_v28, 0  ;;  %v2003_v12 = vsel %vm7494_vm0, %v7592_v54, 0  ;;  %12605 = vst [vmem:[#allocation139_spill] sm:$0xff] %v8309_v13  ;;  %v12606_v58 = vmov 0 }
 0x17d   :  { %v2849_v14 = vsel %vm12603_vm8, %v2846_v3, %v2848_v6  ;;  %v2819_v36 = vpack.c.b16 %v2801_v57, %v2800_v34  ;;  %vm1965_vm9 = vcmp.ne.s32.totalorder %v1961_v18, %v6337_v25  ;;  %vm1966_vm13 = vcmp.ne.s32.totalorder %v1962_v0, %v6340_v26  ;;  %v8322_v3 = vpop.permute.xlu2 %2711  ;;  %v8326_v57 = vpop.permute.xlu1 %2683 }
 0x17e   :  { %2882 = vrot.lane.b32.xlu2 %v2849_v14, %s6283_s21  ;;  %vm8312_vm7 = vmpackc.low %vm1966_vm13, %vm1965_vm9  ;;  %v2923_v28 = vunpack.c.l.b16 %v2002_v41  ;;  %v2924_v55 = vunpack.c.l.b16 %v2003_v12  ;;  %v2004_v54 = vsel %vm7543_vm10, %v7620_v2, 0  ;;  %v2005_v25 = vsel %vm7554_vm6, %v7649_v44, 0  ;;  %12609 = vst [vmem:[#allocation141_spill] sm:$0xff] %v8322_v3 }
 0x17f   :  { %v12607_v58 = vsel %vm8312_vm7, 4294967295, %v12606_v58  ;;  %v2850_v26 = vrot.slane %v2819_v36, 5  ;;  %v2000_v34 = vsel %vm8312_vm7, %v1318_v56, 0  ;;  %v2925_v29 = vunpack.c.l.b16 %v2004_v54  ;;  %12610 = vst [vmem:[#allocation142_spill] sm:$0xff] %v8326_v57 }
 0x180   :  { %12608 = vst [vmem:[#allocation140_spill] sm:$0xff] %v12607_v58  ;;  %v2926_v1 = vunpack.c.l.b16 %v2005_v25  ;;  %v2804_v18 = vunpack.c.l.b16 %v2000_v34  ;;  %v2956_v12 = vpack.c.b16 %v2924_v55, %v2923_v28  ;;  %v2006_v2 = vsel %vm7601_vm4, %v7689_v37, 0 }
 0x181   :  { %vm12611_vm8 = vnez %v12454_v10  ;;  %vm12612_vm9 = vcmask 1042432   ;;  %v2927_v56 = vunpack.c.l.b16 %v2006_v2  ;;  %vm12614_vm0 = vnez %v12464_v4 }
 0x182   :  { %v2007_v44 = vsel %vm12611_vm8, %v7706_v53, 0  ;;  %v2851_v0 = vsel %vm12612_vm9, %v2848_v6, %v2850_v26  ;;  %vm12613_vm13 = vmmov %vm12612_vm9  ;;  %v2957_v14 = vpack.c.b16 %v2926_v1, %v2925_v29  ;;  %v2821_v36 = vpack.c.b16 %v2804_v18, %v2804_v18 }
 0x183   :  { %v2853_v41 = vsel %vm12613_vm13, %v2850_v26, %v2852_v7  ;;  %2884 = vrot.lane.b32.xlu0 %v2851_v0, %s6283_s21  ;;  %v2928_v54 = vunpack.c.l.b16 %v2007_v44  ;;  %v2973_v28 = vrot.slane %v2956_v12, 5  ;;  %v2008_v37 = vsel %vm12614_vm0, %v7717_v63, 0  ;;  %v8351_v2 = vpop.permute.xlu0 %2687 }
 0x184   :  { %2886 = vrot.lane.b32.xlu1 %v2853_v41, %s6283_s21  ;;  %v2974_v55 = vrot.slane %v2957_v14, 5  ;;  %vm12615_vm8 = vnez %v12467_v33  ;;  %v2854_v6 = vrot.slane %v2821_v36, 5  ;;  %v2929_v26 = vunpack.c.l.b16 %v2008_v37  ;;  %12619 = vst [vmem:[#allocation143_spill] sm:$0xff] %v8351_v2 }
 0x185   :  { %v2009_v53 = vsel %vm12615_vm8, %v7740_v49, 0  ;;  %v2958_v25 = vpack.c.b16 %v2928_v54, %v2927_v56  ;;  %vm12616_vm9 = vnez %v12471_v24  ;;  %vm12617_vm13 = vnez %v12475_v30  ;;  %v8361_v54 = vpop.permute.xlu2 %2717 }
 0x186   :  { %v2930_v34 = vunpack.c.l.b16 %v2009_v53  ;;  %v2010_v29 = vsel %vm12616_vm9, %v7770_v5, 0  ;;  %v2011_v1 = vsel %vm12617_vm13, %v7806_v60, 0  ;;  %vm12618_vm4 = vcmask 1042432   ;;  %12623 = vst [vmem:[#allocation144_spill] sm:$0xff] %v8361_v54 }
 0x187   :  { %v2855_v18 = vsel %vm12618_vm4, %v2852_v7, %v2854_v6  ;;  %v2931_v63 = vunpack.c.l.b16 %v2010_v29  ;;  %v2932_v44 = vunpack.c.l.b16 %v2011_v1  ;;  %vm12620_vm8 = vnez %v12481_v22  ;;  %vm12622_vm0 = vmmov %vm12618_vm4 }
 0x188   :  { %v2959_v12 = vpack.c.b16 %v2930_v34, %v2929_v26  ;;  %2888 = vrot.lane.b32.xlu2 %v2855_v18, %s6283_s21  ;;  %v2012_v0 = vsel %vm12620_vm8, %v7823_v35, 0  ;;  %vm12621_vm9 = vnez %v12489_v40  ;;  %v2975_v14 = vsel %vm12622_vm0, %v2973_v28, %v2974_v55  ;;  %v8369_v26 = vpop.permute.xlu1 %2689 }
 0x189   :  { %v2013_v41 = vsel %vm12621_vm9, %v7884_v50, 0  ;;  %v2976_v56 = vrot.slane %v2958_v25, 5  ;;  %v2933_v36 = vunpack.c.l.b16 %v2012_v0  ;;  %v2960_v37 = vpack.c.b16 %v2932_v44, %v2931_v63  ;;  %12626 = vst [vmem:[#allocation145_spill] sm:$0xff] %v8369_v26  ;;  %v12627_v63 = vld [vmem:[#allocation97_spill] sm:$0xff]  ;;  %v12629_v0 = vld [vmem:[#allocation104_spill] sm:$0xff] }
 0x18a   :  { %v2934_v7 = vunpack.c.l.b16 %v2013_v41  ;;  %vm12624_vm4 = vnez %v12492_v27  ;;  %vm12625_vm13 = vnez %v12505_v59  ;;  %v2978_v34 = vrot.slane %v2959_v12, 5  ;;  %v12630_v41 = vld [vmem:[#allocation99_spill] sm:$0xff]  ;;  %v12634_v12 = vld [vmem:[#allocation102_spill] sm:$0xff] }
 0x18b   :  { %v2014_v53 = vsel %vm12624_vm4, %v7899_v9, 0  ;;  %v2015_v6 = vsel %vm12625_vm13, %v7917_v23, 0  ;;  %3006 = vrot.lane.b32.xlu0 %v2973_v28, %s6284_s26  ;;  %v2980_v1 = vrot.slane %v2960_v37, 5  ;;  %vm12628_vm0 = vnez %v12627_v63  ;;  %v12633_v28 = vld [vmem:[#allocation109_spill] sm:$0xff]  ;;  %v12642_v63 = vld [vmem:[#allocation107_spill] sm:$0xff] }
 0x18c   :  { %v2935_v25 = vunpack.c.l.b16 %v2014_v53  ;;  %v2936_v29 = vunpack.c.l.b16 %v2015_v6  ;;  %3008 = vrot.lane.b32.xlu1 %v2975_v14, %s6284_s26  ;;  %v2961_v18 = vpack.c.b16 %v2934_v7, %v2933_v36  ;;  %v2016_v44 = vsel %vm12628_vm0, %v7938_v17, 0  ;;  %v12636_v6 = vld [vmem:[#allocation112_spill] sm:$0xff]  ;;  %v12637_v14 = vld [vmem:[#allocation103_spill] sm:$0xff] }
 0x18d   :  { %vm12631_vm4 = vnez %v12630_v41  ;;  %vm12632_vm13 = vcmask 1042432   ;;  %v2937_v54 = vunpack.c.l.b16 %v2016_v44  ;;  %vm12635_vm9 = vnez %v12634_v12 }
 0x18e   :  { %v2017_v2 = vsel %vm12631_vm4, %v12629_v0, 0  ;;  %v2977_v26 = vsel %vm12632_vm13, %v2974_v55, %v2976_v56  ;;  %v2018_v53 = vsel %vm12635_vm9, %v12633_v28, 0  ;;  %vm12638_vm8 = vnez %v12637_v14  ;;  %vm12639_vm0 = vmmov %vm12632_vm13  ;;  %v12644_v28 = vld [vmem:[#allocation111_spill] sm:$0xff] }
 0x18f   :  { %v2938_v57 = vunpack.c.l.b16 %v2017_v2  ;;  %v2019_v36 = vsel %vm12638_vm8, %v12636_v6, 0  ;;  %v2962_v7 = vpack.c.b16 %v2936_v29, %v2935_v25  ;;  %v2979_v37 = vsel %vm12639_vm0, %v2976_v56, %v2978_v34  ;;  %vm12640_vm6 = vmmov %vm12639_vm0  ;;  %v12641_v2 = vld [vmem:[#allocation114_spill] sm:$0xff]  ;;  %v8395_v6 = vpop.permute.xlu0 %2707 }
 0x190   :  { %3010 = vrot.lane.b32.xlu2 %v2977_v26, %s6284_s26  ;;  %v2981_v13 = vsel %vm12640_vm6, %v2978_v34, %v2980_v1  ;;  %v2982_v3 = vrot.slane %v2961_v18, 5  ;;  %v2939_v55 = vunpack.c.l.b16 %v2018_v53  ;;  %v2940_v44 = vunpack.c.l.b16 %v2019_v36  ;;  %12646 = vst [vmem:[#allocation104_spill] sm:$0xff] %v8395_v6  ;;  %v12647_v26 = vld [vmem:[#allocation113_spill] sm:$0xff]  ;;  %v8404_v34 = vpop.permute.xlu2 %2723  ;;  %v8407_v36 = vpop.permute.xlu1 %2709  ;;  %vm12651_vm6 = vmmov %vm12639_vm0 }
 0x191   :  { %v2963_v41 = vpack.c.b16 %v2938_v57, %v2937_v54  ;;  %vm12643_vm13 = vnez %v12642_v63  ;;  %vm12645_vm9 = vnez %v12644_v28  ;;  %vm12648_vm8 = vnez %v12647_v26  ;;  %12649 = vst [vmem:[#allocation114_spill] sm:$0xff] %v8404_v34  ;;  %v12730_v63 = vld [vmem:[#allocation135_spill] sm:$0xff] }
 0x192   :  { %v2020_v12 = vsel %vm12643_vm13, %v12641_v2, 0  ;;  %v2021_v14 = vsel %vm12645_vm9, %v8084_v31, 0  ;;  %v2022_v56 = vsel %vm12648_vm8, %v8105_v43, 0  ;;  %v2023_v57 = vsel %vm8068_vm3, %v8156_v61, 0  ;;  %12650 = vst [vmem:[#allocation146_spill] sm:$0xff] %v8407_v36  ;;  %vm12654_vm3 = vmmov %vm12651_vm6 }
 0x193   :  { %3012 = vrot.lane.b32.xlu0 %v2979_v37, %s6284_s26  ;;  %v2984_v54 = vrot.slane %v2962_v7, 5  ;;  %v2941_v25 = vunpack.c.l.b16 %v2020_v12  ;;  %v2942_v29 = vunpack.c.l.b16 %v2021_v14  ;;  %v2943_v18 = vunpack.c.l.b16 %v2022_v56  ;;  %v12724_v7 = vld [vmem:[#allocation127_spill] sm:$0xff] }
 0x194   :  { %3014 = vrot.lane.b32.xlu1 %v2981_v13, %s6284_s26  ;;  %v2944_v53 = vunpack.c.l.b16 %v2023_v57  ;;  %v2983_v6 = vsel %vm12651_vm6, %v2980_v1, %v2982_v3  ;;  %v2986_v26 = vrot.slane %v2963_v41, 5  ;;  %v2964_v28 = vpack.c.b16 %v2940_v44, %v2939_v55  ;;  %vm12656_vm6 = vmmov %vm12654_vm3 }
 0x195   :  { %vm12652_vm0 = vnez %v12557_v15  ;;  %v2025_v37 = vsel %vm8141_vm2, %v8226_v16, 0  ;;  %v2985_v13 = vsel %vm12654_vm3, %v2982_v3, %v2984_v54  ;;  %v2965_v12 = vpack.c.b16 %v2942_v29, %v2941_v25 }
 0x196   :  { %v2024_v11 = vsel %vm12652_vm0, %v8175_v8, 0  ;;  %v2966_v14 = vpack.c.b16 %v2944_v53, %v2943_v18  ;;  %v2026_v1 = vsel %vm8167_vm14, %v8243_v45, 0  ;;  %v2027_v41 = vsel %vm8215_vm12, %v8261_v38, 0 }
 0x197   :  { %v2987_v55 = vsel %vm12656_vm6, %v2984_v54, %v2986_v26  ;;  %v2988_v44 = vrot.slane %v2964_v28, 5  ;;  %v2945_v57 = vunpack.c.l.b16 %v2024_v11  ;;  %v2946_v36 = vunpack.c.l.b16 %v2025_v37  ;;  %v8432_v18 = vpop.permute.xlu0 %2713 }
 0x198   :  { %3016 = vrot.lane.b32.xlu2 %v2983_v6, %s6284_s26  ;;  %v2028_v3 = vsel %vm8231_vm11, %v8274_v20, 0  ;;  %v2029_v6 = vsel %vm8250_vm5, %v8291_v42, 0  ;;  %v2947_v25 = vunpack.c.l.b16 %v2026_v1  ;;  %v2948_v29 = vunpack.c.l.b16 %v2027_v41  ;;  %12657 = vst [vmem:[#allocation147_spill] sm:$0xff] %v8432_v18  ;;  %v8436_v37 = vpop.permute.xlu2 %2729  ;;  %v8444_v41 = vpop.permute.xlu1 %2715  ;;  %vm12663_vm5 = vmmov %vm12654_vm3 }
 0x199   :  { %v2990_v54 = vrot.slane %v2965_v12, 5  ;;  %v2992_v28 = vrot.slane %v2966_v14, 5  ;;  %v2989_v11 = vsel %vm12654_vm3, %v2986_v26, %v2988_v44  ;;  %v2967_v53 = vpack.c.b16 %v2946_v36, %v2945_v57  ;;  %12658 = vst [vmem:[#allocation148_spill] sm:$0xff] %v8436_v37  ;;  %v2001_v26 = vld [vmem:[%s11783_s0 + $0x8c] sm:$0x1]  ;;  %v12665_v57 = vld [vmem:[#allocation121_spill] sm:$0xff] }
 0x19a   :  { %v2949_v34 = vunpack.c.l.b16 %v2028_v3  ;;  %v2950_v48 = vunpack.c.l.b16 %v2029_v6  ;;  %v2030_v46 = vsel %vm8266_vm15, %v12659_v32, 0  ;;  %vm12661_vm6 = vnez %v12601_v47  ;;  %12662 = vst [vmem:[#allocation149_spill] sm:$0xff] %v8444_v41  ;;  %v8455_v14 = vld [vmem:[%s11783_s0 + $0x84] sm:$0xf]  ;;  %v8463_v6 = vld [vmem:[%s11783_s0 + $0x88] sm:$0xf] }
 0x19b   :  { %3018 = vrot.lane.b32.xlu0 %v2985_v13, %s6284_s26  ;;  %v12660_v13 = vld [vmem:[#allocation128_spill] sm:$0xff]  ;;  %v2991_v36 = vsel %vm12654_vm3, %v2988_v44, %v2990_v54  ;;  %v2993_v12 = vsel %vm12663_vm5, %v2990_v54, %v2992_v28  ;;  %12664 = vst [vmem:[#allocation150_spill] sm:$0xff] %v8455_v14  ;;  %v2034_v18 = vsel %vm8312_vm7, %v2001_v26, 0  ;;  %vm12669_vm5 = vmmov %vm12654_vm3  ;;  %v8508_v26 = vld [vmem:[%s11783_s0 + $0x24] sm:$0xf] }
 0x19c   :  { %3020 = vrot.lane.b32.xlu1 %v2987_v55, %s6284_s26  ;;  %v2031_v1 = vsel %vm12661_vm6, %v12660_v13, 0  ;;  %v2968_v55 = vpack.c.b16 %v2948_v29, %v2947_v25  ;;  %vm12666_vm6 = vnez %v12665_v57  ;;  %v12667_v25 = vld [vmem:[#allocation123_spill] sm:$0xff]  ;;  %v2994_v29 = vrot.slane %v2967_v53, 5 }
 0x19d   :  { %v2032_v3 = vsel %vm12666_vm6, %v8455_v14, 0  ;;  %vm12668_vm15 = vnez %v12667_v25  ;;  %v2969_v54 = vpack.c.b16 %v2950_v48, %v2949_v34  ;;  %v2952_v41 = vunpack.c.l.b16 %v2031_v1  ;;  %v8481_v1 = vld [vmem:[%s11783_s0 + $0x14] sm:$0xf] }
 0x19e   :  { %v2033_v44 = vsel %vm12668_vm15, %v8463_v6, 0  ;;  %v2996_v37 = vrot.slane %v2968_v55, 5  ;;  %v2953_v47 = vunpack.c.l.b16 %v2032_v3  ;;  %v2995_v14 = vsel %vm12669_vm5, %v2992_v28, %v2994_v29 }
 0x19f   :  { %v2954_v51 = vunpack.c.l.b16 %v2033_v44  ;;  %v2998_v13 = vrot.slane %v2969_v54, 5  ;;  %v8473_v42 = vpop.permute.xlu0 %2719  ;;  %v2955_v53 = vunpack.c.l.b16 %v2034_v18  ;;  %v2036_v55 = vsel %vm7456_vm1, %v8481_v1, 0  ;;  %v8492_v18 = vld [vmem:[%s11783_s0 + $0x1c] sm:$0xf] }
 0x1a0   :  { %3022 = vrot.lane.b32.xlu2 %v2989_v11, %s6284_s26  ;;  %v2951_v11 = vunpack.c.l.b16 %v2030_v46  ;;  %12670 = vst [vmem:[#allocation151_spill] sm:$0xff] %v8473_v42  ;;  %v2997_v48 = vsel %vm12654_vm3, %v2994_v29, %v2996_v37  ;;  %v8476_v46 = vpop.permute.xlu2 %2735  ;;  %v8487_v28 = vpop.permute.xlu1 %2721  ;;  %vm12673_vm5 = vnez %v12443_v52  ;;  %vm12674_vm3 = vnez %v12450_v19  ;;  %v8520_v29 = vld [vmem:[%s11783_s0 + $0x18] sm:$0xf] }
 0x1a1   :  { %12671 = vst [vmem:[#allocation152_spill] sm:$0xff] %v8476_v46  ;;  %v2971_v34 = vpack.c.b16 %v2954_v51, %v2953_v47  ;;  %v2038_v51 = vsel %vm7543_vm10, %v8492_v18, 0  ;;  %v8500_v47 = vld [vmem:[%s11783_s0 + $0x20] sm:$0xf]  ;;  %vm12675_vm10 = vnez %v12454_v10  ;;  %vm12676_vm1 = vcmask 1042432   ;;  %v12806_v46 = vld [vmem:[#allocation43_spill] sm:$0xff] }
 0x1a2   :  { %v2970_v32 = vpack.c.b16 %v2952_v41, %v2951_v11  ;;  %12672 = vst [vmem:[#allocation153_spill] sm:$0xff] %v8487_v28  ;;  %v2039_v41 = vsel %vm12673_vm5, %v8500_v47, 0  ;;  %v2972_v44 = vpack.c.b16 %v2955_v53, %v2955_v53  ;;  %vm12677_vm5 = vnez %v12427_v62 }
 0x1a3   :  { %3024 = vrot.lane.b32.xlu0 %v2991_v36, %s6284_s26  ;;  %v2040_v36 = vsel %vm12674_vm3, %v8508_v26, 0  ;;  %v2037_v54 = vsel %vm12677_vm5, %v8520_v29, 0  ;;  %v3073_v11 = vunpack.c.l.b16 %v2036_v55  ;;  %v3075_v19 = vunpack.c.l.b16 %v2038_v51 }
 0x1a4   :  { %3026 = vrot.lane.b32.xlu1 %v2993_v12, %s6284_s26  ;;  %v2041_v12 = vsel %vm12675_vm10, %v7740_v49, 0  ;;  %v3000_v3 = vrot.slane %v2970_v32, 5  ;;  %v3076_v52 = vunpack.c.l.b16 %v2039_v41  ;;  %v3077_v10 = vunpack.c.l.b16 %v2040_v36 }
 0x1a5   :  { %v3078_v49 = vunpack.c.l.b16 %v2041_v12  ;;  %v3002_v32 = vrot.slane %v2971_v34, 5  ;;  %vm12679_vm10 = vnez %v12467_v33  ;;  %vm12680_vm3 = vcmask 1042432  }
 0x1a6   :  { %v2043_v21 = vsel %vm12679_vm10, %v7806_v60, 0  ;;  %v3001_v55 = vsel %vm12680_vm3, %v2998_v13, %v3000_v3  ;;  %v3004_v62 = vrot.slane %v2972_v44, 5  ;;  %vm12682_vm5 = vmmov %vm12680_vm3  ;;  %vm12685_vm10 = vnez %v12471_v24 }
 0x1a7   :  { %v8534_v51 = vpop.permute.xlu0 %2725  ;;  %v3108_v41 = vpack.c.b16 %v3078_v49, %v3077_v10  ;;  %v3080_v12 = vunpack.c.l.b16 %v2043_v21  ;;  %v3003_v34 = vsel %vm12682_vm5, %v3000_v3, %v3002_v32  ;;  %vm12683_vm7 = vmmov %vm12680_vm3  ;;  %v2044_v60 = vsel %vm12685_vm10, %v7823_v35, 0  ;;  %v6219_v10 = vld [vmem:[%s11783_s0 + $0x8c] sm:$0xf] }
 0x1a8   :  { %3028 = vrot.lane.b32.xlu2 %v2995_v14, %s6284_s26  ;;  %v2999_v14 = vsel %vm12676_vm1, %v2996_v37, %v2998_v13  ;;  %v3074_v37 = vunpack.c.l.b16 %v2037_v54  ;;  %vm12678_vm1 = vnez %v12464_v4  ;;  %12681 = vst [vmem:[#allocation154_spill] sm:$0xff] %v8534_v51  ;;  %v8539_v54 = vpop.permute.xlu2 %2858  ;;  %vm12686_vm3 = vnez %v12475_v30 }
 0x1a9   :  { %v2042_v53 = vsel %vm12678_vm1, %v7770_v5, 0  ;;  %v3005_v5 = vsel %vm12683_vm7, %v3002_v32, %v3004_v62  ;;  %12684 = vst [vmem:[#allocation155_spill] sm:$0xff] %v8539_v54  ;;  %vm12688_vm1 = vnez %v12481_v22  ;;  %vm12689_vm5 = vnez %v12489_v40 }
 0x1aa   :  { %v3079_v36 = vunpack.c.l.b16 %v2042_v53  ;;  %v2046_v21 = vsel %vm12688_vm1, %v7899_v9, 0  ;;  %v2047_v62 = vsel %vm12689_vm5, %v7917_v23, 0  ;;  %v2066_v35 = vsel %vm12666_vm6, %v6219_v10, 0  ;;  %v6220_v9 = vld [vmem:[%s11783_s0 + $0x90] sm:$0xf] }
 0x1ab   :  { %3030 = vrot.lane.b32.xlu0 %v2997_v48, %s6284_s26  ;;  %v3107_v48 = vpack.c.b16 %v3076_v52, %v3075_v19  ;;  %v2045_v52 = vsel %vm12686_vm3, %v7884_v50, 0  ;;  %v8547_v19 = vpop.permute.xlu1 %2727  ;;  %v3126_v13 = vrot.slane %v3108_v41, 5  ;;  %v2067_v44 = vsel %vm12668_vm15, %v6220_v9, 0  ;;  %v12697_v10 = vld [vmem:[#allocation112_spill] sm:$0xff] }
 0x1ac   :  { %3032 = vrot.lane.b32.xlu1 %v2999_v14, %s6284_s26  ;;  %v3106_v14 = vpack.c.b16 %v3074_v37, %v3073_v11  ;;  %12687 = vst [vmem:[#allocation156_spill] sm:$0xff] %v8547_v19  ;;  %v3109_v3 = vpack.c.b16 %v3080_v12, %v3079_v36  ;;  %v3081_v49 = vunpack.c.l.b16 %v2044_v60  ;;  %v3082_v32 = vunpack.c.l.b16 %v2045_v52  ;;  %v12694_v52 = vld [vmem:[#allocation109_spill] sm:$0xff] }
 0x1ad   :  { %v3124_v50 = vrot.slane %v3107_v48, 5  ;;  %v3083_v37 = vunpack.c.l.b16 %v2046_v21  ;;  %v3084_v53 = vunpack.c.l.b16 %v2047_v62  ;;  %vm12690_vm7 = vnez %v12492_v27  ;;  %v12695_v21 = vld [vmem:[#allocation97_spill] sm:$0xff] }
 0x1ae   :  { %v3123_v11 = vrot.slane %v3106_v14, 5  ;;  %v8570_v48 = vunpack.c.l.b16 %v2066_v35  ;;  %vm12691_vm6 = vnez %v12505_v59  ;;  %v8575_v36 = vunpack.c.l.b16 %v2067_v44 }
 0x1af   :  { %v2049_v41 = vsel %vm12691_vm6, %v12629_v0, 0  ;;  %vm12692_vm15 = vcmask 1042432   ;;  %v3128_v14 = vrot.slane %v3109_v3, 5  ;;  %v2051_v0 = vsel %vm12631_vm4, %v12697_v10, 0  ;;  %v8586_v9 = vpop.permute.xlu0 %2731 }
 0x1b0   :  { %3034 = vrot.lane.b32.xlu2 %v3001_v55, %s6284_s26  ;;  %v2048_v55 = vsel %vm12690_vm7, %v7938_v17, 0  ;;  %v3125_v12 = vsel %vm12692_vm15, %v3123_v11, %v3124_v50  ;;  %vm12693_vm5 = vmmov %vm12692_vm15  ;;  %vm12696_vm7 = vnez %v12695_v21  ;;  %12699 = vst [vmem:[#allocation109_spill] sm:$0xff] %v8586_v9  ;;  %v3111_v44 = vpack.c.b16 %v3084_v53, %v3083_v37 }
 0x1b1   :  { %v3085_v60 = vunpack.c.l.b16 %v2048_v55  ;;  %v2050_v62 = vsel %vm12696_vm7, %v12694_v52, 0  ;;  %v3086_v25 = vunpack.c.l.b16 %v2049_v41  ;;  %v3088_v52 = vunpack.c.l.b16 %v2051_v0 }
 0x1b2   :  { %v3087_v55 = vunpack.c.l.b16 %v2050_v62  ;;  %vm12705_vm6 = vcmask 1042432   ;;  %v3132_v59 = vrot.slane %v3111_v44, 5  ;;  %v2055_v0 = vsel %vm12645_vm9, %v8156_v61, 0 }
 0x1b3   :  { %3036 = vrot.lane.b32.xlu0 %v3003_v34, %s6284_s26  ;;  %v3127_v34 = vsel %vm12693_vm5, %v3124_v50, %v3126_v13  ;;  %v12700_v50 = vld [vmem:[#allocation102_spill] sm:$0xff]  ;;  %v3129_v37 = vsel %vm12705_vm6, %v3126_v13, %v3128_v14  ;;  %v8601_v41 = vpop.permute.xlu1 %2733  ;;  %v3112_v27 = vpack.c.b16 %v3086_v25, %v3085_v60  ;;  %vm12708_vm1 = vmmov %vm12705_vm6  ;;  %v3092_v40 = vunpack.c.l.b16 %v2055_v0  ;;  %v12727_v25 = vld [vmem:[#allocation133_spill] sm:$0xff] }
 0x1b4   :  { %3038 = vrot.lane.b32.xlu1 %v3005_v5, %s6284_s26  ;;  %v3110_v5 = vpack.c.b16 %v3082_v32, %v3081_v49  ;;  %vm12701_vm15 = vnez %v12700_v50  ;;  %v8595_v32 = vpop.permute.xlu2 %2864  ;;  %12706 = vst [vmem:[#allocation157_spill] sm:$0xff] %v8601_v41  ;;  %v3113_v10 = vpack.c.b16 %v3088_v52, %v3087_v55  ;;  %vm12709_vm6 = vmmov %vm12708_vm1  ;;  %v2056_v60 = vsel %vm12648_vm8, %v8175_v8, 0 }
 0x1b5   :  { %v2052_v3 = vsel %vm12701_vm15, %v12641_v2, 0  ;;  %12704 = vst [vmem:[#allocation112_spill] sm:$0xff] %v8595_v32  ;;  %v3134_v44 = vrot.slane %v3112_v27, 5  ;;  %v2058_v61 = vsel %vm12652_vm0, %v8243_v45, 0  ;;  %v2060_v24 = vsel %vm8167_vm14, %v8274_v20, 0 }
 0x1b6   :  { %v3130_v53 = vrot.slane %v3110_v5, 5  ;;  %v3089_v2 = vunpack.c.l.b16 %v2052_v3  ;;  %v3095_v0 = vunpack.c.l.b16 %v2058_v61  ;;  %vm12722_vm10 = vcmask 1042432  }
 0x1b7   :  { %v8625_v27 = vpop.permute.xlu0 %2737  ;;  %v3097_v56 = vunpack.c.l.b16 %v2060_v24  ;;  %vm12742_vm14 = vcmask 1042432   ;;  %vm12751_vm8 = vnez %v12607_v58  ;;  %vm12771_vm4 = vcmask 1042432  }
 0x1b8   :  { %3156 = vrot.lane.b32.xlu2 %v3123_v11, %s6285_s27  ;;  %v12702_v11 = vld [vmem:[#allocation103_spill] sm:$0xff]  ;;  %v3131_v13 = vsel %vm12708_vm1, %v3128_v14, %v3130_v53  ;;  %v3133_v3 = vsel %vm12709_vm6, %v3130_v53, %v3132_v59  ;;  %v3136_v14 = vrot.slane %v3113_v10, 5  ;;  %12713 = vst [vmem:[#allocation158_spill] sm:$0xff] %v8625_v27  ;;  %v12716_v10 = vld [vmem:[#allocation138_spill] sm:$0xff]  ;;  %vm12773_vm7 = vmmov %vm12771_vm4 }
 0x1b9   :  { %vm12703_vm5 = vnez %v12702_v11 }
 0x1ba   :  { %v2053_v49 = vsel %vm12703_vm5, %v8084_v31, 0 }
 0x1bb   :  { %3158 = vrot.lane.b32.xlu0 %v3125_v12, %s6285_s27  ;;  %v3090_v57 = vunpack.c.l.b16 %v2053_v49  ;;  %v2054_v12 = vsel %vm12643_vm13, %v8105_v43, 0  ;;  %v12711_v49 = vld [vmem:[#allocation117_spill] sm:$0xff]  ;;  %vm12091_vm13 = vcmask 23552  }
 0x1bc   :  { %3160 = vrot.lane.b32.xlu1 %v3127_v34, %s6285_s27  ;;  %v3091_v5 = vunpack.c.l.b16 %v2054_v12  ;;  %vm12712_vm3 = vnez %v12711_v49  ;;  %v8629_v12 = vpop.permute.xlu2 %2870  ;;  %v2062_v49 = vsel %vm8231_vm11, %v12724_v7, 0 }
 0x1bd   :  { %v3114_v34 = vpack.c.b16 %v3090_v57, %v3089_v2  ;;  %v2057_v22 = vsel %vm12712_vm3, %v8226_v16, 0  ;;  %v2059_v57 = vsel %vm8141_vm2, %v8261_v38, 0  ;;  %v3135_v2 = vsel %vm12708_vm1, %v3132_v59, %v3134_v44  ;;  %12714 = vst [vmem:[#allocation159_spill] sm:$0xff] %v8629_v12  ;;  %v12720_v59 = vld [vmem:[#allocation7_spill] sm:$0xff]  ;;  %vm12723_vm2 = vmmov %vm12722_vm10 }
 0x1be   :  { %v3115_v52 = vpack.c.b16 %v3092_v40, %v3091_v5  ;;  %v3094_v53 = vunpack.c.l.b16 %v2057_v22  ;;  %v3096_v30 = vunpack.c.l.b16 %v2059_v57  ;;  %v12718_v40 = vld [vmem:[#allocation5_spill] sm:$0xff]  ;;  %vm12721_vm1 = vnez %v12720_v59  ;;  %v12818_v59 = vld [vmem:[#allocation28_spill] sm:$0xff] }
 0x1bf   :  { %v3138_v55 = vrot.slane %v3114_v34, 5  ;;  %vm12719_vm6 = vnez %v12718_v40  ;;  %v1222_v34 = vsel %vm12721_vm1, %v8508_v26, 0  ;;  %v3137_v5 = vsel %vm12722_vm10, %v3134_v44, %v3136_v14  ;;  %v12729_v44 = vld [vmem:[#allocation150_spill] sm:$0xff] }
 0x1c0   :  { %3162 = vrot.lane.b32.xlu2 %v3129_v37, %s6285_s27  ;;  %v3093_v37 = vunpack.c.l.b16 %v2056_v60  ;;  %v1221_v22 = vsel %vm12719_vm6, %v8500_v47, 0  ;;  %v3140_v61 = vrot.slane %v3115_v52, 5  ;;  %v3117_v4 = vpack.c.b16 %v3096_v30, %v3095_v0  ;;  %v12726_v47 = vld [vmem:[#allocation128_spill] sm:$0xff]  ;;  %v6221_v30 = vld [vmem:[%s11783_s0 + $0x2c] sm:$0xf]  ;;  %v12734_v52 = vld [vmem:[#allocation14_spill] sm:$0xff] }
 0x1c1   :  { %v3139_v60 = vsel %vm12723_vm2, %v3136_v14, %v3138_v55  ;;  %v2110_v26 = vunpack.c.l.b16 %v1221_v22  ;;  %v2111_v62 = vunpack.c.l.b16 %v1222_v34  ;;  %vm12731_vm10 = vnez %v12730_v63  ;;  %v12732_v14 = vld [vmem:[#allocation137_spill] sm:$0xff]  ;;  %v8682_v63 = vpop.permute.xlu0 %2860 }
 0x1c2   :  { %v3116_v57 = vpack.c.b16 %v3094_v53, %v3093_v37  ;;  %vm12733_vm2 = vnez %v12732_v14  ;;  %vm12735_vm11 = vnez %v12734_v52  ;;  %v6222_v37 = vld [vmem:[%s11783_s0 + $0x28] sm:$0xf]  ;;  %v12736_v53 = vld [vmem:[#allocation12_spill] sm:$0xff]  ;;  %12743 = vst [vmem:[#allocation138_spill] sm:$0xff] %v8682_v63  ;;  %vm12749_vm3 = vcmask 1042432  }
 0x1c3   :  { %3164 = vrot.lane.b32.xlu0 %v3131_v13, %s6285_s27  ;;  %v8634_v13 = vpop.permute.xlu1 %2856  ;;  %v2065_v24 = vsel %vm12733_vm2, %v8463_v6, 0  ;;  %v1224_v7 = vsel %vm12735_vm11, %v6221_v30, 0  ;;  %v12740_v6 = vld [vmem:[#allocation19_spill] sm:$0xff]  ;;  %vm12752_vm9 = vmmov %vm12749_vm3 }
 0x1c4   :  { %3166 = vrot.lane.b32.xlu1 %v3133_v3, %s6285_s27  ;;  %12715 = vst [vmem:[#allocation160_spill] sm:$0xff] %v8634_v13  ;;  %v2061_v3 = vsel %vm8215_vm12, %v12716_v10, 0  ;;  %vm12728_vm12 = vnez %v12727_v25  ;;  %vm12741_vm2 = vnez %v12740_v6  ;;  %v3142_v30 = vrot.slane %v3116_v57, 5 }
 0x1c5   :  { %v3098_v33 = vunpack.c.l.b16 %v2061_v3  ;;  %v2063_v39 = vsel %vm12728_vm12, %v12726_v47, 0  ;;  %vm12737_vm12 = vnez %v12736_v53  ;;  %v12738_v3 = vld [vmem:[#allocation18_spill] sm:$0xff]  ;;  %v1230_v34 = vsel %vm12741_vm2, %v7938_v17, 0  ;;  %v2035_v17 = vld [vmem:[%s11783_s0 + $0x94] sm:$0x1] }
 0x1c6   :  { %v1223_v0 = vsel %vm12737_vm12, %v6222_v37, 0  ;;  %v499_v47 = vld [vmem:[%s11783_s0] sm:$0x8]  ;;  %v3099_v37 = vunpack.c.l.b16 %v2062_v49  ;;  %v3100_v14 = vunpack.c.l.b16 %v2063_v39  ;;  %v3102_v11 = vunpack.c.l.b16 %v2065_v24  ;;  %v6223_v39 = vld [vmem:[%s11783_s0 + $0x4] sm:$0xf] }
 0x1c7   :  { %v3118_v25 = vpack.c.b16 %v3098_v33, %v3097_v56  ;;  %v2112_v50 = vunpack.c.l.b16 %v1223_v0  ;;  %v2119_v21 = vunpack.c.l.b16 %v1230_v34  ;;  %v12746_v49 = vld [vmem:[#allocation6_spill] sm:$0xff]  ;;  %v8694_v33 = vpop.permute.xlu2 %2876  ;;  %v3143_v56 = vsel %vm12749_vm3, %v3140_v61, %v3142_v30 }
 0x1c8   :  { %3168 = vrot.lane.b32.xlu2 %v3135_v2, %s6285_s27  ;;  %v2064_v2 = vsel %vm12731_vm10, %v12729_v44, 0  ;;  %vm12739_vm10 = vnez %v12738_v3  ;;  %v3141_v44 = vsel %vm12742_vm14, %v3138_v55, %v3140_v61  ;;  %vm12747_vm14 = vnez %v12746_v49  ;;  %12748 = vst [vmem:[#allocation127_spill] sm:$0xff] %v8694_v33 }
 0x1c9   :  { %v1229_v22 = vsel %vm12739_vm10, %v7917_v23, 0  ;;  %v3144_v23 = vrot.slane %v3117_v4, 5  ;;  %v3101_v15 = vunpack.c.l.b16 %v2064_v2  ;;  %v1214_v4 = vsel %vm12747_vm14, %v6223_v39, 0 }
 0x1ca   :  { %v2118_v35 = vunpack.c.l.b16 %v1229_v22  ;;  %v3119_v2 = vpack.c.b16 %v3100_v14, %v3099_v37  ;;  %v2068_v24 = vsel %vm12751_vm8, %v2035_v17, 0  ;;  %v3146_v22 = vrot.slane %v3118_v25, 5  ;;  %v6224_v14 = vld [vmem:[%s11783_s0 + $0x10] sm:$0xf]  ;;  %v12760_v17 = vld [vmem:[#allocation30_spill] sm:$0xff] }
 0x1cb   :  { %3170 = vrot.lane.b32.xlu0 %v3137_v5, %s6285_s27  ;;  %v2113_v5 = vunpack.c.l.b16 %v1224_v7  ;;  %v8698_v57 = vpop.permute.xlu1 %2862  ;;  %v2139_v7 = vpack.c.b16 %v2111_v62, %v2110_v26  ;;  %v3145_v0 = vsel %vm12752_vm9, %v3142_v30, %v3144_v23  ;;  %v3120_v34 = vpack.c.b16 %v3102_v11, %v3101_v15  ;;  %v12753_v62 = vld [vmem:[#allocation8_spill] sm:$0xff]  ;;  %v12755_v15 = vld [vmem:[#allocation9_spill] sm:$0xff]  ;;  %v12759_v30 = vld [vmem:[#allocation26_spill] sm:$0xff] }
 0x1cc   :  { %3172 = vrot.lane.b32.xlu1 %v3139_v60, %s6285_s27  ;;  %v12744_v60 = vld [vmem:[#allocation4_spill] sm:$0xff]  ;;  %12750 = vst [vmem:[#allocation128_spill] sm:$0xff] %v8698_v57  ;;  %v2143_v63 = vpack.c.b16 %v2119_v21, %v2118_v35  ;;  %v2103_v13 = vunpack.c.l.b16 %v1214_v4  ;;  %v3148_v61 = vrot.slane %v3119_v2, 5  ;;  %vm12754_vm3 = vnez %v12753_v62  ;;  %v12762_v4 = vld [vmem:[#allocation25_spill] sm:$0xff]  ;;  %v6225_v2 = vld [vmem:[%s11783_s0 + $0x8] sm:$0xf] }
 0x1cd   :  { %vm12745_vm0 = vnez %v12744_v60  ;;  %v1217_v26 = vsel %vm12754_vm3, %v6224_v14, 0  ;;  %vm12756_vm9 = vnez %v12755_v15  ;;  %vm12757_vm8 = vcmask 1042432   ;;  %v12758_v11 = vld [vmem:[#allocation24_spill] sm:$0xff] }
 0x1ce   :  { %v1213_v55 = vsel %vm12745_vm0, %v499_v47, 0  ;;  %v2140_v47 = vpack.c.b16 %v2113_v5, %v2112_v50  ;;  %v1218_v21 = vsel %vm12756_vm9, %v8481_v1, 0  ;;  %v3147_v35 = vsel %vm12757_vm8, %v3144_v23, %v3146_v22  ;;  %v8729_v1 = vld [vmem:[%s11783_s0 + $0xa4] sm:$0xf]  ;;  %v3955_v23 = vld [vmem:[%s11783_s0 + $0xa0] sm:$0x8] }
 0x1cf   :  { %v2102_v39 = vunpack.c.l.b16 %v1213_v55  ;;  %v3150_v50 = vrot.slane %v3120_v34, 5  ;;  %v8716_v25 = vsel %vm12091_vm13, %v2139_v7, %v12758_v11  ;;  %v8724_v5 = vsel %vm12091_vm13, %v2143_v63, %v12760_v17  ;;  %12761 = vst [vmem:[#allocation150_spill] sm:$0xff] %v8729_v1  ;;  %v12764_v63 = vld [vmem:[#allocation10_spill] sm:$0xff]  ;;  %v12766_v7 = vld [vmem:[#allocation11_spill] sm:$0xff]  ;;  %v8747_v34 = vpop.permute.xlu0 %2866 }
 0x1d0   :  { %3174 = vrot.lane.b32.xlu2 %v3141_v44, %s6285_s27  ;;  %v3105_v44 = vunpack.c.l.b16 %v2068_v24  ;;  %v8720_v37 = vsel %vm12091_vm13, %v2140_v47, %v12759_v30  ;;  %vm12763_vm8 = vnez %v12762_v4  ;;  %vm12765_vm13 = vnez %v12764_v63  ;;  %v6226_v24 = vld [vmem:[%s11783_s0 + $0xc] sm:$0xf]  ;;  %12768 = vst [vmem:[#allocation24_spill] sm:$0xff] %v8747_v34 }
 0x1d1   :  { %v2135_v55 = vpack.c.b16 %v2103_v13, %v2102_v39  ;;  %v1215_v13 = vsel %vm12765_vm13, %v6225_v2, 0  ;;  %vm12767_vm5 = vnez %v12766_v7  ;;  %v12769_v39 = vld [vmem:[#allocation27_spill] sm:$0xff]  ;;  %v2106_v14 = vunpack.c.l.b16 %v1217_v26 }
 0x1d2   :  { %v3122_v47 = vpack.c.b16 %v3105_v44, %v3105_v44  ;;  %vm12770_vm15 = vnez %v12769_v39  ;;  %v2107_v11 = vunpack.c.l.b16 %v1218_v21  ;;  %v3149_v30 = vsel %vm12771_vm4, %v3146_v22, %v3148_v61  ;;  %v3893_v26 = vld [vmem:[%s11783_s0 + $0xa8] sm:$0xf] }
 0x1d3   :  { %3176 = vrot.lane.b32.xlu0 %v3143_v56, %s6285_s27  ;;  %v1235_v56 = vsel %vm12763_vm8, %v8084_v31, 0  ;;  %v1236_v31 = vsel %vm12770_vm15, %v8105_v43, 0  ;;  %v3151_v2 = vsel %vm12773_vm7, %v3148_v61, %v3150_v50  ;;  %v3958_v44 = vsel %vm12745_vm0, %v3955_v23, 0  ;;  %v12775_v61 = vld [vmem:[#allocation15_spill] sm:$0xff]  ;;  %v8778_v23 = vpop.permute.xlu1 %2868 }
 0x1d4   :  { %3178 = vrot.lane.b32.xlu1 %v3145_v0, %s6285_s27  ;;  %v1216_v0 = vsel %vm12767_vm5, %v6226_v24, 0  ;;  %v12774_v24 = vpack.c.b16 %v8575_v36, %v8570_v48  ;;  %v3959_v43 = vsel %vm12747_vm14, %v8729_v1, 0  ;;  %v8768_v22 = vunpack.c.l.b16 %v1215_v13  ;;  %v12777_v36 = vld [vmem:[#allocation13_spill] sm:$0xff]  ;;  %12779 = vst [vmem:[#allocation30_spill] sm:$0xff] %v8778_v23  ;;  %v12782_v1 = vld [vmem:[#allocation34_spill] sm:$0xff] }
 0x1d5   :  { %v8770_v21 = vunpack.c.l.b16 %v1216_v0  ;;  %vm12776_vm4 = vnez %v12775_v61  ;;  %vm12778_vm7 = vnez %v12777_v36  ;;  %vm12781_vm14 = vcmask 23552  }
 0x1d6   :  { %v3152_v58 = vrot.slane %v12774_v24, 5  ;;  %v1220_v48 = vsel %vm12776_vm4, %v8492_v18, 0  ;;  %v8783_v24 = vld [vmem:[%s11783_s0 + $0xac] sm:$0xf]  ;;  %v8789_v0 = vunpack.c.l.b16 %v1235_v56  ;;  %vm12783_vm0 = vnez %v12782_v1 }
 0x1d7   :  { %v1241_v18 = vsel %vm12783_vm0, %v8261_v38, 0  ;;  %v8795_v34 = vunpack.c.l.b16 %v1236_v31  ;;  %v4245_v23 = vunpack.c.l.b16 %v3958_v44  ;;  %v4246_v57 = vunpack.c.l.b16 %v3959_v43  ;;  %v8812_v31 = vld [vmem:[%s11783_s0 + $0xb4] sm:$0xf]  ;;  %v8851_v32 = vpop.permute.xlu0 %2872 }
 0x1d8   :  { %3180 = vrot.lane.b32.xlu2 %v3147_v35, %s6285_s27  ;;  %v8754_v17 = vpop.permute.xlu2 %2882  ;;  %v1219_v35 = vsel %vm12778_vm7, %v8520_v29, 0  ;;  %v3154_v29 = vrot.slane %v3122_v47, 5  ;;  %v3960_v33 = vsel %vm12765_vm13, %v3893_v26, 0  ;;  %v3961_v38 = vsel %vm12767_vm5, %v8783_v24, 0  ;;  %v8807_v47 = vld [vmem:[%s11783_s0 + $0xb0] sm:$0xf] }
 0x1d9   :  { %12772 = vst [vmem:[#allocation26_spill] sm:$0xff] %v8754_v17  ;;  %v12780_v17 = vld [vmem:[#allocation32_spill] sm:$0xff]  ;;  %v8819_v43 = vunpack.c.l.b16 %v1241_v18  ;;  %v8824_v26 = vld [vmem:[%s11783_s0 + $0xb8] sm:$0xf]  ;;  %v4247_v27 = vunpack.c.l.b16 %v3960_v33  ;;  %v4278_v12 = vpack.c.b16 %v4246_v57, %v4245_v23  ;;  %v4248_v41 = vunpack.c.l.b16 %v3961_v38  ;;  %v8862_v57 = vld [vmem:[%s11783_s0 + $0xc0] sm:$0xf] }
 0x1da   :  { %v8787_v13 = vsel %vm12781_vm14, %v2135_v55, %v12780_v17  ;;  %v2109_v55 = vunpack.c.l.b16 %v1220_v48  ;;  %v2108_v17 = vunpack.c.l.b16 %v1219_v35  ;;  %vm12784_vm14 = vcmask 1042432   ;;  %12785 = vst [vmem:[#allocation32_spill] sm:$0xff] %v8812_v31  ;;  %v8829_v48 = vld [vmem:[%s11783_s0 + $0xbc] sm:$0xf] }
 0x1db   :  { %3182 = vrot.lane.b32.xlu0 %v3149_v30, %s6285_s27  ;;  %v3153_v56 = vsel %vm12784_vm14, %v3150_v50, %v3152_v58  ;;  %v2137_v30 = vpack.c.b16 %v2107_v11, %v2106_v14  ;;  %v12786_v50 = vld [vmem:[#allocation37_spill] sm:$0xff]  ;;  %12788 = vst [vmem:[#allocation161_spill] sm:$0xff] %v8824_v26  ;;  %v6227_v14 = vld [vmem:[%s11783_s0 + $0x30] sm:$0xf]  ;;  %v3962_v9 = vsel %vm12754_vm3, %v8807_v47, 0  ;;  %v3965_v33 = vsel %vm12776_vm4, %v8829_v48, 0  ;;  %v8893_v54 = vpop.permute.xlu1 %2874 }
 0x1dc   :  { %3184 = vrot.lane.b32.xlu1 %v3151_v2, %s6285_s27  ;;  %v2136_v2 = vpack.c.b16 %v8770_v21, %v8768_v22  ;;  %vm12787_vm14 = vnez %v12786_v50  ;;  %12789 = vst [vmem:[#allocation162_spill] sm:$0xff] %v8829_v48  ;;  %v12790_v11 = vld [vmem:[#allocation16_spill] sm:$0xff]  ;;  %v12792_v21 = vld [vmem:[#allocation17_spill] sm:$0xff]  ;;  %v2138_v51 = vpack.c.b16 %v2109_v55, %v2108_v17  ;;  %v2146_v23 = vpack.c.b16 %v8795_v34, %v8789_v0 }
 0x1dd   :  { %v1242_v44 = vsel %vm12787_vm14, %v8274_v20, 0  ;;  %vm12791_vm5 = vnez %v12790_v11  ;;  %v6228_v20 = vld [vmem:[%s11783_s0 + $0x34] sm:$0xf]  ;;  %vm12793_vm13 = vnez %v12792_v21  ;;  %vm12794_vm14 = vcmask 1042432   ;;  %12795 = vst [vmem:[#allocation163_spill] sm:$0xff] %v8851_v32 }
 0x1de   :  { %v1225_v22 = vsel %vm12791_vm5, %v6227_v14, 0  ;;  %v1226_v35 = vsel %vm12793_vm13, %v6228_v20, 0  ;;  %v3155_v18 = vsel %vm12794_vm14, %v3152_v58, %v3154_v29  ;;  %v3963_v14 = vsel %vm12756_vm9, %v8812_v31, 0  ;;  %12796 = vst [vmem:[#allocation164_spill] sm:$0xff] %v8862_v57  ;;  %v12797_v29 = vld [vmem:[#allocation42_spill] sm:$0xff]  ;;  %v12801_v34 = vld [vmem:[#allocation20_spill] sm:$0xff] }
 0x1df   :  { %v8849_v19 = vunpack.c.l.b16 %v1242_v44  ;;  %v3964_v58 = vsel %vm12778_vm7, %v8824_v26, 0  ;;  %vm12798_vm14 = vcmask 23552   ;;  %v8870_v17 = vunpack.c.l.b16 %v1225_v22  ;;  %v8879_v44 = vld [vmem:[%s11783_s0 + $0xc4] sm:$0xf]  ;;  %v6229_v20 = vld [vmem:[%s11783_s0 + $0x38] sm:$0xf] }
 0x1e0   :  { %3186 = vrot.lane.b32.xlu2 %v3153_v56, %s6285_s27  ;;  %v8868_v55 = vsel %vm12798_vm14, %v2137_v30, %v12797_v29  ;;  %v8872_v56 = vunpack.c.l.b16 %v1226_v35  ;;  %12800 = vst [vmem:[#allocation165_spill] sm:$0xff] %v8879_v44  ;;  %vm12802_vm4 = vnez %v12801_v34  ;;  %v6230_v30 = vld [vmem:[%s11783_s0 + $0x3c] sm:$0xf]  ;;  %v4249_v29 = vunpack.c.l.b16 %v3962_v9 }
 0x1e1   :  { %v1227_v0 = vsel %vm12802_vm4, %v6229_v20, 0  ;;  %v12803_v22 = vld [vmem:[#allocation21_spill] sm:$0xff]  ;;  %v4279_v32 = vpack.c.b16 %v4248_v41, %v4247_v27  ;;  %12805 = vst [vmem:[#allocation166_spill] sm:$0xff] %v8893_v54  ;;  %v4251_v28 = vunpack.c.l.b16 %v3964_v58  ;;  %v4252_v42 = vunpack.c.l.b16 %v3965_v33  ;;  %v8914_v27 = vld [vmem:[%s11783_s0 + $0xc8] sm:$0xf]  ;;  %v12812_v58 = vld [vmem:[#allocation22_spill] sm:$0xff] }
 0x1e2   :  { %v8874_v38 = vpop.permute.xlu2 %2888  ;;  %vm12804_vm14 = vnez %v12803_v22  ;;  %v3966_v20 = vsel %vm12719_vm6, %v8862_v57, 0  ;;  %vm12807_vm7 = vcmask 23552   ;;  %v12808_v9 = vld [vmem:[#allocation45_spill] sm:$0xff]  ;;  %v3967_v41 = vsel %vm12721_vm1, %v8879_v44, 0  ;;  %12810 = vst [vmem:[#allocation43_spill] sm:$0xff] %v8914_v27 }
 0x1e3   :  { %12799 = vst [vmem:[#allocation42_spill] sm:$0xff] %v8874_v38  ;;  %v1228_v35 = vsel %vm12804_vm14, %v6230_v30, 0  ;;  %3188 = vrot.lane.b32.xlu0 %v3155_v18, %s6285_s27  ;;  %v4250_v38 = vunpack.c.l.b16 %v3963_v14  ;;  %v8900_v61 = vsel %vm12807_vm7, %v2136_v2, %v12806_v46  ;;  %vm12809_vm9 = vmmov %vm12807_vm7  ;;  %v8919_v46 = vld [vmem:[%s11783_s0 + $0xcc] sm:$0xf]  ;;  %v6233_v54 = vld [vmem:[%s11783_s0 + $0x50] sm:$0xf]  ;;  %vm12819_vm1 = vnez %v12818_v59 }
 0x1e4   :  { %4295 = vrot.lane.b32.xlu1 %v4278_v12, %s6278_s24  ;;  %v8906_v14 = vsel %vm12809_vm9, %v2138_v51, %v12808_v9  ;;  %12811 = vst [vmem:[#allocation45_spill] sm:$0xff] %v8919_v46  ;;  %v8921_v12 = vunpack.c.l.b16 %v1227_v0  ;;  %v8923_v2 = vunpack.c.l.b16 %v1228_v35  ;;  %v6231_v51 = vld [vmem:[%s11783_s0 + $0x48] sm:$0xf]  ;;  %vm12813_vm9 = vnez %v12812_v58  ;;  %v6232_v30 = vld [vmem:[%s11783_s0 + $0x4c] sm:$0xf]  ;;  %v12849_v58 = vld [vmem:[#allocation48_spill] sm:$0xff] }
 0x1e5   :  { %v1231_v33 = vsel %vm12813_vm9, %v6231_v51, 0  ;;  %v12814_v9 = vld [vmem:[#allocation23_spill] sm:$0xff]  ;;  %v8938_v0 = vld [vmem:[%s11783_s0 + $0xd0] sm:$0xf]  ;;  %v8943_v35 = vld [vmem:[%s11783_s0 + $0xd4] sm:$0xf]  ;;  %v4280_v40 = vpack.c.b16 %v4250_v38, %v4249_v29  ;;  %v4253_v44 = vunpack.c.l.b16 %v3966_v20  ;;  %v4281_v36 = vpack.c.b16 %v4252_v42, %v4251_v28 }
 0x1e6   :  { %vm12815_vm7 = vnez %v12814_v9  ;;  %12816 = vst [vmem:[#allocation167_spill] sm:$0xff] %v8938_v0  ;;  %v4254_v57 = vunpack.c.l.b16 %v3967_v41  ;;  %v3968_v15 = vsel %vm12737_vm12, %v8914_v27, 0  ;;  %v3969_v51 = vsel %vm12735_vm11, %v8919_v46, 0  ;;  %v8972_v28 = vld [vmem:[%s11783_s0 + $0xd8] sm:$0xf] }
 0x1e7   :  { %v1232_v18 = vsel %vm12815_vm7, %v6232_v30, 0  ;;  %12817 = vst [vmem:[#allocation168_spill] sm:$0xff] %v8943_v35  ;;  %v1233_v30 = vsel %vm12819_vm1, %v6233_v54, 0  ;;  %v8959_v48 = vunpack.c.l.b16 %v1231_v33  ;;  %v3970_v54 = vsel %vm12791_vm5, %v8938_v0, 0  ;;  %v6234_v20 = vld [vmem:[%s11783_s0 + $0x54] sm:$0xf] }
 0x1e8   :  { %4297 = vrot.lane.b32.xlu2 %v4279_v32, %s6278_s24  ;;  %v8961_v62 = vunpack.c.l.b16 %v1232_v18  ;;  %v3971_v42 = vsel %vm12793_vm13, %v8943_v35, 0  ;;  %12820 = vst [vmem:[#allocation169_spill] sm:$0xff] %v8972_v28  ;;  %v12821_v32 = vld [vmem:[#allocation35_spill] sm:$0xff]  ;;  %vm12822_vm12 = vcmask 23552   ;;  %v2142_v29 = vpack.c.b16 %v8923_v2, %v8921_v12  ;;  %v12823_v18 = vld [vmem:[#allocation29_spill] sm:$0xff] }
 0x1e9   :  { %v8976_v38 = vsel %vm12822_vm12, %v2146_v23, %v12821_v32  ;;  %vm12824_vm5 = vnez %v12823_v18  ;;  %v8985_v33 = vunpack.c.l.b16 %v1233_v30  ;;  %v8992_v11 = vld [vmem:[%s11783_s0 + $0xdc] sm:$0xf]  ;;  %v6235_v23 = vld [vmem:[%s11783_s0 + $0x60] sm:$0xf]  ;;  %v12827_v12 = vld [vmem:[#allocation31_spill] sm:$0xff]  ;;  %v4256_v52 = vunpack.c.l.b16 %v3969_v51 }
 0x1ea   :  { %v1234_v41 = vsel %vm12824_vm5, %v6234_v20, 0  ;;  %v8987_v21 = vpop.permute.xlu2 %3010  ;;  %12826 = vst [vmem:[#allocation170_spill] sm:$0xff] %v8992_v11  ;;  %vm12828_vm13 = vnez %v12827_v12  ;;  %v12829_v32 = vld [vmem:[#allocation33_spill] sm:$0xff]  ;;  %v9003_v20 = vpop.permute.xlu0 %2878  ;;  %v4282_v35 = vpack.c.b16 %v4254_v57, %v4253_v44  ;;  %v4257_v53 = vunpack.c.l.b16 %v3970_v54  ;;  %v9025_v57 = vld [vmem:[%s11783_s0 + $0xe4] sm:$0xf]  ;;  %v12837_v51 = vld [vmem:[#allocation40_spill] sm:$0xff] }
 0x1eb   :  { %12825 = vst [vmem:[#allocation35_spill] sm:$0xff] %v8987_v21  ;;  %v1237_v2 = vsel %vm12828_vm13, %v6235_v23, 0  ;;  %vm12830_vm11 = vnez %v12829_v32  ;;  %4299 = vrot.lane.b32.xlu0 %v4280_v40, %s6278_s24  ;;  %v4255_v21 = vunpack.c.l.b16 %v3968_v15  ;;  %v4258_v0 = vunpack.c.l.b16 %v3971_v42  ;;  %v9087_v9 = vld [vmem:[%s11783_s0 + $0xf4] sm:$0xf]  ;;  %v12873_v32 = vld [vmem:[#allocation59_spill] sm:$0xff] }
 0x1ec   :  { %v1238_v30 = vsel %vm12830_vm11, %v8175_v8, 0  ;;  %12831 = vst [vmem:[#allocation171_spill] sm:$0xff] %v9003_v20  ;;  %4301 = vrot.lane.b32.xlu1 %v4281_v36, %s6278_s24  ;;  %v3972_v46 = vsel %vm12802_vm4, %v8972_v28, 0  ;;  %v2144_v23 = vpack.c.b16 %v8961_v62, %v8959_v48  ;;  %v2123_v27 = vunpack.c.l.b16 %v1234_v41  ;;  %v12832_v8 = vld [vmem:[#allocation36_spill] sm:$0xff]  ;;  %v9020_v36 = vld [vmem:[%s11783_s0 + $0xe0] sm:$0xf] }
 0x1ed   :  { %vm12833_vm12 = vnez %v12832_v8  ;;  %v3973_v15 = vsel %vm12804_vm14, %v8992_v11, 0  ;;  %12834 = vst [vmem:[#allocation172_spill] sm:$0xff] %v9025_v57  ;;  %v9027_v62 = vunpack.c.l.b16 %v1237_v2  ;;  %v9029_v48 = vunpack.c.l.b16 %v1238_v30  ;;  %v9037_v42 = vpop.permute.xlu1 %2880  ;;  %v9042_v41 = vld [vmem:[%s11783_s0 + $0xe8] sm:$0xf]  ;;  %v9047_v2 = vld [vmem:[%s11783_s0 + $0xec] sm:$0xf] }
 0x1ee   :  { %v1239_v40 = vsel %vm12833_vm12, %v8226_v16, 0  ;;  %v12835_v16 = vld [vmem:[#allocation39_spill] sm:$0xff]  ;;  %vm12838_vm14 = vnez %v12837_v51  ;;  %12839 = vst [vmem:[#allocation173_spill] sm:$0xff] %v9037_v42  ;;  %v12841_v30 = vld [vmem:[#allocation41_spill] sm:$0xff]  ;;  %v12843_v42 = vld [vmem:[#allocation38_spill] sm:$0xff]  ;;  %v4283_v34 = vpack.c.b16 %v4256_v52, %v4255_v21  ;;  %v4259_v11 = vunpack.c.l.b16 %v3972_v46 }
 0x1ef   :  { %vm12836_vm4 = vnez %v12835_v16  ;;  %v1243_v54 = vsel %vm12838_vm14, %v12716_v10, 0  ;;  %12840 = vst [vmem:[#allocation174_spill] sm:$0xff] %v9047_v2  ;;  %vm12842_vm6 = vnez %v12841_v30  ;;  %v6237_v10 = vld [vmem:[%s11783_s0 + $0x80] sm:$0xf]  ;;  %vm12844_vm3 = vnez %v12843_v42  ;;  %v9242_v16 = vld [vmem:[%s11783_s0 + $0x118] sm:$0xf] }
 0x1f0   :  { %v1240_v44 = vsel %vm12836_vm4, %v8243_v45, 0  ;;  %v6236_v45 = vld [vmem:[%s11783_s0 + $0x7c] sm:$0xf]  ;;  %v1245_v22 = vsel %vm12844_vm3, %v6237_v10, 0  ;;  %4303 = vrot.lane.b32.xlu2 %v4282_v35, %s6278_s24  ;;  %v4284_v28 = vpack.c.b16 %v4258_v0, %v4257_v53  ;;  %v4260_v26 = vunpack.c.l.b16 %v3973_v15  ;;  %v9075_v53 = vld [vmem:[%s11783_s0 + $0xf0] sm:$0xf] }
 0x1f1   :  { %v1244_v20 = vsel %vm12842_vm6, %v6236_v45, 0  ;;  %v3974_v7 = vsel %vm12739_vm10, %v9020_v36, 0  ;;  %v3975_v45 = vsel %vm12741_vm2, %v9025_v57, 0  ;;  %v2128_v31 = vunpack.c.l.b16 %v1239_v40  ;;  %v12845_v21 = vld [vmem:[#allocation46_spill] sm:$0xff]  ;;  %v12889_v12 = vld [vmem:[#allocation67_spill] sm:$0xff]  ;;  %v12900_v30 = vld [vmem:[#allocation76_spill] sm:$0xff] }
 0x1f2   :  { %v2129_v63 = vunpack.c.l.b16 %v1240_v44  ;;  %v3976_v10 = vsel %vm12813_vm9, %v9042_v41, 0  ;;  %v3977_v52 = vsel %vm12815_vm7, %v9047_v2, 0  ;;  %v12846_v46 = vpack.c.b16 %v8872_v56, %v8870_v17  ;;  %v9082_v44 = vpop.permute.xlu2 %3016  ;;  %v12912_v42 = vld [vmem:[#allocation95_spill] sm:$0xff] }
 0x1f3   :  { %vm12847_vm2 = vcmask 23552   ;;  %v2132_v35 = vunpack.c.l.b16 %v1243_v54  ;;  %v2133_v40 = vunpack.c.l.b16 %v1244_v20  ;;  %v2134_v15 = vunpack.c.l.b16 %v1245_v22  ;;  %12848 = vst [vmem:[#allocation46_spill] sm:$0xff] %v9082_v44  ;;  %4305 = vrot.lane.b32.xlu0 %v4283_v34, %s6278_s24  ;;  %v12853_v34 = vld [vmem:[#allocation44_spill] sm:$0xff] }
 0x1f4   :  { %v3211_v0 = vsel %vm12847_vm2, %v12846_v46, %v12845_v21  ;;  %vm12850_vm7 = vmmov %vm12847_vm2  ;;  %v2145_v2 = vpack.c.b16 %v2123_v27, %v8985_v33  ;;  %v4261_v17 = vunpack.c.l.b16 %v3974_v7  ;;  %v4262_v56 = vunpack.c.l.b16 %v3975_v45  ;;  %4307 = vrot.lane.b32.xlu1 %v4284_v28, %s6278_s24  ;;  %v12851_v46 = vld [vmem:[#allocation49_spill] sm:$0xff]  ;;  %v12856_v28 = vld [vmem:[#allocation47_spill] sm:$0xff] }
 0x1f5   :  { %v9091_v6 = vsel %vm12850_vm7, %v2142_v29, %v12849_v58  ;;  %v4285_v22 = vpack.c.b16 %v4260_v26, %v4259_v11  ;;  %v4263_v20 = vunpack.c.l.b16 %v3976_v10  ;;  %v4264_v54 = vunpack.c.l.b16 %v3977_v52  ;;  %v9103_v29 = vpop.permute.xlu0 %2884  ;;  %v9111_v26 = vld [vmem:[%s11783_s0 + $0xf8] sm:$0xf]  ;;  %v9116_v11 = vld [vmem:[%s11783_s0 + $0xfc] sm:$0xf]  ;;  %vm12855_vm7 = vmmov %vm12847_vm2 }
 0x1f6   :  { %v3978_v21 = vsel %vm12819_vm1, %v9075_v53, 0  ;;  %v3220_v44 = vsel %vm12847_vm2, %v2144_v23, %v12851_v46  ;;  %v2147_v58 = vpack.c.b16 %v9029_v48, %v9027_v62  ;;  %v2148_v27 = vpack.c.b16 %v2129_v63, %v2128_v31  ;;  %12852 = vst [vmem:[#allocation48_spill] sm:$0xff] %v9103_v29  ;;  %v9130_v48 = vpop.permute.xlu1 %2886  ;;  %v9135_v45 = vld [vmem:[%s11783_s0 + $0x100] sm:$0xf] }
 0x1f7   :  { %v3979_v7 = vsel %vm12824_vm5, %v9087_v9, 0  ;;  %v12854_v63 = vpack.c.b16 %v8849_v19, %v8819_v43  ;;  %vm12857_vm2 = vcmask 48128   ;;  %v2150_v23 = vpack.c.b16 %v2133_v40, %v2132_v35  ;;  %12858 = vst [vmem:[#allocation49_spill] sm:$0xff] %v9130_v48  ;;  %v9140_v19 = vld [vmem:[%s11783_s0 + $0x104] sm:$0xf]  ;;  %v12859_v43 = vld [vmem:[#allocation51_spill] sm:$0xff] }
 0x1f8   :  { %v9128_v33 = vsel %vm12857_vm2, %v8787_v13, %v12856_v28  ;;  %v2151_v62 = vpack.c.b16 %v2134_v15, %v2134_v15  ;;  %v3223_v10 = vsel %vm12855_vm7, %v2145_v2, %v12859_v43  ;;  %v12860_v52 = vld [vmem:[#allocation50_spill] sm:$0xff]  ;;  %v4286_v35 = vpack.c.b16 %v4262_v56, %v4261_v17  ;;  %4309 = vrot.lane.b32.xlu2 %v4285_v22, %s6278_s24  ;;  %v12861_v2 = vld [vmem:[#allocation53_spill] sm:$0xff]  ;;  %v12862_v43 = vld [vmem:[#allocation52_spill] sm:$0xff] }
 0x1f9   :  { %v9123_v31 = vsel %vm12855_vm7, %v12854_v63, %v12853_v34  ;;  %v9147_v13 = vsel %vm12857_vm2, %v8906_v14, %v12860_v52  ;;  %v4265_v40 = vunpack.c.l.b16 %v3978_v21  ;;  %v4287_v15 = vpack.c.b16 %v4264_v54, %v4263_v20  ;;  %v9171_v22 = vld [vmem:[%s11783_s0 + $0x108] sm:$0xf]  ;;  %v12863_v20 = vld [vmem:[#allocation54_spill] sm:$0xff]  ;;  %v12865_v21 = vld [vmem:[#allocation56_spill] sm:$0xff] }
 0x1fa   :  { %v4266_v46 = vunpack.c.l.b16 %v3979_v7  ;;  %v3980_v34 = vsel %vm12763_vm8, %v9111_v26, 0  ;;  %v3981_v63 = vsel %vm12770_vm15, %v9116_v11, 0  ;;  %v3229_v28 = vsel %vm12855_vm7, %v2147_v58, %v12861_v2  ;;  %vm12864_vm15 = vmmov %vm12855_vm7  ;;  %v12866_v58 = vld [vmem:[#allocation55_spill] sm:$0xff]  ;;  %v9181_v52 = vpop.permute.xlu2 %3022  ;;  %v12871_v29 = vld [vmem:[#allocation58_spill] sm:$0xff] }
 0x1fb   :  { %v9160_v14 = vsel %vm12857_vm2, %v3211_v0, %v12862_v43  ;;  %v3982_v17 = vsel %vm12828_vm13, %v9135_v45, 0  ;;  %v3983_v56 = vsel %vm12830_vm11, %v9140_v19, 0  ;;  %v3232_v54 = vsel %vm12864_vm15, %v2148_v27, %v12863_v20  ;;  %12867 = vst [vmem:[#allocation44_spill] sm:$0xff] %v9181_v52  ;;  %v9186_v2 = vld [vmem:[%s11783_s0 + $0x10c] sm:$0xf]  ;;  %v12869_v43 = vld [vmem:[#allocation57_spill] sm:$0xff]  ;;  %vm12870_vm11 = vmmov %vm12855_vm7  ;;  %4311 = vrot.lane.b32.xlu0 %v4286_v35, %s6278_s24 }
 0x1fc   :  { %v3238_v0 = vsel %vm12855_vm7, %v2150_v23, %v12865_v21  ;;  %v9179_v7 = vsel %vm12857_vm2, %v3220_v44, %v12866_v58  ;;  %vm12162_vm13 = vcmask 72704   ;;  %12868 = vst [vmem:[#allocation47_spill] sm:$0xff] %v9186_v2  ;;  %v3241_v48 = vsel %vm12870_vm11, %v2151_v62, %v12869_v43  ;;  %vm12872_vm15 = vmmov %vm12857_vm2  ;;  %4313 = vrot.lane.b32.xlu1 %v4287_v15, %s6278_s24  ;;  %v12875_v43 = vld [vmem:[#allocation60_spill] sm:$0xff]  ;;  %v12877_v35 = vld [vmem:[#allocation61_spill] sm:$0xff] }
 0x1fd   :  { %v9192_v27 = vsel %vm12872_vm15, %v3229_v28, %v12871_v29  ;;  %v4267_v23 = vunpack.c.l.b16 %v3980_v34  ;;  %v4268_v44 = vunpack.c.l.b16 %v3981_v63  ;;  %v4288_v20 = vpack.c.b16 %v4266_v46, %v4265_v40  ;;  %vm12874_vm11 = vmmov %vm12857_vm2  ;;  %v9209_v15 = vpop.permute.xlu0 %3006  ;;  %v9217_v46 = vld [vmem:[%s11783_s0 + $0x110] sm:$0xf]  ;;  %v12880_v63 = vld [vmem:[#allocation62_spill] sm:$0xff] }
 0x1fe   :  { %v4269_v21 = vunpack.c.l.b16 %v3982_v17  ;;  %v4270_v58 = vunpack.c.l.b16 %v3983_v56  ;;  %v3984_v52 = vsel %vm12833_vm12, %v9171_v22, 0  ;;  %v3246_v62 = vsel %vm12874_vm11, %v8900_v61, %v12873_v32  ;;  %vm12876_vm7 = vmmov %vm12857_vm2  ;;  %v9222_v61 = vld [vmem:[%s11783_s0 + $0x114] sm:$0xf]  ;;  %v12882_v17 = vld [vmem:[#allocation63_spill] sm:$0xff] }
 0x1ff   :  { %v3248_v29 = vsel %vm12876_vm7, %v8868_v55, %v12875_v43  ;;  %v9207_v34 = vsel %vm12857_vm2, %v3238_v0, %v12877_v35  ;;  %v3985_v40 = vsel %vm12836_vm4, %v9186_v2, 0  ;;  %v12878_v55 = vld [vmem:[#allocation2_spill] sm:$0xff]  ;;  %vm12879_vm15 = vmmov %vm12857_vm2  ;;  %v12884_v0 = vld [vmem:[#allocation3_spill] sm:$0xff]  ;;  %v9237_v35 = vpop.permute.xlu1 %3008 }
 0x200   :  { %v3252_v32 = vsel %vm12879_vm15, %v8716_v25, %v12878_v55  ;;  %vm12881_vm11 = vmmov %vm12857_vm2  ;;  %v9235_v43 = vsel %vm12162_vm13, %v3246_v62, %v12884_v0  ;;  %12885 = vst [vmem:[#allocation51_spill] sm:$0xff] %v9237_v35  ;;  %v9247_v25 = vld [vmem:[%s11783_s0 + $0x11c] sm:$0xf]  ;;  %4315 = vrot.lane.b32.xlu2 %v4288_v20, %s6278_s24  ;;  %v4290_v0 = vpack.c.b16 %v4270_v58, %v4269_v21  ;;  %v4272_v8 = vunpack.c.l.b16 %v3985_v40  ;;  %v9277_v20 = vld [vmem:[%s11783_s0 + $0x120] sm:$0xf] }
 0x201   :  { %v3254_v28 = vsel %vm12881_vm11, %v8720_v37, %v12880_v63  ;;  %vm12883_vm7 = vmmov %vm12857_vm2  ;;  %v12886_v37 = vld [vmem:[#allocation64_spill] sm:$0xff]  ;;  %v12887_v55 = vld [vmem:[#allocation65_spill] sm:$0xff]  ;;  %v4289_v63 = vpack.c.b16 %v4268_v44, %v4267_v23  ;;  %v3986_v35 = vsel %vm12783_vm0, %v9217_v46, 0  ;;  %vm12888_vm15 = vnez %v12786_v50 }
 0x202   :  { %v3258_v56 = vsel %vm12883_vm7, %v9091_v6, %v12882_v17  ;;  %v3260_v6 = vsel %vm12857_vm2, %v8724_v5, %v12886_v37  ;;  %v9254_v62 = vsel %vm12162_vm13, %v3252_v32, %v12887_v55  ;;  %v4271_v17 = vunpack.c.l.b16 %v3984_v52  ;;  %vm12890_vm11 = vmmov %vm12857_vm2  ;;  %v12891_v37 = vld [vmem:[#allocation68_spill] sm:$0xff]  ;;  %v12893_v21 = vld [vmem:[#allocation73_spill] sm:$0xff]  ;;  %v9288_v32 = vpop.permute.xlu2 %3028 }
 0x203   :  { %v3987_v2 = vsel %vm12888_vm15, %v9222_v61, 0  ;;  %v3264_v5 = vsel %vm12890_vm11, %v3223_v10, %v12889_v12  ;;  %vm12892_vm7 = vmmov %vm12857_vm2  ;;  %v3988_v52 = vsel %vm12838_vm14, %v9242_v16, 0  ;;  %v3989_v44 = vsel %vm12842_vm6, %v9247_v25, 0  ;;  %v12894_v10 = vld [vmem:[#allocation74_spill] sm:$0xff]  ;;  %12897 = vst [vmem:[#allocation50_spill] sm:$0xff] %v9288_v32  ;;  %4317 = vrot.lane.b32.xlu0 %v4289_v63, %s6278_s24  ;;  %v12901_v32 = vld [vmem:[#allocation79_spill] sm:$0xff] }
 0x204   :  { %v3266_v23 = vsel %vm12892_vm7, %v8976_v38, %v12891_v37  ;;  %v3270_v12 = vsel %vm12857_vm2, %v3232_v54, %v12893_v21  ;;  %vm12895_vm11 = vmmov %vm12857_vm2  ;;  %v12896_v58 = vld [vmem:[#allocation70_spill] sm:$0xff]  ;;  %vm12159_vm7 = vcmask 97280   ;;  %v9294_v51 = vsel %vm12162_vm13, %v3264_v5, %v12900_v30  ;;  %4319 = vrot.lane.b32.xlu1 %v4290_v0, %s6278_s24  ;;  %v12906_v0 = vld [vmem:[#allocation89_spill] sm:$0xff] }
 0x205   :  { %v3272_v38 = vsel %vm12895_vm11, %v9123_v31, %v12894_v10  ;;  %v9286_v40 = vsel %vm12162_vm13, %v3258_v56, %v12896_v58  ;;  %v12898_v55 = vld [vmem:[#allocation78_spill] sm:$0xff]  ;;  %vm12899_vm6 = vmmov %vm12857_vm2  ;;  %v4273_v54 = vunpack.c.l.b16 %v3986_v35  ;;  %v4274_v21 = vunpack.c.l.b16 %v3987_v2  ;;  %v9313_v63 = vpop.permute.xlu0 %3012 }
 0x206   :  { %v3276_v37 = vsel %vm12899_vm6, %v3241_v48, %v12898_v55  ;;  %v4291_v31 = vpack.c.b16 %v4272_v8, %v4271_v17  ;;  %v4275_v10 = vunpack.c.l.b16 %v3988_v52  ;;  %v4276_v56 = vunpack.c.l.b16 %v3989_v44  ;;  %v12902_v55 = vld [vmem:[#allocation84_spill] sm:$0xff]  ;;  %v12903_v5 = vld [vmem:[#allocation86_spill] sm:$0xff]  ;;  %12905 = vst [vmem:[#allocation53_spill] sm:$0xff] %v9313_v63  ;;  %v3991_v17 = vld [vmem:[%s11783_s0 + $0xa8] sm:$0x8] }
 0x207   :  { %v3990_v58 = vsel %vm12844_vm3, %v9277_v20, 0  ;;  %v3279_v48 = vsel %vm12162_vm13, %v9128_v33, %v12901_v32  ;;  %v3283_v30 = vsel %vm12162_vm13, %v3248_v29, %v12902_v55  ;;  %v3285_v2 = vsel %vm12162_vm13, %v9147_v13, %v12903_v5  ;;  %v12904_v35 = vld [vmem:[#allocation82_spill] sm:$0xff]  ;;  %v12908_v44 = vld [vmem:[#allocation87_spill] sm:$0xff]  ;;  %v12909_v32 = vld [vmem:[#allocation93_spill] sm:$0xff]  ;;  %v9331_v55 = vpop.permute.xlu1 %3014 }
 0x208   :  { %v9311_v8 = vsel %vm12162_vm13, %v3270_v12, %v12904_v35  ;;  %v3289_v33 = vsel %vm12162_vm13, %v3254_v28, %v12906_v0  ;;  %v12907_v52 = vld [vmem:[#allocation90_spill] sm:$0xff]  ;;  %v9325_v13 = vsel %vm12162_vm13, %v3276_v37, %v12908_v44  ;;  %v9329_v12 = vsel %vm12159_vm7, %v3283_v30, %v12909_v32  ;;  %12910 = vst [vmem:[#allocation52_spill] sm:$0xff] %v9331_v55  ;;  %v12916_v44 = vld [vmem:[#allocation100_spill] sm:$0xff] }
 0x209   :  { %v3291_v29 = vsel %vm12162_vm13, %v9160_v14, %v12907_v52  ;;  %v12911_v5 = vld [vmem:[#allocation94_spill] sm:$0xff]  ;;  %v3297_v28 = vsel %vm12162_vm13, %v9179_v7, %v12912_v42  ;;  %v4292_v0 = vpack.c.b16 %v4274_v21, %v4273_v54  ;;  %v4277_v63 = vunpack.c.l.b16 %v3990_v58  ;;  %4321 = vrot.lane.b32.xlu2 %v4291_v31, %s6278_s24  ;;  %v12917_v42 = vld [vmem:[#allocation101_spill] sm:$0xff]  ;;  %v12920_v31 = vld [vmem:[#allocation32_spill] sm:$0xff] }
 0x20a   :  { %v3295_v35 = vsel %vm12162_vm13, %v3260_v6, %v12911_v5  ;;  %v12913_v14 = vld [vmem:[#allocation98_spill] sm:$0xff]  ;;  %v4293_v37 = vpack.c.b16 %v4276_v56, %v4275_v10  ;;  %vm12914_vm6 = vnez %v12744_v60  ;;  %vm12915_vm2 = vnez %v12746_v49  ;;  %v12921_v10 = vld [vmem:[#allocation11_spill] sm:$0xff]  ;;  %v12923_v58 = vld [vmem:[#allocation105_spill] sm:$0xff] }
 0x20b   :  { %v9340_v52 = vsel %vm12159_vm7, %v3289_v33, %v12913_v14  ;;  %v3994_v30 = vsel %vm12914_vm6, %v3991_v17, 0  ;;  %v3995_v6 = vsel %vm12915_vm2, %v8783_v24, 0  ;;  %v3301_v32 = vsel %vm12162_vm13, %v3266_v23, %v12916_v44  ;;  %v12918_v54 = vld [vmem:[#allocation10_spill] sm:$0xff]  ;;  %v12924_v24 = vld [vmem:[#allocation108_spill] sm:$0xff]  ;;  %4323 = vrot.lane.b32.xlu0 %v4292_v0, %s6278_s24  ;;  %v12938_v49 = vld [vmem:[#allocation115_spill] sm:$0xff] }
 0x20c   :  { %v9353_v7 = vsel %vm12162_vm13, %v9192_v27, %v12917_v42  ;;  %vm12919_vm11 = vnez %v12918_v54  ;;  %vm12922_vm7 = vnez %v12921_v10  ;;  %v3307_v17 = vsel %vm12162_vm13, %v3272_v38, %v12923_v58  ;;  %v12925_v33 = vld [vmem:[#allocation106_spill] sm:$0xff]  ;;  %v12927_v5 = vld [vmem:[#allocation116_spill] sm:$0xff]  ;;  %4325 = vrot.lane.b32.xlu1 %v4293_v37, %s6278_s24  ;;  %v6012_v37 = vld [vmem:[%s11784_s1 + $0x8] sm:$0xf] }
 0x20d   :  { %v3996_v21 = vsel %vm12919_vm11, %v8807_v47, 0  ;;  %v3997_v56 = vsel %vm12922_vm7, %v12920_v31, 0  ;;  %v9366_v23 = vsel %vm12162_vm13, %v9207_v34, %v12924_v24  ;;  %vm12926_vm3 = vcmask 97280   ;;  %v9376_v47 = vpop.permute.xlu2 %3034  ;;  %v12930_v44 = vld [vmem:[#allocation110_spill] sm:$0xff]  ;;  %v12939_v0 = vld [vmem:[#allocation124_spill] sm:$0xff]  ;;  %v12948_v10 = vld [vmem:[#allocation165_spill] sm:$0xff] }
 0x20e   :  { %v9370_v27 = vsel %vm12926_vm3, %v3295_v35, %v12925_v33  ;;  %vm12928_vm2 = vmmov %vm12926_vm3  ;;  %12929 = vst [vmem:[#allocation54_spill] sm:$0xff] %v9376_v47  ;;  %v4294_v38 = vpack.c.b16 %v4277_v63, %v4277_v63  ;;  %v4362_v31 = vunpack.c.l.b16 %v3994_v30  ;;  %v4363_v58 = vunpack.c.l.b16 %v3995_v6  ;;  %v12932_v35 = vld [vmem:[#allocation161_spill] sm:$0xff]  ;;  %v12933_v33 = vld [vmem:[#allocation8_spill] sm:$0xff]  ;;  %v9395_v30 = vpop.permute.xlu0 %3018 }
 0x20f   :  { %v9374_v14 = vsel %vm12928_vm2, %v3301_v32, %v12927_v5  ;;  %vm12931_vm6 = vmmov %vm12928_vm2  ;;  %v4364_v34 = vunpack.c.l.b16 %v3996_v21  ;;  %v4365_v24 = vunpack.c.l.b16 %v3997_v56  ;;  %vm12934_vm3 = vnez %v12933_v33  ;;  %v12935_v32 = vld [vmem:[#allocation162_spill] sm:$0xff]  ;;  %v12936_v5 = vld [vmem:[#allocation9_spill] sm:$0xff]  ;;  %12941 = vst [vmem:[#allocation56_spill] sm:$0xff] %v9395_v30 }
 0x210   :  { %v3314_v42 = vsel %vm12931_vm6, %v3279_v48, %v12930_v44  ;;  %v3998_v55 = vsel %vm12934_vm3, %v12932_v35, 0  ;;  %vm12937_vm2 = vnez %v12936_v5  ;;  %v3316_v48 = vsel %vm12931_vm6, %v9235_v43, %v12938_v49  ;;  %vm12940_vm13 = vmmov %vm12931_vm6  ;;  %v6145_v6 = vld [vmem:[%s11784_s1 + $0x8] sm:$0x30]  ;;  %v9405_v49 = vpop.permute.xlu1 %3020  ;;  %v12945_v33 = vld [vmem:[#allocation164_spill] sm:$0xff] }
 0x211   :  { %v3999_v47 = vsel %vm12937_vm2, %v12935_v32, 0  ;;  %v9393_v63 = vsel %vm12940_vm13, %v3307_v17, %v12939_v0  ;;  %vm3690_vm3 = vcmask 1044480   ;;  %v12942_v21 = vld [vmem:[#allocation119_spill] sm:$0xff]  ;;  %vm12943_vm2 = vmmov %vm12931_vm6  ;;  %12944 = vst [vmem:[#allocation55_spill] sm:$0xff] %v9405_v49  ;;  %v6013_v43 = vor.u32 %v6145_v6, %v6012_v37  ;;  %4327 = vrot.lane.b32.xlu2 %v4294_v38, %s6278_s24  ;;  %v12946_v30 = vld [vmem:[#allocation13_spill] sm:$0xff] }
 0x212   :  { %v3320_v56 = vsel %vm12943_vm2, %v3285_v2, %v12942_v21  ;;  %vm3691_vm13 = vcmask 1045504   ;;  %v4395_v17 = vpack.c.b16 %v4363_v58, %v4362_v31  ;;  %v4366_v44 = vunpack.c.l.b16 %v3998_v55  ;;  %v12949_v54 = vld [vmem:[#allocation15_spill] sm:$0xff]  ;;  %v12952_v37 = vld [vmem:[#allocation120_spill] sm:$0xff]  ;;  %v12955_v31 = vld [vmem:[#allocation5_spill] sm:$0xff] }
 0x213   :  { %v4367_v35 = vunpack.c.l.b16 %v3999_v47  ;;  %v6286_v32 = vmov 65535   ;;  %v4396_v5 = vpack.c.b16 %v4365_v24, %v4364_v34  ;;  %vm12947_vm6 = vnez %v12946_v30  ;;  %v12954_v47 = vld [vmem:[#allocation43_spill] sm:$0xff]  ;;  %v12957_v38 = vld [vmem:[#allocation45_spill] sm:$0xff]  ;;  %v12960_v6 = vld [vmem:[#allocation126_spill] sm:$0xff] }
 0x214   :  { %v3692_v0 = vsel %vm3690_vm3, 4294967295, %v6286_v32  ;;  %v4000_v60 = vsel %vm12947_vm6, %v12945_v33, 0  ;;  %vm12950_vm2 = vnez %v12949_v54  ;;  %vm12953_vm7 = vcmask 97280   ;;  %v12958_v34 = vld [vmem:[#allocation7_spill] sm:$0xff]  ;;  %v12964_v54 = vld [vmem:[#allocation132_spill] sm:$0xff]  ;;  %4412 = vrot.lane.b32.xlu0 %v4395_v17, %s6279_s29  ;;  %v12977_v17 = vld [vmem:[#allocation142_spill] sm:$0xff] }
 0x215   :  { %v4001_v2 = vsel %vm12950_vm2, %v12948_v10, 0  ;;  %v9414_v21 = vsel %vm3691_vm13, %v3692_v0, 0  ;;  %v3322_v55 = vsel %vm12953_vm7, %v9254_v62, %v12952_v37  ;;  %vm12956_vm3 = vnez %v12955_v31  ;;  %vm12961_vm6 = vmmov %vm12953_vm7  ;;  %v12962_v10 = vld [vmem:[#allocation129_spill] sm:$0xff]  ;;  %v12966_v37 = vld [vmem:[#allocation134_spill] sm:$0xff]  ;;  %v9437_v30 = vpop.permute.xlu2 %3156  ;;  %4414 = vrot.lane.b32.xlu1 %v4396_v5, %s6279_s29 }
 0x216   :  { %12951 = vst [vmem:[#allocation57_spill] sm:$0xff] %v9414_v21  ;;  %v4002_v58 = vsel %vm12956_vm3, %v12954_v47, 0  ;;  %vm12959_vm11 = vnez %v12958_v34  ;;  %v3695_v33 = vand.u32 %v6013_v43, %v9414_v21  ;;  %v3326_v32 = vsel %vm12961_vm6, %v3291_v29, %v12960_v6  ;;  %vm12963_vm13 = vmmov %vm12961_vm6  ;;  %v12968_v34 = vld [vmem:[#allocation136_spill] sm:$0xff]  ;;  %v12997_v49 = vld [vmem:[#allocation170_spill] sm:$0xff] }
 0x217   :  { %v4003_v24 = vsel %vm12959_vm11, %v12957_v38, 0  ;;  %v3328_v0 = vsel %vm12963_vm13, %v9286_v40, %v12962_v10  ;;  %vm12965_vm2 = vcmask 121856   ;;  %vm12967_vm7 = vmmov %vm12961_vm6  ;;  %v12970_v38 = vld [vmem:[#allocation141_spill] sm:$0xff]  ;;  %v4368_v40 = vunpack.c.l.b16 %v4000_v60  ;;  %v12972_v10 = vld [vmem:[#allocation167_spill] sm:$0xff] }
 0x218   :  { %v9433_v62 = vsel %vm12965_vm2, %v3314_v42, %v12964_v54  ;;  %v3332_v47 = vsel %vm12967_vm7, %v3297_v28, %v12966_v37  ;;  %vm12969_vm11 = vmmov %vm12961_vm6  ;;  %v4369_v6 = vunpack.c.l.b16 %v4001_v2  ;;  %3703 = vmatpush.bf16.msra.mxu0 %v3695_v33  ;;  %v4397_v54 = vpack.c.b16 %v4367_v35, %v4366_v44  ;;  %v12973_v37 = vld [vmem:[#allocation12_spill] sm:$0xff]  ;;  %6166 = vmatpush.bf16.msra.mxu2 %v3695_v33  ;;  %v9464_v2 = vpop.permute.xlu0 %3024 }
 0x219   :  { %v3334_v43 = vsel %vm12969_vm11, %v9294_v51, %v12968_v34  ;;  %vm12971_vm3 = vmmov %vm12965_vm2  ;;  %v4370_v42 = vunpack.c.l.b16 %v4002_v58  ;;  %v4371_v28 = vunpack.c.l.b16 %v4003_v24  ;;  %vm12974_vm6 = vnez %v12973_v37  ;;  %v6144_v51 = vld [vmem:[%s11784_s1] sm:$0xff]  ;;  %v12979_v44 = vld [vmem:[#allocation144_spill] sm:$0xff] }
 0x21a   :  { %v9444_v29 = vsel %vm12971_vm3, %v3320_v56, %v12970_v38  ;;  %v4004_v21 = vsel %vm12974_vm6, %v12972_v10, 0  ;;  %v12975_v56 = vld [vmem:[#allocation139_spill] sm:$0xff]  ;;  %vm12976_vm11 = vmmov %vm12967_vm7  ;;  %v9462_v35 = vsel %vm12971_vm3, %v3326_v32, %v12979_v44  ;;  %v12980_v58 = vld [vmem:[#allocation168_spill] sm:$0xff]  ;;  %v9481_v44 = vpop.permute.xlu1 %3026  ;;  %v4398_v31 = vpack.c.b16 %v4369_v6, %v4368_v40  ;;  %4416 = vrot.lane.b32.xlu2 %v4397_v54, %s6279_s29 }
 0x21b   :  { %v3338_v60 = vsel %vm12976_vm11, %v9353_v7, %v12975_v56  ;;  %vm12978_vm2 = vmmov %vm12967_vm7  ;;  %v12981_v34 = vld [vmem:[#allocation14_spill] sm:$0xff]  ;;  %v12983_v38 = vld [vmem:[#allocation143_spill] sm:$0xff]  ;;  %12991 = vst [vmem:[#allocation58_spill] sm:$0xff] %v9481_v44 }
 0x21c   :  { %v3340_v5 = vsel %vm12978_vm2, %v9311_v8, %v12977_v17  ;;  %vm12982_vm13 = vnez %v12981_v34  ;;  %vm12984_vm7 = vmmov %vm12978_vm2  ;;  %v12985_v10 = vld [vmem:[#allocation145_spill] sm:$0xff]  ;;  %v12987_v56 = vld [vmem:[#allocation114_spill] sm:$0xff]  ;;  %3704 = vmatpush.bf16.msra.mxu0 %v6144_v51  ;;  %6167 = vmatpush.bf16.msra.mxu2 %v6144_v51 }
 0x21d   :  { %v4005_v24 = vsel %vm12982_vm13, %v12980_v58, 0  ;;  %v3344_v33 = vsel %vm12984_vm7, %v9366_v23, %v12983_v38  ;;  %vm12986_vm11 = vmmov %vm12978_vm2  ;;  %v12989_v32 = vld [vmem:[#allocation104_spill] sm:$0xff]  ;;  %v12992_v37 = vld [vmem:[#allocation146_spill] sm:$0xff]  ;;  %v4372_v23 = vunpack.c.l.b16 %v4004_v21  ;;  %4418 = vrot.lane.b32.xlu0 %v4398_v31, %s6279_s29 }
 0x21e   :  { %v3346_v7 = vsel %vm12986_vm11, %v9325_v13, %v12985_v10  ;;  %vm12988_vm2 = vmmov %vm12971_vm3  ;;  %v4399_v13 = vpack.c.b16 %v4371_v28, %v4370_v42  ;;  %v4373_v38 = vunpack.c.l.b16 %v4005_v24  ;;  %v12994_v10 = vld [vmem:[#allocation169_spill] sm:$0xff]  ;;  %v13000_v44 = vld [vmem:[#allocation148_spill] sm:$0xff] }
 0x21f   :  { %v9477_v8 = vsel %vm12988_vm2, %v3332_v47, %v12987_v56  ;;  %vm12990_vm3 = vmmov %vm12988_vm2  ;;  %v12995_v47 = vld [vmem:[#allocation16_spill] sm:$0xff]  ;;  %v13002_v40 = vld [vmem:[#allocation147_spill] sm:$0xff] }
 0x220   :  { %v3351_v17 = vsel %vm12990_vm3, %v3316_v48, %v12989_v32  ;;  %vm12993_vm13 = vmmov %vm12988_vm2  ;;  %vm12996_vm7 = vnez %v12995_v47  ;;  %v12998_v48 = vld [vmem:[#allocation17_spill] sm:$0xff]  ;;  %v13004_v6 = vld [vmem:[#allocation20_spill] sm:$0xff]  ;;  %v9517_v47 = vpop.permute.xlu2 %3162  ;;  %4420 = vrot.lane.b32.xlu1 %v4399_v13, %s6279_s29  ;;  %v9541_v13 = vpop.permute.xlu0 %3030 }
 0x221   :  { %v3353_v34 = vsel %vm12993_vm13, %v9329_v12, %v12992_v37  ;;  %v4006_v56 = vsel %vm12996_vm7, %v12994_v10, 0  ;;  %vm12999_vm11 = vnez %v12998_v48  ;;  %v9495_v12 = vsel %vm12988_vm2, %v3338_v60, %v13000_v44  ;;  %vm13003_vm13 = vmmov %vm12988_vm2  ;;  %v13006_v42 = vld [vmem:[#allocation21_spill] sm:$0xff]  ;;  %v13010_v51 = vld [vmem:[#allocation152_spill] sm:$0xff] }
 0x222   :  { %v4007_v32 = vsel %vm12999_vm11, %v12997_v49, 0  ;;  %13001 = vst [vmem:[#allocation59_spill] sm:$0xff] %v9495_v12  ;;  %v3357_v21 = vsel %vm13003_vm13, %v3322_v55, %v13002_v40  ;;  %vm13005_vm3 = vnez %v13004_v6  ;;  %vm13007_vm6 = vnez %v13006_v42  ;;  %v13008_v37 = vld [vmem:[#allocation149_spill] sm:$0xff]  ;;  %vm13009_vm7 = vmmov %vm12988_vm2  ;;  %v13012_v60 = vld [vmem:[#allocation151_spill] sm:$0xff] }
 0x223   :  { %v4008_v54 = vsel %vm13005_vm3, %v9020_v36, 0  ;;  %v4009_v28 = vsel %vm13007_vm6, %v9025_v57, 0  ;;  %v3359_v24 = vsel %vm13009_vm7, %v9340_v52, %v13008_v37  ;;  %vm13011_vm11 = vmmov %vm12988_vm2  ;;  %v3363_v44 = vsel %vm12988_vm2, %v3328_v0, %v13012_v60  ;;  %v13013_v55 = vld [vmem:[#allocation153_spill] sm:$0xff]  ;;  %v13015_v6 = vld [vmem:[#allocation155_spill] sm:$0xff] }
 0x224   :  { %v9510_v48 = vsel %vm13011_vm11, %v3344_v33, %v13010_v51  ;;  %vm13014_vm13 = vmmov %vm12988_vm2  ;;  %vm13016_vm3 = vcmask 146432   ;;  %v13017_v12 = vld [vmem:[#allocation112_spill] sm:$0xff]  ;;  %v4374_v52 = vunpack.c.l.b16 %v4006_v56  ;;  %v4375_v33 = vunpack.c.l.b16 %v4007_v32  ;;  %v13019_v60 = vld [vmem:[#allocation154_spill] sm:$0xff] }
 0x225   :  { %v3365_v40 = vsel %vm13014_vm13, %v9370_v27, %v13013_v55  ;;  %v3386_v42 = vsel %vm13016_vm3, %v3351_v17, %v13015_v6  ;;  %vm13018_vm6 = vmmov %vm13016_vm3  ;;  %v4400_v0 = vpack.c.b16 %v4373_v38, %v4372_v23  ;;  %v4376_v37 = vunpack.c.l.b16 %v4008_v54  ;;  %v13021_v6 = vld [vmem:[#allocation156_spill] sm:$0xff]  ;;  %v13023_v31 = vld [vmem:[#allocation109_spill] sm:$0xff] }
 0x226   :  { %v9523_v57 = vsel %vm13018_vm6, %v3357_v21, %v13017_v12  ;;  %v4377_v51 = vunpack.c.l.b16 %v4009_v28  ;;  %v4010_v27 = vsel %vm12739_vm10, %v9042_v41, 0  ;;  %vm13020_vm7 = vmmov %vm12988_vm2  ;;  %v13025_v23 = vld [vmem:[#allocation174_spill] sm:$0xff]  ;;  %v13026_v38 = vld [vmem:[#allocation19_spill] sm:$0xff]  ;;  %vm13030_vm13 = vcmask 146432  }
 0x227   :  { %v3369_v17 = vsel %vm13020_vm7, %v3334_v43, %v13019_v60  ;;  %vm13022_vm6 = vmmov %vm12988_vm2  ;;  %vm13027_vm3 = vnez %v13026_v38  ;;  %v13028_v21 = vld [vmem:[#allocation157_spill] sm:$0xff]  ;;  %v13029_v43 = vld [vmem:[#allocation159_spill] sm:$0xff]  ;;  %v4378_v38 = vunpack.c.l.b16 %v4010_v27  ;;  %4422 = vrot.lane.b32.xlu2 %v4400_v0, %s6279_s29  ;;  %vm13076_vm10 = vsmask.f32 4352 }
 0x228   :  { %v9535_v12 = vsel %vm13022_vm6, %v9374_v14, %v13021_v6  ;;  %vm13024_vm11 = vmmov %vm12988_vm2  ;;  %v4011_v32 = vsel %vm13027_vm3, %v13025_v23, 0  ;;  %v9549_v54 = vsel %vm12988_vm2, %v9393_v63, %v13028_v21  ;;  %v9553_v28 = vsel %vm13030_vm13, %v3363_v44, %v13029_v43  ;;  %v13031_v14 = vld [vmem:[#allocation158_spill] sm:$0xff]  ;;  %v9562_v6 = vpop.permute.xlu1 %3032  ;;  %v13036_v21 = vld [vmem:[#allocation23_spill] sm:$0xff] }
 0x229   :  { %v9539_v56 = vsel %vm13024_vm11, %v3340_v5, %v13023_v31  ;;  %vm13032_vm7 = vmmov %vm12988_vm2  ;;  %v13033_v5 = vld [vmem:[#allocation160_spill] sm:$0xff]  ;;  %v4401_v31 = vpack.c.b16 %v4375_v33, %v4374_v52  ;;  %v4012_v63 = vsel %vm12813_vm9, %v9075_v53, 0  ;;  %vm13037_vm11 = vnez %v13036_v21  ;;  %v13038_v33 = vld [vmem:[#allocation127_spill] sm:$0xff] }
 0x22a   :  { %v9557_v55 = vsel %vm13032_vm7, %v3346_v7, %v13031_v14  ;;  %vm13034_vm6 = vmmov %vm13030_vm13  ;;  %v4013_v44 = vsel %vm13037_vm11, %v9087_v9, 0  ;;  %v4402_v7 = vpack.c.b16 %v4377_v51, %v4376_v37  ;;  %v4379_v43 = vunpack.c.l.b16 %v4011_v32  ;;  %v13040_v14 = vld [vmem:[#allocation138_spill] sm:$0xff]  ;;  %v13042_v21 = vld [vmem:[#allocation128_spill] sm:$0xff]  ;;  %v9592_v32 = vpop.permute.xlu2 %3168 }
 0x22b   :  { %v3384_v60 = vsel %vm13034_vm6, %v9433_v62, %v13033_v5  ;;  %v4014_v62 = vsel %vm12819_vm1, %v9111_v26, 0  ;;  %v4015_v52 = vsel %vm12824_vm5, %v9116_v11, 0  ;;  %vm13039_vm2 = vmmov %vm13034_vm6  ;;  %v13044_v37 = vld [vmem:[#allocation24_spill] sm:$0xff]  ;;  %vm12169_vm11 = vcmask 171008   ;;  %4424 = vrot.lane.b32.xlu0 %v4401_v31, %s6279_s29 }
 0x22c   :  { %v9579_v27 = vsel %vm13039_vm2, %v3369_v17, %v13038_v33  ;;  %vm13041_vm13 = vmmov %vm13039_vm2  ;;  %v4380_v11 = vunpack.c.l.b16 %v4012_v63  ;;  %v4381_v3 = vunpack.c.l.b16 %v4013_v44  ;;  %v3419_v17 = vsel %vm12169_vm11, %v3384_v60, %v9209_v15  ;;  %4426 = vrot.lane.b32.xlu1 %v4402_v7, %s6279_s29  ;;  %v13047_v63 = vld [vmem:[#allocation31_spill] sm:$0xff]  ;;  %v13050_v60 = vld [vmem:[#allocation33_spill] sm:$0xff] }
 0x22d   :  { %v3388_v5 = vsel %vm13041_vm13, %v3353_v34, %v13040_v14  ;;  %vm13043_vm7 = vmmov %vm13039_vm2  ;;  %v4382_v34 = vunpack.c.l.b16 %v4014_v62  ;;  %v4383_v33 = vunpack.c.l.b16 %v4015_v52  ;;  %vm13048_vm13 = vnez %v13047_v63  ;;  %v13049_v15 = vld [vmem:[#allocation47_spill] sm:$0xff]  ;;  %v13052_v62 = vld [vmem:[#allocation30_spill] sm:$0xff] }
 0x22e   :  { %v9586_v0 = vsel %vm13043_vm7, %v9444_v29, %v13042_v21  ;;  %vm13045_vm6 = vmmov %vm13039_vm2  ;;  %v4016_v29 = vsel %vm12763_vm8, %v9135_v45, 0  ;;  %vm13046_vm2 = vnez %v12769_v39  ;;  %v4018_v44 = vsel %vm13048_vm13, %v9171_v22, 0  ;;  %v13053_v45 = vld [vmem:[#allocation163_spill] sm:$0xff]  ;;  %v13055_v7 = vld [vmem:[#allocation166_spill] sm:$0xff] }
 0x22f   :  { %v9590_v51 = vsel %vm13045_vm6, %v3359_v24, %v13044_v37  ;;  %v4403_v24 = vpack.c.b16 %v4379_v43, %v4378_v38  ;;  %v4017_v21 = vsel %vm13046_vm2, %v9140_v19, 0  ;;  %vm13051_vm7 = vnez %v13050_v60  ;;  %vm13054_vm11 = vmmov %vm13045_vm6  ;;  %v9624_v43 = vpop.permute.xlu0 %3036  ;;  %v6153_v14 = vld [vmem:[%s11783_s0 + $0xd4] sm:$0xff]  ;;  %v13059_v37 = vld [vmem:[#allocation35_spill] sm:$0xff] }
 0x230   :  { %v4019_v31 = vsel %vm13051_vm7, %v13049_v15, 0  ;;  %v9613_v52 = vsel %vm13045_vm6, %v9462_v35, %v13052_v62  ;;  %v9617_v38 = vsel %vm13054_vm11, %v3365_v40, %v13053_v45  ;;  %vm13056_vm9 = vmmov %vm13045_vm6  ;;  %vm13057_vm3 = vcmask 195584   ;;  %13058 = vst [vmem:[#allocation60_spill] sm:$0xff] %v9624_v43  ;;  %v13061_v15 = vld [vmem:[#allocation51_spill] sm:$0xff]  ;;  %v9635_v62 = vpop.permute.xlu1 %3038 }
 0x231   :  { %v3402_v19 = vsel %vm13056_vm9, %v9477_v8, %v13055_v7  ;;  %v3454_v22 = vsel %vm13057_vm3, %v3419_v17, %v9437_v30  ;;  %vm13060_vm6 = vcmask 171008   ;;  %13063 = vst [vmem:[#allocation61_spill] sm:$0xff] %v9635_v62  ;;  %v4404_v45 = vpack.c.b16 %v4381_v3, %v4380_v11  ;;  %v6154_v30 = vld [vmem:[%s11783_s0 + $0xdc] sm:$0xff]  ;;  %4428 = vrot.lane.b32.xlu2 %v4403_v24, %s6279_s29  ;;  %v6156_v24 = vld [vmem:[%s11783_s0 + $0xec] sm:$0xff] }
 0x232   :  { %v9631_v35 = vsel %vm13060_vm6, %v3388_v5, %v13059_v37  ;;  %vm13062_vm11 = vmmov %vm13060_vm6  ;;  %v4384_v8 = vunpack.c.l.b16 %v4016_v29  ;;  %v4405_v17 = vpack.c.b16 %v4383_v33, %v4382_v34  ;;  %v4385_v7 = vunpack.c.l.b16 %v4017_v21  ;;  %v3992_v5 = vld [vmem:[%s11783_s0 + $0x124] sm:$0xf] }
 0x233   :  { %v3421_v40 = vsel %vm13062_vm11, %v3386_v42, %v13061_v15  ;;  %v4386_v60 = vunpack.c.l.b16 %v4018_v44  ;;  %v4387_v63 = vunpack.c.l.b16 %v4019_v31  ;;  %v3495_v37 = vshrl.u32 %v3454_v22, 16  ;;  %v3175_v31 = vpop.permute.xlu2 %3174  ;;  %4430 = vrot.lane.b32.xlu0 %v4404_v45, %s6279_s29 }
 0x234   :  { %v3498_v18 = vshll.u32 %v3454_v22, 16  ;;  %v4020_v3 = vsel %vm12833_vm12, %v9217_v46, 0  ;;  %v4021_v29 = vsel %vm12836_vm4, %v9222_v61, 0  ;;  %v4022_v34 = vsel %vm12783_vm0, %v9242_v16, 0  ;;  %v13067_v46 = vld [vmem:[#allocation41_spill] sm:$0xff]  ;;  %v6155_v16 = vld [vmem:[%s11783_s0 + $0xe4] sm:$0xff]  ;;  %4432 = vrot.lane.b32.xlu1 %v4405_v17, %s6279_s29 }
 0x235   :  { %v4023_v33 = vsel %vm12888_vm15, %v9247_v25, 0  ;;  %v4589_v21 = vshrl.u32 %v6153_v14, 16  ;;  %v4592_v44 = vshll.u32 %v6153_v14, 16  ;;  %v4024_v22 = vsel %vm12838_vm14, %v9277_v20, 0 }
 0x236   :  { %vm13068_vm9 = vnez %v13067_v46  ;;  %v4598_v11 = vshrl.u32 %v6154_v30, 16  ;;  %v4601_v61 = vshll.u32 %v6154_v30, 16  ;;  %v4406_v42 = vpack.c.b16 %v4385_v7, %v4384_v8 }
 0x237   :  { %v4025_v15 = vsel %vm13068_vm9, %v3992_v5, 0  ;;  %v4407_v25 = vpack.c.b16 %v4387_v63, %v4386_v60  ;;  %v4388_v59 = vunpack.c.l.b16 %v4020_v3  ;;  %v4389_v14 = vunpack.c.l.b16 %v4021_v29  ;;  %v3159_v46 = vpop.permute.xlu0 %3158 }
 0x238   :  { %v3497_v20 = vrot.slane %v3495_v37, 3  ;;  %v3500_v50 = vrot.slane %v3498_v18, 4  ;;  %v4390_v5 = vunpack.c.l.b16 %v4022_v34  ;;  %v4391_v30 = vunpack.c.l.b16 %v4023_v33  ;;  %v3161_v60 = vpop.permute.xlu1 %3160 }
 0x239   :  { %v9669_v1 = vunpack.c.l.b16 %v4024_v22  ;;  %v9671_v39 = vunpack.c.l.b16 %v4025_v15  ;;  %v4591_v45 = vrot.slane %v4589_v21, 4  ;;  %v4594_v8 = vrot.slane %v4592_v44, 5  ;;  %4434 = vrot.lane.b32.xlu2 %v4406_v42, %s6279_s29 }
 0x23a   :  { %v3456_v63 = vsel %vm13057_vm3, %v3421_v40, %v3159_v46  ;;  %v4600_v7 = vrot.slane %v4598_v11, 4  ;;  %v4603_v3 = vrot.slane %v4601_v61, 5  ;;  %v4607_v29 = vshrl.u32 %v6155_v16, 16  ;;  %v6157_v11 = vld [vmem:[%s11783_s0 + $0xf4] sm:$0xff] }
 0x23b   :  { %v3502_v4 = vshrl.u32 %v3456_v63, 16  ;;  %v3505_v37 = vshll.u32 %v3456_v63, 16  ;;  %v4610_v18 = vshll.u32 %v6155_v16, 16  ;;  %v4616_v62 = vshrl.u32 %v6156_v24, 16  ;;  %v9680_v46 = vpop.permute.xlu2 %3180  ;;  %4436 = vrot.lane.b32.xlu0 %v4407_v25, %s6279_s29 }
 0x23c   :  { %v3437_v17 = vsel %vm13060_vm6, %v3402_v19, %v9464_v2  ;;  %v4408_v34 = vpack.c.b16 %v4389_v14, %v4388_v59  ;;  %v4619_v33 = vshll.u32 %v6156_v24, 16  ;;  %v3501_v21 = vor.u32 %v3500_v50, %v3497_v20  ;;  %v9689_v59 = vld [vmem:[%s11783_s0 + $0xa0] sm:$0xf]  ;;  %vm13071_vm6 = vmmov %vm13057_vm3  ;;  %v13074_v14 = vld [vmem:[#allocation99_spill] sm:$0xff] }
 0x23d   :  { %v3504_v44 = vrot.slane %v3502_v4, 3  ;;  %v3507_v22 = vrot.slane %v3505_v37, 4  ;;  %v4409_v40 = vpack.c.b16 %v4391_v30, %v4390_v5  ;;  %v4410_v15 = vpack.c.b16 %v9671_v39, %v9669_v1  ;;  %13070 = vst [vmem:[#allocation62_spill] sm:$0xff] %v9689_v59  ;;  %v13072_v39 = vld [vmem:[#allocation97_spill] sm:$0xff]  ;;  %v13079_v30 = vld [vmem:[#allocation150_spill] sm:$0xff]  ;;  %v13087_v37 = vld [vmem:[#allocation103_spill] sm:$0xff] }
 0x23e   :  { %v9684_v2 = vor.u32 %v4594_v8, %v4591_v45  ;;  %v4609_v19 = vrot.slane %v4607_v29, 4  ;;  %v4604_v50 = vor.u32 %v4603_v3, %v4600_v7  ;;  %v4612_v42 = vrot.slane %v4610_v18, 5  ;;  %4438 = vrot.lane.b32.xlu1 %v4408_v34, %s6279_s29  ;;  %v13080_v45 = vld [vmem:[#allocation11_spill] sm:$0xff]  ;;  %v13085_v3 = vld [vmem:[#allocation102_spill] sm:$0xff] }
 0x23f   :  { %v9691_v4 = vor.u32 %v3507_v22, %v3504_v44  ;;  %v4618_v24 = vrot.slane %v4616_v62, 4  ;;  %v3472_v61 = vsel %vm13071_vm6, %v3437_v17, %v3175_v31  ;;  %v4621_v1 = vrot.slane %v4619_v33, 5  ;;  %v9702_v5 = vpop.permute.xlu0 %3164  ;;  %v13077_v62 = vld [vmem:[#allocation10_spill] sm:$0xff] }
 0x240   :  { %13069 = vst [vmem:[#allocation2_spill] sm:$0xff] %v9684_v2  ;;  %vm13073_vm3 = vnez %v13072_v39  ;;  %vm13075_vm11 = vnez %v13074_v14  ;;  %vm13078_vm9 = vnez %v13077_v62  ;;  %vm13081_vm6 = vnez %v13080_v45 }
 0x241   :  { %v4042_v16 = vsel %vm13073_vm3, %v12980_v58, 0  ;;  %v4043_v20 = vsel %vm13075_vm11, %v12994_v10, 0  ;;  %v3509_v25 = vsel %vm13076_vm10, %v3501_v21, %v9691_v4  ;;  %v3924_v31 = vsel %vm13078_vm9, %v9689_v59, 0  ;;  %v9715_v10 = vpop.permute.xlu1 %3166  ;;  %4440 = vrot.lane.b32.xlu2 %v4409_v40, %s6279_s29 }
 0x242   :  { %v3925_v8 = vsel %vm13081_vm6, %v13079_v30, 0  ;;  %v4625_v63 = vshrl.u32 %v6157_v11, 16  ;;  %vm13082_vm14 = vcmask 195584   ;;  %vm13083_vm7 = vcmask 220160   ;;  %13084 = vst [vmem:[#allocation63_spill] sm:$0xff] %v9715_v10  ;;  %v13092_v10 = vld [vmem:[#allocation107_spill] sm:$0xff] }
 0x243   :  { %v3458_v58 = vsel %vm13082_vm14, %v9631_v35, %v3161_v60  ;;  %6014 = vmatmul.msk.bf16.vlgmr.msra.gmra.mxu0 %vm13083_vm7, %v3509_v25  ;;  %v4628_v7 = vshll.u32 %v6157_v11, 16  ;;  %vm13086_vm10 = vnez %v13085_v3  ;;  %vm13088_vm9 = vnez %v13087_v37  ;;  %v9730_v45 = vpop.permute.xlu2 %3186  ;;  %4442 = vrot.lane.b32.xlu0 %v4410_v15, %s6279_s29 }
 0x244   :  { %v4044_v29 = vsel %vm13086_vm10, %v12997_v49, 0  ;;  %v4045_v18 = vsel %vm13088_vm9, %v9020_v36, 0  ;;  %v3566_v17 = vshrl.u32 %v3472_v61, 16  ;;  %v3569_v34 = vshll.u32 %v3472_v61, 16 }
 0x245   :  { %v4846_v33 = vunpack.c.l.b16 %v4042_v16  ;;  %v4847_v21 = vunpack.c.l.b16 %v4043_v20  ;;  %vm13089_vm14 = vsmask.f32 3328  ;;  %v4613_v60 = vor.u32 %v4612_v42, %v4609_v19  ;;  %v13091_v20 = vld [vmem:[#allocation172_spill] sm:$0xff]  ;;  %v13094_v42 = vld [vmem:[#allocation111_spill] sm:$0xff] }
 0x246   :  { %v9726_v35 = vsel %vm13089_vm14, %v9684_v2, %v4604_v50  ;;  %v4165_v44 = vunpack.c.l.b16 %v3925_v8  ;;  %v9728_v22 = vor.u32 %v4621_v1, %v4618_v24  ;;  %v3510_v11 = vshrl.u32 %v3458_v58, 16  ;;  %v13096_v1 = vld [vmem:[#allocation26_spill] sm:$0xff] }
 0x247   :  { %13090 = vst [vmem:[#allocation3_spill] sm:$0xff] %v9726_v35  ;;  %v3513_v25 = vshll.u32 %v3458_v58, 16  ;;  %v4164_v62 = vunpack.c.l.b16 %v3924_v31  ;;  %v4627_v30 = vrot.slane %v4625_v63, 4  ;;  %v4630_v59 = vrot.slane %v4628_v7, 5  ;;  %v13098_v8 = vld [vmem:[#allocation42_spill] sm:$0xff]  ;;  %v13100_v58 = vld [vmem:[#allocation44_spill] sm:$0xff]  ;;  %4685 = vrot.lane.b32.xlu1 %v9726_v35, %s6280_s23 }
 0x248   :  { %v4848_v61 = vunpack.c.l.b16 %v4044_v29  ;;  %v4849_v16 = vunpack.c.l.b16 %v4045_v18  ;;  %vm13093_vm7 = vnez %v13092_v10  ;;  %v3568_v43 = vrot.slane %v3566_v17, 3  ;;  %v9757_v17 = vpop.permute.xlu0 %3170  ;;  %v13135_v10 = vld [vmem:[#allocation49_spill] sm:$0xff] }
 0x249   :  { %v4046_v40 = vsel %vm13093_vm7, %v13091_v20, 0  ;;  %v3571_v2 = vrot.slane %v3569_v34, 4  ;;  %v4872_v19 = vpack.c.b16 %v4847_v21, %v4846_v33  ;;  %vm13095_vm6 = vnez %v13094_v42 }
 0x24a   :  { %v4047_v24 = vsel %vm13095_vm6, %v9042_v41, 0  ;;  %vm13097_vm14 = vcmask 146432   ;;  %vm13101_vm4 = vcmask 171008   ;;  %vm13102_vm12 = vsmask.f32 3328 }
 0x24b   :  { %v9742_v31 = vsel %vm13097_vm14, %v9539_v56, %v13096_v1  ;;  %vm13099_vm13 = vmmov %vm13097_vm14  ;;  %v3435_v7 = vsel %vm13101_vm4, %v9617_v38, %v13100_v58  ;;  %v9755_v15 = vsel %vm13102_vm12, %v4604_v50, %v4613_v60  ;;  %v3512_v29 = vrot.slane %v3510_v11, 3 }
 0x24c   :  { %v9747_v63 = vsel %vm13099_vm13, %v9557_v55, %v13098_v8  ;;  %13103 = vst [vmem:[#allocation64_spill] sm:$0xff] %v9755_v15  ;;  %v3515_v18 = vrot.slane %v3513_v25, 4  ;;  %v4196_v56 = vpack.c.b16 %v4165_v44, %v4164_v62  ;;  %vm13104_vm14 = vmmov %vm13102_vm12  ;;  %v3173_v55 = vpop.permute.xlu1 %3172  ;;  %v9763_v33 = vor.u32 %v4630_v59, %v4627_v30  ;;  %4687 = vrot.lane.b32.xlu2 %v9755_v15, %s6280_s23 }
 0x24d   :  { %v9761_v34 = vsel %vm13104_vm14, %v4613_v60, %v9728_v22  ;;  %v4873_v21 = vpack.c.b16 %v4849_v16, %v4848_v61  ;;  %v4850_v38 = vunpack.c.l.b16 %v4046_v40  ;;  %v4851_v1 = vunpack.c.l.b16 %v4047_v24  ;;  %v4298_v61 = vpop.permute.xlu2 %4297  ;;  %4733 = vrot.lane.b32.xlu0 %v9755_v15, %s6281_s15 }
 0x24e   :  { %v9765_v8 = vor.u32 %v3571_v2, %v3568_v43  ;;  %vm13105_vm4 = vcmask 195584   ;;  %v9768_v58 = vrot.slane %v4872_v19, 5  ;;  %v4076_v44 = vsel %vm13073_vm3, %v12997_v49, 0 }
 0x24f   :  { %v3470_v50 = vsel %vm13105_vm4, %v3435_v7, %v3173_v55  ;;  %v4077_v59 = vsel %vm13075_vm11, %v9020_v36, 0  ;;  %v4078_v43 = vsel %vm13086_vm10, %v13091_v20, 0  ;;  %v9781_v2 = vor.u32 %v3515_v18, %v3512_v29  ;;  %4735 = vrot.lane.b32.xlu1 %v9761_v34, %s6281_s15 }
 0x250   :  { %13106 = vst [vmem:[#allocation65_spill] sm:$0xff] %v9768_v58  ;;  %v3558_v60 = vshrl.u32 %v3470_v50, 16  ;;  %v3561_v11 = vshll.u32 %v3470_v50, 16  ;;  %v4079_v25 = vsel %vm13088_vm9, %v9042_v41, 0  ;;  %v4080_v49 = vsel %vm13093_vm7, %v13025_v23, 0 }
 0x251   :  { %v4081_v62 = vsel %vm13095_vm6, %v9075_v53, 0  ;;  %v4897_v16 = vrot.slane %v4873_v21, 5  ;;  %v4874_v40 = vpack.c.b16 %v4851_v1, %v4850_v38  ;;  %vm13107_vm12 = vcmask 23552   ;;  %v3177_v1 = vpop.permute.xlu0 %3176 }
 0x252   :  { %v3560_v30 = vrot.slane %v3558_v60, 3  ;;  %v3563_v36 = vrot.slane %v3561_v11, 4  ;;  %v9793_v19 = vsel %vm13107_vm12, %v4196_v56, %v4298_v61  ;;  %v4996_v24 = vunpack.c.l.b16 %v4076_v44  ;;  %v13108_v11 = vld [vmem:[#allocation53_spill] sm:$0xff]  ;;  %v13110_v56 = vld [vmem:[#allocation58_spill] sm:$0xff]  ;;  %v13120_v61 = vld [vmem:[#allocation171_spill] sm:$0xff] }
 0x253   :  { %v4997_v7 = vunpack.c.l.b16 %v4077_v59  ;;  %v4998_v29 = vunpack.c.l.b16 %v4078_v43  ;;  %v4999_v55 = vunpack.c.l.b16 %v4079_v25  ;;  %v5000_v50 = vunpack.c.l.b16 %v4080_v49 }
 0x254   :  { %v9797_v18 = vor.u32 %v3563_v36, %v3560_v30  ;;  %v5001_v60 = vunpack.c.l.b16 %v4081_v62  ;;  %vm13109_vm13 = vcmask 171008   ;;  %vm13112_vm4 = vsmask.f32 4352  ;;  %v9814_v43 = vpop.permute.xlu1 %3178  ;;  %4781 = vrot.lane.b32.xlu2 %v9761_v34, %s6282_s18  ;;  %v9849_v36 = vld [vmem:[%s11783_s0 + $0x9c] sm:$0xf] }
 0x255   :  { %v3425_v21 = vsel %vm13109_vm13, %v9586_v0, %v13108_v11  ;;  %vm13111_vm14 = vmmov %vm13109_vm13  ;;  %v3517_v44 = vsel %vm13112_vm4, %v9691_v4, %v9781_v2  ;;  %v4110_v59 = vsel %vm13073_vm3, %v13091_v20, 0  ;;  %vm13113_vm12 = vcmask 220160   ;;  %v13125_v11 = vld [vmem:[#allocation46_spill] sm:$0xff] }
 0x256   :  { %v3439_v38 = vsel %vm13111_vm14, %v9579_v27, %v13110_v56  ;;  %6015 = vmatmul.msk.bf16.gmra.mxu0 %vm13113_vm12, %v3517_v44  ;;  %vm13114_vm13 = vmmov %vm13112_vm4  ;;  %v4111_v27 = vsel %vm13075_vm11, %v9042_v41, 0  ;;  %v4112_v4 = vsel %vm13086_vm10, %v13025_v23, 0  ;;  %v4113_v39 = vsel %vm13088_vm9, %v9075_v53, 0 }
 0x257   :  { %v3573_v0 = vsel %vm13114_vm13, %v9797_v18, %v9765_v8  ;;  %vm13115_vm3 = vcmask 195584   ;;  %vm13117_vm4 = vmmov %vm13113_vm12  ;;  %vm13118_vm12 = vsmask.f32 3328  ;;  %v9837_v41 = vrot.slane %v4874_v40, 5 }
 0x258   :  { %v3460_v20 = vsel %vm13115_vm3, %v3425_v21, %v9517_v47  ;;  %vm13116_vm14 = vmmov %vm13115_vm3  ;;  %6022 = vmatmul.msk.bf16.vlgmr.msra.gmra.mxu2 %vm13117_vm4, %v3573_v0  ;;  %v9835_v14 = vsel %vm13118_vm12, %v9728_v22, %v9763_v33  ;;  %vm13119_vm11 = vcmask 1042432   ;;  %v5022_v23 = vpack.c.b16 %v4997_v7, %v4996_v24  ;;  %v3889_v22 = vld [vmem:[%s11783_s0 + $0x98] sm:$0x8]  ;;  %v13123_v7 = vld [vmem:[#allocation59_spill] sm:$0xff] }
 0x259   :  { %v3474_v25 = vsel %vm13116_vm14, %v3439_v38, %v3177_v1  ;;  %v4898_v53 = vsel %vm13119_vm11, %v9768_v58, %v4897_v16  ;;  %v5023_v3 = vpack.c.b16 %v4999_v55, %v4998_v29  ;;  %v5024_v47 = vpack.c.b16 %v5001_v60, %v5000_v50  ;;  %v13122_v24 = vld [vmem:[#allocation173_spill] sm:$0xff]  ;;  %v9859_v60 = vpop.permute.xlu2 %4303  ;;  %4783 = vrot.lane.b32.xlu0 %v9835_v14, %s6282_s18  ;;  %vm13127_vm3 = vmmov %vm13119_vm11 }
 0x25a   :  { %v5146_v37 = vunpack.c.l.b16 %v4110_v59  ;;  %v5147_v49 = vunpack.c.l.b16 %v4111_v27  ;;  %v5148_v62 = vunpack.c.l.b16 %v4112_v4  ;;  %v5149_v30 = vunpack.c.l.b16 %v4113_v39  ;;  %4931 = vrot.lane.b32.xlu1 %v4898_v53, %s6283_s21  ;;  %v13129_v59 = vld [vmem:[#allocation4_spill] sm:$0xff]  ;;  %v13131_v27 = vld [vmem:[#allocation6_spill] sm:$0xff]  ;;  %v9878_v4 = vpop.permute.xlu0 %3182 }
 0x25b   :  { %vm13121_vm10 = vcmask 146432   ;;  %v3574_v55 = vshrl.u32 %v3474_v25, 16  ;;  %v3577_v50 = vshll.u32 %v3474_v25, 16  ;;  %vm13126_vm13 = vcmask 171008  }
 0x25c   :  { %v3406_v40 = vsel %vm13121_vm10, %v9535_v12, %v13120_v61  ;;  %vm13124_vm9 = vmmov %vm13121_vm10  ;;  %v9864_v21 = vsel %vm13126_vm13, %v9590_v51, %v13125_v11  ;;  %v3518_v56 = vshrl.u32 %v3460_v20, 16  ;;  %v3521_v38 = vshll.u32 %v3460_v20, 16 }
 0x25d   :  { %v9857_v29 = vsel %vm13124_vm9, %v13123_v7, %v13122_v24  ;;  %v4900_v12 = vsel %vm13127_vm3, %v4897_v16, %v9837_v41  ;;  %v9871_v1 = vrot.slane %v5022_v23, 5  ;;  %v5047_v44 = vrot.slane %v5023_v3, 5  ;;  %v9885_v3 = vpop.permute.xlu1 %3184  ;;  %vm13139_vm11 = vmmov %vm13126_vm13 }
 0x25e   :  { %vm13130_vm14 = vnez %v13129_v59  ;;  %vm13132_vm4 = vnez %v13131_v27  ;;  %v9880_v39 = vrot.slane %v5024_v47, 5  ;;  %v5172_v20 = vpack.c.b16 %v5147_v49, %v5146_v37  ;;  %v6146_v47 = vld [vmem:[%s11783_s0 + $0x9c] sm:$0xff]  ;;  %4933 = vrot.lane.b32.xlu2 %v4900_v12, %s6283_s21  ;;  %vm13140_vm10 = vmmov %vm13127_vm3 }
 0x25f   :  { %13128 = vst [vmem:[#allocation67_spill] sm:$0xff] %v9871_v1  ;;  %v3922_v0 = vsel %vm13130_vm14, %v3889_v22, 0  ;;  %v3923_v51 = vsel %vm13132_vm4, %v9849_v36, 0  ;;  %v5173_v25 = vpack.c.b16 %v5149_v30, %v5148_v62  ;;  %v4114_v16 = vsel %vm13093_vm7, %v9087_v9, 0  ;;  %v13133_v30 = vld [vmem:[#allocation48_spill] sm:$0xff]  ;;  %vm13134_vm7 = vmmov %vm13124_vm9 }
 0x260   :  { %v3576_v53 = vrot.slane %v3574_v55, 3  ;;  %v3579_v23 = vrot.slane %v3577_v50, 4  ;;  %v4115_v22 = vsel %vm13095_vm6, %v9111_v26, 0  ;;  %v5150_v61 = vunpack.c.l.b16 %v4114_v16  ;;  %vm13136_vm12 = vmmov %vm13134_vm7  ;;  %v6147_v55 = vld [vmem:[%s11783_s0 + $0xa4] sm:$0xff]  ;;  %v13144_v16 = vld [vmem:[#allocation56_spill] sm:$0xff] }
 0x261   :  { %v3520_v24 = vrot.slane %v3518_v56, 3  ;;  %v3523_v37 = vrot.slane %v3521_v38, 4  ;;  %v4162_v49 = vunpack.c.l.b16 %v3922_v0  ;;  %v4163_v62 = vunpack.c.l.b16 %v3923_v51  ;;  %vm13137_vm6 = vmmov %vm13127_vm3  ;;  %v13138_v50 = vld [vmem:[#allocation50_spill] sm:$0xff]  ;;  %v9916_v0 = vpop.permute.xlu2 %4309 }
 0x262   :  { %v3412_v9 = vsel %vm13134_vm7, %v9549_v54, %v13133_v30  ;;  %v3414_v7 = vsel %vm13136_vm12, %v9510_v48, %v13135_v10  ;;  %v5048_v26 = vsel %vm13137_vm6, %v9871_v1, %v5047_v44  ;;  %v5151_v42 = vunpack.c.l.b16 %v4115_v22  ;;  %v13142_v48 = vld [vmem:[#allocation52_spill] sm:$0xff]  ;;  %vm13143_vm9 = vmmov %vm13139_vm11 }
 0x263   :  { %v3441_v11 = vsel %vm13139_vm11, %v3406_v40, %v13138_v50  ;;  %v5050_v54 = vsel %vm13140_vm10, %v5047_v44, %v9880_v39  ;;  %v9909_v56 = vrot.slane %v5172_v20, 5  ;;  %v5197_v38 = vrot.slane %v5173_v25, 5  ;;  %vm13145_vm13 = vmmov %vm13143_vm9  ;;  %5081 = vrot.lane.b32.xlu0 %v5048_v26, %s6284_s26 }
 0x264   :  { %v3427_v12 = vsel %vm13143_vm9, %v9523_v57, %v13142_v48  ;;  %v9914_v59 = vor.u32 %v3579_v23, %v3576_v53  ;;  %v5174_v27 = vpack.c.b16 %v5151_v42, %v5150_v61  ;;  %v4527_v51 = vshrl.u32 %v6146_v47, 16  ;;  %5083 = vrot.lane.b32.xlu1 %v5050_v54, %s6284_s26  ;;  %v9929_v61 = vpop.permute.xlu0 %3188  ;;  %vm13147_vm14 = vmmov %vm13137_vm6 }
 0x265   :  { %13141 = vst [vmem:[#allocation68_spill] sm:$0xff] %v9909_v56  ;;  %v3431_v40 = vsel %vm13145_vm13, %v9613_v52, %v13144_v16  ;;  %v9921_v22 = vor.u32 %v3523_v37, %v3520_v24  ;;  %v4195_v44 = vpack.c.b16 %v4163_v62, %v4162_v49  ;;  %v4530_v20 = vshll.u32 %v6146_v47, 16  ;;  %v13149_v49 = vld [vmem:[#allocation54_spill] sm:$0xff]  ;;  %vm13150_vm7 = vmmov %vm13143_vm9  ;;  %v4296_v30 = vpop.permute.xlu1 %4295 }
 0x266   :  { %vm13146_vm3 = vcmask 195584   ;;  %v9927_v57 = vrot.slane %v5174_v27, 5  ;;  %v4529_v53 = vrot.slane %v4527_v51, 4  ;;  %v4535_v23 = vshrl.u32 %v6147_v55, 16 }
 0x267   :  { %v3466_v25 = vsel %vm13146_vm3, %v3431_v40, %v9592_v32  ;;  %v5198_v52 = vsel %vm13147_vm14, %v9909_v56, %v5197_v38  ;;  %vm13148_vm4 = vsmask.f32 4352  ;;  %v4532_v37 = vrot.slane %v4530_v20, 5  ;;  %vm13151_vm12 = vmmov %vm13146_vm3 }
 0x268   :  { %v3525_v24 = vsel %vm13148_vm4, %v9781_v2, %v9921_v22  ;;  %v4538_v47 = vshll.u32 %v6147_v55, 16  ;;  %v9938_v32 = vsel %vm13150_vm7, %v3412_v9, %v13149_v49  ;;  %v3462_v62 = vsel %vm13151_vm12, %v3427_v12, %v9702_v5  ;;  %vm13153_vm11 = vmmov %vm13148_vm4  ;;  %5231 = vrot.lane.b32.xlu2 %v5198_v52, %s6285_s27  ;;  %v13167_v52 = vld [vmem:[#allocation7_spill] sm:$0xff] }
 0x269   :  { %vm13152_vm6 = vcmask 220160   ;;  %v3581_v10 = vsel %vm13153_vm11, %v9765_v8, %v9914_v59  ;;  %v4537_v26 = vrot.slane %v4535_v23, 4  ;;  %v3542_v42 = vshrl.u32 %v3466_v25, 16  ;;  %vm13154_vm10 = vmmov %vm13146_vm3  ;;  %v9971_v16 = vpop.permute.xlu2 %4315  ;;  %v9987_v23 = vld [vmem:[%s11783_s0 + $0xbc] sm:$0xf] }
 0x26a   :  { %6016 = vmatmul.msk.bf16.gmra.mxu0 %vm13152_vm6, %v3525_v24  ;;  %v3545_v50 = vshll.u32 %v3466_v25, 16  ;;  %v3476_v2 = vsel %vm13154_vm10, %v3441_v11, %v9814_v43  ;;  %vm13155_vm9 = vcmask 23552   ;;  %vm13156_vm13 = vmmov %vm13152_vm6  ;;  %v5200_v8 = vsel %vm13147_vm14, %v5197_v38, %v9927_v57  ;;  %v6148_v43 = vld [vmem:[%s11783_s0 + $0xac] sm:$0xff]  ;;  %13162 = vst [vmem:[#allocation73_spill] sm:$0xff] %v9971_v16 }
 0x26b   :  { %v9949_v55 = vsel %vm13155_vm9, %v4195_v44, %v4296_v30  ;;  %6023 = vmatmul.msk.bf16.gmra.mxu2 %vm13156_vm13, %v3581_v10  ;;  %vm13157_vm3 = vmmov %vm13150_vm7  ;;  %v4533_v9 = vor.u32 %v4532_v37, %v4529_v53  ;;  %v4540_v54 = vrot.slane %v4538_v47, 5  ;;  %v13158_v11 = vld [vmem:[#allocation55_spill] sm:$0xff]  ;;  %v3526_v27 = vshrl.u32 %v3462_v62, 16  ;;  %v13163_v25 = vld [vmem:[#allocation60_spill] sm:$0xff]  ;;  %5233 = vrot.lane.b32.xlu0 %v5200_v8, %s6285_s27 }
 0x26c   :  { %v3443_v5 = vsel %vm13157_vm3, %v9857_v29, %v9541_v13  ;;  %vm13159_vm4 = vmmov %vm13157_vm3  ;;  %v3529_v13 = vshll.u32 %v3462_v62, 16  ;;  %v3582_v38 = vshrl.u32 %v3476_v2, 16  ;;  %v3585_v51 = vshll.u32 %v3476_v2, 16  ;;  %v13165_v53 = vld [vmem:[#allocation5_spill] sm:$0xff]  ;;  %v13169_v30 = vld [vmem:[#allocation63_spill] sm:$0xff] }
 0x26d   :  { %v3433_v48 = vsel %vm13159_vm4, %v9553_v28, %v13158_v11  ;;  %vm13160_vm7 = vmmov %vm13154_vm10  ;;  %v4541_v40 = vor.u32 %v4540_v54, %v4537_v26  ;;  %v3544_v44 = vrot.slane %v3542_v42, 3  ;;  %v3547_v20 = vrot.slane %v3545_v50, 4  ;;  %4669 = vrot.lane.b32.xlu1 %v4533_v9, %s6280_s23  ;;  %v6149_v47 = vld [vmem:[%s11783_s0 + $0xb4] sm:$0xff]  ;;  %v9999_v26 = vpop.permute.xlu0 %4299 }
 0x26e   :  { %v3478_v12 = vsel %vm13160_vm7, %v3443_v5, %v9680_v46  ;;  %vm13161_vm12 = vmmov %vm13157_vm3  ;;  %v9978_v46 = vld [vmem:[%s11783_s0 + $0xb8] sm:$0xf]  ;;  %vm13166_vm11 = vnez %v13165_v53  ;;  %vm13168_vm10 = vnez %v13167_v52  ;;  %v4544_v24 = vshrl.u32 %v6148_v43, 16  ;;  %v10002_v5 = vpop.permute.xlu1 %4301 }
 0x26f   :  { %v9969_v29 = vsel %vm13161_vm12, %v9742_v31, %v9562_v6  ;;  %vm13164_vm6 = vmmov %vm13157_vm3  ;;  %v3930_v6 = vsel %vm13166_vm11, %v9978_v46, 0  ;;  %v3590_v31 = vshrl.u32 %v3478_v12, 16  ;;  %v4547_v37 = vshll.u32 %v6148_v43, 16  ;;  %v13172_v11 = vld [vmem:[#allocation61_spill] sm:$0xff] }
 0x270   :  { %v3449_v28 = vsel %vm13164_vm6, %v3414_v7, %v13163_v25  ;;  %v3931_v7 = vsel %vm13168_vm10, %v9987_v23, 0  ;;  %v3528_v49 = vrot.slane %v3526_v27, 3  ;;  %v3531_v62 = vrot.slane %v3529_v13, 4  ;;  %vm13170_vm9 = vmmov %vm13160_vm7 }
 0x271   :  { %v3464_v10 = vsel %vm13170_vm9, %v9864_v21, %v13169_v30  ;;  %vm13171_vm13 = vsmask.f32 3328  ;;  %v3584_v50 = vrot.slane %v3582_v38, 3  ;;  %v3587_v2 = vrot.slane %v3585_v51, 4  ;;  %vm13175_vm4 = vmmov %vm13160_vm7 }
 0x272   :  { %v4542_v42 = vsel %vm13171_vm13, %v4533_v9, %v4541_v40  ;;  %v4546_v8 = vrot.slane %v4544_v24, 4  ;;  %v4549_v54 = vrot.slane %v4547_v37, 5  ;;  %v10004_v43 = vor.u32 %v3547_v20, %v3544_v44  ;;  %v10020_v37 = vpop.permute.xlu2 %4321  ;;  %vm13174_vm14 = vmmov %vm13171_vm13 }
 0x273   :  { %v10009_v27 = vsel %vm13157_vm3, %v9747_v63, %v13172_v11  ;;  %v3593_v13 = vshll.u32 %v3478_v12, 16  ;;  %v10011_v25 = vunpack.c.l.b16 %v3930_v6  ;;  %v10013_v21 = vunpack.c.l.b16 %v3931_v7  ;;  %4671 = vrot.lane.b32.xlu2 %v4542_v42, %s6280_s23  ;;  %13173 = vst [vmem:[#allocation74_spill] sm:$0xff] %v10020_v37  ;;  %4717 = vrot.lane.b32.xlu0 %v4541_v40, %s6281_s15  ;;  %vm13181_vm6 = vmmov %vm13175_vm4  ;;  %v10059_v11 = vld [vmem:[%s11783_s0 + $0xa8] sm:$0xf] }
 0x274   :  { %v4550_v9 = vor.u32 %v4549_v54, %v4546_v8  ;;  %v4553_v38 = vshrl.u32 %v6149_v47, 16  ;;  %v4556_v51 = vshll.u32 %v6149_v47, 16  ;;  %v3592_v53 = vrot.slane %v3590_v31, 3  ;;  %v13176_v31 = vld [vmem:[#allocation66_spill] sm:$0xff] }
 0x275   :  { %v10016_v52 = vor.u32 %v3531_v62, %v3528_v49  ;;  %v3534_v44 = vshrl.u32 %v3464_v10, 16  ;;  %v3537_v20 = vshll.u32 %v3464_v10, 16  ;;  %v10018_v24 = vor.u32 %v3587_v2, %v3584_v50  ;;  %v13178_v49 = vld [vmem:[#allocation62_spill] sm:$0xff]  ;;  %v13179_v62 = vld [vmem:[#allocation69_spill] sm:$0xff]  ;;  %v10042_v8 = vpop.permute.xlu0 %4305 }
 0x276   :  { %v10023_v63 = vsel %vm13174_vm14, %v4541_v40, %v4550_v9  ;;  %v4555_v12 = vrot.slane %v4553_v38, 4  ;;  %v4558_v6 = vrot.slane %v4556_v51, 5  ;;  %v3595_v7 = vrot.slane %v3593_v13, 4  ;;  %v10050_v54 = vld [vmem:[%s11783_s0 + $0xa4] sm:$0xf]  ;;  %v13183_v13 = vld [vmem:[#allocation8_spill] sm:$0xff]  ;;  %v10065_v38 = vpop.permute.xlu1 %4307 }
 0x277   :  { %v10027_v30 = vsel %vm13175_vm4, %v3449_v28, %v9730_v45  ;;  %vm13177_vm7 = vnez %v13176_v31  ;;  %vm13180_vm12 = vnez %v13179_v62  ;;  %v3468_v42 = vsel %vm13181_vm6, %v3433_v48, %v9757_v17  ;;  %4719 = vrot.lane.b32.xlu1 %v10023_v63, %s6281_s15  ;;  %13186 = vst [vmem:[#allocation70_spill] sm:$0xff] %v10065_v38  ;;  %v13201_v31 = vld [vmem:[#allocation12_spill] sm:$0xff] }
 0x278   :  { %v4028_v47 = vsel %vm13177_vm7, %v9849_v36, 0  ;;  %v4029_v10 = vsel %vm13180_vm12, %v13178_v49, 0  ;;  %v10040_v50 = vor.u32 %v4558_v6, %v4555_v12  ;;  %v3536_v2 = vrot.slane %v3534_v44, 3  ;;  %v10073_v12 = vld [vmem:[%s11783_s0 + $0xac] sm:$0xf]  ;;  %v13188_v6 = vld [vmem:[#allocation9_spill] sm:$0xff] }
 0x279   :  { %v4832_v45 = vunpack.c.l.b16 %v4028_v47  ;;  %v4833_v28 = vunpack.c.l.b16 %v4029_v10  ;;  %v3539_v40 = vrot.slane %v3537_v20, 4  ;;  %vm13182_vm11 = vsmask.f32 4352 }
 0x27a   :  { %v3533_v36 = vsel %vm13182_vm11, %v9921_v22, %v10016_v52  ;;  %v4062_v17 = vsel %vm13177_vm7, %v10050_v54, 0  ;;  %v3614_v48 = vshrl.u32 %v10027_v30, 16  ;;  %vm13184_vm10 = vnez %v13183_v13  ;;  %vm13187_vm13 = vmmov %vm13182_vm11 }
 0x27b   :  { %v3926_v22 = vsel %vm13184_vm10, %v10059_v11, 0  ;;  %vm13185_vm9 = vcmask 220160   ;;  %v3589_v51 = vsel %vm13187_vm13, %v9914_v59, %v10018_v24  ;;  %v4865_v44 = vpack.c.b16 %v4833_v28, %v4832_v45  ;;  %4765 = vrot.lane.b32.xlu2 %v4550_v9, %s6282_s18 }
 0x27c   :  { %6017 = vmatmul.msk.bf16.gmra.mxu0 %vm13185_vm9, %v3533_v36  ;;  %v3550_v20 = vshrl.u32 %v3468_v42, 16  ;;  %vm13189_vm3 = vnez %v13188_v6  ;;  %vm13190_vm14 = vmmov %vm13185_vm9  ;;  %v4063_v49 = vsel %vm13180_vm12, %v10059_v11, 0  ;;  %v4982_v10 = vunpack.c.l.b16 %v4062_v17  ;;  %v13195_v17 = vld [vmem:[#allocation72_spill] sm:$0xff] }
 0x27d   :  { %v3927_v47 = vsel %vm13189_vm3, %v10073_v12, 0  ;;  %6024 = vmatmul.msk.bf16.gmra.mxu2 %vm13190_vm14, %v3589_v51  ;;  %v3553_v36 = vshll.u32 %v3468_v42, 16  ;;  %vm13191_vm4 = vsmask.f32 3328  ;;  %v10086_v45 = vrot.slane %v4865_v44, 5  ;;  %v13193_v51 = vld [vmem:[#allocation71_spill] sm:$0xff] }
 0x27e   :  { %v10084_v59 = vsel %vm13191_vm4, %v4550_v9, %v10040_v50  ;;  %v4983_v28 = vunpack.c.l.b16 %v4063_v49  ;;  %v10089_v13 = vor.u32 %v3595_v7, %v3592_v53  ;;  %v4166_v6 = vunpack.c.l.b16 %v3926_v22  ;;  %v10097_v42 = vld [vmem:[%s11783_s0 + $0xb0] sm:$0xf]  ;;  %v10102_v49 = vpop.permute.xlu2 %4327 }
 0x27f   :  { %13192 = vst [vmem:[#allocation78_spill] sm:$0xff] %v10084_v59  ;;  %vm13194_vm6 = vnez %v13193_v51  ;;  %vm13196_vm11 = vnez %v13195_v17  ;;  %v4167_v56 = vunpack.c.l.b16 %v3927_v47  ;;  %v10104_v22 = vor.u32 %v3539_v40, %v3536_v2  ;;  %4767 = vrot.lane.b32.xlu0 %v10084_v59, %s6282_s18  ;;  %4915 = vrot.lane.b32.xlu1 %v10086_v45, %s6283_s21 }
 0x280   :  { %v4064_v1 = vsel %vm13194_vm6, %v10073_v12, 0  ;;  %v4065_v44 = vsel %vm13196_vm11, %v10097_v42, 0  ;;  %13197 = vst [vmem:[#allocation76_spill] sm:$0xff] %v10102_v49  ;;  %v5015_v9 = vpack.c.b16 %v4983_v28, %v4982_v10  ;;  %v10106_v15 = vrot.slane %v3614_v48, 3  ;;  %v10147_v10 = vpop.permute.xlu1 %4313 }
 0x281   :  { %v4984_v53 = vunpack.c.l.b16 %v4064_v1  ;;  %v4985_v7 = vunpack.c.l.b16 %v4065_v44  ;;  %v3617_v58 = vshll.u32 %v10027_v30, 16  ;;  %v3552_v35 = vrot.slane %v3550_v20, 3  ;;  %v10123_v30 = vpop.permute.xlu0 %4311  ;;  %v10142_v20 = vld [vmem:[%s11783_s0 + $0xc0] sm:$0xf]  ;;  %13203 = vst [vmem:[#allocation84_spill] sm:$0xff] %v10147_v10 }
 0x282   :  { %v3555_v37 = vrot.slane %v3553_v36, 4  ;;  %vm13198_vm10 = vcmask 195584   ;;  %13200 = vst [vmem:[#allocation79_spill] sm:$0xff] %v10123_v30  ;;  %v5032_v40 = vrot.slane %v5015_v9, 5  ;;  %v4096_v48 = vsel %vm13177_vm7, %v10073_v12, 0 }
 0x283   :  { %v10114_v47 = vsel %vm13198_vm10, %v9969_v29, %v9878_v4  ;;  %vm13199_vm9 = vmmov %vm13198_vm10  ;;  %v5016_v2 = vpack.c.b16 %v4985_v7, %v4984_v53  ;;  %v4097_v4 = vsel %vm13180_vm12, %v10097_v42, 0  ;;  %v4197_v29 = vpack.c.b16 %v4167_v56, %v4166_v6  ;;  %v10157_v56 = vld [vmem:[%s11783_s0 + $0xc4] sm:$0xf] }
 0x284   :  { %v10119_v1 = vsel %vm13199_vm9, %v9938_v32, %v9885_v3  ;;  %v10134_v3 = vld [vmem:[%s11783_s0 + $0xb4] sm:$0xf]  ;;  %vm13202_vm7 = vnez %v13201_v31  ;;  %v4099_v28 = vsel %vm13196_vm11, %v9978_v46, 0  ;;  %13205 = vst [vmem:[#allocation82_spill] sm:$0xff] %v10157_v56  ;;  %v13206_v6 = vld [vmem:[#allocation14_spill] sm:$0xff]  ;;  %v5132_v9 = vunpack.c.l.b16 %v4096_v48  ;;  %vm13210_vm14 = vmmov %vm13199_vm9 }
 0x285   :  { %v4098_v32 = vsel %vm13194_vm6, %v10134_v3, 0  ;;  %v3932_v62 = vsel %vm13202_vm7, %v10142_v20, 0  ;;  %v10149_v36 = vrot.slane %v5016_v2, 5  ;;  %vm13207_vm12 = vnez %v13206_v6  ;;  %v6158_v2 = vld [vmem:[%s11783_s0 + $0xfc] sm:$0xff] }
 0x286   :  { %v3933_v44 = vsel %vm13207_vm12, %v10157_v56, 0  ;;  %v5133_v53 = vunpack.c.l.b16 %v4097_v4  ;;  %v5134_v7 = vunpack.c.l.b16 %v4098_v32  ;;  %v10165_v31 = vrot.slane %v3617_v58, 4  ;;  %v4417_v58 = vpop.permute.xlu2 %4416 }
 0x287   :  { %13204 = vst [vmem:[#allocation86_spill] sm:$0xff] %v10149_v36  ;;  %v10167_v49 = vor.u32 %v3555_v37, %v3552_v35  ;;  %v3598_v10 = vshrl.u32 %v10114_v47, 16  ;;  %v5135_v30 = vunpack.c.l.b16 %v4099_v28  ;;  %v3601_v16 = vshll.u32 %v10114_v47, 16  ;;  %5065 = vrot.lane.b32.xlu0 %v5032_v40, %s6284_s26 }
 0x288   :  { %v3606_v59 = vshrl.u32 %v10119_v1, 16  ;;  %vm13208_vm13 = vcmask 1042432   ;;  %v5165_v4 = vpack.c.b16 %v5133_v53, %v5132_v9  ;;  %vm13209_vm3 = vcmask 23552   ;;  %v10209_v53 = vpop.permute.xlu1 %4319 }
 0x289   :  { %v5034_v48 = vsel %vm13208_vm13, %v5032_v40, %v10149_v36  ;;  %v5257_v32 = vsel %vm13209_vm3, %v4197_v29, %v9999_v26  ;;  %v4172_v6 = vunpack.c.l.b16 %v3932_v62  ;;  %v4173_v56 = vunpack.c.l.b16 %v3933_v44  ;;  %v13214_v62 = vld [vmem:[#allocation113_spill] sm:$0xff]  ;;  %13217 = vst [vmem:[#allocation90_spill] sm:$0xff] %v10209_v53 }
 0x28a   :  { %v5166_v38 = vpack.c.b16 %v5135_v30, %v5134_v7  ;;  %v3609_v35 = vshll.u32 %v10119_v1, 16  ;;  %v3486_v37 = vsel %vm13210_vm14, %v10009_v27, %v9929_v61  ;;  %vm13211_vm4 = vcmask 48128   ;;  %5067 = vrot.lane.b32.xlu1 %v5034_v48, %s6284_s26  ;;  %v10192_v30 = vpop.permute.xlu0 %4317  ;;  %v13220_v48 = vld [vmem:[#allocation117_spill] sm:$0xff] }
 0x28b   :  { %v10181_v47 = vsel %vm13211_vm4, %v5257_v32, %v4417_v58  ;;  %v4634_v28 = vshrl.u32 %v6158_v2, 16  ;;  %v10185_v9 = vrot.slane %v5165_v4, 5  ;;  %v4637_v29 = vshll.u32 %v6158_v2, 16  ;;  %v6248_v2 = vld [vmem:[%s11783_s0 + $0xf0] sm:$0xf]  ;;  %vm13222_vm14 = vmmov %vm13211_vm4 }
 0x28c   :  { %13212 = vst [vmem:[#allocation89_spill] sm:$0xff] %v10181_v47  ;;  %v10187_v26 = vrot.slane %v5166_v38, 5  ;;  %v4030_v1 = vsel %vm13194_vm6, %v10050_v54, 0  ;;  %vm13213_vm10 = vsmask.f32 4352  ;;  %v4031_v27 = vsel %vm13196_vm11, %v10059_v11, 0  ;;  %vm13224_vm4 = vmmov %vm13208_vm13 }
 0x28d   :  { %v3541_v61 = vsel %vm13213_vm10, %v10016_v52, %v10104_v22  ;;  %v4834_v40 = vunpack.c.l.b16 %v4030_v1  ;;  %v10203_v38 = vld [vmem:[%s11783_s0 + $0xec] sm:$0xf]  ;;  %vm13215_vm9 = vnez %v13214_v62  ;;  %v3622_v51 = vshrl.u32 %v3486_v37, 16  ;;  %vm13218_vm7 = vmmov %vm13213_vm10  ;;  %v13246_v62 = vld [vmem:[#allocation21_spill] sm:$0xff] }
 0x28e   :  { %v4048_v54 = vsel %vm13215_vm9, %v10203_v38, 0  ;;  %v4200_v44 = vpack.c.b16 %v4173_v56, %v4172_v6  ;;  %vm13216_vm6 = vcmask 220160   ;;  %v3597_v52 = vsel %vm13218_vm7, %v10018_v24, %v10089_v13 }
 0x28f   :  { %6018 = vmatmul.msk.bf16.gmra.mxu0 %vm13216_vm6, %v3541_v61  ;;  %v4835_v11 = vunpack.c.l.b16 %v4031_v27  ;;  %v3625_v17 = vshll.u32 %v3486_v37, 16  ;;  %vm13219_vm11 = vmmov %vm13216_vm6  ;;  %v4636_v7 = vrot.slane %v4634_v28, 4  ;;  %vm13221_vm12 = vnez %v13220_v48  ;;  %v10226_v28 = vld [vmem:[%s11783_s0 + $0xfc] sm:$0xf]  ;;  %v10234_v27 = vld [vmem:[%s11783_s0 + $0x100] sm:$0xf] }
 0x290   :  { %6025 = vmatmul.msk.bf16.gmra.mxu2 %vm13219_vm11, %v3597_v52  ;;  %v4049_v56 = vsel %vm13221_vm12, %v6248_v2, 0  ;;  %v4852_v4 = vunpack.c.l.b16 %v4048_v54  ;;  %v5184_v32 = vsel %vm13208_vm13, %v10185_v9, %v10187_v26  ;;  %v4639_v6 = vrot.slane %v4637_v29, 5  ;;  %vm13229_vm6 = vmmov %vm13218_vm7 }
 0x291   :  { %v4866_v58 = vpack.c.b16 %v4835_v11, %v4834_v40  ;;  %v4853_v24 = vunpack.c.l.b16 %v4049_v56  ;;  %v3608_v1 = vrot.slane %v3606_v59, 3  ;;  %v3611_v37 = vrot.slane %v3609_v35, 4  ;;  %v4423_v40 = vpop.permute.xlu2 %4422  ;;  %5217 = vrot.lane.b32.xlu0 %v5184_v32, %s6285_s27  ;;  %vm13236_vm11 = vmmov %vm13224_vm4 }
 0x292   :  { %v4116_v61 = vsel %vm13215_vm9, %v10226_v28, 0  ;;  %v4117_v29 = vsel %vm13221_vm12, %v10234_v27, 0  ;;  %v3600_v59 = vrot.slane %v3598_v10, 3  ;;  %v5266_v35 = vsel %vm13209_vm3, %v4200_v44, %v10042_v8  ;;  %4689 = vrot.lane.b32.xlu1 %v9761_v34, %s6280_s23 }
 0x293   :  { %v10241_v54 = vrot.slane %v4866_v58, 5  ;;  %v4875_v52 = vpack.c.b16 %v4853_v24, %v4852_v4  ;;  %v3603_v11 = vrot.slane %v3601_v16, 4  ;;  %v3624_v56 = vrot.slane %v3622_v51, 3  ;;  %v10256_v16 = vpop.permute.xlu0 %4323  ;;  %v10274_v24 = vpop.permute.xlu1 %4325 }
 0x294   :  { %v3627_v47 = vrot.slane %v3625_v17, 4  ;;  %v10244_v53 = vsel %vm13222_vm14, %v5266_v35, %v4423_v40  ;;  %v10249_v36 = vor.u32 %v4639_v6, %v4636_v7  ;;  %v5152_v10 = vunpack.c.l.b16 %v4116_v61  ;;  %v13225_v17 = vld [vmem:[#allocation13_spill] sm:$0xff]  ;;  %v10288_v61 = vld [vmem:[%s11783_s0 + $0xd0] sm:$0xf]  ;;  %vm13242_vm14 = vmmov %vm13229_vm6 }
 0x295   :  { %13223 = vst [vmem:[#allocation87_spill] sm:$0xff] %v10244_v53  ;;  %v4884_v8 = vsel %vm13224_vm4, %v10086_v45, %v10241_v54  ;;  %v5153_v44 = vunpack.c.l.b16 %v4117_v29  ;;  %v10254_v4 = vor.u32 %v3611_v37, %v3608_v1  ;;  %v10259_v51 = vrot.slane %v4875_v52, 5  ;;  %v10269_v45 = vld [vmem:[%s11783_s0 + $0xf4] sm:$0xf]  ;;  %v6150_v7 = vld [vmem:[%s11783_s0 + $0xbc] sm:$0xff]  ;;  %vm13243_vm4 = vmmov %vm13229_vm6 }
 0x296   :  { %4917 = vrot.lane.b32.xlu2 %v4884_v8, %s6283_s21  ;;  %vm13226_vm10 = vnez %v13225_v17  ;;  %v3944_v32 = vsel %vm12763_vm8, %v6248_v2, 0  ;;  %v3945_v58 = vsel %vm13046_vm2, %v10269_v45, 0  ;;  %v10279_v1 = vsel %vm13229_vm6, %v10004_v43, %v10167_v49  ;;  %13230 = vst [vmem:[#allocation93_spill] sm:$0xff] %v10288_v61  ;;  %v13231_v29 = vld [vmem:[#allocation20_spill] sm:$0xff]  ;;  %v13233_v8 = vld [vmem:[#allocation15_spill] sm:$0xff] }
 0x297   :  { %v3928_v34 = vsel %vm13226_vm10, %v10097_v42, 0  ;;  %v3620_v37 = vor.u32 %v10165_v31, %v10106_v15  ;;  %vm13232_vm8 = vnez %v13231_v29  ;;  %v3628_v40 = vor.u32 %v3627_v47, %v3624_v56  ;;  %v13238_v56 = vld [vmem:[#allocation75_spill] sm:$0xff]  ;;  %vm13244_vm10 = vmmov %vm13243_vm4 }
 0x298   :  { %v3936_v35 = vsel %vm13232_vm8, %v10288_v61, 0  ;;  %v10293_v52 = vor.u32 %v3603_v11, %v3600_v59  ;;  %vm13234_vm2 = vnez %v13233_v8  ;;  %vm13235_vm7 = vsmask.f32 3328 }
 0x299   :  { %v3929_v17 = vsel %vm13234_vm2, %v10134_v3, 0  ;;  %v10301_v15 = vsel %vm13235_vm7, %v9763_v33, %v10249_v36  ;;  %v5175_v31 = vpack.c.b16 %v5153_v44, %v5152_v10  ;;  %v10306_v6 = vunpack.c.l.b16 %v3928_v34  ;;  %v10311_v11 = vpop.permute.xlu2 %4428  ;;  %v13240_v10 = vld [vmem:[#allocation77_spill] sm:$0xff]  ;;  %vm13252_vm2 = vmmov %vm13243_vm4 }
 0x29a   :  { %v4184_v29 = vunpack.c.l.b16 %v3944_v32  ;;  %v4185_v47 = vunpack.c.l.b16 %v3945_v58  ;;  %v4902_v59 = vsel %vm13236_vm11, %v9837_v41, %v10259_v51  ;;  %13237 = vst [vmem:[#allocation94_spill] sm:$0xff] %v10311_v11  ;;  %vm13239_vm13 = vnez %v13238_v56  ;;  %4785 = vrot.lane.b32.xlu0 %v10301_v15, %s6282_s18  ;;  %v10347_v58 = vld [vmem:[%s11783_s0 + $0xd4] sm:$0xf] }
 0x29b   :  { %v4032_v33 = vsel %vm13239_vm13, %v10073_v12, 0  ;;  %vm13241_vm3 = vnez %v13240_v10  ;;  %v10322_v34 = vsel %vm13242_vm14, %v10167_v49, %v9797_v18  ;;  %v10326_v32 = vsel %vm13243_vm4, %v10254_v4, %v3620_v37  ;;  %13245 = vst [vmem:[#allocation95_spill] sm:$0xff] %v10347_v58  ;;  %4935 = vrot.lane.b32.xlu1 %v4902_v59, %s6283_s21  ;;  %v4413_v61 = vpop.permute.xlu0 %4412 }
 0x29c   :  { %v4033_v44 = vsel %vm13241_vm3, %v10097_v42, 0  ;;  %v4169_v41 = vunpack.c.l.b16 %v3929_v17  ;;  %v4082_v12 = vsel %vm13215_vm9, %v10269_v45, 0  ;;  %v10336_v42 = vld [vmem:[%s11783_s0 + $0xf8] sm:$0xf]  ;;  %v10342_v49 = vsel %vm13244_vm10, %v3620_v37, %v3628_v40 }
 0x29d   :  { %v4083_v18 = vsel %vm13221_vm12, %v10336_v42, 0  ;;  %vm13247_vm9 = vnez %v13246_v62  ;;  %v10353_v17 = vrot.slane %v5175_v31, 5  ;;  %v4562_v2 = vshrl.u32 %v6150_v7, 16  ;;  %vm13248_vm12 = vmmov %vm13243_vm4  ;;  %v4415_v31 = vpop.permute.xlu1 %4414 }
 0x29e   :  { %v3937_v8 = vsel %vm13247_vm9, %v10347_v58, 0  ;;  %v4565_v53 = vshll.u32 %v6150_v7, 16  ;;  %v4206_v48 = vpack.c.b16 %v4185_v47, %v4184_v29  ;;  %v3549_v37 = vsel %vm13248_vm12, %v10104_v22, %v10004_v43  ;;  %5215 = vrot.lane.b32.xlu2 %v10185_v9, %s6285_s27  ;;  %v10372_v22 = vld [vmem:[%s11783_s0 + $0x108] sm:$0xf] }
 0x29f   :  { %v4836_v40 = vunpack.c.l.b16 %v4032_v33  ;;  %v4837_v11 = vunpack.c.l.b16 %v4033_v44  ;;  %vm13249_vm6 = vcmask 48128   ;;  %vm13251_vm8 = vcmask 220160   ;;  %v10393_v33 = vld [vmem:[%s11783_s0 + $0xc8] sm:$0xf]  ;;  %v13259_v44 = vld [vmem:[#allocation16_spill] sm:$0xff] }
 0x2a0   :  { %v10362_v62 = vsel %vm13249_vm6, %v9949_v55, %v4413_v61  ;;  %6019 = vmatmul.msk.bf16.gmra.mxu0 %vm13251_vm8, %v3549_v37  ;;  %v3605_v7 = vsel %vm13252_vm2, %v10089_v13, %v10293_v52  ;;  %v5002_v29 = vunpack.c.l.b16 %v4082_v12  ;;  %v5003_v47 = vunpack.c.l.b16 %v4083_v18  ;;  %v10380_v61 = vld [vmem:[%s11783_s0 + $0x10c] sm:$0xf]  ;;  %vm13256_vm7 = vmmov %vm13249_vm6 }
 0x2a1   :  { %13250 = vst [vmem:[#allocation98_spill] sm:$0xff] %v10362_v62  ;;  %v4198_v43 = vpack.c.b16 %v4169_v41, %v10306_v6  ;;  %v3950_v55 = vsel %vm12783_vm0, %v10372_v22, 0  ;;  %v3951_v59 = vsel %vm12888_vm15, %v10380_v61, 0  ;;  %v10387_v6 = vsel %vm13256_vm7, %v9793_v19, %v4415_v31  ;;  %vm13258_vm11 = vmmov %vm13251_vm8  ;;  %v10404_v19 = vld [vmem:[%s11783_s0 + $0xcc] sm:$0xf]  ;;  %v13262_v31 = vld [vmem:[#allocation17_spill] sm:$0xff]  ;;  %v4435_v58 = vpop.permute.xlu2 %4434 }
 0x2a2   :  { %13254 = vst [vmem:[#allocation100_spill] sm:$0xff] %v10380_v61  ;;  %6026 = vmatmul.msk.bf16.gmra.mxu2 %vm13258_vm11, %v3605_v7  ;;  %vm13260_vm0 = vnez %v13259_v44  ;;  %vm13261_vm14 = vcmask 1042432   ;;  %v4564_v18 = vrot.slane %v4562_v2, 4  ;;  %v4567_v37 = vrot.slane %v4565_v53, 5  ;;  %vm13265_vm10 = vmmov %vm13249_vm6 }
 0x2a3   :  { %13257 = vst [vmem:[#allocation101_spill] sm:$0xff] %v10387_v6  ;;  %v3934_v41 = vsel %vm13260_vm0, %v10393_v33, 0  ;;  %v5202_v12 = vsel %vm13261_vm14, %v9927_v57, %v10353_v17  ;;  %vm13263_vm15 = vnez %v13262_v31  ;;  %v4867_v9 = vpack.c.b16 %v4837_v11, %v4836_v40  ;;  %4673 = vrot.lane.b32.xlu1 %v10023_v63, %s6280_s23  ;;  %vm13270_vm8 = vmmov %vm13249_vm6 }
 0x2a4   :  { %v3935_v7 = vsel %vm13263_vm15, %v10404_v19, 0  ;;  %v4100_v13 = vsel %vm13239_vm13, %v9987_v23, 0  ;;  %v4101_v57 = vsel %vm13241_vm3, %v10142_v20, 0  ;;  %vm13264_vm4 = vcmask 23552   ;;  %5235 = vrot.lane.b32.xlu0 %v5202_v12, %s6285_s27 }
 0x2a5   :  { %v5284_v53 = vsel %vm13264_vm4, %v4206_v48, %v10192_v30  ;;  %v4190_v2 = vunpack.c.l.b16 %v3950_v55  ;;  %v4191_v44 = vunpack.c.l.b16 %v3951_v59  ;;  %v5025_v6 = vpack.c.b16 %v5003_v47, %v5002_v29  ;;  %vm13267_vm9 = vmmov %vm13264_vm4  ;;  %v4419_v47 = vpop.permute.xlu0 %4418 }
 0x2a6   :  { %v4176_v62 = vunpack.c.l.b16 %v3936_v35  ;;  %v4177_v61 = vunpack.c.l.b16 %v3937_v8  ;;  %v10418_v31 = vsel %vm13265_vm10, %v5284_v53, %v4435_v58  ;;  %v13266_v11 = vpack.c.b16 %v10013_v21, %v10011_v25  ;;  %vm13268_vm12 = vmmov %vm13264_vm4  ;;  %4737 = vrot.lane.b32.xlu2 %v9835_v14, %s6281_s15  ;;  %v13277_v53 = vld [vmem:[#allocation118_spill] sm:$0xff] }
 0x2a7   :  { %v10428_v30 = vor.u32 %v4567_v37, %v4564_v18  ;;  %v5136_v48 = vunpack.c.l.b16 %v4100_v13  ;;  %v5137_v29 = vunpack.c.l.b16 %v4101_v57  ;;  %v5260_v35 = vsel %vm13268_vm12, %v4198_v43, %v10002_v5  ;;  %v4421_v5 = vpop.permute.xlu1 %4420  ;;  %v6159_v13 = vld [vmem:[%s11783_s0 + $0x104] sm:$0xff]  ;;  %vm13275_vm7 = vmmov %vm13264_vm4 }
 0x2a8   :  { %v5263_v40 = vsel %vm13267_vm9, %v13266_v11, %v9859_v60  ;;  %v4174_v58 = vunpack.c.l.b16 %v3934_v41  ;;  %v4175_v8 = vunpack.c.l.b16 %v3935_v7  ;;  %v10432_v55 = vrot.slane %v4867_v9, 5  ;;  %v6259_v60 = vld [vmem:[%s11783_s0 + $0xe8] sm:$0xf]  ;;  %vm13283_vm15 = vmmov %vm13264_vm4 }
 0x2a9   :  { %v3942_v21 = vsel %vm12819_vm1, %v6259_v60, 0  ;;  %v4209_v63 = vpack.c.b16 %v4191_v44, %v4190_v2  ;;  %v10442_v59 = vsel %vm13249_vm6, %v5260_v35, %v4419_v47  ;;  %v10444_v43 = vrot.slane %v5025_v6, 5  ;;  %vm13274_vm1 = vmmov %vm13261_vm14  ;;  %v13279_v44 = vld [vmem:[#allocation122_spill] sm:$0xff]  ;;  %v13295_v18 = vld [vmem:[#allocation39_spill] sm:$0xff] }
 0x2aa   :  { %v10447_v41 = vsel %vm13270_vm8, %v5263_v40, %v4421_v5  ;;  %v4202_v12 = vpack.c.b16 %v4177_v61, %v4176_v62  ;;  %v3943_v37 = vsel %vm12824_vm5, %v10203_v38, 0  ;;  %vm13273_vm2 = vsmask.f32 3328  ;;  %v4441_v61 = vpop.permute.xlu2 %4440  ;;  %vm13276_vm5 = vmmov %vm13274_vm1  ;;  %v13289_v5 = vld [vmem:[#allocation36_spill] sm:$0xff] }
 0x2ab   :  { %13271 = vst [vmem:[#allocation32_spill] sm:$0xff] %v10447_v41  ;;  %v10455_v7 = vsel %vm13273_vm2, %v10040_v50, %v10428_v30  ;;  %v5167_v9 = vpack.c.b16 %v5137_v29, %v5136_v48  ;;  %v10460_v6 = vunpack.c.l.b16 %v3942_v21  ;;  %v4201_v57 = vpack.c.b16 %v4175_v8, %v4174_v58  ;;  %vm13281_vm14 = vmmov %vm13249_vm6  ;;  %v13284_v58 = vld [vmem:[#allocation70_spill] sm:$0xff] }
 0x2ac   :  { %v4886_v62 = vsel %vm13274_vm1, %v10241_v54, %v10432_v55  ;;  %v5293_v38 = vsel %vm13275_vm7, %v4209_v63, %v10256_v16  ;;  %v5052_v50 = vsel %vm13276_vm5, %v9880_v39, %v10444_v43  ;;  %vm13278_vm11 = vnez %v13277_v53  ;;  %4769 = vrot.lane.b32.xlu0 %v10455_v7, %s6282_s18 }
 0x2ad   :  { %v4050_v2 = vsel %vm13278_vm11, %v10269_v45, 0  ;;  %vm13280_vm0 = vnez %v13279_v44  ;;  %v4183_v40 = vunpack.c.l.b16 %v3943_v37  ;;  %v10477_v48 = vsel %vm13281_vm14, %v5293_v38, %v4441_v61  ;;  %4919 = vrot.lane.b32.xlu1 %v4886_v62, %s6283_s21  ;;  %v4425_v47 = vpop.permute.xlu0 %4424  ;;  %vm13303_vm14 = vmmov %vm13264_vm4 }
 0x2ae   :  { %v4051_v11 = vsel %vm13280_vm0, %v10336_v42, 0  ;;  %13282 = vst [vmem:[#allocation105_spill] sm:$0xff] %v10477_v48  ;;  %v4066_v54 = vsel %vm13239_vm13, %v10134_v3, 0  ;;  %v4067_v39 = vsel %vm13241_vm3, %v9978_v46, 0  ;;  %v5272_v16 = vsel %vm13283_vm15, %v4202_v12, %v9916_v0  ;;  %5085 = vrot.lane.b32.xlu2 %v5052_v50, %s6284_s26  ;;  %vm13286_vm3 = vmmov %vm13249_vm6  ;;  %v13297_v50 = vld [vmem:[#allocation31_spill] sm:$0xff]  ;;  %v13346_v48 = vld [vmem:[#allocation57_spill] sm:$0xff] }
 0x2af   :  { %v10490_v45 = vrot.slane %v5167_v9, 5  ;;  %v4643_v29 = vshrl.u32 %v6159_v13, 16  ;;  %v4646_v35 = vshll.u32 %v6159_v13, 16  ;;  %v5269_v8 = vsel %vm13264_vm4, %v4201_v57, %v13284_v58  ;;  %v4427_v25 = vpop.permute.xlu1 %4426  ;;  %vm13291_vm6 = vmmov %vm13286_vm3 }
 0x2b0   :  { %vm13285_vm13 = vsmask.f32 4352  ;;  %v4854_v10 = vunpack.c.l.b16 %v4050_v2  ;;  %v4855_v60 = vunpack.c.l.b16 %v4051_v11  ;;  %v10499_v0 = vsel %vm13286_vm3, %v5269_v8, %v4425_v47  ;;  %v13299_v11 = vld [vmem:[#allocation33_spill] sm:$0xff]  ;;  %vm13304_vm15 = vmmov %vm13286_vm3 }
 0x2b1   :  { %v3613_v56 = vsel %vm13285_vm13, %v10293_v52, %v10254_v4  ;;  %13287 = vst [vmem:[#allocation108_spill] sm:$0xff] %v10499_v0  ;;  %vm13288_vm10 = vcmask 220160   ;;  %v4986_v21 = vunpack.c.l.b16 %v4066_v54  ;;  %v4987_v63 = vunpack.c.l.b16 %v4067_v39 }
 0x2b2   :  { %6020 = vmatmul.msk.bf16.gmra.mxu0 %vm13288_vm10, %v10279_v1  ;;  %vm3818_vm9 = vcmask 519168   ;;  %vm13290_vm12 = vnez %v13289_v5  ;;  %v10507_v4 = vsel %vm13291_vm6, %v5272_v16, %v4427_v25  ;;  %vm13293_vm8 = vmmov %vm13288_vm10  ;;  %v13294_v52 = vmov 0   ;;  %v10518_v1 = vld [vmem:[%s11783_s0 + $0x104] sm:$0xf]  ;;  %v10569_v8 = vpop.permute.xlu2 %4687 }
 0x2b3   :  { %v3948_v12 = vsel %vm13290_vm12, %v10234_v27, 0  ;;  %13292 = vst [vmem:[#allocation106_spill] sm:$0xff] %v10507_v4  ;;  %6027 = vmatmul.msk.bf16.gmra.mxu2 %vm13293_vm8, %v3613_v56  ;;  %vm13296_vm2 = vnez %v13295_v18  ;;  %v5186_v9 = vsel %vm13274_vm1, %v10187_v26, %v10490_v45  ;;  %v4645_v13 = vrot.slane %v4643_v29, 4  ;;  %v13305_v18 = vld [vmem:[#allocation40_spill] sm:$0xff]  ;;  %vm13310_vm10 = vmmov %vm13274_vm1 }
 0x2b4   :  { %3819 = vst.msk [vmem:[%s11786_s3] sm:$0xf] %vm3818_vm9, %v13294_v52  ;;  %v3949_v37 = vsel %vm13296_vm2, %v10518_v1, 0  ;;  %v4648_v57 = vrot.slane %v4646_v35, 5  ;;  %v4876_v62 = vpack.c.b16 %v4855_v60, %v4854_v10  ;;  %v4118_v38 = vsel %vm13278_vm11, %v10518_v1, 0  ;;  %5219 = vrot.lane.b32.xlu0 %v5186_v9, %s6285_s27  ;;  %v13302_v10 = vld [vmem:[#allocation73_spill] sm:$0xff]  ;;  %vm13312_vm12 = vmmov %vm13274_vm1 }
 0x2b5   :  { %3820 = vst.msk [vmem:[%s11786_s3 + $0x4] sm:$0xf] %vm3818_vm9, %v13294_v52  ;;  %v4119_v61 = vsel %vm13280_vm0, %v10372_v22, 0  ;;  %v4205_v26 = vpack.c.b16 %v4183_v40, %v10460_v6  ;;  %vm13298_vm7 = vnez %v13297_v50  ;;  %vm13300_vm5 = vnez %v13299_v11  ;;  %4691 = vrot.lane.b32.xlu1 %v9835_v14, %s6280_s23  ;;  %v10571_v47 = vpop.permute.xlu0 %4430  ;;  %v13301_v14 = vld [vmem:[#allocation78_spill] sm:$0xff]  ;;  %v13313_v11 = vld [vmem:[#allocation80_spill] sm:$0xff]  ;;  %vm13318_vm2 = vmmov %vm13303_vm14 }
 0x2b6   :  { %3821 = vst.msk [vmem:[%s11786_s3 + $0x8] sm:$0xf] %vm3818_vm9, %v13294_v52  ;;  %v3946_v2 = vsel %vm13298_vm7, %v10336_v42, 0  ;;  %v3947_v54 = vsel %vm13300_vm5, %v10226_v28, 0  ;;  %v5017_v39 = vpack.c.b16 %v4987_v63, %v4986_v21  ;;  %v4188_v16 = vunpack.c.l.b16 %v3948_v12  ;;  %4721 = vrot.lane.b32.xlu2 %v13301_v14, %s6281_s15  ;;  %v10602_v12 = vld [vmem:[%s11783_s0 + $0x110] sm:$0xf]  ;;  %vm13320_vm1 = vmmov %vm13318_vm2 }
 0x2b7   :  { %3886 = vst.msk [vmem:[%s11786_s3 + $0x8c] sm:$0xf] %vm3818_vm9, %v13294_v52  ;;  %v4189_v29 = vunpack.c.l.b16 %v3949_v37  ;;  %v10562_v42 = vor.u32 %v4648_v57, %v4645_v13  ;;  %v5154_v6 = vunpack.c.l.b16 %v4118_v38  ;;  %v5155_v40 = vunpack.c.l.b16 %v4119_v61  ;;  %v4433_v25 = vpop.permute.xlu1 %4432  ;;  %v6151_v57 = vld [vmem:[%s11783_s0 + $0xc4] sm:$0xff]  ;;  %v10623_v38 = vld [vmem:[%s11783_s0 + $0x114] sm:$0xf] }
 0x2b8   :  { %3887 = vst.msk [vmem:[%s11786_s3 + $0x90] sm:$0xf] %vm3818_vm9, %v13294_v52  ;;  %v4186_v35 = vunpack.c.l.b16 %v3946_v2  ;;  %v4187_v58 = vunpack.c.l.b16 %v3947_v54  ;;  %v10573_v56 = vrot.slane %v4876_v62, 5  ;;  %v5281_v60 = vsel %vm13303_vm14, %v4205_v26, %v13302_v10  ;;  %v13311_v50 = vld [vmem:[#allocation86_spill] sm:$0xff]  ;;  %v13315_v54 = vld [vmem:[#allocation81_spill] sm:$0xff]  ;;  %vm13328_vm14 = vmmov %vm13310_vm10 }
 0x2b9   :  { %3888 = vst.msk [vmem:[%s11786_s3 + $0x94] sm:$0xf] %vm3818_vm9, %v13294_v52  ;;  %v10584_v21 = vrot.slane %v5017_v39, 5  ;;  %v4208_v63 = vpack.c.b16 %v4189_v29, %v4188_v16  ;;  %v10592_v5 = vsel %vm13304_vm15, %v5281_v60, %v4433_v25  ;;  %vm13306_vm4 = vnez %v13305_v18  ;;  %v13317_v16 = vld [vmem:[#allocation74_spill] sm:$0xff] }
 0x2ba   :  { %5860 = vst.msk [vmem:[%s11786_s3 + $0x98] sm:$0xf] %vm3818_vm9, %v13294_v52  ;;  %v3952_v37 = vsel %vm13306_vm4, %v10602_v12, 0  ;;  %vm13307_vm13 = vsmask.f32 3328  ;;  %v5176_v13 = vpack.c.b16 %v5155_v40, %v5154_v6  ;;  %v4207_v62 = vpack.c.b16 %v4187_v58, %v4186_v35  ;;  %v13319_v10 = vld [vmem:[#allocation90_spill] sm:$0xff] }
 0x2bb   :  { %5861 = vst.msk [vmem:[%s11786_s3 + $0x9c] sm:$0xf] %vm3818_vm9, %v13294_v52  ;;  %v10610_v9 = vsel %vm13307_vm13, %v10249_v36, %v10562_v42  ;;  %v13308_v36 = vld [vmem:[#allocation41_spill] sm:$0xff]  ;;  %v4904_v26 = vsel %vm13310_vm10, %v10259_v51, %v10573_v56  ;;  %v5036_v2 = vsel %vm13312_vm12, %v13311_v50, %v10584_v21  ;;  %vm13314_vm6 = vnez %v13313_v11  ;;  %v13321_v18 = vld [vmem:[#allocation82_spill] sm:$0xff] }
 0x2bc   :  { %5862 = vst.msk [vmem:[%s11786_s3 + $0xa0] sm:$0xf] %vm3818_vm9, %v13294_v52  ;;  %vm13309_vm3 = vnez %v13308_v36  ;;  %v4034_v51 = vsel %vm13314_vm6, %v10134_v3, 0  ;;  %vm13316_vm8 = vnez %v13315_v54  ;;  %v5290_v29 = vsel %vm13318_vm2, %v4208_v63, %v13317_v16  ;;  %4787 = vrot.lane.b32.xlu0 %v10610_v9, %s6282_s18  ;;  %vm13337_vm2 = vmmov %vm13312_vm12  ;;  %v10769_v54 = vld [vmem:[%s11783_s0 + $0xe0] sm:$0xf] }
 0x2bd   :  { %5927 = vst.msk [vmem:[%s11786_s3 + $0x124] sm:$0xf] %vm3818_vm9, %v13294_v52  ;;  %v3953_v61 = vsel %vm13309_vm3, %v10623_v38, 0  ;;  %v4035_v39 = vsel %vm13316_vm8, %v9978_v46, 0  ;;  %v4192_v6 = vunpack.c.l.b16 %v3952_v37  ;;  %v4084_v40 = vsel %vm13278_vm11, %v10226_v28, 0  ;;  %4937 = vrot.lane.b32.xlu1 %v4904_v26, %s6283_s21  ;;  %v4437_v25 = vpop.permute.xlu0 %4436  ;;  %vm13322_vm11 = vmmov %vm13304_vm15 }
 0x2be   :  { %5928 = vst.msk [vmem:[%s11786_s3 + $0x128] sm:$0xf] %vm3818_vm9, %v13294_v52  ;;  %v4193_v3 = vunpack.c.l.b16 %v3953_v61  ;;  %v10661_v35 = vrot.slane %v5176_v13, 5  ;;  %v4571_v46 = vshrl.u32 %v6151_v57, 16  ;;  %v4574_v58 = vshll.u32 %v6151_v57, 16  ;;  %5069 = vrot.lane.b32.xlu2 %v5036_v2, %s6284_s26  ;;  %v10677_v61 = vpop.permute.xlu2 %4781  ;;  %vm13325_vm7 = vmmov %vm13322_vm11 }
 0x2bf   :  { %5929 = vst.msk [vmem:[%s11786_s3 + $0x12c] sm:$0xf] %vm3818_vm9, %v13294_v52  ;;  %v4085_v52 = vsel %vm13280_vm0, %v10234_v27, 0  ;;  %v5287_v60 = vsel %vm13320_vm1, %v4207_v62, %v13319_v10  ;;  %v4838_v63 = vunpack.c.l.b16 %v4034_v51  ;;  %v4839_v53 = vunpack.c.l.b16 %v4035_v39  ;;  %v4439_v13 = vpop.permute.xlu1 %4438  ;;  %vm13329_vm15 = vmmov %vm13320_vm1 }
 0x2c0   :  { %v4102_v44 = vsel %vm13314_vm6, %v13321_v18, 0  ;;  %v10670_v37 = vsel %vm13322_vm11, %v5287_v60, %v4437_v25  ;;  %vm13324_vm0 = vcmask 220160   ;;  %v4103_v57 = vsel %vm13316_vm8, %v10393_v33, 0  ;;  %vm13330_vm4 = vmmov %vm13325_vm7 }
 0x2c1   :  { %13323 = vst [vmem:[#allocation116_spill] sm:$0xff] %v10670_v37  ;;  %v5004_v62 = vunpack.c.l.b16 %v4084_v40  ;;  %v5005_v36 = vunpack.c.l.b16 %v4085_v52  ;;  %v10680_v26 = vsel %vm13325_vm7, %v5290_v29, %v4439_v13  ;;  %vm13327_vm5 = vmmov %vm13324_vm0  ;;  %v5204_v50 = vsel %vm13328_vm14, %v10353_v17, %v10661_v35  ;;  %v13335_v13 = vld [vmem:[#allocation19_spill] sm:$0xff] }
 0x2c2   :  { %6021 = vmatmul.msk.bf16.gmra.mxu0 %vm13324_vm0, %v10322_v34  ;;  %13326 = vst [vmem:[#allocation110_spill] sm:$0xff] %v10680_v26  ;;  %v4573_v34 = vrot.slane %v4571_v46, 4  ;;  %v4576_v2 = vrot.slane %v4574_v58, 5  ;;  %v4210_v51 = vpack.c.b16 %v4193_v3, %v4192_v6  ;;  %v4868_v39 = vpack.c.b16 %v4839_v53, %v4838_v63  ;;  %v13332_v58 = vld [vmem:[#allocation18_spill] sm:$0xff]  ;;  %vm13347_vm7 = vmmov %vm13337_vm2 }
 0x2c3   :  { %6028 = vmatmul.msk.bf16.gmra.mxu2 %vm13327_vm5, %v10326_v32  ;;  %v5138_v16 = vunpack.c.l.b16 %v4102_v44  ;;  %v5139_v10 = vunpack.c.l.b16 %v4103_v57  ;;  %v5026_v40 = vpack.c.b16 %v5005_v36, %v5004_v62  ;;  %vm13333_vm13 = vnez %v13332_v58  ;;  %v10724_v53 = vld [vmem:[%s11785_s2] ss:$0 sm:$0xff]  ;;  %v10729_v44 = vld [vmem:[%s11783_s0 + $0xdc] sm:$0xf]  ;;  %vm13350_vm5 = vmmov %vm13329_vm15 }
 0x2c4   :  { %5237 = vrot.lane.b32.xlu0 %v5204_v50, %s6285_s27  ;;  %v10690_v29 = vor.u32 %v4576_v2, %v4573_v34  ;;  %v5296_v32 = vsel %vm13329_vm15, %v4210_v51, %v10274_v24  ;;  %v10694_v60 = vrot.slane %v4868_v39, 5  ;;  %v10711_v24 = vld [vmem:[%s11783_s0 + $0xd8] sm:$0xf]  ;;  %vm13334_vm3 = vsmask.f32 3328  ;;  %v13340_v39 = vld [vmem:[#allocation130_spill] sm:$0xff]  ;;  %vm13352_vm14 = vmmov %vm13330_vm4 }
 0x2c5   :  { %4675 = vrot.lane.b32.xlu1 %v13301_v14, %s6280_s23  ;;  %v4443_v52 = vpop.permute.xlu0 %4442  ;;  %v5168_v17 = vpack.c.b16 %v5139_v10, %v5138_v16  ;;  %v10703_v46 = vrot.slane %v5026_v40, 5  ;;  %v6160_v14 = vld [vmem:[%s11783_s0 + $0x10c] sm:$0xff]  ;;  %v3938_v25 = vsel %vm13333_vm13, %v10711_v24, 0  ;;  %vm13336_vm10 = vnez %v13335_v13  ;;  %v13338_v2 = vld [vmem:[#allocation125_spill] sm:$0xff]  ;;  %v13342_v58 = vld [vmem:[#allocation22_spill] sm:$0xff] }
 0x2c6   :  { %4739 = vrot.lane.b32.xlu2 %v10301_v15, %s6281_s15  ;;  %v10699_v6 = vsel %vm13330_vm4, %v5296_v32, %v4443_v52  ;;  %v10719_v63 = vsel %vm13334_vm3, %v10428_v30, %v10690_v29  ;;  %v3939_v57 = vsel %vm13336_vm10, %v10729_v44, 0  ;;  %v10734_v62 = vpop.permute.xlu2 %4933  ;;  %v4888_v30 = vsel %vm13312_vm12, %v10432_v55, %v10694_v60  ;;  %v3706_v55 = vpop.f32.mrf.mxu0  ;;  %v6266_v13 = vld [vmem:[%s11783_s0 + $0xe4] sm:$0xf]  ;;  %vm13355_vm13 = vmmov %vm13334_vm3 }
 0x2c7   :  { %13331 = vst [vmem:[#allocation161_spill] sm:$0xff] %v10699_v6  ;;  %v10701_v3 = vpop.permute.xlu1 %4685  ;;  %v10739_v36 = vrot.slane %v5168_v17, 5  ;;  %v5054_v50 = vsel %vm13337_vm2, %v10444_v43, %v10703_v46  ;;  %v4652_v34 = vshrl.u32 %v6160_v14, 16  ;;  %vm13339_vm1 = vnez %v13338_v2  ;;  %vm13357_vm3 = vmmov %vm13350_vm5 }
 0x2c8   :  { %v4052_v51 = vsel %vm13339_vm1, %v10226_v28, 0  ;;  %vm13341_vm11 = vnez %v13340_v39  ;;  %v4178_v10 = vunpack.c.l.b16 %v3938_v25  ;;  %v4068_v40 = vsel %vm13314_vm6, %v9987_v23, 0  ;;  %v6108_v28 = vld [vmem:[%s11784_s1 + $0x8] sm:$0xf]  ;;  %vm13358_vm10 = vmmov %vm13337_vm2 }
 0x2c9   :  { %v4053_v16 = vsel %vm13341_vm11, %v10234_v27, 0  ;;  %v4069_v43 = vsel %vm13316_vm8, %v10142_v20, 0  ;;  %v6165_v27 = vld [vmem:[%s11784_s1 + $0x8] sm:$0x30]  ;;  %v4179_v32 = vunpack.c.l.b16 %v3939_v57  ;;  %v3707_v52 = vadd.f32 %v10724_v53, %v3706_v55 }
 0x2ca   :  { %v4655_v17 = vshll.u32 %v6160_v14, 16  ;;  %v6109_v11 = vor.u32 %v6165_v27, %v6108_v28  ;;  %vm13343_vm6 = vnez %v13342_v58  ;;  %v13344_v57 = vld [vmem:[#allocation23_spill] sm:$0xff]  ;;  %v4856_v14 = vunpack.c.l.b16 %v4052_v51 }
 0x2cb   :  { %v3940_v25 = vsel %vm13343_vm6, %v10769_v54, 0  ;;  %vm13345_vm8 = vnez %v13344_v57  ;;  %v3786_v28 = vmax.f32 %v3707_v52, 0.0  ;;  %v4988_v6 = vunpack.c.l.b16 %v4068_v40  ;;  %vm13363_vm6 = vmmov %vm13352_vm14 }
 0x2cc   :  { %4771 = vrot.lane.b32.xlu0 %v10719_v63, %s6282_s18  ;;  %v3941_v55 = vsel %vm13345_vm8, %v6266_v13, 0  ;;  %v4989_v0 = vunpack.c.l.b16 %v4069_v43  ;;  %v5737_v58 = vand.u32 %v6109_v11, %v13346_v48  ;;  %v5188_v57 = vsel %vm13347_vm7, %v10490_v45, %v10739_v36  ;;  %vm13364_vm8 = vmmov %vm13347_vm7 }
 0x2cd   :  { %4921 = vrot.lane.b32.xlu1 %v4888_v30, %s6283_s21  ;;  %v4734_v4 = vpop.permute.xlu0 %4733  ;;  %v4857_v30 = vunpack.c.l.b16 %v4053_v16  ;;  %v4654_v13 = vrot.slane %v4652_v34, 4  ;;  %v3822_v26 = vpack.c.bf16 %v3786_v28, %v3786_v28  ;;  %v4657_v41 = vrot.slane %v4655_v17, 5 }
 0x2ce   :  { %5087 = vrot.lane.b32.xlu2 %v5054_v50, %s6284_s26  ;;  %v13348_v50 = vld [vmem:[#allocation100_spill] sm:$0xff]  ;;  %v4121_v16 = vsel %vm13341_vm11, %v10602_v12, 0  ;;  %6168 = vmatpush.bf16.msra.mxu3 %v5737_v58  ;;  %v4203_v48 = vpack.c.b16 %v4179_v32, %v4178_v10  ;;  %v4180_v40 = vunpack.c.l.b16 %v3940_v25  ;;  %v4181_v45 = vunpack.c.l.b16 %v3941_v55  ;;  %v5232_v52 = vpop.permute.xlu2 %5231  ;;  %v3708_v17 = vpop.f32.mrf.mxu0  ;;  %v13349_v32 = vld [vmem:[#allocation79_spill] sm:$0xff] }
 0x2cf   :  { %v10780_v27 = vpop.permute.xlu1 %4735  ;;  %v4120_v51 = vsel %vm13339_vm1, %v13348_v50, 0  ;;  %5745 = vmatpush.bf16.msra.mxu1 %v5737_v58  ;;  %v4877_v34 = vpack.c.b16 %v4857_v30, %v4856_v14  ;;  %3854 = vst.msk [vmem:[%s11786_s3 + $0xc] sm:$0xf] %vm3818_vm9, %v3822_v26  ;;  %v5018_v43 = vpack.c.b16 %v4989_v0, %v4988_v6  ;;  %v5157_v28 = vunpack.c.l.b16 %v4121_v16  ;;  %v13351_v6 = vld [vmem:[#allocation94_spill] sm:$0xff] }
 0x2d0   :  { %v5156_v11 = vunpack.c.l.b16 %v4120_v51  ;;  %v3709_v37 = vadd.f32 %v10724_v53, %v3708_v17  ;;  %v10805_v10 = vor.u32 %v4657_v41, %v4654_v13  ;;  %v5275_v25 = vsel %vm13350_vm5, %v4203_v48, %v13349_v32  ;;  %v6152_v13 = vld [vmem:[%s11783_s0 + $0xcc] sm:$0xff] }
 0x2d1   :  { %v4204_v55 = vpack.c.b16 %v4181_v45, %v4180_v40  ;;  %v10809_v0 = vrot.slane %v4877_v34, 5  ;;  %v5317_v14 = vsel %vm13352_vm14, %v5275_v25, %v13351_v6  ;;  %vm13353_vm15 = vcmask 72704   ;;  %v13359_v40 = vld [vmem:[#allocation83_spill] sm:$0xff]  ;;  %v13361_v34 = vld [vmem:[#allocation85_spill] sm:$0xff] }
 0x2d2   :  { %v3787_v30 = vmax.f32 %v3709_v37, 0.0  ;;  %v5351_v41 = vsel %vm13353_vm15, %v5317_v14, %v10701_v3  ;;  %vm13354_vm4 = vcmask 97280   ;;  %v13356_v37 = vld [vmem:[#allocation84_spill] sm:$0xff]  ;;  %vm13360_vm12 = vnez %v13359_v40 }
 0x2d3   :  { %6029 = vmatmul.msk.bf16.gmra.mxu2 %vm13324_vm0, %v10342_v49  ;;  %v6164_v49 = vld [vmem:[%s11784_s1] sm:$0xff]  ;;  %v5385_v51 = vsel %vm13354_vm4, %v5351_v41, %v4734_v4  ;;  %v5278_v48 = vsel %vm13357_vm3, %v4204_v55, %v13356_v37  ;;  %v4906_v3 = vsel %vm13358_vm10, %v10573_v56, %v10809_v0  ;;  %v4036_v45 = vsel %vm13360_vm12, %v9987_v23, 0  ;;  %vm13370_vm5 = vmmov %vm13354_vm4 }
 0x2d4   :  { %5221 = vrot.lane.b32.xlu0 %v5188_v57, %s6285_s27  ;;  %6169 = vmatpush.bf16.msra.mxu3 %v6164_v49  ;;  %v5177_v57 = vpack.c.b16 %v5157_v28, %v5156_v11  ;;  %v3823_v16 = vpack.c.bf16 %v3787_v30, %v3787_v30  ;;  %vm13362_vm2 = vnez %v13361_v34  ;;  %v4086_v23 = vsel %vm13339_vm1, %v10518_v1, 0  ;;  %vm13366_vm1 = vmmov %vm13353_vm15 }
 0x2d5   :  { %4693 = vrot.lane.b32.xlu1 %v10301_v15, %s6280_s23  ;;  %v4784_v26 = vpop.permute.xlu0 %4783  ;;  %5746 = vmatpush.bf16.msra.mxu1 %v6164_v49  ;;  %v10815_v15 = vrot.slane %v5018_v43, 5  ;;  %v10826_v49 = vsel %vm13355_vm13, %v10562_v42, %v10805_v10  ;;  %v4037_v4 = vsel %vm13362_vm2, %v10142_v20, 0  ;;  %v5319_v43 = vsel %vm13363_vm6, %v5278_v48, %v10571_v47  ;;  %vm13372_vm15 = vmmov %vm13364_vm8 }
 0x2d6   :  { %4723 = vrot.lane.b32.xlu2 %v10455_v7, %s6281_s15  ;;  %3855 = vst.msk [vmem:[%s11786_s3 + $0x10] sm:$0xf] %vm3818_vm9, %v3823_v16  ;;  %v4087_v20 = vsel %vm13341_vm11, %v10372_v22, 0  ;;  %vm13365_vm0 = vcmask 121856   ;;  %v3711_v56 = vpop.f32.mrf.mxu0  ;;  %v10858_v17 = vrot.slane %v5177_v57, 5  ;;  %v4580_v11 = vshrl.u32 %v6152_v13, 16  ;;  %v10864_v25 = vpop.permute.xlu2 %4671 }
 0x2d7   :  { %v4932_v58 = vpop.permute.xlu1 %4931  ;;  %v5038_v42 = vsel %vm13364_vm8, %v10584_v21, %v10815_v15  ;;  %v5419_v47 = vsel %vm13365_vm0, %v5385_v51, %v10677_v61  ;;  %v3712_v21 = vadd.f32 %v10724_v53, %v3711_v56  ;;  %v4583_v2 = vshll.u32 %v6152_v13, 16  ;;  %v13369_v51 = vld [vmem:[#allocation93_spill] sm:$0xff]  ;;  %vm13373_vm4 = vmmov %vm13365_vm0 }
 0x2d8   :  { %v4840_v28 = vunpack.c.l.b16 %v4036_v45  ;;  %v4841_v32 = vunpack.c.l.b16 %v4037_v4  ;;  %v5353_v39 = vsel %vm13366_vm1, %v5319_v43, %v10569_v8  ;;  %vm13367_vm11 = vcmask 146432   ;;  %vm13378_vm0 = vmmov %vm13364_vm8 }
 0x2d9   :  { %v5453_v61 = vsel %vm13367_vm11, %v5419_v47, %v4932_v58  ;;  %v5006_v6 = vunpack.c.l.b16 %v4086_v23  ;;  %v5007_v14 = vunpack.c.l.b16 %v4087_v20  ;;  %v3788_v30 = vmax.f32 %v3712_v21, 0.0  ;;  %vm13374_vm13 = vmmov %vm13367_vm11 }
 0x2da   :  { %vm13368_vm7 = vcmask 171008   ;;  %v4104_v13 = vsel %vm13360_vm12, %v10404_v19, 0  ;;  %v4105_v8 = vsel %vm13362_vm2, %v13369_v51, 0  ;;  %v5387_v58 = vsel %vm13370_vm5, %v5353_v39, %v10780_v27 }
 0x2db   :  { %vm13371_vm14 = vcmask 195584   ;;  %v5206_v37 = vsel %vm13372_vm15, %v10661_v35, %v10858_v17  ;;  %v3824_v48 = vpack.c.bf16 %v3788_v30, %v3788_v30  ;;  %v4585_v45 = vrot.slane %v4583_v2, 5  ;;  %v3746_v47 = vpop.f32.mrf.mxu2  ;;  %vm13375_vm3 = vmmov %vm13368_vm7 }
 0x2dc   :  { %4789 = vrot.lane.b32.xlu0 %v10826_v49, %s6282_s18  ;;  %v4869_v4 = vpack.c.b16 %v4841_v32, %v4840_v28  ;;  %v5421_v43 = vsel %vm13373_vm4, %v5387_v58, %v4784_v26  ;;  %v5141_v23 = vunpack.c.l.b16 %v4105_v8  ;;  %v5027_v20 = vpack.c.b16 %v5007_v14, %v5006_v6  ;;  %vm13376_vm10 = vmmov %vm13371_vm14 }
 0x2dd   :  { %4939 = vrot.lane.b32.xlu1 %v4906_v3, %s6283_s21  ;;  %v5082_v55 = vpop.permute.xlu0 %5081  ;;  %v4582_v3 = vrot.slane %v4580_v11, 4  ;;  %3856 = vst.msk [vmem:[%s11786_s3 + $0x14] sm:$0xf] %vm3818_vm9, %v3824_v48  ;;  %v3747_v56 = vadd.f32 %v10724_v53, %v3746_v47  ;;  %v5455_v11 = vsel %vm13374_vm13, %v5421_v43, %v10734_v62  ;;  %vm13377_vm6 = vsmask.f32 3328  ;;  %vm13390_vm4 = vmmov %vm13378_vm0 }
 0x2de   :  { %5071 = vrot.lane.b32.xlu2 %v5038_v42, %s6284_s26  ;;  %v5487_v41 = vsel %vm13368_vm7, %v5453_v61, %v5082_v55  ;;  %v5140_v42 = vunpack.c.l.b16 %v4104_v13  ;;  %v3713_v35 = vpop.f32.mrf.mxu0  ;;  %v10895_v2 = vrot.slane %v4869_v4, 5  ;;  %v10900_v61 = vpop.permute.xlu2 %4765  ;;  %v10902_v62 = vrot.slane %v5027_v20, 5  ;;  %v13381_v20 = vld [vmem:[#allocation133_spill] sm:$0xff] }
 0x2df   :  { %v5084_v57 = vpop.permute.xlu1 %5083  ;;  %v5521_v16 = vsel %vm13371_vm14, %v5487_v41, %v5232_v52  ;;  %v3714_v26 = vadd.f32 %v10724_v53, %v3713_v35  ;;  %v10893_v21 = vor.u32 %v4585_v45, %v4582_v3  ;;  %v3802_v32 = vmax.f32 %v3747_v56, 0.0  ;;  %vm13388_vm14 = vmmov %vm13377_vm6 }
 0x2e0   :  { %v5605_v27 = vshrl.u32 %v5521_v16, 16  ;;  %v5608_v52 = vshll.u32 %v5521_v16, 16  ;;  %v5489_v28 = vsel %vm13375_vm3, %v5455_v11, %v5084_v57  ;;  %v5169_v55 = vpack.c.b16 %v5141_v23, %v5140_v42  ;;  %v13379_v42 = vld [vmem:[#allocation131_spill] sm:$0xff] }
 0x2e1   :  { %v3789_v30 = vmax.f32 %v3714_v26, 0.0  ;;  %v3838_v13 = vpack.c.bf16 %v3802_v32, %v3802_v32  ;;  %v10913_v16 = vsel %vm13377_vm6, %v10690_v29, %v10893_v21  ;;  %vm13380_vm1 = vnez %v13379_v42 }
 0x2e2   :  { %v5607_v6 = vrot.slane %v5605_v27, 3  ;;  %v5610_v14 = vrot.slane %v5608_v52, 4  ;;  %v10922_v45 = vrot.slane %v5169_v55, 5  ;;  %v4054_v23 = vsel %vm13380_vm1, %v10518_v1, 0 }
 0x2e3   :  { %v3825_v58 = vpack.c.bf16 %v3789_v30, %v3789_v30  ;;  %3870 = vst.msk [vmem:[%s11786_s3 + $0x4c] sm:$0xf] %vm3818_vm9, %v3838_v13  ;;  %v3748_v29 = vpop.f32.mrf.mxu2  ;;  %vm13382_vm11 = vnez %v13381_v20  ;;  %v4071_v1 = vsel %vm13362_vm2, %v10393_v33, 0  ;;  %vm13383_vm7 = vsmask.f32 4352  ;;  %vm13385_vm2 = vmmov %vm13378_vm0 }
 0x2e4   :  { %5239 = vrot.lane.b32.xlu0 %v5206_v37, %s6285_s27  ;;  %v4890_v37 = vsel %vm13364_vm8, %v10694_v60, %v10895_v2  ;;  %v10928_v43 = vor.u32 %v5610_v14, %v5607_v6  ;;  %v5056_v60 = vsel %vm13378_vm0, %v10703_v46, %v10902_v62  ;;  %v4055_v27 = vsel %vm13382_vm11, %v10372_v22, 0 }
 0x2e5   :  { %4677 = vrot.lane.b32.xlu1 %v10455_v7, %s6280_s23  ;;  %v5234_v39 = vpop.permute.xlu0 %5233  ;;  %v6161_v7 = vld [vmem:[%s11783_s0 + $0x114] sm:$0xff]  ;;  %3857 = vst.msk [vmem:[%s11786_s3 + $0x18] sm:$0xf] %vm3818_vm9, %v3825_v58  ;;  %v3749_v35 = vadd.f32 %v10724_v53, %v3748_v29  ;;  %v4070_v46 = vsel %vm13360_vm12, %v13321_v18, 0  ;;  %v4858_v32 = vunpack.c.l.b16 %v4054_v23  ;;  %v4859_v40 = vunpack.c.l.b16 %v4055_v27 }
 0x2e6   :  { %4741 = vrot.lane.b32.xlu2 %v10610_v9, %s6281_s15  ;;  %v5523_v41 = vsel %vm13376_vm10, %v5489_v28, %v5234_v39  ;;  %v4661_v4 = vshrl.u32 %v6161_v7, 16  ;;  %v4664_v22 = vshll.u32 %v6161_v7, 16  ;;  %vm13384_vm12 = vcmask 220160   ;;  %v10970_v58 = vld [vmem:[%s11783_s0 + $0x118] sm:$0xf]  ;;  %vm13395_vm10 = vmmov %vm13378_vm0 }
 0x2e7   :  { %v10908_v57 = vpop.permute.xlu1 %4669  ;;  %v5613_v51 = vshrl.u32 %v5523_v41, 16  ;;  %v5616_v8 = vshll.u32 %v5523_v41, 16  ;;  %v3716_v47 = vpop.f32.mrf.mxu0  ;;  %v3803_v11 = vmax.f32 %v3749_v35, 0.0  ;;  %v4990_v55 = vunpack.c.l.b16 %v4070_v46 }
 0x2e8   :  { %v3717_v56 = vadd.f32 %v10724_v53, %v3716_v47  ;;  %v4991_v6 = vunpack.c.l.b16 %v4071_v1  ;;  %v5190_v7 = vsel %vm13385_vm2, %v10739_v36, %v10922_v45  ;;  %v4663_v41 = vrot.slane %v4661_v4, 4 }
 0x2e9   :  { %v5615_v48 = vrot.slane %v5613_v51, 3  ;;  %v5618_v3 = vrot.slane %v5616_v8, 4  ;;  %v3839_v14 = vpack.c.bf16 %v3803_v11, %v3803_v11  ;;  %v4666_v51 = vrot.slane %v4664_v22, 5 }
 0x2ea   :  { %v3790_v39 = vmax.f32 %v3717_v56, 0.0  ;;  %v4122_v8 = vsel %vm13380_vm1, %v10623_v38, 0  ;;  %v4878_v36 = vpack.c.b16 %v4859_v40, %v4858_v32  ;;  %vm13387_vm5 = vcmask 72704  }
 0x2eb   :  { %v10939_v52 = vor.u32 %v5618_v3, %v5615_v48  ;;  %3871 = vst.msk [vmem:[%s11786_s3 + $0x50] sm:$0xf] %vm3818_vm9, %v3839_v14  ;;  %v5019_v3 = vpack.c.b16 %v4991_v6, %v4990_v55  ;;  %v10988_v47 = vor.u32 %v4666_v51, %v4663_v41  ;;  %vm13389_vm15 = vcmask 97280   ;;  %v13391_v41 = vld [vmem:[#allocation88_spill] sm:$0xff] }
 0x2ec   :  { %4773 = vrot.lane.b32.xlu0 %v10913_v16, %s6282_s18  ;;  %v3826_v13 = vpack.c.bf16 %v3790_v39, %v3790_v39  ;;  %v10990_v1 = vrot.slane %v4878_v36, 5  ;;  %v13386_v39 = vld [vmem:[#allocation98_spill] sm:$0xff]  ;;  %vm13392_vm13 = vnez %v13391_v41  ;;  %vm13396_vm6 = vcmask 121856  }
 0x2ed   :  { %4923 = vrot.lane.b32.xlu1 %v4890_v37, %s6283_s21  ;;  %v4718_v26 = vpop.permute.xlu0 %4717  ;;  %v5620_v28 = vsel %vm13383_vm7, %v10928_v43, %v10939_v52  ;;  %v4123_v37 = vsel %vm13382_vm11, %v10970_v58, 0  ;;  %v10994_v11 = vrot.slane %v5019_v3, 5  ;;  %v11002_v6 = vsel %vm13388_vm14, %v10805_v10, %v10988_v47  ;;  %vm13402_vm7 = vmmov %vm13389_vm15 }
 0x2ee   :  { %5089 = vrot.lane.b32.xlu2 %v5056_v60, %s6284_s26  ;;  %6118 = vmatmul.msk.bf16.vlgmr.msra.gmra.mxu3 %vm13384_vm12, %v5620_v28  ;;  %3858 = vst.msk [vmem:[%s11786_s3 + $0x1c] sm:$0xf] %vm3818_vm9, %v3826_v13  ;;  %v3751_v48 = vpop.f32.mrf.mxu2  ;;  %v5158_v60 = vunpack.c.l.b16 %v4122_v8  ;;  %v5159_v23 = vunpack.c.l.b16 %v4123_v37  ;;  %v13393_v13 = vld [vmem:[#allocation91_spill] sm:$0xff]  ;;  %v4089_v37 = vsel %vm13382_vm11, %v10602_v12, 0  ;;  %vm13397_vm8 = vcmask 146432   ;;  %vm13403_vm12 = vmmov %vm13385_vm2 }
 0x2ef   :  { %v10957_v34 = vpop.permute.xlu1 %4719  ;;  %v3718_v4 = vpop.f32.mrf.mxu0  ;;  %v3752_v29 = vadd.f32 %v10724_v53, %v3751_v48  ;;  %vm13394_vm3 = vnez %v13393_v13  ;;  %v5040_v51 = vsel %vm13395_vm10, %v10815_v15, %v10994_v11  ;;  %vm13398_vm0 = vcmask 171008   ;;  %vm13405_vm2 = vmmov %vm13396_vm6 }
 0x2f0   :  { %v10962_v30 = vpop.permute.xlu2 %4917  ;;  %v3719_v27 = vadd.f32 %v10724_v53, %v3718_v4  ;;  %v5178_v40 = vpack.c.b16 %v5159_v23, %v5158_v60  ;;  %v4039_v10 = vsel %vm13394_vm3, %v10393_v33, 0  ;;  %v4088_v33 = vsel %vm13380_vm1, %v13348_v50, 0  ;;  %vm13400_vm1 = vmmov %vm13387_vm5 }
 0x2f1   :  { %v3804_v35 = vmax.f32 %v3752_v29, 0.0  ;;  %v4843_v3 = vunpack.c.l.b16 %v4039_v10  ;;  %v5008_v42 = vunpack.c.l.b16 %v4088_v33  ;;  %v5009_v23 = vunpack.c.l.b16 %v4089_v37  ;;  %vm13407_vm14 = vmmov %vm13398_vm0 }
 0x2f2   :  { %v3791_v56 = vmax.f32 %v3719_v27, 0.0  ;;  %v11028_v8 = vrot.slane %v5178_v40, 5  ;;  %vm13401_vm11 = vcmask 195584  }
 0x2f3   :  { %v3840_v28 = vpack.c.bf16 %v3804_v35, %v3804_v35 }
 0x2f4   :  { %5223 = vrot.lane.b32.xlu0 %v5190_v7, %s6285_s27  ;;  %v3827_v55 = vpack.c.bf16 %v3791_v56, %v3791_v56  ;;  %v4908_v7 = vsel %vm13390_vm4, %v10809_v0, %v10990_v1  ;;  %vm13410_vm4 = vsmask.f32 3328 }
 0x2f5   :  { %4695 = vrot.lane.b32.xlu1 %v10610_v9, %s6280_s23  ;;  %v4768_v46 = vpop.permute.xlu0 %4767  ;;  %v5335_v9 = vsel %vm13387_vm5, %v13386_v39, %v10908_v57  ;;  %3872 = vst.msk [vmem:[%s11786_s3 + $0x54] sm:$0xf] %vm3818_vm9, %v3840_v28  ;;  %v4038_v57 = vsel %vm13392_vm13, %v13321_v18, 0  ;;  %vm13406_vm5 = vmmov %vm13397_vm8 }
 0x2f6   :  { %4725 = vrot.lane.b32.xlu2 %v10719_v63, %s6281_s15  ;;  %v5369_v14 = vsel %vm13389_vm15, %v5335_v9, %v4718_v26  ;;  %3859 = vst.msk [vmem:[%s11786_s3 + $0x20] sm:$0xf] %vm3818_vm9, %v3827_v55  ;;  %v3753_v26 = vpop.f32.mrf.mxu2  ;;  %v4842_v48 = vunpack.c.l.b16 %v4038_v57  ;;  %v5208_v55 = vsel %vm13403_vm12, %v10858_v17, %v11028_v8  ;;  %vm13408_vm15 = vmmov %vm13401_vm11 }
 0x2f7   :  { %v4916_v22 = vpop.permute.xlu1 %4915  ;;  %v3754_v18 = vadd.f32 %v10724_v53, %v3753_v26  ;;  %v5403_v36 = vsel %vm13396_vm6, %v5369_v14, %v10900_v61  ;;  %v13399_v61 = vld [vmem:[#allocation101_spill] sm:$0xff]  ;;  %v13404_v14 = vld [vmem:[#allocation95_spill] sm:$0xff]  ;;  %vm13411_vm6 = vmmov %vm13395_vm10 }
 0x2f8   :  { %v5216_v32 = vpop.permute.xlu2 %5215  ;;  %v5437_v4 = vsel %vm13397_vm8, %v5403_v36, %v4916_v22  ;;  %v5337_v56 = vsel %vm13400_vm1, %v13399_v61, %v10864_v25  ;;  %v4870_v25 = vpack.c.b16 %v4843_v3, %v4842_v48  ;;  %vm13412_vm8 = vmmov %vm13400_vm1 }
 0x2f9   :  { %v3721_v0 = vpop.f32.mrf.mxu0  ;;  %v3805_v29 = vmax.f32 %v3754_v18, 0.0  ;;  %v5371_v22 = vsel %vm13402_vm7, %v5337_v56, %v10957_v34  ;;  %v4107_v34 = vsel %vm13394_vm3, %v10711_v24, 0  ;;  %v13409_v56 = vld [vmem:[#allocation2_spill] sm:$0xff]  ;;  %vm13421_vm12 = vmmov %vm13411_vm6 }
 0x2fa   :  { %v3722_v15 = vadd.f32 %v10724_v53, %v3721_v0  ;;  %v5405_v57 = vsel %vm13405_vm2, %v5371_v22, %v4768_v46  ;;  %v5143_v37 = vunpack.c.l.b16 %v4107_v34  ;;  %v11077_v3 = vrot.slane %v4870_v25, 5  ;;  %v6162_v22 = vld [vmem:[%s11783_s0 + $0x11c] sm:$0xff]  ;;  %v13413_v34 = vld [vmem:[#allocation135_spill] sm:$0xff] }
 0x2fb   :  { %v3841_v28 = vpack.c.bf16 %v3805_v29, %v3805_v29  ;;  %v5439_v0 = vsel %vm13406_vm5, %v5405_v57, %v10962_v30 }
 0x2fc   :  { %4791 = vrot.lane.b32.xlu0 %v11002_v6, %s6282_s18  ;;  %v3792_v27 = vmax.f32 %v3722_v15, 0.0 }
 0x2fd   :  { %4941 = vrot.lane.b32.xlu1 %v4908_v7, %s6283_s21  ;;  %v5066_v60 = vpop.permute.xlu0 %5065  ;;  %v4106_v7 = vsel %vm13392_vm13, %v13404_v14, 0  ;;  %3873 = vst.msk [vmem:[%s11786_s3 + $0x58] sm:$0xf] %vm3818_vm9, %v3841_v28  ;;  %v11089_v28 = vsel %vm13410_vm4, %v10893_v21, %v13409_v56  ;;  %v4892_v14 = vsel %vm13395_vm10, %v10895_v2, %v11077_v3  ;;  %v13415_v2 = vld [vmem:[#allocation137_spill] sm:$0xff]  ;;  %vm13428_vm10 = vmmov %vm13412_vm8 }
 0x2fe   :  { %5073 = vrot.lane.b32.xlu2 %v5040_v51, %s6284_s26  ;;  %v5471_v20 = vsel %vm13398_vm0, %v5437_v4, %v5066_v60  ;;  %v3828_v9 = vpack.c.bf16 %v3792_v27, %v3792_v27  ;;  %v5142_v33 = vunpack.c.l.b16 %v4106_v7  ;;  %vm13414_vm0 = vnez %v13413_v34  ;;  %v11155_v56 = vld [vmem:[%s11783_s0 + $0x11c] sm:$0xf] }
 0x2ff   :  { %v5068_v35 = vpop.permute.xlu1 %5067  ;;  %v5505_v40 = vsel %vm13401_vm11, %v5471_v20, %v5216_v32  ;;  %v5028_v32 = vpack.c.b16 %v5009_v23, %v5008_v42  ;;  %vm13416_vm1 = vnez %v13415_v2  ;;  %vm13418_vm11 = vmmov %vm13402_vm7 }
 0x300   :  { %v11047_v39 = vpop.permute.xlu2 %4737  ;;  %3860 = vst.msk [vmem:[%s11786_s3 + $0x24] sm:$0xf] %vm3818_vm9, %v3828_v9  ;;  %v5542_v17 = vshrl.u32 %v5505_v40, 16  ;;  %v5545_v10 = vshll.u32 %v5505_v40, 16  ;;  %v3756_v26 = vpop.f32.mrf.mxu2  ;;  %v5473_v36 = vsel %vm13407_vm14, %v5439_v0, %v5068_v35  ;;  %v5170_v40 = vpack.c.b16 %v5143_v37, %v5142_v33  ;;  %vm13420_vm7 = vmmov %vm13405_vm2 }
 0x301   :  { %v3723_v46 = vpop.f32.mrf.mxu0  ;;  %v3757_v51 = vadd.f32 %v10724_v53, %v3756_v26  ;;  %v11081_v4 = vrot.slane %v5028_v32, 5  ;;  %v4056_v32 = vsel %vm13414_vm0, %v13348_v50, 0  ;;  %v11127_v50 = vld [vmem:[%s11783_s0 + $0xd0] sm:$0xf]  ;;  %v4709_v0 = vshrl.u32 %v6162_v22, 16  ;;  %vm13422_vm2 = vmmov %vm13406_vm5 }
 0x302   :  { %v3724_v18 = vadd.f32 %v10724_v53, %v3723_v46  ;;  %v5544_v29 = vrot.slane %v5542_v17, 3  ;;  %v5547_v30 = vrot.slane %v5545_v10, 4  ;;  %v4057_v17 = vsel %vm13416_vm1, %v10602_v12, 0  ;;  %vm13423_vm5 = vmmov %vm13407_vm14 }
 0x303   :  { %v3806_v15 = vmax.f32 %v3757_v51, 0.0  ;;  %v5058_v21 = vsel %vm13411_vm6, %v10902_v62, %v11081_v4  ;;  %v4073_v12 = vsel %vm13394_vm3, %v11127_v50, 0  ;;  %v11134_v51 = vrot.slane %v5170_v40, 5  ;;  %vm13424_vm14 = vmmov %vm13408_vm15 }
 0x304   :  { %5241 = vrot.lane.b32.xlu0 %v5208_v55, %s6285_s27  ;;  %v3793_v60 = vmax.f32 %v3724_v18, 0.0  ;;  %v5548_v7 = vor.u32 %v5547_v30, %v5544_v29  ;;  %v4712_v18 = vshll.u32 %v6162_v22, 16  ;;  %v4860_v37 = vunpack.c.l.b16 %v4056_v32 }
 0x305   :  { %4679 = vrot.lane.b32.xlu1 %v10719_v63, %s6280_s23  ;;  %v5218_v48 = vpop.permute.xlu0 %5217  ;;  %v3842_v63 = vpack.c.bf16 %v3806_v15, %v3806_v15  ;;  %vm13419_vm3 = vcmask 220160   ;;  %v4993_v30 = vunpack.c.l.b16 %v4073_v12  ;;  %v4124_v40 = vsel %vm13414_vm0, %v11155_v56, 0 }
 0x306   :  { %4743 = vrot.lane.b32.xlu2 %v10826_v49, %s6281_s15  ;;  %v5507_v42 = vsel %vm13408_vm15, %v5473_v36, %v5218_v48  ;;  %v3829_v35 = vpack.c.bf16 %v3793_v60, %v3793_v60  ;;  %v4861_v36 = vunpack.c.l.b16 %v4057_v17  ;;  %v5160_v32 = vunpack.c.l.b16 %v4124_v40  ;;  %vm13425_vm15 = vmmov %vm13410_vm4 }
 0x307   :  { %v4690_v23 = vpop.permute.xlu1 %4689  ;;  %v5549_v27 = vshrl.u32 %v5507_v42, 16  ;;  %v5552_v20 = vshll.u32 %v5507_v42, 16  ;;  %3874 = vst.msk [vmem:[%s11786_s3 + $0x5c] sm:$0xf] %vm3818_vm9, %v3842_v63  ;;  %vm13426_vm4 = vmmov %vm13411_vm6 }
 0x308   :  { %v11084_v61 = vpop.permute.xlu2 %5085  ;;  %3861 = vst.msk [vmem:[%s11786_s3 + $0x28] sm:$0xf] %vm3818_vm9, %v3829_v35  ;;  %v5355_v57 = vsel %vm13412_vm8, %v10592_v5, %v4690_v23  ;;  %v3758_v25 = vpop.f32.mrf.mxu2  ;;  %v4072_v5 = vsel %vm13392_vm13, %v10404_v19, 0  ;;  %vm13417_vm13 = vsmask.f32 4352  ;;  %v4714_v35 = vrot.slane %v4712_v18, 5  ;;  %vm13429_vm6 = vmmov %vm13426_vm4 }
 0x309   :  { %v5551_v9 = vrot.slane %v5549_v27, 3  ;;  %v5554_v55 = vrot.slane %v5552_v20, 4  ;;  %v3759_v26 = vadd.f32 %v10724_v53, %v3758_v25  ;;  %v5389_v13 = vsel %vm13418_vm11, %v5355_v57, %v11047_v39 }
 0x30a   :  { %v4992_v29 = vunpack.c.l.b16 %v4072_v5  ;;  %v5192_v27 = vsel %vm13421_vm12, %v10922_v45, %v11134_v51  ;;  %v4711_v20 = vrot.slane %v4709_v0, 4  ;;  %v4879_v39 = vpack.c.b16 %v4861_v36, %v4860_v37  ;;  %v11163_v45 = vld [vmem:[%s11783_s0 + $0x120] sm:$0xf]  ;;  %vm13439_vm12 = vmmov %vm13422_vm2 }
 0x30b   :  { %v11116_v10 = vor.u32 %v5554_v55, %v5551_v9  ;;  %v3807_v33 = vmax.f32 %v3759_v26, 0.0  ;;  %v4125_v22 = vsel %vm13416_vm1, %v11163_v45, 0  ;;  %vm13434_vm11 = vsmask.f32 4352 }
 0x30c   :  { %4775 = vrot.lane.b32.xlu0 %v11089_v28, %s6282_s18  ;;  %v3726_v62 = vpop.f32.mrf.mxu0  ;;  %v11178_v25 = vor.u32 %v4714_v35, %v4711_v20  ;;  %v5161_v17 = vunpack.c.l.b16 %v4125_v22  ;;  %v11182_v12 = vrot.slane %v4879_v39, 5  ;;  %v13430_v20 = vld [vmem:[#allocation92_spill] sm:$0xff] }
 0x30d   :  { %v3727_v46 = vadd.f32 %v10724_v53, %v3726_v62  ;;  %4925 = vrot.lane.b32.xlu1 %v4892_v14, %s6283_s21  ;;  %v4786_v41 = vpop.permute.xlu0 %4785  ;;  %v5556_v19 = vsel %vm13417_vm13, %v5548_v7, %v11116_v10  ;;  %v3843_v60 = vpack.c.bf16 %v3807_v33, %v3807_v33  ;;  %v5020_v14 = vpack.c.b16 %v4993_v30, %v4992_v29  ;;  %v13427_v30 = vld [vmem:[#allocation89_spill] sm:$0xff]  ;;  %v13432_v35 = vld [vmem:[#allocation96_spill] sm:$0xff] }
 0x30e   :  { %5091 = vrot.lane.b32.xlu2 %v5058_v21, %s6284_s26  ;;  %6110 = vmatmul.msk.bf16.vlgmr.msra.gmra.mxu1 %vm13419_vm3, %v5556_v19  ;;  %v5423_v42 = vsel %vm13420_vm7, %v5389_v13, %v4786_v41  ;;  %v5179_v13 = vpack.c.b16 %v5161_v17, %v5160_v32  ;;  %v4910_v29 = vsel %vm13426_vm4, %v10990_v1, %v11182_v12 }
 0x30f   :  { %v3794_v15 = vmax.f32 %v3727_v46, 0.0  ;;  %v4936_v48 = vpop.permute.xlu1 %4935  ;;  %3875 = vst.msk [vmem:[%s11786_s3 + $0x60] sm:$0xf] %vm3818_vm9, %v3843_v60  ;;  %v11187_v33 = vrot.slane %v5020_v14, 5  ;;  %vm13431_vm8 = vnez %v13430_v20  ;;  %vm13433_vm13 = vnez %v13432_v35 }
 0x310   :  { %v11143_v23 = vpop.permute.xlu2 %4721  ;;  %v5457_v9 = vsel %vm13422_vm2, %v5423_v42, %v4936_v48  ;;  %v4041_v39 = vsel %vm13433_vm13, %v11127_v50, 0  ;;  %v11231_v50 = vrot.slane %v5179_v13, 5  ;;  %vm13440_vm2 = vmmov %vm13423_vm5 }
 0x311   :  { %v3830_v63 = vpack.c.bf16 %v3794_v15, %v3794_v15  ;;  %v5491_v62 = vsel %vm13423_vm5, %v5457_v9, %v11084_v61  ;;  %v11192_v61 = vsel %vm13425_vm15, %v10988_v47, %v11178_v25  ;;  %v4845_v32 = vunpack.c.l.b16 %v4041_v39  ;;  %vm13441_vm5 = vmmov %vm13424_vm14 }
 0x312   :  { %vm13443_vm15 = vmmov %vm13428_vm10 }
 0x313   :  { %3862 = vst.msk [vmem:[%s11786_s3 + $0x2c] sm:$0xf] %vm3818_vm9, %v3830_v63  ;;  %v3761_v55 = vpop.f32.mrf.mxu2  ;;  %v5042_v63 = vsel %vm13429_vm6, %v10994_v11, %v11187_v33  ;;  %v4090_v11 = vsel %vm13414_vm0, %v10623_v38, 0  ;;  %vm13435_vm0 = vcmask 97280  }
 0x314   :  { %5225 = vrot.lane.b32.xlu0 %v5192_v27, %s6285_s27  ;;  %v3728_v21 = vpop.f32.mrf.mxu0  ;;  %v3762_v7 = vadd.f32 %v10724_v53, %v3761_v55  ;;  %v6271_v27 = vld [vmem:[%s11783_s0 + $0xcc] sm:$0xf]  ;;  %v4091_v55 = vsel %vm13416_vm1, %v10970_v58, 0  ;;  %vm13436_vm1 = vmmov %vm13419_vm3 }
 0x315   :  { %v3729_v57 = vadd.f32 %v10724_v53, %v3728_v21  ;;  %4697 = vrot.lane.b32.xlu1 %v10826_v49, %s6280_s23  ;;  %v4040_v1 = vsel %vm13431_vm8, %v6271_v27, 0  ;;  %vm13437_vm3 = vmmov %vm13420_vm7 }
 0x316   :  { %v3808_v26 = vmax.f32 %v3762_v7, 0.0  ;;  %v5236_v5 = vpop.permute.xlu0 %5235  ;;  %4727 = vrot.lane.b32.xlu2 %v10913_v16, %s6281_s15  ;;  %v4844_v34 = vunpack.c.l.b16 %v4040_v1  ;;  %vm13438_vm7 = vmmov %vm13426_vm4 }
 0x317   :  { %v3795_v46 = vmax.f32 %v3729_v57, 0.0  ;;  %v5525_v0 = vsel %vm13424_vm14, %v5491_v62, %v5236_v5  ;;  %v4674_v18 = vpop.permute.xlu1 %4673  ;;  %v5011_v5 = vunpack.c.l.b16 %v4091_v55  ;;  %vm13442_vm14 = vmmov %vm13426_vm4 }
 0x318   :  { %v3844_v49 = vpack.c.bf16 %v3808_v26, %v3808_v26  ;;  %v5621_v41 = vshrl.u32 %v5525_v0, 16  ;;  %v5624_v19 = vshll.u32 %v5525_v0, 16  ;;  %v5070_v37 = vpop.permute.xlu2 %5069  ;;  %v5339_v60 = vsel %vm13428_vm10, %v13427_v30, %v4674_v18 }
 0x319   :  { %v3831_v36 = vpack.c.bf16 %v3795_v46, %v3795_v46  ;;  %v5373_v2 = vsel %vm13435_vm0, %v5339_v60, %v11143_v23  ;;  %v5010_v26 = vunpack.c.l.b16 %v4090_v11  ;;  %v4871_v23 = vpack.c.b16 %v4845_v32, %v4844_v34 }
 0x31a   :  { %3876 = vst.msk [vmem:[%s11786_s3 + $0x64] sm:$0xf] %vm3818_vm9, %v3844_v49  ;;  %v5623_v15 = vrot.slane %v5621_v41, 3  ;;  %v5626_v48 = vrot.slane %v5624_v19, 4  ;;  %v4108_v41 = vsel %vm13431_vm8, %v10729_v44, 0  ;;  %v4109_v19 = vsel %vm13433_vm13, %v10769_v54, 0 }
 0x31b   :  { %3863 = vst.msk [vmem:[%s11786_s3 + $0x30] sm:$0xf] %vm3818_vm9, %v3831_v36  ;;  %v3763_v42 = vpop.f32.mrf.mxu2  ;;  %v5029_v13 = vpack.c.b16 %v5011_v5, %v5010_v26  ;;  %v5144_v54 = vunpack.c.l.b16 %v4108_v41  ;;  %v13446_v5 = vld [vmem:[#allocation123_spill] sm:$0xff] }
 0x31c   :  { %v11218_v40 = vor.u32 %v5626_v48, %v5623_v15  ;;  %4793 = vrot.lane.b32.xlu0 %v11192_v61, %s6282_s18  ;;  %v3764_v9 = vadd.f32 %v10724_v53, %v3763_v42  ;;  %vm13447_vm6 = vnez %v13446_v5 }
 0x31d   :  { %v3731_v22 = vpop.f32.mrf.mxu0  ;;  %4943 = vrot.lane.b32.xlu1 %v4910_v29, %s6283_s21  ;;  %v5145_v29 = vunpack.c.l.b16 %v4109_v19 }
 0x31e   :  { %v3732_v14 = vadd.f32 %v10724_v53, %v3731_v22  ;;  %v3809_v21 = vmax.f32 %v3764_v9, 0.0  ;;  %v4770_v7 = vpop.permute.xlu0 %4769  ;;  %v5628_v57 = vsel %vm13434_vm11, %v10939_v52, %v11218_v40  ;;  %5075 = vrot.lane.b32.xlu2 %v5042_v63, %s6284_s26  ;;  %v5210_v52 = vsel %vm13438_vm7, %v11028_v8, %v11231_v50  ;;  %vm13454_vm7 = vmmov %vm13440_vm2 }
 0x31f   :  { %6119 = vmatmul.msk.bf16.gmra.mxu3 %vm13436_vm1, %v5628_v57  ;;  %v4920_v62 = vpop.permute.xlu1 %4919  ;;  %v5407_v0 = vsel %vm13437_vm3, %v5373_v2, %v4770_v7  ;;  %v11267_v63 = vrot.slane %v4871_v23, 5  ;;  %v11272_v22 = vrot.slane %v5029_v13, 5 }
 0x320   :  { %v3796_v17 = vmax.f32 %v3732_v14, 0.0  ;;  %v3845_v46 = vpack.c.bf16 %v3809_v21, %v3809_v21  ;;  %v11241_v18 = vpop.permute.xlu2 %4739  ;;  %v5441_v8 = vsel %vm13439_vm12, %v5407_v0, %v4920_v62  ;;  %v6163_v21 = vld [vmem:[%s11783_s0 + $0x124] sm:$0xff]  ;;  %v13444_v62 = vld [vmem:[#allocation121_spill] sm:$0xff] }
 0x321   :  { %v5475_v30 = vsel %vm13440_vm2, %v5441_v8, %v5070_v37  ;;  %v5171_v37 = vpack.c.b16 %v5145_v29, %v5144_v54  ;;  %v4894_v34 = vsel %vm13442_vm14, %v11077_v3, %v11267_v63  ;;  %vm13445_vm10 = vnez %v13444_v62  ;;  %v13448_v0 = vld [vmem:[#allocation3_spill] sm:$0xff] }
 0x322   :  { %v3832_v49 = vpack.c.bf16 %v3796_v17, %v3796_v17  ;;  %3877 = vst.msk [vmem:[%s11786_s3 + $0x68] sm:$0xf] %vm3818_vm9, %v3845_v46  ;;  %v5060_v17 = vsel %vm13426_vm4, %v11081_v4, %v11272_v22  ;;  %v4058_v26 = vsel %vm13445_vm10, %v10623_v38, 0  ;;  %v4059_v3 = vsel %vm13447_vm6, %v10970_v58, 0  ;;  %v6272_v4 = vld [vmem:[%s11783_s0 + $0xd4] sm:$0xf] }
 0x323   :  { %v4075_v38 = vsel %vm13433_vm13, %v10711_v24, 0  ;;  %v11316_v23 = vrot.slane %v5171_v37, 5  ;;  %v4757_v41 = vshrl.u32 %v6163_v21, 16  ;;  %v4760_v19 = vshll.u32 %v6163_v21, 16  ;;  %vm13450_vm13 = vmmov %vm13436_vm1 }
 0x324   :  { %3864 = vst.msk [vmem:[%s11786_s3 + $0x34] sm:$0xf] %vm3818_vm9, %v3832_v49  ;;  %5243 = vrot.lane.b32.xlu0 %v5210_v52, %s6285_s27  ;;  %v4074_v52 = vsel %vm13431_vm8, %v6272_v4, 0  ;;  %v4862_v20 = vunpack.c.l.b16 %v4058_v26  ;;  %vm13449_vm8 = vmmov %vm13435_vm0  ;;  %v4995_v29 = vunpack.c.l.b16 %v4075_v38  ;;  %vm13456_vm2 = vsmask.f32 3328 }
 0x325   :  { %v3766_v36 = vpop.f32.mrf.mxu2  ;;  %v3733_v15 = vpop.f32.mrf.mxu0  ;;  %4681 = vrot.lane.b32.xlu1 %v10913_v16, %s6280_s23  ;;  %v4994_v54 = vunpack.c.l.b16 %v4074_v52  ;;  %vm13451_vm0 = vmmov %vm13437_vm3 }
 0x326   :  { %v3767_v48 = vadd.f32 %v10724_v53, %v3766_v36  ;;  %v3734_v44 = vadd.f32 %v10724_v53, %v3733_v15  ;;  %v5220_v42 = vpop.permute.xlu0 %5219  ;;  %4745 = vrot.lane.b32.xlu2 %v11002_v6, %s6281_s15  ;;  %v4863_v15 = vunpack.c.l.b16 %v4059_v3  ;;  %vm13452_vm1 = vmmov %vm13426_vm4 }
 0x327   :  { %v5509_v1 = vsel %vm13441_vm5, %v5475_v30, %v5220_v42  ;;  %v4692_v39 = vpop.permute.xlu1 %4691  ;;  %vm13453_vm3 = vmmov %vm13439_vm12  ;;  %v5021_v37 = vpack.c.b16 %v4995_v29, %v4994_v54 }
 0x328   :  { %v3810_v60 = vmax.f32 %v3767_v48, 0.0  ;;  %v3797_v27 = vmax.f32 %v3734_v44, 0.0  ;;  %v5557_v11 = vshrl.u32 %v5509_v1, 16  ;;  %v5560_v16 = vshll.u32 %v5509_v1, 16  ;;  %v11274_v55 = vpop.permute.xlu2 %5087  ;;  %v11328_v44 = vld [vmem:[%s11783_s0 + $0x128] sm:$0xf]  ;;  %vm13455_vm12 = vmmov %vm13441_vm5 }
 0x329   :  { %v5357_v32 = vsel %vm13443_vm15, %v10418_v31, %v4692_v39  ;;  %v4762_v1 = vrot.slane %v4760_v19, 5  ;;  %v4880_v39 = vpack.c.b16 %v4863_v15, %v4862_v20  ;;  %v11365_v38 = vrot.slane %v5021_v37, 5  ;;  %vm13457_vm5 = vmmov %vm13452_vm1 }
 0x32a   :  { %v3846_v9 = vpack.c.bf16 %v3810_v60, %v3810_v60  ;;  %v3833_v14 = vpack.c.bf16 %v3797_v27, %v3797_v27  ;;  %v5559_v7 = vrot.slane %v5557_v11, 3  ;;  %v5562_v57 = vrot.slane %v5560_v16, 4  ;;  %vm13458_vm14 = vmmov %vm13452_vm1 }
 0x32b   :  { %v5391_v24 = vsel %vm13449_vm8, %v5357_v32, %v11241_v18  ;;  %v5194_v18 = vsel %vm13452_vm1, %v11134_v51, %v11316_v23  ;;  %v4759_v27 = vrot.slane %v4757_v41, 4  ;;  %v4127_v16 = vsel %vm13447_vm6, %v11328_v44, 0  ;;  %vm13459_vm4 = vmmov %vm13434_vm11 }
 0x32c   :  { %3878 = vst.msk [vmem:[%s11786_s3 + $0x6c] sm:$0xf] %vm3818_vm9, %v3846_v9  ;;  %v11301_v46 = vor.u32 %v5562_v57, %v5559_v7  ;;  %4777 = vrot.lane.b32.xlu0 %v13448_v0, %s6282_s18  ;;  %v6273_v9 = vld [vmem:[%s11783_s0 + $0x124] sm:$0xf] }
 0x32d   :  { %3865 = vst.msk [vmem:[%s11786_s3 + $0x38] sm:$0xf] %vm3818_vm9, %v3833_v14  ;;  %v3768_v2 = vpop.f32.mrf.mxu2  ;;  %4927 = vrot.lane.b32.xlu1 %v4894_v34, %s6283_s21  ;;  %v4126_v11 = vsel %vm13445_vm10, %v6273_v9, 0  ;;  %v11356_v34 = vor.u32 %v4762_v1, %v4759_v27 }
 0x32e   :  { %v3769_v31 = vadd.f32 %v10724_v53, %v3768_v2  ;;  %v4788_v36 = vpop.permute.xlu0 %4787  ;;  %v5564_v13 = vsel %vm13434_vm11, %v11116_v10, %v11301_v46  ;;  %5093 = vrot.lane.b32.xlu2 %v5060_v17, %s6284_s26  ;;  %v5162_v32 = vunpack.c.l.b16 %v4126_v11  ;;  %v5163_v2 = vunpack.c.l.b16 %v4127_v16  ;;  %vm13460_vm11 = vmmov %vm13449_vm8 }
 0x32f   :  { %v3736_v49 = vpop.f32.mrf.mxu0  ;;  %6111 = vmatmul.msk.bf16.gmra.mxu1 %vm13450_vm13, %v5564_v13  ;;  %v4938_v48 = vpop.permute.xlu1 %4937  ;;  %v5425_v10 = vsel %vm13451_vm0, %v5391_v24, %v4788_v36  ;;  %vm13462_vm8 = vmmov %vm13451_vm0 }
 0x330   :  { %v3737_v58 = vadd.f32 %v10724_v53, %v3736_v49  ;;  %v3811_v8 = vmax.f32 %v3769_v31, 0.0  ;;  %v4724_v60 = vpop.permute.xlu2 %4723  ;;  %v5459_v51 = vsel %vm13453_vm3, %v5425_v10, %v4938_v48  ;;  %v11360_v49 = vrot.slane %v4880_v39, 5  ;;  %vm13465_vm0 = vmmov %vm13454_vm7 }
 0x331   :  { %v5493_v17 = vsel %vm13454_vm7, %v5459_v51, %v11274_v55  ;;  %v4764_v55 = vsel %vm13456_vm2, %v11178_v25, %v11356_v34  ;;  %v5180_v36 = vpack.c.b16 %v5163_v2, %v5162_v32  ;;  %vm13473_vm2 = vmmov %vm13443_vm15 }
 0x332   :  { %v3798_v35 = vmax.f32 %v3737_v58, 0.0  ;;  %v3847_v30 = vpack.c.bf16 %v3811_v8, %v3811_v8  ;;  %v4912_v15 = vsel %vm13457_vm5, %v11182_v12, %v11360_v49 }
 0x334   :  { %v3834_v42 = vpack.c.bf16 %v3798_v35, %v3798_v35  ;;  %3879 = vst.msk [vmem:[%s11786_s3 + $0x70] sm:$0xf] %vm3818_vm9, %v3847_v30  ;;  %5227 = vrot.lane.b32.xlu0 %v5194_v18, %s6285_s27  ;;  %v5044_v35 = vsel %vm13458_vm14, %v11187_v33, %v11365_v38  ;;  %v4092_v30 = vsel %vm13445_vm10, %v11155_v56, 0  ;;  %v4093_v33 = vsel %vm13447_vm6, %v11163_v45, 0  ;;  %vm13461_vm10 = vmmov %vm13450_vm13 }
 0x335   :  { %4699 = vrot.lane.b32.xlu1 %v11002_v6, %s6280_s23  ;;  %v5012_v1 = vunpack.c.l.b16 %v4092_v30  ;;  %v5013_v39 = vunpack.c.l.b16 %v4093_v33  ;;  %vm13463_vm6 = vmmov %vm13452_vm1 }
 0x336   :  { %3866 = vst.msk [vmem:[%s11786_s3 + $0x3c] sm:$0xf] %vm3818_vm9, %v3834_v42  ;;  %v3771_v14 = vpop.f32.mrf.mxu2  ;;  %v5238_v3 = vpop.permute.xlu0 %5237  ;;  %4729 = vrot.lane.b32.xlu2 %v11089_v28, %s6281_s15  ;;  %v11395_v42 = vrot.slane %v5180_v36, 5  ;;  %vm13464_vm13 = vmmov %vm13453_vm3 }
 0x337   :  { %v3738_v21 = vpop.f32.mrf.mxu0  ;;  %v3772_v7 = vadd.f32 %v10724_v53, %v3771_v14  ;;  %v5527_v4 = vsel %vm13455_vm12, %v5493_v17, %v5238_v3  ;;  %v4676_v52 = vpop.permute.xlu1 %4675  ;;  %v5030_v51 = vpack.c.b16 %v5013_v39, %v5012_v1  ;;  %vm13466_vm1 = vmmov %vm13455_vm12 }
 0x338   :  { %v3739_v57 = vadd.f32 %v10724_v53, %v3738_v21  ;;  %v5629_v58 = vshrl.u32 %v5527_v4, 16  ;;  %v5632_v41 = vshll.u32 %v5527_v4, 16  ;;  %v5072_v19 = vpop.permute.xlu2 %5071  ;;  %v5341_v54 = vsel %vm13443_vm15, %v10442_v59, %v4676_v52  ;;  %vm13468_vm3 = vmmov %vm13457_vm5 }
 0x339   :  { %v3812_v26 = vmax.f32 %v3772_v7, 0.0  ;;  %v5375_v56 = vsel %vm13460_vm11, %v5341_v54, %v4724_v60  ;;  %v5212_v16 = vsel %vm13463_vm6, %v11231_v50, %v11395_v42  ;;  %v11423_v50 = vld [vmem:[%s11785_s2] ss:$0 sm:$0xff]  ;;  %v11433_v3 = vrot.slane %v5030_v51, 5  ;;  %vm13471_vm12 = vmmov %vm13468_vm3 }
 0x33a   :  { %v3799_v31 = vmax.f32 %v3739_v57, 0.0  ;;  %v5631_v13 = vrot.slane %v5629_v58, 3  ;;  %v5634_v20 = vrot.slane %v5632_v41, 4  ;;  %vm13475_vm5 = vmmov %vm13459_vm4 }
 0x33b   :  { %v3848_v6 = vpack.c.bf16 %v3812_v26, %v3812_v26  ;;  %vm13476_vm14 = vmmov %vm13460_vm11 }
 0x33c   :  { %v3835_v8 = vpack.c.bf16 %v3799_v31, %v3799_v31  ;;  %v11384_v48 = vor.u32 %v5634_v20, %v5631_v13  ;;  %4795 = vrot.lane.b32.xlu0 %v4764_v55, %s6282_s18  ;;  %v5062_v13 = vsel %vm13471_vm12, %v11272_v22, %v11433_v3  ;;  %vm13477_vm15 = vmmov %vm13461_vm10 }
 0x33d   :  { %3880 = vst.msk [vmem:[%s11786_s3 + $0x74] sm:$0xf] %vm3818_vm9, %v3848_v6  ;;  %4945 = vrot.lane.b32.xlu1 %v4912_v15, %s6283_s21  ;;  %v13472_v15 = vld [vmem:[#allocation116_spill] sm:$0xff]  ;;  %vm13480_vm11 = vmmov %vm13468_vm3 }
 0x33e   :  { %3867 = vst.msk [vmem:[%s11786_s3 + $0x40] sm:$0xf] %vm3818_vm9, %v3835_v8  ;;  %v3773_v24 = vpop.f32.mrf.mxu2  ;;  %v4772_v18 = vpop.permute.xlu0 %4771  ;;  %v5636_v27 = vsel %vm13459_vm4, %v11218_v40, %v11384_v48  ;;  %5077 = vrot.lane.b32.xlu2 %v5044_v35, %s6284_s26  ;;  %v13469_v8 = vld [vmem:[#allocation38_spill] sm:$0xff]  ;;  %vm13478_vm4 = vmmov %vm13462_vm8 }
 0x33f   :  { %v3741_v29 = vpop.f32.mrf.mxu0  ;;  %v3774_v12 = vadd.f32 %v10724_v53, %v3773_v24  ;;  %6120 = vmatmul.msk.bf16.gmra.mxu3 %vm13461_vm10, %v5636_v27  ;;  %v5409_v5 = vsel %vm13462_vm8, %v5375_v56, %v4772_v18  ;;  %vm13470_vm7 = vnez %v13469_v8  ;;  %v4095_v27 = vld [vmem:[%s11783_s0 + $0x12c] sm:$0x1]  ;;  %vm13483_vm8 = vmmov %vm13464_vm13 }
 0x340   :  { %v3742_v10 = vadd.f32 %v10724_v53, %v3741_v29  ;;  %v4922_v53 = vpop.permute.xlu1 %4921  ;;  %v4742_v45 = vpop.permute.xlu2 %4741  ;;  %v4026_v55 = vsel %vm13470_vm7, %v11328_v44, 0  ;;  %vm13484_vm6 = vmmov %vm13465_vm0 }
 0x341   :  { %v3813_v59 = vmax.f32 %v3774_v12, 0.0  ;;  %v5443_v40 = vsel %vm13464_vm13, %v5409_v5, %v4922_v53  ;;  %v4394_v35 = vunpack.c.l.b16 %v4026_v55  ;;  %v13481_v53 = vld [vmem:[#allocation140_spill] sm:$0xff]  ;;  %vm13485_vm13 = vmmov %vm13466_vm1 }
 0x342   :  { %v3800_v62 = vmax.f32 %v3742_v10, 0.0  ;;  %v5477_v7 = vsel %vm13465_vm0, %v5443_v40, %v5072_v19  ;;  %v13467_v19 = vld [vmem:[#allocation65_spill] sm:$0xff]  ;;  %v4061_v10 = vld [vmem:[%s11783_s0 + $0x124] sm:$0x1]  ;;  %vm13482_vm10 = vnez %v13481_v53  ;;  %vm13487_vm0 = vmmov %vm13468_vm3 }
 0x343   :  { %v3849_v9 = vpack.c.bf16 %v3813_v59, %v3813_v59  ;;  %v4094_v1 = vsel %vm13482_vm10, %v4061_v10, 0  ;;  %v4128_v5 = vsel %vm13482_vm10, %v4095_v27, 0  ;;  %vm13491_vm12 = vmmov %vm13476_vm14 }
 0x344   :  { %v3836_v11 = vpack.c.bf16 %v3800_v62, %v3800_v62  ;;  %5245 = vrot.lane.b32.xlu0 %v5212_v16, %s6285_s27  ;;  %v4411_v62 = vpack.c.b16 %v4394_v35, %v4394_v35 }
 0x345   :  { %3881 = vst.msk [vmem:[%s11786_s3 + $0x78] sm:$0xf] %vm3818_vm9, %v3849_v9  ;;  %4683 = vrot.lane.b32.xlu1 %v11089_v28, %s6280_s23 }
 0x346   :  { %3868 = vst.msk [vmem:[%s11786_s3 + $0x44] sm:$0xf] %vm3818_vm9, %v3836_v11  ;;  %v3776_v60 = vpop.f32.mrf.mxu2  ;;  %v5222_v32 = vpop.permute.xlu0 %5221  ;;  %4747 = vrot.lane.b32.xlu2 %v11192_v61, %s6281_s15  ;;  %v4896_v61 = vsel %vm13468_vm3, %v11267_v63, %v13467_v19  ;;  %v13474_v63 = vld [vmem:[#allocation64_spill] sm:$0xff]  ;;  %vm13490_vm3 = vmmov %vm13475_vm5 }
 0x347   :  { %v3743_v14 = vpop.f32.mrf.mxu0  ;;  %v3777_v37 = vadd.f32 %v11423_v50, %v3776_v60  ;;  %v5511_v17 = vsel %vm13466_vm1, %v5477_v7, %v5222_v32  ;;  %v5164_v60 = vunpack.c.l.b16 %v4128_v5  ;;  %vm13489_vm1 = vmmov %vm13473_vm2 }
 0x348   :  { %v3744_v21 = vadd.f32 %v11423_v50, %v3743_v14  ;;  %v4694_v26 = vpop.permute.xlu1 %4693  ;;  %v5565_v4 = vshrl.u32 %v5511_v17, 16  ;;  %v5568_v52 = vshll.u32 %v5511_v17, 16  ;;  %v5090_v6 = vpop.permute.xlu2 %5089 }
 0x349   :  { %v3814_v57 = vmax.f32 %v3777_v37, 0.0  ;;  %v5359_v24 = vsel %vm13473_vm2, %v13472_v15, %v4694_v26  ;;  %v5181_v26 = vpack.c.b16 %v5164_v60, %v5164_v60  ;;  %vm13492_vm2 = vmmov %vm13477_vm15 }
 0x34a   :  { %v3801_v2 = vmax.f32 %v3744_v21, 0.0  ;;  %v5567_v28 = vrot.slane %v5565_v4, 3  ;;  %v5570_v41 = vrot.slane %v5568_v52, 4  ;;  %v5393_v22 = vsel %vm13476_vm14, %v5359_v24, %v4742_v45  ;;  %v13486_v4 = vld [vmem:[#allocation67_spill] sm:$0xff]  ;;  %vm13494_vm14 = vmmov %vm13487_vm0 }
 0x34b   :  { %v3850_v31 = vpack.c.bf16 %v3814_v57, %v3814_v57 }
 0x34c   :  { %v3837_v58 = vpack.c.bf16 %v3801_v2, %v3801_v2  ;;  %v11452_v20 = vor.u32 %v5570_v41, %v5567_v28  ;;  %4779 = vrot.lane.b32.xlu0 %v13474_v63, %s6282_s18  ;;  %v4027_v41 = vld [vmem:[%s11783_s0 + $0x11c] sm:$0x1] }
 0x34d   :  { %3882 = vst.msk [vmem:[%s11786_s3 + $0x7c] sm:$0xf] %vm3818_vm9, %v3850_v31  ;;  %4929 = vrot.lane.b32.xlu1 %v4896_v61, %s6283_s21 }
 0x34e   :  { %3869 = vst.msk [vmem:[%s11786_s3 + $0x48] sm:$0xf] %vm3818_vm9, %v3837_v58  ;;  %v3778_v36 = vpop.f32.mrf.mxu2  ;;  %v4790_v29 = vpop.permute.xlu0 %4789  ;;  %v5572_v12 = vsel %vm13475_vm5, %v11301_v46, %v11452_v20  ;;  %5095 = vrot.lane.b32.xlu2 %v5062_v13, %s6284_s26  ;;  %v13479_v46 = vld [vmem:[#allocation68_spill] sm:$0xff]  ;;  %vm13493_vm5 = vmmov %vm13478_vm4 }
 0x34f   :  { %v3779_v44 = vadd.f32 %v11423_v50, %v3778_v36  ;;  %6112 = vmatmul.msk.bf16.gmra.mxu1 %vm13477_vm15, %v5572_v12  ;;  %v5427_v59 = vsel %vm13478_vm4, %v5393_v22, %v4790_v29  ;;  %v5196_v56 = vsel %vm13480_vm11, %v11316_v23, %v13479_v46  ;;  %v5014_v23 = vunpack.c.l.b16 %v4094_v1  ;;  %vm13495_vm15 = vmmov %vm13487_vm0 }
 0x350   :  { %v4940_v30 = vpop.permute.xlu1 %4939  ;;  %v4726_v18 = vpop.permute.xlu2 %4725  ;;  %vm13496_vm4 = vmmov %vm13483_vm8 }
 0x351   :  { %v3815_v54 = vmax.f32 %v3779_v44, 0.0  ;;  %v5461_v39 = vsel %vm13483_vm8, %v5427_v59, %v4940_v30  ;;  %v5031_v32 = vpack.c.b16 %v5014_v23, %v5014_v23  ;;  %vm13497_vm11 = vmmov %vm13484_vm6 }
 0x352   :  { %v5495_v11 = vsel %vm13484_vm6, %v5461_v39, %v5090_v6  ;;  %v13488_v6 = vld [vmem:[#allocation32_spill] sm:$0xff]  ;;  %vm13499_vm8 = vmmov %vm13487_vm0 }
 0x353   :  { %v3851_v33 = vpack.c.bf16 %v3815_v54, %v3815_v54  ;;  %v5063_v19 = vrot.slane %v5031_v32, 5  ;;  %vm13501_vm6 = vmmov %vm13489_vm1 }
 0x354   :  { %5229 = vrot.lane.b32.xlu0 %v5196_v56, %s6285_s27 }
 0x355   :  { %3883 = vst.msk [vmem:[%s11786_s3 + $0x80] sm:$0xf] %vm3818_vm9, %v3851_v33  ;;  %4444 = vrot.lane.b32.xlu1 %v4411_v62, %s6279_s29  ;;  %v5064_v35 = vsel %vm13494_vm14, %v11433_v3, %v5063_v19  ;;  %v13500_v62 = vld [vmem:[#allocation110_spill] sm:$0xff]  ;;  %vm13510_vm14 = vmmov %vm13501_vm6 }
 0x356   :  { %v3781_v9 = vpop.f32.mrf.mxu2  ;;  %v5240_v40 = vpop.permute.xlu0 %5239  ;;  %4731 = vrot.lane.b32.xlu2 %v13448_v0, %s6281_s15  ;;  %v5046_v0 = vsel %vm13487_vm0, %v11365_v38, %v13486_v4  ;;  %v4060_v38 = vsel %vm13482_vm10, %v4027_v41, 0  ;;  %vm13498_vm10 = vmmov %vm13485_vm13 }
 0x357   :  { %v3782_v45 = vadd.f32 %v11423_v50, %v3781_v9  ;;  %v5529_v51 = vsel %vm13485_vm13, %v5495_v11, %v5240_v40  ;;  %v4864_v24 = vunpack.c.l.b16 %v4060_v38  ;;  %vm13502_vm13 = vmmov %vm13490_vm3 }
 0x358   :  { %v4678_v14 = vpop.permute.xlu1 %4677  ;;  %v5637_v21 = vshrl.u32 %v5529_v51, 16  ;;  %v5640_v7 = vshll.u32 %v5529_v51, 16  ;;  %v5074_v57 = vpop.permute.xlu2 %5073  ;;  %vm13503_vm0 = vmmov %vm13491_vm12 }
 0x359   :  { %v3816_v16 = vmax.f32 %v3782_v45, 0.0  ;;  %v5343_v58 = vsel %vm13489_vm1, %v13488_v6, %v4678_v14  ;;  %v4881_v29 = vpack.c.b16 %v4864_v24, %v4864_v24  ;;  %vm13504_vm1 = vmmov %vm13492_vm2 }
 0x35a   :  { %v5639_v2 = vrot.slane %v5637_v21, 3  ;;  %v5642_v17 = vrot.slane %v5640_v7, 4  ;;  %v5377_v13 = vsel %vm13491_vm12, %v5343_v58, %v4726_v18  ;;  %vm13506_vm12 = vmmov %vm13496_vm4 }
 0x35b   :  { %v3852_v37 = vpack.c.bf16 %v3816_v16, %v3816_v16  ;;  %v4913_v10 = vrot.slane %v4881_v29, 5 }
 0x35c   :  { %v11499_v52 = vor.u32 %v5642_v17, %v5639_v2  ;;  %4749 = vrot.lane.b32.xlu0 %v11178_v25, %s6281_s15  ;;  %v5213_v25 = vrot.slane %v5181_v26, 5 }
 0x35d   :  { %3884 = vst.msk [vmem:[%s11786_s3 + $0x84] sm:$0xf] %vm3818_vm9, %v3852_v37  ;;  %4797 = vrot.lane.b32.xlu1 %v11356_v34, %s6282_s18  ;;  %v4914_v46 = vsel %vm13499_vm8, %v11360_v49, %v4913_v10  ;;  %vm13515_vm8 = vmmov %vm13506_vm12 }
 0x35e   :  { %v3783_v31 = vpop.f32.mrf.mxu2  ;;  %v4774_v55 = vpop.permute.xlu0 %4773  ;;  %v5644_v36 = vsel %vm13490_vm3, %v11384_v48, %v11499_v52  ;;  %5079 = vrot.lane.b32.xlu2 %v5046_v0, %s6284_s26  ;;  %v5214_v48 = vsel %vm13495_vm15, %v11395_v42, %v5213_v25  ;;  %vm13505_vm3 = vmmov %vm13493_vm5 }
 0x35f   :  { %v3784_v28 = vadd.f32 %v11423_v50, %v3783_v31  ;;  %6121 = vmatmul.msk.bf16.gmra.mxu3 %vm13492_vm2, %v5644_v36  ;;  %v5411_v63 = vsel %vm13493_vm5, %v5377_v13, %v4774_v55  ;;  %vm13507_vm2 = vmmov %vm13497_vm11  ;;  %v13509_v31 = vld [vmem:[#allocation87_spill] sm:$0xff] }
 0x360   :  { %v4924_v15 = vpop.permute.xlu1 %4923  ;;  %v4744_v44 = vpop.permute.xlu2 %4743  ;;  %vm13508_vm5 = vmmov %vm13498_vm10 }
 0x361   :  { %v3817_v61 = vmax.f32 %v3784_v28, 0.0  ;;  %v5445_v54 = vsel %vm13496_vm4, %v5411_v63, %v4924_v15  ;;  %vm13511_vm15 = vmmov %vm13502_vm13 }
 0x362   :  { %v5479_v12 = vsel %vm13497_vm11, %v5445_v54, %v5074_v57  ;;  %vm13512_vm4 = vmmov %vm13503_vm0 }
 0x363   :  { %v3853_v34 = vpack.c.bf16 %v3817_v61, %v3817_v61  ;;  %vm13513_vm11 = vmmov %vm13504_vm1 }
 0x364   :  { %5097 = vrot.lane.b32.xlu0 %v5064_v35, %s6284_s26 }
 0x365   :  { %3885 = vst.msk [vmem:[%s11786_s3 + $0x88] sm:$0xf] %vm3818_vm9, %v3853_v34  ;;  %5247 = vrot.lane.b32.xlu1 %v5214_v48, %s6285_s27  ;;  %v13518_v48 = vld [vmem:[#allocation105_spill] sm:$0xff] }
 0x366   :  { %v5224_v22 = vpop.permute.xlu0 %5223  ;;  %4701 = vrot.lane.b32.xlu2 %v10988_v47, %s6280_s23 }
 0x367   :  { %v5513_v3 = vsel %vm13498_vm10, %v5479_v12, %v5224_v22  ;;  %vm13514_vm10 = vmmov %vm13505_vm3 }
 0x368   :  { %v4696_v30 = vpop.permute.xlu1 %4695  ;;  %v5573_v33 = vshrl.u32 %v5513_v3, 16  ;;  %v5576_v59 = vshll.u32 %v5513_v3, 16  ;;  %v5092_v42 = vpop.permute.xlu2 %5091 }
 0x369   :  { %v5361_v53 = vsel %vm13501_vm6, %v13500_v62, %v4696_v30  ;;  %vm13516_vm6 = vmmov %vm13507_vm2 }
 0x36a   :  { %v5575_v18 = vrot.slane %v5573_v33, 3  ;;  %v5578_v27 = vrot.slane %v5576_v59, 4  ;;  %v5395_v39 = vsel %vm13503_vm0, %v5361_v53, %v4744_v44  ;;  %vm13519_vm0 = vmmov %vm13510_vm14 }
 0x36c   :  { %v5579_v56 = vor.u32 %v5578_v27, %v5575_v18 }
 0x36e   :  { %v4792_v1 = vpop.permute.xlu0 %4791  ;;  %v5580_v47 = vsel %vm13502_vm13, %v11452_v20, %v5579_v56  ;;  %4947 = vrot.lane.b32.xlu2 %v4914_v46, %s6283_s21  ;;  %vm13517_vm13 = vmmov %vm13508_vm5 }
 0x36f   :  { %6113 = vmatmul.msk.bf16.gmra.mxu1 %vm13504_vm1, %v5580_v47  ;;  %v5429_v5 = vsel %vm13505_vm3, %v5395_v39, %v4792_v1  ;;  %vm13520_vm1 = vmmov %vm13511_vm15 }
 0x370   :  { %v4942_v9 = vpop.permute.xlu1 %4941  ;;  %v4728_v45 = vpop.permute.xlu2 %4727  ;;  %vm13521_vm3 = vmmov %vm13512_vm4 }
 0x371   :  { %v5788_v23 = vpop.f32.mrf.mxu3  ;;  %v5463_v49 = vsel %vm13506_vm12, %v5429_v5, %v4942_v9  ;;  %vm13522_vm12 = vmmov %vm13513_vm11 }
 0x372   :  { %v5789_v11 = vadd.f32 %v11423_v50, %v5788_v23  ;;  %v5497_v40 = vsel %vm13507_vm2, %v5463_v49, %v5092_v42  ;;  %vm13523_vm2 = vmmov %vm13514_vm10 }
 0x374   :  { %v5844_v16 = vmax.f32 %v5789_v11, 0.0 }
 0x376   :  { %v5242_v60 = vpop.permute.xlu0 %5241  ;;  %v5879_v20 = vpack.c.bf16 %v5844_v16, %v5844_v16 }
 0x377   :  { %v5531_v51 = vsel %vm13508_vm5, %v5497_v40, %v5242_v60  ;;  %vm13524_vm5 = vmmov %vm13515_vm8  ;;  %v13527_v40 = vld [vmem:[#allocation108_spill] sm:$0xff] }
 0x378   :  { %v4680_v14 = vpop.permute.xlu1 %4679  ;;  %v5645_v37 = vshrl.u32 %v5531_v51, 16  ;;  %v5648_v21 = vshll.u32 %v5531_v51, 16  ;;  %v5076_v7 = vpop.permute.xlu2 %5075  ;;  %5911 = vst.msk [vmem:[%s11786_s3 + $0xe4] sm:$0xf] %vm3818_vm9, %v5879_v20 }
 0x379   :  { %v5790_v2 = vpop.f32.mrf.mxu3  ;;  %v5345_v4 = vsel %vm13510_vm14, %v13509_v31, %v4680_v14  ;;  %vm13525_vm14 = vmmov %vm13516_vm6 }
 0x37a   :  { %v5647_v57 = vrot.slane %v5645_v37, 3  ;;  %v5650_v32 = vrot.slane %v5648_v21, 4  ;;  %v5791_v17 = vadd.f32 %v11423_v50, %v5790_v2  ;;  %v5379_v28 = vsel %vm13512_vm4, %v5345_v4, %v4728_v45  ;;  %vm13528_vm4 = vmmov %vm13519_vm0 }
 0x37c   :  { %v5651_v26 = vor.u32 %v5650_v32, %v5647_v57  ;;  %v5845_v0 = vmax.f32 %v5791_v17, 0.0 }
 0x37e   :  { %v4776_v6 = vpop.permute.xlu0 %4775  ;;  %v5652_v58 = vsel %vm13511_vm15, %v11499_v52, %v5651_v26  ;;  %v5880_v41 = vpack.c.bf16 %v5845_v0, %v5845_v0  ;;  %vm13526_vm15 = vmmov %vm13517_vm13 }
 0x37f   :  { %6122 = vmatmul.msk.bf16.gmra.mxu3 %vm13513_vm11, %v5652_v58  ;;  %v5413_v38 = vsel %vm13514_vm10, %v5379_v28, %v4776_v6  ;;  %vm13529_vm11 = vmmov %vm13520_vm1 }
 0x380   :  { %v4926_v19 = vpop.permute.xlu1 %4925  ;;  %v4746_v61 = vpop.permute.xlu2 %4745  ;;  %5912 = vst.msk [vmem:[%s11786_s3 + $0xe8] sm:$0xf] %vm3818_vm9, %v5880_v41  ;;  %vm13530_vm10 = vmmov %vm13521_vm3 }
 0x381   :  { %v5447_v55 = vsel %vm13515_vm8, %v5413_v38, %v4926_v19  ;;  %vm13531_vm8 = vmmov %vm13522_vm12 }
 0x382   :  { %v5481_v36 = vsel %vm13516_vm6, %v5447_v55, %v5076_v7  ;;  %vm13532_vm6 = vmmov %vm13523_vm2 }
 0x386   :  { %v5226_v25 = vpop.permute.xlu0 %5225 }
 0x387   :  { %v5515_v52 = vsel %vm13517_vm13, %v5481_v36, %v5226_v25  ;;  %vm13533_vm13 = vmmov %vm13524_vm5  ;;  %v13536_v25 = vld [vmem:[#allocation161_spill] sm:$0xff] }
 0x388   :  { %v4698_v13 = vpop.permute.xlu1 %4697  ;;  %v5581_v15 = vshrl.u32 %v5515_v52, 16  ;;  %v5584_v24 = vshll.u32 %v5515_v52, 16  ;;  %v5094_v34 = vpop.permute.xlu2 %5093 }
 0x389   :  { %v5363_v54 = vsel %vm13519_vm0, %v13518_v48, %v4698_v13  ;;  %vm13534_vm0 = vmmov %vm13525_vm14 }
 0x38a   :  { %v5583_v63 = vrot.slane %v5581_v15, 3  ;;  %v5586_v44 = vrot.slane %v5584_v24, 4  ;;  %v5397_v30 = vsel %vm13521_vm3, %v5363_v54, %v4746_v61  ;;  %vm13537_vm3 = vmmov %vm13528_vm4 }
 0x38b   :  { %v5748_v29 = vpop.f32.mrf.mxu1 }
 0x38c   :  { %v5587_v35 = vor.u32 %v5586_v44, %v5583_v63  ;;  %v5749_v12 = vadd.f32 %v11423_v50, %v5748_v29 }
 0x38e   :  { %v4794_v22 = vpop.permute.xlu0 %4793  ;;  %v5588_v3 = vsel %vm13520_vm1, %v5579_v56, %v5587_v35  ;;  %v5828_v10 = vmax.f32 %v5749_v12, 0.0  ;;  %vm13535_vm1 = vmmov %vm13526_vm15 }
 0x38f   :  { %6114 = vmatmul.msk.bf16.gmra.mxu1 %vm13522_vm12, %v5588_v3  ;;  %v5431_v59 = vsel %vm13523_vm2, %v5397_v30, %v4794_v22  ;;  %vm13538_vm12 = vmmov %vm13529_vm11 }
 0x390   :  { %v4944_v33 = vpop.permute.xlu1 %4943  ;;  %v4730_v42 = vpop.permute.xlu2 %4729  ;;  %v5863_v18 = vpack.c.bf16 %v5828_v10, %v5828_v10  ;;  %vm13539_vm2 = vmmov %vm13530_vm10 }
 0x391   :  { %v5465_v27 = vsel %vm13524_vm5, %v5431_v59, %v4944_v33  ;;  %vm13540_vm5 = vmmov %vm13531_vm8 }
 0x392   :  { %5895 = vst.msk [vmem:[%s11786_s3 + $0xa4] sm:$0xf] %vm3818_vm9, %v5863_v18  ;;  %v5499_v62 = vsel %vm13525_vm14, %v5465_v27, %v5094_v34  ;;  %vm13541_vm14 = vmmov %vm13532_vm6 }
 0x393   :  { %v5750_v46 = vpop.f32.mrf.mxu1 }
 0x394   :  { %v5751_v56 = vadd.f32 %v11423_v50, %v5750_v46 }
 0x396   :  { %v5244_v53 = vpop.permute.xlu0 %5243  ;;  %v5829_v1 = vmax.f32 %v5751_v56, 0.0 }
 0x397   :  { %v5533_v47 = vsel %vm13526_vm15, %v5499_v62, %v5244_v53  ;;  %vm13542_vm15 = vmmov %vm13533_vm13 }
 0x398   :  { %v4682_v39 = vpop.permute.xlu1 %4681  ;;  %v5653_v9 = vshrl.u32 %v5533_v47, 16  ;;  %v5656_v5 = vshll.u32 %v5533_v47, 16  ;;  %v5078_v45 = vpop.permute.xlu2 %5077  ;;  %v5864_v23 = vpack.c.bf16 %v5829_v1, %v5829_v1 }
 0x399   :  { %v5347_v60 = vsel %vm13528_vm4, %v13527_v40, %v4682_v39  ;;  %vm13543_vm4 = vmmov %vm13534_vm0  ;;  %v13545_v39 = vld [vmem:[#allocation106_spill] sm:$0xff]  ;;  %v6275_v40 = vld [vmem:[%s11783_s0 + $0x118] sm:$0xf] }
 0x39a   :  { %v5655_v49 = vrot.slane %v5653_v9, 3  ;;  %v5658_v11 = vrot.slane %v5656_v5, 4  ;;  %5896 = vst.msk [vmem:[%s11786_s3 + $0xa8] sm:$0xf] %vm3818_vm9, %v5864_v23  ;;  %v5381_v14 = vsel %vm13530_vm10, %v5347_v60, %v4730_v42  ;;  %vm13546_vm10 = vmmov %vm13537_vm3  ;;  %v3954_v60 = vsel %vm13470_vm7, %v6275_v40, 0 }
 0x39b   :  { %vm13555_vm7 = vcmask 23552  }
 0x39c   :  { %v5659_v16 = vor.u32 %v5658_v11, %v5655_v49 }
 0x39e   :  { %v4778_v20 = vpop.permute.xlu0 %4777  ;;  %v5660_v51 = vsel %vm13529_vm11, %v5651_v26, %v5659_v16  ;;  %vm13544_vm11 = vmmov %vm13535_vm1 }
 0x39f   :  { %6123 = vmatmul.msk.bf16.gmra.mxu3 %vm13531_vm8, %v5660_v51  ;;  %v5415_v21 = vsel %vm13532_vm6, %v5381_v14, %v4778_v20  ;;  %vm13547_vm8 = vmmov %vm13538_vm12  ;;  %v4194_v14 = vunpack.c.l.b16 %v3954_v60 }
 0x3a0   :  { %v4928_v37 = vpop.permute.xlu1 %4927  ;;  %v4748_v7 = vpop.permute.xlu2 %4747  ;;  %vm13548_vm6 = vmmov %vm13539_vm2 }
 0x3a1   :  { %v5449_v32 = vsel %vm13533_vm13, %v5415_v21, %v4928_v37  ;;  %vm13549_vm13 = vmmov %vm13540_vm5 }
 0x3a2   :  { %v5793_v57 = vpop.f32.mrf.mxu3  ;;  %v5483_v31 = vsel %vm13534_vm0, %v5449_v32, %v5078_v45  ;;  %vm13550_vm0 = vmmov %vm13541_vm14  ;;  %v4211_v32 = vpack.c.b16 %v4194_v14, %v4194_v14 }
 0x3a3   :  { %v5794_v2 = vadd.f32 %v11423_v50, %v5793_v57 }
 0x3a5   :  { %v5846_v17 = vmax.f32 %v5794_v2, 0.0 }
 0x3a6   :  { %v5228_v4 = vpop.permute.xlu0 %5227 }
 0x3a7   :  { %v5881_v0 = vpack.c.bf16 %v5846_v17, %v5846_v17  ;;  %v5517_v26 = vsel %vm13535_vm1, %v5483_v31, %v5228_v4  ;;  %vm13551_vm1 = vmmov %vm13542_vm15 }
 0x3a8   :  { %v4700_v6 = vpop.permute.xlu1 %4699  ;;  %v5589_v58 = vshrl.u32 %v5517_v26, 16  ;;  %v5592_v28 = vshll.u32 %v5517_v26, 16  ;;  %v5096_v55 = vpop.permute.xlu2 %5095 }
 0x3a9   :  { %5913 = vst.msk [vmem:[%s11786_s3 + $0xec] sm:$0xf] %vm3818_vm9, %v5881_v0  ;;  %v5365_v52 = vsel %vm13537_vm3, %v13536_v25, %v4700_v6  ;;  %vm13552_vm3 = vmmov %vm13543_vm4 }
 0x3aa   :  { %v5591_v41 = vrot.slane %v5589_v58, 3  ;;  %v5594_v19 = vrot.slane %v5592_v28, 4  ;;  %v5795_v38 = vpop.f32.mrf.mxu3  ;;  %v5399_v44 = vsel %vm13539_vm2, %v5365_v52, %v4748_v7  ;;  %v13554_v28 = vld [vmem:[#allocation76_spill] sm:$0xff]  ;;  %vm13556_vm2 = vcmask 48128  }
 0x3ab   :  { %v5796_v61 = vadd.f32 %v11423_v50, %v5795_v38 }
 0x3ac   :  { %v11602_v36 = vor.u32 %v5594_v19, %v5591_v41  ;;  %v5753_v13 = vpop.f32.mrf.mxu1  ;;  %v5299_v41 = vsel %vm13555_vm7, %v4211_v32, %v13554_v28 }
 0x3ad   :  { %v5847_v15 = vmax.f32 %v5796_v61, 0.0  ;;  %v5754_v24 = vadd.f32 %v11423_v50, %v5753_v13 }
 0x3ae   :  { %v4796_v34 = vpop.permute.xlu0 %4795  ;;  %v5596_v63 = vsel %vm13538_vm12, %v5587_v35, %v11602_v36  ;;  %vm13553_vm12 = vmmov %vm13544_vm11 }
 0x3af   :  { %v5882_v48 = vpack.c.bf16 %v5847_v15, %v5847_v15  ;;  %v5830_v54 = vmax.f32 %v5754_v24, 0.0  ;;  %6115 = vmatmul.msk.bf16.gmra.mxu1 %vm13540_vm5, %v5596_v63  ;;  %v5433_v12 = vsel %vm13541_vm14, %v5399_v44, %v4796_v34  ;;  %vm13557_vm5 = vmmov %vm13547_vm8 }
 0x3b0   :  { %v4946_v29 = vpop.permute.xlu1 %4945  ;;  %v4732_v10 = vpop.permute.xlu2 %4731  ;;  %vm13558_vm14 = vmmov %vm13546_vm10 }
 0x3b1   :  { %5914 = vst.msk [vmem:[%s11786_s3 + $0xf0] sm:$0xf] %vm3818_vm9, %v5882_v48  ;;  %v5865_v22 = vpack.c.bf16 %v5830_v54, %v5830_v54  ;;  %v5467_v35 = vsel %vm13542_vm15, %v5433_v12, %v4946_v29  ;;  %vm13559_vm15 = vmmov %vm13549_vm13 }
 0x3b2   :  { %v5501_v33 = vsel %vm13543_vm4, %v5467_v35, %v5096_v55  ;;  %vm13560_vm4 = vmmov %vm13548_vm6 }
 0x3b3   :  { %5897 = vst.msk [vmem:[%s11786_s3 + $0xac] sm:$0xf] %vm3818_vm9, %v5865_v22 }
 0x3b4   :  { %v5755_v3 = vpop.f32.mrf.mxu1 }
 0x3b5   :  { %v5756_v30 = vadd.f32 %v11423_v50, %v5755_v3 }
 0x3b6   :  { %v5246_v59 = vpop.permute.xlu0 %5245 }
 0x3b7   :  { %v5831_v42 = vmax.f32 %v5756_v30, 0.0  ;;  %v5535_v18 = vsel %vm13544_vm11, %v5501_v33, %v5246_v59  ;;  %vm13561_vm11 = vmmov %vm13550_vm0 }
 0x3b8   :  { %v4684_v27 = vpop.permute.xlu1 %4683  ;;  %v5661_v46 = vshrl.u32 %v5535_v18, 16  ;;  %v5664_v56 = vshll.u32 %v5535_v18, 16  ;;  %v5080_v11 = vpop.permute.xlu2 %5079 }
 0x3b9   :  { %v5866_v62 = vpack.c.bf16 %v5831_v42, %v5831_v42  ;;  %v5349_v9 = vsel %vm13546_vm10, %v13545_v39, %v4684_v27  ;;  %vm13562_vm10 = vmmov %vm13551_vm1 }
 0x3ba   :  { %v5663_v53 = vrot.slane %v5661_v46, 3  ;;  %v5666_v1 = vrot.slane %v5664_v56, 4  ;;  %v5383_v23 = vsel %vm13548_vm6, %v5349_v9, %v4732_v10  ;;  %vm13564_vm6 = vmmov %vm13553_vm12 }
 0x3bb   :  { %5898 = vst.msk [vmem:[%s11786_s3 + $0xb0] sm:$0xf] %vm3818_vm9, %v5866_v62 }
 0x3bc   :  { %v11628_v47 = vor.u32 %v5666_v1, %v5663_v53 }
 0x3be   :  { %v4780_v5 = vpop.permute.xlu0 %4779  ;;  %v5668_v45 = vsel %vm13547_vm8, %v5659_v16, %v11628_v47  ;;  %vm13563_vm8 = vmmov %vm13552_vm3 }
 0x3bf   :  { %6124 = vmatmul.msk.bf16.gmra.mxu3 %vm13549_vm13, %v5668_v45  ;;  %v5417_v20 = vsel %vm13550_vm0, %v5383_v23, %v4780_v5  ;;  %vm13565_vm13 = vmmov %vm13557_vm5 }
 0x3c0   :  { %v4930_v49 = vpop.permute.xlu1 %4929  ;;  %v4702_v0 = vpop.permute.xlu2 %4701  ;;  %vm13566_vm0 = vmmov %vm13559_vm15 }
 0x3c1   :  { %v5451_v37 = vsel %vm13551_vm1, %v5417_v20, %v4930_v49  ;;  %vm13567_vm1 = vmmov %vm13557_vm5 }
 0x3c2   :  { %v5798_v51 = vpop.f32.mrf.mxu3  ;;  %v5485_v7 = vsel %vm13552_vm3, %v5451_v37, %v5080_v11  ;;  %vm13568_vm3 = vmmov %vm13566_vm0 }
 0x3c3   :  { %v5799_v16 = vadd.f32 %v11423_v50, %v5798_v51 }
 0x3c5   :  { %v5848_v21 = vmax.f32 %v5799_v16, 0.0 }
 0x3c6   :  { %v5230_v57 = vpop.permute.xlu0 %5229 }
 0x3c7   :  { %v5883_v2 = vpack.c.bf16 %v5848_v21, %v5848_v21  ;;  %v5519_v17 = vsel %vm13553_vm12, %v5485_v7, %v5230_v57 }
 0x3c8   :  { %v4445_v31 = vpop.permute.xlu1 %4444  ;;  %v5597_v4 = vshrl.u32 %v5519_v17, 16  ;;  %v5600_v8 = vshll.u32 %v5519_v17, 16  ;;  %v4948_v29 = vpop.permute.xlu2 %4947 }
 0x3c9   :  { %5915 = vst.msk [vmem:[%s11786_s3 + $0xf4] sm:$0xf] %vm3818_vm9, %v5883_v2  ;;  %v5333_v61 = vsel %vm13556_vm2, %v5299_v41, %v4445_v31 }
 0x3ca   :  { %v5599_v26 = vrot.slane %v5597_v4, 3  ;;  %v5602_v6 = vrot.slane %v5600_v8, 4  ;;  %v5800_v58 = vpop.f32.mrf.mxu3  ;;  %v5367_v24 = vsel %vm13558_vm14, %v5333_v61, %v4702_v0 }
 0x3cb   :  { %v5801_v19 = vadd.f32 %v11423_v50, %v5800_v58 }
 0x3cc   :  { %v5603_v38 = vor.u32 %v5602_v6, %v5599_v26  ;;  %v5758_v55 = vpop.f32.mrf.mxu1 }
 0x3cd   :  { %v5849_v25 = vmax.f32 %v5801_v19, 0.0  ;;  %v5759_v52 = vadd.f32 %v11423_v50, %v5758_v55 }
 0x3ce   :  { %v4750_v13 = vpop.permute.xlu0 %4749  ;;  %v5604_v15 = vsel %vm13557_vm5, %v11602_v36, %v5603_v38  ;;  %v5612_v53 = vsel %vm13565_vm13, %v5603_v38, %v10928_v43 }
 0x3cf   :  { %v5884_v34 = vpack.c.bf16 %v5849_v25, %v5849_v25  ;;  %v5832_v63 = vmax.f32 %v5759_v52, 0.0  ;;  %6116 = vmatmul.msk.bf16.gmra.mxu1 %vm13559_vm15, %v5604_v15  ;;  %v5401_v48 = vsel %vm13560_vm4, %v5367_v24, %v4750_v13 }
 0x3d0   :  { %v4798_v44 = vpop.permute.xlu1 %4797 }
 0x3d1   :  { %5916 = vst.msk [vmem:[%s11786_s3 + $0xf8] sm:$0xf] %vm3818_vm9, %v5884_v34  ;;  %v5867_v54 = vpack.c.bf16 %v5832_v63, %v5832_v63  ;;  %v5435_v36 = vsel %vm13561_vm11, %v5401_v48, %v4798_v44 }
 0x3d2   :  { %v5469_v35 = vsel %vm13562_vm10, %v5435_v36, %v4948_v29 }
 0x3d3   :  { %5899 = vst.msk [vmem:[%s11786_s3 + $0xb4] sm:$0xf] %vm3818_vm9, %v5867_v54 }
 0x3d4   :  { %v5760_v12 = vpop.f32.mrf.mxu1 }
 0x3d5   :  { %v5761_v22 = vadd.f32 %v11423_v50, %v5760_v12 }
 0x3d6   :  { %v5098_v3 = vpop.permute.xlu0 %5097 }
 0x3d7   :  { %v5833_v30 = vmax.f32 %v5761_v22, 0.0  ;;  %v5503_v10 = vsel %vm13563_vm8, %v5469_v35, %v5098_v3 }
 0x3d8   :  { %v5248_v33 = vpop.permute.xlu1 %5247 }
 0x3d9   :  { %v5537_v59 = vsel %vm13564_vm6, %v5503_v10, %v5248_v33  ;;  %v5868_v42 = vpack.c.bf16 %v5833_v30, %v5833_v30 }
 0x3da   :  { %v5669_v18 = vshrl.u32 %v5537_v59, 16  ;;  %v5672_v27 = vshll.u32 %v5537_v59, 16 }
 0x3db   :  { %5900 = vst.msk [vmem:[%s11786_s3 + $0xb8] sm:$0xf] %vm3818_vm9, %v5868_v42 }
 0x3dc   :  { %v5671_v46 = vrot.slane %v5669_v18, 3  ;;  %v5674_v56 = vrot.slane %v5672_v27, 4 }
 0x3de   :  { %v5675_v62 = vor.u32 %v5674_v56, %v5671_v46 }
 0x3df   :  { %6117 = vmatmul.msk.bf16.gmra.mxu1 %vm13566_vm0, %v5612_v53 }
 0x3e0   :  { %v5676_v1 = vsel %vm13567_vm1, %v11628_v47, %v5675_v62 }
 0x3e1   :  { %6125 = vmatmul.msk.bf16.gmra.mxu3 %vm13568_vm3, %v5676_v1 }
 0x3e2   :  { %v5803_v39 = vpop.f32.mrf.mxu3 }
 0x3e3   :  { %v5804_v9 = vadd.f32 %v11423_v50, %v5803_v39 }
 0x3e5   :  { %v5850_v5 = vmax.f32 %v5804_v9, 0.0 }
 0x3e7   :  { %v5885_v45 = vpack.c.bf16 %v5850_v5, %v5850_v5 }
 0x3e9   :  { %5917 = vst.msk [vmem:[%s11786_s3 + $0xfc] sm:$0xf] %vm3818_vm9, %v5885_v45 }
 0x3ea   :  { %v5805_v23 = vpop.f32.mrf.mxu3 }
 0x3eb   :  { %v5806_v43 = vadd.f32 %v11423_v50, %v5805_v23 }
 0x3ec   :  { %v5763_v49 = vpop.f32.mrf.mxu1 }
 0x3ed   :  { %v5851_v11 = vmax.f32 %v5806_v43, 0.0  ;;  %v5764_v40 = vadd.f32 %v11423_v50, %v5763_v49 }
 0x3ef   :  { %v5886_v47 = vpack.c.bf16 %v5851_v11, %v5851_v11  ;;  %v5834_v60 = vmax.f32 %v5764_v40, 0.0 }
 0x3f1   :  { %5918 = vst.msk [vmem:[%s11786_s3 + $0x100] sm:$0xf] %vm3818_vm9, %v5886_v47  ;;  %v5869_v20 = vpack.c.bf16 %v5834_v60, %v5834_v60 }
 0x3f3   :  { %5901 = vst.msk [vmem:[%s11786_s3 + $0xbc] sm:$0xf] %vm3818_vm9, %v5869_v20 }
 0x3f4   :  { %v5765_v51 = vpop.f32.mrf.mxu1 }
 0x3f5   :  { %v5766_v14 = vadd.f32 %v11423_v50, %v5765_v51 }
 0x3f7   :  { %v5835_v37 = vmax.f32 %v5766_v14, 0.0 }
 0x3f9   :  { %v5870_v16 = vpack.c.bf16 %v5835_v37, %v5835_v37 }
 0x3fb   :  { %5902 = vst.msk [vmem:[%s11786_s3 + $0xc0] sm:$0xf] %vm3818_vm9, %v5870_v16 }
 0x402   :  { %v5808_v21 = vpop.f32.mrf.mxu3 }
 0x403   :  { %v5809_v7 = vadd.f32 %v11423_v50, %v5808_v21 }
 0x405   :  { %v5852_v57 = vmax.f32 %v5809_v7, 0.0 }
 0x407   :  { %v5887_v32 = vpack.c.bf16 %v5852_v57, %v5852_v57 }
 0x409   :  { %5919 = vst.msk [vmem:[%s11786_s3 + $0x104] sm:$0xf] %vm3818_vm9, %v5887_v32 }
 0x40a   :  { %v5810_v2 = vpop.f32.mrf.mxu3 }
 0x40b   :  { %v5811_v17 = vadd.f32 %v11423_v50, %v5810_v2 }
 0x40c   :  { %v5768_v31 = vpop.f32.mrf.mxu1 }
 0x40d   :  { %v5853_v4 = vmax.f32 %v5811_v17, 0.0  ;;  %v5769_v8 = vadd.f32 %v11423_v50, %v5768_v31 }
 0x40f   :  { %v5888_v0 = vpack.c.bf16 %v5853_v4, %v5853_v4  ;;  %v5836_v26 = vmax.f32 %v5769_v8, 0.0 }
 0x411   :  { %5920 = vst.msk [vmem:[%s11786_s3 + $0x108] sm:$0xf] %vm3818_vm9, %v5888_v0  ;;  %v5871_v6 = vpack.c.bf16 %v5836_v26, %v5836_v26 }
 0x413   :  { %5903 = vst.msk [vmem:[%s11786_s3 + $0xc4] sm:$0xf] %vm3818_vm9, %v5871_v6 }
 0x414   :  { %v5770_v58 = vpop.f32.mrf.mxu1 }
 0x415   :  { %v5771_v28 = vadd.f32 %v11423_v50, %v5770_v58 }
 0x417   :  { %v5837_v41 = vmax.f32 %v5771_v28, 0.0 }
 0x419   :  { %v5872_v19 = vpack.c.bf16 %v5837_v41, %v5837_v41 }
 0x41b   :  { %5904 = vst.msk [vmem:[%s11786_s3 + $0xc8] sm:$0xf] %vm3818_vm9, %v5872_v19 }
 0x422   :  { %v5813_v38 = vpop.f32.mrf.mxu3 }
 0x423   :  { %v5814_v61 = vadd.f32 %v11423_v50, %v5813_v38 }
 0x425   :  { %v5854_v55 = vmax.f32 %v5814_v61, 0.0 }
 0x427   :  { %v5889_v25 = vpack.c.bf16 %v5854_v55, %v5854_v55 }
 0x429   :  { %5921 = vst.msk [vmem:[%s11786_s3 + $0x10c] sm:$0xf] %vm3818_vm9, %v5889_v25 }
 0x42a   :  { %v5815_v52 = vpop.f32.mrf.mxu3 }
 0x42b   :  { %v5816_v13 = vadd.f32 %v11423_v50, %v5815_v52 }
 0x42c   :  { %v5773_v15 = vpop.f32.mrf.mxu1 }
 0x42d   :  { %v5855_v24 = vmax.f32 %v5816_v13, 0.0  ;;  %v5774_v34 = vadd.f32 %v11423_v50, %v5773_v15 }
 0x42f   :  { %v5890_v63 = vpack.c.bf16 %v5855_v24, %v5855_v24  ;;  %v5838_v44 = vmax.f32 %v5774_v34, 0.0 }
 0x431   :  { %5922 = vst.msk [vmem:[%s11786_s3 + $0x110] sm:$0xf] %vm3818_vm9, %v5890_v63  ;;  %v5873_v48 = vpack.c.bf16 %v5838_v44, %v5838_v44 }
 0x433   :  { %5905 = vst.msk [vmem:[%s11786_s3 + $0xcc] sm:$0xf] %vm3818_vm9, %v5873_v48 }
 0x434   :  { %v5775_v54 = vpop.f32.mrf.mxu1 }
 0x435   :  { %v5776_v36 = vadd.f32 %v11423_v50, %v5775_v54 }
 0x437   :  { %v5839_v29 = vmax.f32 %v5776_v36, 0.0 }
 0x439   :  { %v5874_v12 = vpack.c.bf16 %v5839_v29, %v5839_v29 }
 0x43b   :  { %5906 = vst.msk [vmem:[%s11786_s3 + $0xd0] sm:$0xf] %vm3818_vm9, %v5874_v12 }
 0x442   :  { %v5818_v22 = vpop.f32.mrf.mxu3 }
 0x443   :  { %v5819_v35 = vadd.f32 %v11423_v50, %v5818_v22 }
 0x445   :  { %v5856_v3 = vmax.f32 %v5819_v35, 0.0 }
 0x447   :  { %v5891_v30 = vpack.c.bf16 %v5856_v3, %v5856_v3 }
 0x449   :  { %5923 = vst.msk [vmem:[%s11786_s3 + $0x114] sm:$0xf] %vm3818_vm9, %v5891_v30 }
 0x44a   :  { %v5820_v10 = vpop.f32.mrf.mxu3 }
 0x44b   :  { %v5821_v33 = vadd.f32 %v11423_v50, %v5820_v10 }
 0x44c   :  { %v5778_v59 = vpop.f32.mrf.mxu1 }
 0x44d   :  { %v5857_v42 = vmax.f32 %v5821_v33, 0.0  ;;  %v5779_v18 = vadd.f32 %v11423_v50, %v5778_v59 }
 0x44f   :  { %v5892_v27 = vpack.c.bf16 %v5857_v42, %v5857_v42  ;;  %v5840_v46 = vmax.f32 %v5779_v18, 0.0 }
 0x451   :  { %5924 = vst.msk [vmem:[%s11786_s3 + $0x118] sm:$0xf] %vm3818_vm9, %v5892_v27  ;;  %v5875_v56 = vpack.c.bf16 %v5840_v46, %v5840_v46 }
 0x453   :  { %5907 = vst.msk [vmem:[%s11786_s3 + $0xd4] sm:$0xf] %vm3818_vm9, %v5875_v56 }
 0x454   :  { %v5780_v62 = vpop.f32.mrf.mxu1 }
 0x455   :  { %v5781_v53 = vadd.f32 %v11423_v50, %v5780_v62 }
 0x457   :  { %v5841_v1 = vmax.f32 %v5781_v53, 0.0 }
 0x459   :  { %v5876_v39 = vpack.c.bf16 %v5841_v1, %v5841_v1 }
 0x45b   :  { %5908 = vst.msk [vmem:[%s11786_s3 + $0xd8] sm:$0xf] %vm3818_vm9, %v5876_v39 }
 0x45c   :  { %v5783_v9 = vpop.f32.mrf.mxu1 }
 0x45d   :  { %v5784_v5 = vadd.f32 %v11423_v50, %v5783_v9 }
 0x45f   :  { %v5842_v45 = vmax.f32 %v5784_v5, 0.0 }
 0x461   :  { %v5877_v23 = vpack.c.bf16 %v5842_v45, %v5842_v45 }
 0x463   :  { %5909 = vst.msk [vmem:[%s11786_s3 + $0xdc] sm:$0xf] %vm3818_vm9, %v5877_v23 }
 0x464   :  { %v5823_v43 = vpop.f32.mrf.mxu3  ;;  %v5785_v49 = vpop.f32.mrf.mxu1 }
 0x465   :  { %v5824_v11 = vadd.f32 %v11423_v50, %v5823_v43  ;;  %v5786_v40 = vadd.f32 %v11423_v50, %v5785_v49 }
 0x467   :  { %v5858_v47 = vmax.f32 %v5824_v11, 0.0  ;;  %v5843_v60 = vmax.f32 %v5786_v40, 0.0 }
 0x469   :  { %v5893_v20 = vpack.c.bf16 %v5858_v47, %v5858_v47  ;;  %v5878_v51 = vpack.c.bf16 %v5843_v60, %v5843_v60 }
 0x46b   :  { %5925 = vst.msk [vmem:[%s11786_s3 + $0x11c] sm:$0xf] %vm3818_vm9, %v5893_v20 }
 0x46c   :  { %5910 = vst.msk [vmem:[%s11786_s3 + $0xe0] sm:$0xf] %vm3818_vm9, %v5878_v51  ;;  %v5825_v14 = vpop.f32.mrf.mxu3 }
 0x46d   :  { %v5826_v37 = vadd.f32 %v11423_v50, %v5825_v14 }
 0x46f   :  { %v5859_v16 = vmax.f32 %v5826_v37, 0.0 }
 0x471   :  { %v5894_v21 = vpack.c.bf16 %v5859_v16, %v5859_v16 }
 0x473   :  { %5926 = vst.msk [vmem:[%s11786_s3 + $0x120] sm:$0xf] %vm3818_vm9, %v5894_v21 }

</bundles_post_ra>
